<compile_context>
chip_gen: v6e
topology: v6e:2x2x1
jax: 0.10.0
libtpu: 0.0.40
codegen_flags: <defaults>
</compile_context>

<pallas_src>
import jax
import jax.numpy as jnp
import numpy as np
from jax import lax
from jax.experimental import pallas as pl
from jax.experimental.pallas import tpu as pltpu

LANE = 128
_VMEM_LIMIT = 32 * 1024 * 1024  # safe on v5e/v6e/v7x


# --------------------------------------------------------------------------
# small helpers
# --------------------------------------------------------------------------
def _ceil_to(x, m):
    return (x + m - 1) // m * m


def _pad_channels(x, c):
    pad = c - x.shape[-1]
    if pad == 0:
        return x
    return jnp.pad(x, ((0, 0),) * (x.ndim - 1) + ((0, pad),))


def _pick_row_tile(h, cap=8):
    """Largest divisor of h that is <= cap (bounds the accumulator / VMEM)."""
    for t in range(min(cap, h), 0, -1):
        if h % t == 0:
            return t
    return 1


def _pick_cout_tile(coutp):
    # coutp is a multiple of 128; prefer 256-wide tiles (v6e/v7x MXU width).
    return 256 if coutp % 256 == 0 else 128


# --------------------------------------------------------------------------
# Pallas kernels
# --------------------------------------------------------------------------
def _make_conv_kernel(n_inputs):
    """3x3 conv (+bias +ReLU +folded BatchNorm) over the virtual channel-concat
    of `n_inputs` activations.  Per input the refs are (lo_rows, prev_row,
    next_row); the 1-pixel column pad is built in VMEM; the matmul is done as
    3 dots with K = 3*Cin (kw-stacked im2col)."""

    def kernel(*refs):
        x_refs = refs[: 3 * n_inputs]
        w_refs = refs[3 * n_inputs: 4 * n_inputs]
        b_ref, s_ref, t_ref, o_ref = refs[4 * n_inputs:]
        _, th, wd, tco = o_ref.shape

        # grid = (N, cout-blocks, row-blocks): row axis is innermost (axis 2)
        i = pl.program_id(2)
        last = pl.num_programs(2) - 1

        acc = jnp.zeros((th * wd, tco), jnp.float32)
        for k in range(n_inputs):
            lo, prev, nxt = x_refs[3 * k], x_refs[3 * k + 1], x_refs[3 * k + 2]
            c = lo.shape[-1]
            # halo rows: zero them out at the image border (top / bottom pad)
            p = jnp.where(i == 0, jnp.zeros_like(prev[0]), prev[0])
            q = jnp.where(i == last, jnp.zeros_like(nxt[0]), nxt[0])
            x = jnp.concatenate([p, lo[0], q], axis=0)          # (th+2, wd, c)
            # 1-column zero pad built in VMEM (no HBM round trip)
            zcol = jnp.zeros((th + 2, 1, c), x.dtype)
            x = jnp.concatenate([zcol, x, zcol], axis=1)        # (th+2, wd+2, c)
            # kw-stacked im2col -> fat contraction K = 3*c
            xs = jnp.concatenate(
                [x[:, 0:wd, :], x[:, 1:wd + 1, :], x[:, 2:wd + 2, :]],
                axis=-1)                                        # (th+2, wd, 3c)
            for kh in range(3):
                acc += jnp.dot(xs[kh:kh + th].reshape(th * wd, 3 * c),
                               w_refs[k][kh],
                               preferred_element_type=jnp.float32)

        acc = jnp.maximum(acc + b_ref[...], 0.0)   # conv bias + ReLU (f32)
        acc = acc * s_ref[...] + t_ref[...]        # BatchNorm (eval, folded)
        o_ref[...] = acc.reshape(1, th, wd, tco).astype(o_ref.dtype)

    return kernel


def _upconv_kernel(d_lo, d_nxt, w_ref, b_ref, o_ref):
    """Polyphase ConvTranspose2d(k=3, s=2, p=1, output_padding=1).
    One fat matmul: K = 4*Cin (taps d[i,j], d[i,j+1], d[i+1,j], d[i+1,j+1]),
    output channels = 4 phases x Cout (interleaved to 2x spatial outside)."""
    _, thd, wd, tco = o_ref.shape
    c = d_lo.shape[-1]

    i = pl.program_id(2)
    last = pl.num_programs(2) - 1
    nxt = jnp.where(i == last, jnp.zeros_like(d_nxt[0]), d_nxt[0])
    x = jnp.concatenate([d_lo[0], nxt], axis=0)                 # (thd+1, wd, c)
    zcol = jnp.zeros((thd + 1, 1, c), x.dtype)
    x = jnp.concatenate([x, zcol], axis=1)                      # (thd+1, wd+1, c)

    cols = jnp.concatenate(
        [x[0:thd, 0:wd, :], x[0:thd, 1:wd + 1, :],
         x[1:thd + 1, 0:wd, :], x[1:thd + 1, 1:wd + 1, :]],
        axis=-1)                                                # (thd, wd, 4c)
    acc = jnp.dot(cols.reshape(thd * wd, 4 * c), w_ref[...],
                  preferred_element_type=jnp.float32)
    acc = acc + b_ref[...]
    o_ref[...] = acc.reshape(1, thd, wd, tco).astype(o_ref.dtype)


# --------------------------------------------------------------------------
# pallas_call wrappers
# --------------------------------------------------------------------------
def conv3x3_bn_pallas(xs, ws, b, s, t, out_dtype=jnp.bfloat16, row_cap=8):
    """Fused 3x3 conv + bias + ReLU + BN over the virtual concat of `xs`.
    xs[k]: (N, H, W, Ck) bf16 (Ck multiple of 128); ws[k]: (3, 3*Ck, Coutp)."""
    n_in = len(xs)
    N, H, W, _ = xs[0].shape
    coutp = ws[0].shape[-1]
    th = _pick_row_tile(H, row_cap)
    tco = _pick_cout_tile(coutp)
    # Row axis innermost: weight / bias / BN tiles (indexed by co only) stay
    # resident in VMEM across the whole row sweep.
    grid = (N, coutp // tco, H // th)

    in_specs, call_args = [], []
    for x in xs:
        c = x.shape[-1]
        in_specs += [
            pl.BlockSpec((1, th, W, c), lambda n, co, i: (n, i, 0, 0)),
            pl.BlockSpec((1, 1, W, c),
                         lambda n, co, i: (n, jnp.maximum(i * th - 1, 0), 0, 0)),
            pl.BlockSpec((1, 1, W, c),
                         lambda n, co, i: (n, jnp.minimum((i + 1) * th, H - 1), 0, 0)),
        ]
        call_args += [x, x, x]
    for w in ws:
        in_specs.append(pl.BlockSpec(w.shape[:-1] + (tco,),
                                     lambda n, co, i: (0, 0, co)))
        call_args.append(w)
    vec_spec = pl.BlockSpec((1, tco), lambda n, co, i: (0, co))
    in_specs += [vec_spec, vec_spec, vec_spec]
    call_args += [b, s, t]

    return pl.pallas_call(
        _make_conv_kernel(n_in),
        out_shape=jax.ShapeDtypeStruct((N, H, W, coutp), out_dtype),
        grid_spec=pltpu.PrefetchScalarGridSpec(
            num_scalar_prefetch=0, grid=grid,
            in_specs=in_specs,
            out_specs=pl.BlockSpec((1, th, W, tco),
                                   lambda n, co, i: (n, i, 0, co))),
        compiler_params=pltpu.CompilerParams(
            dimension_semantics=("parallel", "parallel", "parallel"),
            vmem_limit_bytes=_VMEM_LIMIT),
    )(*call_args)


def upconv_pallas(d, w_up, b_up, row_cap=8):
    """Polyphase transposed conv.  d: (N, Hd, Wd, Cinp) bf16.
    w_up: (4*Cinp, 4*Coutp).  Returns (N, 2Hd, 2Wd, Coutp) bf16."""
    N, Hd, Wd, cp = d.shape
    k4, co4 = w_up.shape
    thd = _pick_row_tile(Hd, row_cap)
    tco = _pick_cout_tile(co4)
    grid = (N, co4 // tco, Hd // thd)   # row axis innermost -> weights resident

    out = pl.pallas_call(
        _upconv_kernel,
        out_shape=jax.ShapeDtypeStruct((N, Hd, Wd, co4), jnp.bfloat16),
        grid_spec=pltpu.PrefetchScalarGridSpec(
            num_scalar_prefetch=0, grid=grid,
            in_specs=[
                pl.BlockSpec((1, thd, Wd, cp), lambda n, co, i: (n, i, 0, 0)),
                pl.BlockSpec((1, 1, Wd, cp),
                             lambda n, co, i: (n, jnp.minimum((i + 1) * thd, Hd - 1), 0, 0)),
                pl.BlockSpec((k4, tco), lambda n, co, i: (0, co)),
                pl.BlockSpec((1, tco), lambda n, co, i: (0, co)),
            ],
            out_specs=pl.BlockSpec((1, thd, Wd, tco),
                                   lambda n, co, i: (n, i, 0, co))),
        compiler_params=pltpu.CompilerParams(
            dimension_semantics=("parallel", "parallel", "parallel"),
            vmem_limit_bytes=_VMEM_LIMIT),
    )(d, d, w_up, b_up)

    # interleave the 4 phases -> 2x spatial (lane-dense reshape/transpose, XLA)
    cq = co4 // 4
    out = out.reshape(N, Hd, Wd, 2, 2, cq)
    out = jnp.transpose(out, (0, 1, 3, 2, 4, 5)).reshape(N, 2 * Hd, 2 * Wd, cq)
    return out


# --------------------------------------------------------------------------
# expansive_block forward (glue in JAX, hot path in Pallas)
# --------------------------------------------------------------------------
def expansive_block_forward(e_nchw, d_nchw, params, row_cap=8):
    bf16 = jnp.bfloat16
    w_up = params['w_up']
    cinP = w_up.shape[0] // 4
    cEp = params['w1e'].shape[1] // 3
    out_ch = params['out_ch']

    # NCHW -> NHWC bf16, channel-pad to lane width (once).
    d = jnp.transpose(d_nchw, (0, 2, 3, 1)).astype(bf16)
    d = _pad_channels(d, cinP)
    d_up = upconv_pallas(d, w_up, params['b_up'], row_cap=row_cap)

    # center-crop the skip connection exactly like the PyTorch module
    Hu, Wu = d_up.shape[1], d_up.shape[2]
    diffY = e_nchw.shape[2] - Hu
    diffX = e_nchw.shape[3] - Wu
    e_c = e_nchw[:, :, diffY // 2: e_nchw.shape[2] - diffY // 2,
                       diffX // 2: e_nchw.shape[3] - diffX // 2]
    e_c = jnp.transpose(e_c, (0, 2, 3, 1)).astype(bf16)
    e_c = _pad_channels(e_c, cEp)

    # conv1 fused over the *virtual* concat [e, d_up] (no cat materialized)
    h1 = conv3x3_bn_pallas([e_c, d_up], [params['w1e'], params['w1d']],
                           params['b1'], params['s1'], params['t1'],
                           out_dtype=bf16, row_cap=row_cap)
    # conv2
    h2 = conv3x3_bn_pallas([h1], [params['w2']],
                           params['b2'], params['s2'], params['t2'],
                           out_dtype=jnp.float32, row_cap=row_cap)

    return jnp.transpose(h2[..., :out_ch], (0, 3, 1, 2))   # back to NCHW


# --------------------------------------------------------------------------
# parameters: raw (torch-layout) weights + packed Pallas weights
# --------------------------------------------------------------------------
def init_raw_params(key, in_ch, mid_ch, out_ch):
    ks = jax.random.split(key, 14)
    half = in_ch // 2
    n = lambda k, shape, s=0.1: s * jax.random.normal(k, shape, jnp.float32)
    return dict(
        up_w=n(ks[0], (in_ch, half, 3, 3)), up_b=n(ks[1], (half,)),
        w1=n(ks[2], (mid_ch, in_ch, 3, 3)), b1=n(ks[3], (mid_ch,)),
        g1=1.0 + n(ks[4], (mid_ch,)), be1=n(ks[5], (mid_ch,)),
        m1=n(ks[6], (mid_ch,)), v1=1.0 + jnp.abs(n(ks[7], (mid_ch,))),
        w2=n(ks[8], (out_ch, mid_ch, 3, 3)), b2=n(ks[9], (out_ch,)),
        g2=1.0 + n(ks[10], (out_ch,)), be2=n(ks[11], (out_ch,)),
        m2=n(ks[12], (out_ch,)), v2=1.0 + jnp.abs(n(ks[13], (out_ch,))),
    )


def pack_params(raw, eps=1e-5):
    bf16 = jnp.bfloat16
    up_w = raw['up_w']                       # (in_ch, in_ch//2, 3, 3)
    in_ch, half = up_w.shape[0], up_w.shape[1]
    ce = in_ch - half                        # skip-connection channels
    cinP, cqP = _ceil_to(in_ch, LANE), _ceil_to(half, LANE)
    cEp = _ceil_to(ce, LANE)
    mid, out = raw['w1'].shape[0], raw['w2'].shape[0]
    cmP, coP = _ceil_to(mid, LANE), _ceil_to(out, LANE)

    def pad_mat(m, r, c):
        return jnp.pad(m, ((0, r - m.shape[0]), (0, c - m.shape[1])))

    # --- polyphase weight for ConvTranspose2d(k=3, s=2, p=1, op=1) ---------
    # output phase p = ry*2+rx; taps are d[i,j], d[i,j+1], d[i+1,j], d[i+1,j+1]
    tap_phase = {
        (0, 0): {0: (1, 1), 1: (1, 2), 2: (2, 1), 3: (2, 2)},
        (0, 1): {1: (1, 0), 3: (2, 0)},
        (1, 0): {2: (0, 1), 3: (0, 2)},
        (1, 1): {3: (0, 0)},
    }
    zero = jnp.zeros((cinP, cqP), jnp.float32)
    rows = []
    for tap in ((0, 0), (0, 1), (1, 0), (1, 1)):
        row = []
        for p in range(4):
            if p in tap_phase[tap]:
                kh, kw = tap_phase[tap][p]
                row.append(pad_mat(up_w[:, :, kh, kw], cinP, cqP))
            else:
                row.append(zero)
        rows.append(jnp.concatenate(row, axis=1))
    w_up = jnp.concatenate(rows, axis=0).astype(bf16)          # (4*cinP, 4*cqP)
    b_up = jnp.tile(jnp.pad(raw['up_b'], (0, cqP - half)), 4).reshape(1, -1)

    # --- 3x3 conv weights, kw-stacked per kh: (3, 3*Cinp, Coutp) -----------
    def conv_pack(w_t, cinp, coutp):
        blocks = []
        for kh in range(3):
            ks_ = [pad_mat(w_t[:, :, kh, kw].T, cinp, coutp) for kw in range(3)]
            blocks.append(jnp.concatenate(ks_, axis=0))
        return jnp.stack(blocks, axis=0).astype(bf16)

    def bn_fold(g, b, m, v):
        sc = g / jnp.sqrt(v + eps)
        return sc, b - m * sc

    w1e = conv_pack(raw['w1'][:, :ce], cEp, cmP)
    w1d = conv_pack(raw['w1'][:, ce:], cqP, cmP)
    s1, t1 = bn_fold(raw['g1'], raw['be1'], raw['m1'], raw['v1'])
    w2 = conv_pack(raw['w2'], cmP, coP)
    s2, t2 = bn_fold(raw['g2'], raw['be2'], raw['m2'], raw['v2'])

    pvec = lambda v, n_: jnp.pad(v, (0, n_ - v.shape[0])).reshape(1, -1).astype(jnp.float32)
    return dict(
        w_up=w_up, b_up=b_up.astype(jnp.float32),
        w1e=w1e, w1d=w1d,
        b1=pvec(raw['b1'], cmP), s1=pvec(s1, cmP), t1=pvec(t1, cmP),
        w2=w2,
        b2=pvec(raw['b2'], coP), s2=pvec(s2, coP), t2=pvec(t2, coP),
        out_ch=out)


# --------------------------------------------------------------------------
# pure-JAX reference (same math / same bf16 cast points) for self-check
# --------------------------------------------------------------------------
def expansive_block_reference(e_nchw, d_nchw, raw, eps=1e-5):
    bf16, f32 = jnp.bfloat16, jnp.float32
    d = jnp.transpose(d_nchw, (0, 2, 3, 1)).astype(bf16)
    N, Hd, Wd, cin = d.shape

    # ConvTranspose2d(k3,s2,p1,op1) == zero-insert + pad(1,2) + VALID conv w/ flipped kernel
    w_hwio = jnp.transpose(raw['up_w'][:, :, ::-1, ::-1], (2, 3, 0, 1)).astype(bf16)
    d_dil = jnp.zeros((N, 2 * Hd - 1, 2 * Wd - 1, cin), bf16).at[:, ::2, ::2, :].set(d)
    d_pad = jnp.pad(d_dil, ((0, 0), (1, 2), (1, 2), (0, 0)))
    dup = lax.conv_general_dilated(d_pad, w_hwio, (1, 1), 'VALID',
                                   dimension_numbers=('NHWC', 'HWIO', 'NHWC'),
                                   preferred_element_type=f32)
    dup = (dup + raw['up_b'].reshape(1, 1, 1, -1)).astype(bf16)

    Hu, Wu = dup.shape[1], dup.shape[2]
    diffY = e_nchw.shape[2] - Hu
    diffX = e_nchw.shape[3] - Wu
    e_c = e_nchw[:, :, diffY // 2: e_nchw.shape[2] - diffY // 2,
                       diffX // 2: e_nchw.shape[3] - diffX // 2]
    e_c = jnp.transpose(e_c, (0, 2, 3, 1)).astype(bf16)
    cat = jnp.concatenate([e_c, dup], axis=-1)

    def conv_relu_bn(x, w_t, b, g, be, m, v, out_dt):
        w = jnp.transpose(w_t, (2, 3, 1, 0)).astype(bf16)      # HWIO
        y = lax.conv_general_dilated(x, w, (1, 1), ((1, 1), (1, 1)),
                                     dimension_numbers=('NHWC', 'HWIO', 'NHWC'),
                                     preferred_element_type=f32)
        y = jnp.maximum(y + b.reshape(1, 1, 1, -1), 0.0)
        sc = g / jnp.sqrt(v + eps)
        sh = be - m * sc
        return (y * sc.reshape(1, 1, 1, -1) + sh.reshape(1, 1, 1, -1)).astype(out_dt)

    h1 = conv_relu_bn(cat, raw['w1'], raw['b1'], raw['g1'], raw['be1'],
                      raw['m1'], raw['v1'], bf16)
    h2 = conv_relu_bn(h1, raw['w2'], raw['b2'], raw['g2'], raw['be2'],
                      raw['m2'], raw['v2'], f32)
    return jnp.transpose(h2, (0, 3, 1, 2))


# --------------------------------------------------------------------------
if __name__ == "__main__":
    in_ch, mid_ch, out_ch = 8, 8, 4
    key = jax.random.PRNGKey(0)
    k_e, k_d, k_p = jax.random.split(key, 3)

    # UNet decoder step: skip `e` has in_ch//2 channels at 2x the spatial size of `d`.
    e = jax.random.normal(k_e, (2, in_ch // 2, 32, 32), jnp.float32)
    d = jax.random.normal(k_d, (2, in_ch, 16, 16), jnp.float32)

    raw = init_raw_params(k_p, in_ch, mid_ch, out_ch)
    params = pack_params(raw)

    fwd = jax.jit(lambda e_, d_: expansive_block_forward(e_, d_, params))
    out = jax.block_until_ready(fwd(e, d))
    assert out.shape == (2, out_ch, 32, 32), out.shape

    ref = jax.block_until_ready(expansive_block_reference(e, d, raw))
    np.testing.assert_allclose(np.asarray(out), np.asarray(ref),
                               rtol=2e-2, atol=2e-2)
    print("KERNEL_OK")
</pallas_src>

<mosaic_0001>
module attributes {stable_mosaic.version = 11 : i64} {
  func.func @_upconv_kernel(%arg0: i32, %arg1: i32, %arg2: i32, %arg3: memref<1x8x16x128xbf16, #tpu.memory_space<vmem>>, %arg4: memref<1x1x16x128xbf16, #tpu.memory_space<vmem>>, %arg5: memref<512x256xbf16, #tpu.memory_space<vmem>>, %arg6: memref<1x256xf32, #tpu.memory_space<vmem>>, %arg7: memref<1x8x16x256xbf16, #tpu.memory_space<vmem>>) attributes {dimension_semantics = [#tpu.dimension_semantics<parallel>, #tpu.dimension_semantics<parallel>, #tpu.dimension_semantics<parallel>], iteration_bounds = array<i64: 2, 2, 2>, scalar_prefetch = 0 : i64, scratch_operands = 0 : i64, tpu.core_type = #tpu.core_type<tc>, window_params = [{transform_indices = @transform_0, window_bounds = array<i64: 1, 8, 16, 128>}, {transform_indices = @transform_1, window_bounds = array<i64: 1, 1, 16, 128>}, {transform_indices = @transform_2, window_bounds = array<i64: 512, 256>}, {transform_indices = @transform_3, window_bounds = array<i64: 1, 256>}, {transform_indices = @transform_4, window_bounds = array<i64: 1, 8, 16, 256>}]} {
    %c1_i32 = arith.constant 1 : i32
    %0 = arith.cmpi eq, %arg2, %c1_i32 : i32
    %cst = arith.constant 0.000000e+00 : bf16
    %1 = vector.broadcast %cst : bf16 to vector<1x16x128xbf16>
    %c0 = arith.constant 0 : index
    %c0_0 = arith.constant 0 : index
    %c0_1 = arith.constant 0 : index
    %c0_2 = arith.constant 0 : index
    %2 = vector.load %arg4[%c0, %c0_0, %c0_1, %c0_2] : memref<1x1x16x128xbf16, #tpu.memory_space<vmem>>, vector<1x1x16x128xbf16>
    %3 = vector.shape_cast %2 : vector<1x1x16x128xbf16> to vector<1x16x128xbf16>
    %4 = arith.select %0, %1, %3 : vector<1x16x128xbf16>
    %c0_3 = arith.constant 0 : index
    %c0_4 = arith.constant 0 : index
    %c0_5 = arith.constant 0 : index
    %c0_6 = arith.constant 0 : index
    %5 = vector.load %arg3[%c0_3, %c0_4, %c0_5, %c0_6] : memref<1x8x16x128xbf16, #tpu.memory_space<vmem>>, vector<1x8x16x128xbf16>
    %6 = vector.shape_cast %5 : vector<1x8x16x128xbf16> to vector<8x16x128xbf16>
    %7 = tpu.concatenate %6, %4 in 0 : vector<8x16x128xbf16>, vector<1x16x128xbf16> -> vector<9x16x128xbf16>
    %cst_7 = arith.constant 0.000000e+00 : bf16
    %8 = vector.broadcast %cst_7 : bf16 to vector<9x1x128xbf16>
    %9 = tpu.concatenate %7, %8 in 1 : vector<9x16x128xbf16>, vector<9x1x128xbf16> -> vector<9x17x128xbf16>
    %10 = vector.extract_strided_slice %9 {offsets = [0, 0, 0], sizes = [8, 16, 128], strides = [1, 1, 1]} : vector<9x17x128xbf16> to vector<8x16x128xbf16>
    %11 = vector.extract_strided_slice %9 {offsets = [0, 1, 0], sizes = [8, 16, 128], strides = [1, 1, 1]} : vector<9x17x128xbf16> to vector<8x16x128xbf16>
    %12 = vector.extract_strided_slice %9 {offsets = [1, 0, 0], sizes = [8, 16, 128], strides = [1, 1, 1]} : vector<9x17x128xbf16> to vector<8x16x128xbf16>
    %13 = vector.extract_strided_slice %9 {offsets = [1, 1, 0], sizes = [8, 16, 128], strides = [1, 1, 1]} : vector<9x17x128xbf16> to vector<8x16x128xbf16>
    %14 = tpu.concatenate %10, %11, %12, %13 in 2 : vector<8x16x128xbf16>, vector<8x16x128xbf16>, vector<8x16x128xbf16>, vector<8x16x128xbf16> -> vector<8x16x512xbf16>
    %15 = vector.shape_cast %14 : vector<8x16x512xbf16> to vector<128x512xbf16>
    %c0_8 = arith.constant 0 : index
    %c0_9 = arith.constant 0 : index
    %16 = vector.load %arg5[%c0_8, %c0_9] : memref<512x256xbf16, #tpu.memory_space<vmem>>, vector<512x256xbf16>
    %cst_10 = arith.constant dense<0.000000e+00> : vector<128x256xf32>
    %17 = tpu.matmul %15, %16, %cst_10 {dimension_numbers = #tpu.dot_dimension_numbers<[1], [0], [0], [1], [0, 0, 1, 1], [], []>} : vector<128x512xbf16>, vector<512x256xbf16>, vector<128x256xf32> -> vector<128x256xf32>
    %c0_11 = arith.constant 0 : index
    %c0_12 = arith.constant 0 : index
    %18 = vector.load %arg6[%c0_11, %c0_12] : memref<1x256xf32, #tpu.memory_space<vmem>>, vector<1x256xf32>
    %19 = vector.broadcast %18 : vector<1x256xf32> to vector<128x256xf32>
    %20 = arith.addf %17, %19 : vector<128x256xf32>
    %21 = vector.shape_cast %20 : vector<128x256xf32> to vector<1x8x16x256xf32>
    %22 = arith.truncf %21 : vector<1x8x16x256xf32> to vector<1x8x16x256xbf16>
    %c0_13 = arith.constant 0 : index
    %c0_14 = arith.constant 0 : index
    %c0_15 = arith.constant 0 : index
    %c0_16 = arith.constant 0 : index
    %23 = vector.load %arg7[%c0_13, %c0_14, %c0_15, %c0_16] : memref<1x8x16x256xbf16, #tpu.memory_space<vmem>>, vector<1x8x16x256xbf16>
    tpu.vector_store %arg7[%c0_13, %c0_14, %c0_15, %c0_16], %22 {strides = array<i32>} : memref<1x8x16x256xbf16, #tpu.memory_space<vmem>>, vector<1x8x16x256xbf16>,
    return
  }
  func.func @transform_0(%arg0: i32, %arg1: i32, %arg2: i32) -> (i32, i32, i32, i32) {
    %c0_i32 = arith.constant 0 : i32
    %c0_i32_0 = arith.constant 0 : i32
    %c0_i32_1 = arith.constant 0 : i32
    return %arg0, %arg2, %c0_i32, %c0_i32_0 : i32, i32, i32, i32
  }
  func.func @transform_1(%arg0: i32, %arg1: i32, %arg2: i32) -> (i32, i32, i32, i32) {
    %c1_i32 = arith.constant 1 : i32
    %0 = arith.addi %arg2, %c1_i32 : i32
    %c8_i32 = arith.constant 8 : i32
    %1 = arith.muli %0, %c8_i32 : i32
    %c15_i32 = arith.constant 15 : i32
    %2 = arith.minsi %1, %c15_i32 : i32
    %c0_i32 = arith.constant 0 : i32
    %c0_i32_0 = arith.constant 0 : i32
    %c0_i32_1 = arith.constant 0 : i32
    return %arg0, %2, %c0_i32, %c0_i32_0 : i32, i32, i32, i32
  }
  func.func @transform_2(%arg0: i32, %arg1: i32, %arg2: i32) -> (i32, i32) {
    %c0_i32 = arith.constant 0 : i32
    %c0_i32_0 = arith.constant 0 : i32
    return %c0_i32, %arg1 : i32, i32
  }
  func.func @transform_3(%arg0: i32, %arg1: i32, %arg2: i32) -> (i32, i32) {
    %c0_i32 = arith.constant 0 : i32
    %c0_i32_0 = arith.constant 0 : i32
    return %c0_i32, %arg1 : i32, i32
  }
  func.func @transform_4(%arg0: i32, %arg1: i32, %arg2: i32) -> (i32, i32, i32, i32) {
    %c0_i32 = arith.constant 0 : i32
    %c0_i32_0 = arith.constant 0 : i32
    return %arg0, %arg2, %c0_i32, %arg1 : i32, i32, i32, i32
  }
}

module attributes {stable_mosaic.version = 11 : i64} {
  func.func @kernel(%arg0: i32, %arg1: i32, %arg2: i32, %arg3: memref<1x8x32x128xbf16, #tpu.memory_space<vmem>>, %arg4: memref<1x1x32x128xbf16, #tpu.memory_space<vmem>>, %arg5: memref<1x1x32x128xbf16, #tpu.memory_space<vmem>>, %arg6: memref<1x8x32x128xbf16, #tpu.memory_space<vmem>>, %arg7: memref<1x1x32x128xbf16, #tpu.memory_space<vmem>>, %arg8: memref<1x1x32x128xbf16, #tpu.memory_space<vmem>>, %arg9: memref<3x384x128xbf16, #tpu.memory_space<vmem>>, %arg10: memref<3x384x128xbf16, #tpu.memory_space<vmem>>, %arg11: memref<1x128xf32, #tpu.memory_space<vmem>>, %arg12: memref<1x128xf32, #tpu.memory_space<vmem>>, %arg13: memref<1x128xf32, #tpu.memory_space<vmem>>, %arg14: memref<1x8x32x128xbf16, #tpu.memory_space<vmem>>) attributes {dimension_semantics = [#tpu.dimension_semantics<parallel>, #tpu.dimension_semantics<parallel>, #tpu.dimension_semantics<parallel>], iteration_bounds = array<i64: 2, 1, 4>, scalar_prefetch = 0 : i64, scratch_operands = 0 : i64, tpu.core_type = #tpu.core_type<tc>, window_params = [{transform_indices = @transform_0, window_bounds = array<i64: 1, 8, 32, 128>}, {transform_indices = @transform_1, window_bounds = array<i64: 1, 1, 32, 128>}, {transform_indices = @transform_2, window_bounds = array<i64: 1, 1, 32, 128>}, {transform_indices = @transform_3, window_bounds = array<i64: 1, 8, 32, 128>}, {transform_indices = @transform_4, window_bounds = array<i64: 1, 1, 32, 128>}, {transform_indices = @transform_5, window_bounds = array<i64: 1, 1, 32, 128>}, {transform_indices = @transform_6, window_bounds = array<i64: 3, 384, 128>}, {transform_indices = @transform_7, window_bounds = array<i64: 3, 384, 128>}, {transform_indices = @transform_8, window_bounds = array<i64: 1, 128>}, {transform_indices = @transform_9, window_bounds = array<i64: 1, 128>}, {transform_indices = @transform_10, window_bounds = array<i64: 1, 128>}, {transform_indices = @transform_11, window_bounds = array<i64: 1, 8, 32, 128>}]} {
    %cst = arith.constant 0.000000e+00 : f32
    %0 = vector.broadcast %cst : f32 to vector<256x128xf32>
    %c0_i32 = arith.constant 0 : i32
    %1 = arith.cmpi eq, %arg2, %c0_i32 : i32
    %cst_0 = arith.constant 0.000000e+00 : bf16
    %2 = vector.broadcast %cst_0 : bf16 to vector<1x32x128xbf16>
    %c0 = arith.constant 0 : index
    %c0_1 = arith.constant 0 : index
    %c0_2 = arith.constant 0 : index
    %c0_3 = arith.constant 0 : index
    %3 = vector.load %arg4[%c0, %c0_1, %c0_2, %c0_3] : memref<1x1x32x128xbf16, #tpu.memory_space<vmem>>, vector<1x1x32x128xbf16>
    %4 = vector.shape_cast %3 : vector<1x1x32x128xbf16> to vector<1x32x128xbf16>
    %5 = arith.select %1, %2, %4 : vector<1x32x128xbf16>
    %c3_i32 = arith.constant 3 : i32
    %6 = arith.cmpi eq, %arg2, %c3_i32 : i32
    %cst_4 = arith.constant 0.000000e+00 : bf16
    %7 = vector.broadcast %cst_4 : bf16 to vector<1x32x128xbf16>
    %c0_5 = arith.constant 0 : index
    %c0_6 = arith.constant 0 : index
    %c0_7 = arith.constant 0 : index
    %c0_8 = arith.constant 0 : index
    %8 = vector.load %arg5[%c0_5, %c0_6, %c0_7, %c0_8] : memref<1x1x32x128xbf16, #tpu.memory_space<vmem>>, vector<1x1x32x128xbf16>
    %9 = vector.shape_cast %8 : vector<1x1x32x128xbf16> to vector<1x32x128xbf16>
    %10 = arith.select %6, %7, %9 : vector<1x32x128xbf16>
    %c0_9 = arith.constant 0 : index
    %c0_10 = arith.constant 0 : index
    %c0_11 = arith.constant 0 : index
    %c0_12 = arith.constant 0 : index
    %11 = vector.load %arg3[%c0_9, %c0_10, %c0_11, %c0_12] : memref<1x8x32x128xbf16, #tpu.memory_space<vmem>>, vector<1x8x32x128xbf16>
    %12 = vector.shape_cast %11 : vector<1x8x32x128xbf16> to vector<8x32x128xbf16>
    %13 = tpu.concatenate %5, %12, %10 in 0 : vector<1x32x128xbf16>, vector<8x32x128xbf16>, vector<1x32x128xbf16> -> vector<10x32x128xbf16>
    %cst_13 = arith.constant 0.000000e+00 : bf16
    %14 = vector.broadcast %cst_13 : bf16 to vector<10x1x128xbf16>
    %15 = tpu.concatenate %14, %13, %14 in 1 : vector<10x1x128xbf16>, vector<10x32x128xbf16>, vector<10x1x128xbf16> -> vector<10x34x128xbf16>
    %16 = vector.extract_strided_slice %15 {offsets = [0, 0, 0], sizes = [10, 32, 128], strides = [1, 1, 1]} : vector<10x34x128xbf16> to vector<10x32x128xbf16>
    %17 = vector.extract_strided_slice %15 {offsets = [0, 1, 0], sizes = [10, 32, 128], strides = [1, 1, 1]} : vector<10x34x128xbf16> to vector<10x32x128xbf16>
    %18 = vector.extract_strided_slice %15 {offsets = [0, 2, 0], sizes = [10, 32, 128], strides = [1, 1, 1]} : vector<10x34x128xbf16> to vector<10x32x128xbf16>
    %19 = tpu.concatenate %16, %17, %18 in 2 : vector<10x32x128xbf16>, vector<10x32x128xbf16>, vector<10x32x128xbf16> -> vector<10x32x384xbf16>
    %20 = vector.extract_strided_slice %19 {offsets = [0, 0, 0], sizes = [8, 32, 384], strides = [1, 1, 1]} : vector<10x32x384xbf16> to vector<8x32x384xbf16>
    %21 = vector.shape_cast %20 : vector<8x32x384xbf16> to vector<256x384xbf16>
    %c0_14 = arith.constant 0 : index
    %c0_15 = arith.constant 0 : index
    %c0_16 = arith.constant 0 : index
    %22 = vector.load %arg9[%c0_14, %c0_15, %c0_16] : memref<3x384x128xbf16, #tpu.memory_space<vmem>>, vector<1x384x128xbf16>
    %23 = vector.shape_cast %22 : vector<1x384x128xbf16> to vector<384x128xbf16>
    %cst_17 = arith.constant dense<0.000000e+00> : vector<256x128xf32>
    %24 = tpu.matmul %21, %23, %cst_17 {dimension_numbers = #tpu.dot_dimension_numbers<[1], [0], [0], [1], [0, 0, 1, 1], [], []>} : vector<256x384xbf16>, vector<384x128xbf16>, vector<256x128xf32> -> vector<256x128xf32>
    %25 = arith.addf %0, %24 : vector<256x128xf32>
    %26 = vector.extract_strided_slice %19 {offsets = [1, 0, 0], sizes = [8, 32, 384], strides = [1, 1, 1]} : vector<10x32x384xbf16> to vector<8x32x384xbf16>
    %27 = vector.shape_cast %26 : vector<8x32x384xbf16> to vector<256x384xbf16>
    %c1 = arith.constant 1 : index
    %c0_18 = arith.constant 0 : index
    %c0_19 = arith.constant 0 : index
    %28 = vector.load %arg9[%c1, %c0_18, %c0_19] : memref<3x384x128xbf16, #tpu.memory_space<vmem>>, vector<1x384x128xbf16>
    %29 = vector.shape_cast %28 : vector<1x384x128xbf16> to vector<384x128xbf16>
    %cst_20 = arith.constant dense<0.000000e+00> : vector<256x128xf32>
    %30 = tpu.matmul %27, %29, %cst_20 {dimension_numbers = #tpu.dot_dimension_numbers<[1], [0], [0], [1], [0, 0, 1, 1], [], []>} : vector<256x384xbf16>, vector<384x128xbf16>, vector<256x128xf32> -> vector<256x128xf32>
    %31 = arith.addf %25, %30 : vector<256x128xf32>
    %32 = vector.extract_strided_slice %19 {offsets = [2, 0, 0], sizes = [8, 32, 384], strides = [1, 1, 1]} : vector<10x32x384xbf16> to vector<8x32x384xbf16>
    %33 = vector.shape_cast %32 : vector<8x32x384xbf16> to vector<256x384xbf16>
    %c2 = arith.constant 2 : index
    %c0_21 = arith.constant 0 : index
    %c0_22 = arith.constant 0 : index
    %34 = vector.load %arg9[%c2, %c0_21, %c0_22] : memref<3x384x128xbf16, #tpu.memory_space<vmem>>, vector<1x384x128xbf16>
    %35 = vector.shape_cast %34 : vector<1x384x128xbf16> to vector<384x128xbf16>
    %cst_23 = arith.constant dense<0.000000e+00> : vector<256x128xf32>
    %36 = tpu.matmul %33, %35, %cst_23 {dimension_numbers = #tpu.dot_dimension_numbers<[1], [0], [0], [1], [0, 0, 1, 1], [], []>} : vector<256x384xbf16>, vector<384x128xbf16>, vector<256x128xf32> -> vector<256x128xf32>
    %37 = arith.addf %31, %36 : vector<256x128xf32>
    %c0_i32_24 = arith.constant 0 : i32
    %38 = arith.cmpi eq, %arg2, %c0_i32_24 : i32
    %cst_25 = arith.constant 0.000000e+00 : bf16
    %39 = vector.broadcast %cst_25 : bf16 to vector<1x32x128xbf16>
    %c0_26 = arith.constant 0 : index
    %c0_27 = arith.constant 0 : index
    %c0_28 = arith.constant 0 : index
    %c0_29 = arith.constant 0 : index
    %40 = vector.load %arg7[%c0_26, %c0_27, %c0_28, %c0_29] : memref<1x1x32x128xbf16, #tpu.memory_space<vmem>>, vector<1x1x32x128xbf16>
    %41 = vector.shape_cast %40 : vector<1x1x32x128xbf16> to vector<1x32x128xbf16>
    %42 = arith.select %38, %39, %41 : vector<1x32x128xbf16>
    %c3_i32_30 = arith.constant 3 : i32
    %43 = arith.cmpi eq, %arg2, %c3_i32_30 : i32
    %cst_31 = arith.constant 0.000000e+00 : bf16
    %44 = vector.broadcast %cst_31 : bf16 to vector<1x32x128xbf16>
    %c0_32 = arith.constant 0 : index
    %c0_33 = arith.constant 0 : index
    %c0_34 = arith.constant 0 : index
    %c0_35 = arith.constant 0 : index
    %45 = vector.load %arg8[%c0_32, %c0_33, %c0_34, %c0_35] : memref<1x1x32x128xbf16, #tpu.memory_space<vmem>>, vector<1x1x32x128xbf16>
    %46 = vector.shape_cast %45 : vector<1x1x32x128xbf16> to vector<1x32x128xbf16>
    %47 = arith.select %43, %44, %46 : vector<1x32x128xbf16>
    %c0_36 = arith.constant 0 : index
    %c0_37 = arith.constant 0 : index
    %c0_38 = arith.constant 0 : index
    %c0_39 = arith.constant 0 : index
    %48 = vector.load %arg6[%c0_36, %c0_37, %c0_38, %c0_39] : memref<1x8x32x128xbf16, #tpu.memory_space<vmem>>, vector<1x8x32x128xbf16>
    %49 = vector.shape_cast %48 : vector<1x8x32x128xbf16> to vector<8x32x128xbf16>
    %50 = tpu.concatenate %42, %49, %47 in 0 : vector<1x32x128xbf16>, vector<8x32x128xbf16>, vector<1x32x128xbf16> -> vector<10x32x128xbf16>
    %cst_40 = arith.constant 0.000000e+00 : bf16
    %51 = vector.broadcast %cst_40 : bf16 to vector<10x1x128xbf16>
    %52 = tpu.concatenate %51, %50, %51 in 1 : vector<10x1x128xbf16>, vector<10x32x128xbf16>, vector<10x1x128xbf16> -> vector<10x34x128xbf16>
    %53 = vector.extract_strided_slice %52 {offsets = [0, 0, 0], sizes = [10, 32, 128], strides = [1, 1, 1]} : vector<10x34x128xbf16> to vector<10x32x128xbf16>
    %54 = vector.extract_strided_slice %52 {offsets = [0, 1, 0], sizes = [10, 32, 128], strides = [1, 1, 1]} : vector<10x34x128xbf16> to vector<10x32x128xbf16>
    %55 = vector.extract_strided_slice %52 {offsets = [0, 2, 0], sizes = [10, 32, 128], strides = [1, 1, 1]} : vector<10x34x128xbf16> to vector<10x32x128xbf16>
    %56 = tpu.concatenate %53, %54, %55 in 2 : vector<10x32x128xbf16>, vector<10x32x128xbf16>, vector<10x32x128xbf16> -> vector<10x32x384xbf16>
    %57 = vector.extract_strided_slice %56 {offsets = [0, 0, 0], sizes = [8, 32, 384], strides = [1, 1, 1]} : vector<10x32x384xbf16> to vector<8x32x384xbf16>
    %58 = vector.shape_cast %57 : vector<8x32x384xbf16> to vector<256x384xbf16>
    %c0_41 = arith.constant 0 : index
    %c0_42 = arith.constant 0 : index
    %c0_43 = arith.constant 0 : index
    %59 = vector.load %arg10[%c0_41, %c0_42, %c0_43] : memref<3x384x128xbf16, #tpu.memory_space<vmem>>, vector<1x384x128xbf16>
    %60 = vector.shape_cast %59 : vector<1x384x128xbf16> to vector<384x128xbf16>
    %cst_44 = arith.constant dense<0.000000e+00> : vector<256x128xf32>
    %61 = tpu.matmul %58, %60, %cst_44 {dimension_numbers = #tpu.dot_dimension_numbers<[1], [0], [0], [1], [0, 0, 1, 1], [], []>} : vector<256x384xbf16>, vector<384x128xbf16>, vector<256x128xf32> -> vector<256x128xf32>
    %62 = arith.addf %37, %61 : vector<256x128xf32>
    %63 = vector.extract_strided_slice %56 {offsets = [1, 0, 0], sizes = [8, 32, 384], strides = [1, 1, 1]} : vector<10x32x384xbf16> to vector<8x32x384xbf16>
    %64 = vector.shape_cast %63 : vector<8x32x384xbf16> to vector<256x384xbf16>
    %c1_45 = arith.constant 1 : index
    %c0_46 = arith.constant 0 : index
    %c0_47 = arith.constant 0 : index
    %65 = vector.load %arg10[%c1_45, %c0_46, %c0_47] : memref<3x384x128xbf16, #tpu.memory_space<vmem>>, vector<1x384x128xbf16>
    %66 = vector.shape_cast %65 : vector<1x384x128xbf16> to vector<384x128xbf16>
    %cst_48 = arith.constant dense<0.000000e+00> : vector<256x128xf32>
    %67 = tpu.matmul %64, %66, %cst_48 {dimension_numbers = #tpu.dot_dimension_numbers<[1], [0], [0], [1], [0, 0, 1, 1], [], []>} : vector<256x384xbf16>, vector<384x128xbf16>, vector<256x128xf32> -> vector<256x128xf32>
    %68 = arith.addf %62, %67 : vector<256x128xf32>
    %69 = vector.extract_strided_slice %56 {offsets = [2, 0, 0], sizes = [8, 32, 384], strides = [1, 1, 1]} : vector<10x32x384xbf16> to vector<8x32x384xbf16>
    %70 = vector.shape_cast %69 : vector<8x32x384xbf16> to vector<256x384xbf16>
    %c2_49 = arith.constant 2 : index
    %c0_50 = arith.constant 0 : index
    %c0_51 = arith.constant 0 : index
    %71 = vector.load %arg10[%c2_49, %c0_50, %c0_51] : memref<3x384x128xbf16, #tpu.memory_space<vmem>>, vector<1x384x128xbf16>
    %72 = vector.shape_cast %71 : vector<1x384x128xbf16> to vector<384x128xbf16>
    %cst_52 = arith.constant dense<0.000000e+00> : vector<256x128xf32>
    %73 = tpu.matmul %70, %72, %cst_52 {dimension_numbers = #tpu.dot_dimension_numbers<[1], [0], [0], [1], [0, 0, 1, 1], [], []>} : vector<256x384xbf16>, vector<384x128xbf16>, vector<256x128xf32> -> vector<256x128xf32>
    %74 = arith.addf %68, %73 : vector<256x128xf32>
    %c0_53 = arith.constant 0 : index
    %c0_54 = arith.constant 0 : index
    %75 = vector.load %arg11[%c0_53, %c0_54] : memref<1x128xf32, #tpu.memory_space<vmem>>, vector<1x128xf32>
    %76 = vector.broadcast %75 : vector<1x128xf32> to vector<256x128xf32>
    %77 = arith.addf %74, %76 : vector<256x128xf32>
    %cst_55 = arith.constant 0.000000e+00 : f32
    %78 = vector.broadcast %cst_55 : f32 to vector<256x128xf32>
    %79 = arith.maximumf %77, %78 : vector<256x128xf32>
    %c0_56 = arith.constant 0 : index
    %c0_57 = arith.constant 0 : index
    %80 = vector.load %arg12[%c0_56, %c0_57] : memref<1x128xf32, #tpu.memory_space<vmem>>, vector<1x128xf32>
    %81 = vector.broadcast %80 : vector<1x128xf32> to vector<256x128xf32>
    %82 = arith.mulf %79, %81 : vector<256x128xf32>
    %c0_58 = arith.constant 0 : index
    %c0_59 = arith.constant 0 : index
    %83 = vector.load %arg13[%c0_58, %c0_59] : memref<1x128xf32, #tpu.memory_space<vmem>>, vector<1x128xf32>
    %84 = vector.broadcast %83 : vector<1x128xf32> to vector<256x128xf32>
    %85 = arith.addf %82, %84 : vector<256x128xf32>
    %86 = vector.shape_cast %85 : vector<256x128xf32> to vector<1x8x32x128xf32>
    %87 = arith.truncf %86 : vector<1x8x32x128xf32> to vector<1x8x32x128xbf16>
    %c0_60 = arith.constant 0 : index
    %c0_61 = arith.constant 0 : index
    %c0_62 = arith.constant 0 : index
    %c0_63 = arith.constant 0 : index
    %88 = vector.load %arg14[%c0_60, %c0_61, %c0_62, %c0_63] : memref<1x8x32x128xbf16, #tpu.memory_space<vmem>>, vector<1x8x32x128xbf16>
    tpu.vector_store %arg14[%c0_60, %c0_61, %c0_62, %c0_63], %87 {strides = array<i32>} : memref<1x8x32x128xbf16, #tpu.memory_space<vmem>>, vector<1x8x32x128xbf16>,
    return
  }
  func.func @transform_0(%arg0: i32, %arg1: i32, %arg2: i32) -> (i32, i32, i32, i32) {
    %c0_i32 = arith.constant 0 : i32
    %c0_i32_0 = arith.constant 0 : i32
    %c0_i32_1 = arith.constant 0 : i32
    return %arg0, %arg2, %c0_i32, %c0_i32_0 : i32, i32, i32, i32
  }
  func.func @transform_1(%arg0: i32, %arg1: i32, %arg2: i32) -> (i32, i32, i32, i32) {
    %c8_i32 = arith.constant 8 : i32
    %0 = arith.muli %arg2, %c8_i32 : i32
    %c1_i32 = arith.constant 1 : i32
    %1 = arith.subi %0, %c1_i32 : i32
    %c0_i32 = arith.constant 0 : i32
    %2 = arith.maxsi %1, %c0_i32 : i32
    %c0_i32_0 = arith.constant 0 : i32
    %c0_i32_1 = arith.constant 0 : i32
    %c0_i32_2 = arith.constant 0 : i32
    return %arg0, %2, %c0_i32_0, %c0_i32_1 : i32, i32, i32, i32
  }
  func.func @transform_2(%arg0: i32, %arg1: i32, %arg2: i32) -> (i32, i32, i32, i32) {
    %c1_i32 = arith.constant 1 : i32
    %0 = arith.addi %arg2, %c1_i32 : i32
    %c8_i32 = arith.constant 8 : i32
    %1 = arith.muli %0, %c8_i32 : i32
    %c31_i32 = arith.constant 31 : i32
    %2 = arith.minsi %1, %c31_i32 : i32
    %c0_i32 = arith.constant 0 : i32
    %c0_i32_0 = arith.constant 0 : i32
    %c0_i32_1 = arith.constant 0 : i32
    return %arg0, %2, %c0_i32, %c0_i32_0 : i32, i32, i32, i32
  }
  func.func @transform_3(%arg0: i32, %arg1: i32, %arg2: i32) -> (i32, i32, i32, i32) {
    %c0_i32 = arith.constant 0 : i32
    %c0_i32_0 = arith.constant 0 : i32
    %c0_i32_1 = arith.constant 0 : i32
    return %arg0, %arg2, %c0_i32, %c0_i32_0 : i32, i32, i32, i32
  }
  func.func @transform_4(%arg0: i32, %arg1: i32, %arg2: i32) -> (i32, i32, i32, i32) {
    %c8_i32 = arith.constant 8 : i32
    %0 = arith.muli %arg2, %c8_i32 : i32
    %c1_i32 = arith.constant 1 : i32
    %1 = arith.subi %0, %c1_i32 : i32
    %c0_i32 = arith.constant 0 : i32
    %2 = arith.maxsi %1, %c0_i32 : i32
    %c0_i32_0 = arith.constant 0 : i32
    %c0_i32_1 = arith.constant 0 : i32
    %c0_i32_2 = arith.constant 0 : i32
    return %arg0, %2, %c0_i32_0, %c0_i32_1 : i32, i32, i32, i32
  }
  func.func @transform_5(%arg0: i32, %arg1: i32, %arg2: i32) -> (i32, i32, i32, i32) {
    %c1_i32 = arith.constant 1 : i32
    %0 = arith.addi %arg2, %c1_i32 : i32
    %c8_i32 = arith.constant 8 : i32
    %1 = arith.muli %0, %c8_i32 : i32
    %c31_i32 = arith.constant 31 : i32
    %2 = arith.minsi %1, %c31_i32 : i32
    %c0_i32 = arith.constant 0 : i32
    %c0_i32_0 = arith.constant 0 : i32
    %c0_i32_1 = arith.constant 0 : i32
    return %arg0, %2, %c0_i32, %c0_i32_0 : i32, i32, i32, i32
  }
  func.func @transform_6(%arg0: i32, %arg1: i32, %arg2: i32) -> (i32, i32, i32) {
    %c0_i32 = arith.constant 0 : i32
    %c0_i32_0 = arith.constant 0 : i32
    %c0_i32_1 = arith.constant 0 : i32
    return %c0_i32, %c0_i32_0, %arg1 : i32, i32, i32
  }
  func.func @transform_7(%arg0: i32, %arg1: i32, %arg2: i32) -> (i32, i32, i32) {
    %c0_i32 = arith.constant 0 : i32
    %c0_i32_0 = arith.constant 0 : i32
    %c0_i32_1 = arith.constant 0 : i32
    return %c0_i32, %c0_i32_0, %arg1 : i32, i32, i32
  }
  func.func @transform_8(%arg0: i32, %arg1: i32, %arg2: i32) -> (i32, i32) {
    %c0_i32 = arith.constant 0 : i32
    %c0_i32_0 = arith.constant 0 : i32
    return %c0_i32, %arg1 : i32, i32
  }
  func.func @transform_9(%arg0: i32, %arg1: i32, %arg2: i32) -> (i32, i32) {
    %c0_i32 = arith.constant 0 : i32
    %c0_i32_0 = arith.constant 0 : i32
    return %c0_i32, %arg1 : i32, i32
  }
  func.func @transform_10(%arg0: i32, %arg1: i32, %arg2: i32) -> (i32, i32) {
    %c0_i32 = arith.constant 0 : i32
    %c0_i32_0 = arith.constant 0 : i32
    return %c0_i32, %arg1 : i32, i32
  }
  func.func @transform_11(%arg0: i32, %arg1: i32, %arg2: i32) -> (i32, i32, i32, i32) {
    %c0_i32 = arith.constant 0 : i32
    %c0_i32_0 = arith.constant 0 : i32
    return %arg0, %arg2, %c0_i32, %arg1 : i32, i32, i32, i32
  }
}

module attributes {stable_mosaic.version = 11 : i64} {
  func.func @kernel(%arg0: i32, %arg1: i32, %arg2: i32, %arg3: memref<1x8x32x128xbf16, #tpu.memory_space<vmem>>, %arg4: memref<1x1x32x128xbf16, #tpu.memory_space<vmem>>, %arg5: memref<1x1x32x128xbf16, #tpu.memory_space<vmem>>, %arg6: memref<3x384x128xbf16, #tpu.memory_space<vmem>>, %arg7: memref<1x128xf32, #tpu.memory_space<vmem>>, %arg8: memref<1x128xf32, #tpu.memory_space<vmem>>, %arg9: memref<1x128xf32, #tpu.memory_space<vmem>>, %arg10: memref<1x8x32x128xf32, #tpu.memory_space<vmem>>) attributes {dimension_semantics = [#tpu.dimension_semantics<parallel>, #tpu.dimension_semantics<parallel>, #tpu.dimension_semantics<parallel>], iteration_bounds = array<i64: 2, 1, 4>, scalar_prefetch = 0 : i64, scratch_operands = 0 : i64, tpu.core_type = #tpu.core_type<tc>, window_params = [{transform_indices = @transform_0, window_bounds = array<i64: 1, 8, 32, 128>}, {transform_indices = @transform_1, window_bounds = array<i64: 1, 1, 32, 128>}, {transform_indices = @transform_2, window_bounds = array<i64: 1, 1, 32, 128>}, {transform_indices = @transform_3, window_bounds = array<i64: 3, 384, 128>}, {transform_indices = @transform_4, window_bounds = array<i64: 1, 128>}, {transform_indices = @transform_5, window_bounds = array<i64: 1, 128>}, {transform_indices = @transform_6, window_bounds = array<i64: 1, 128>}, {transform_indices = @transform_7, window_bounds = array<i64: 1, 8, 32, 128>}]} {
    %cst = arith.constant 0.000000e+00 : f32
    %0 = vector.broadcast %cst : f32 to vector<256x128xf32>
    %c0_i32 = arith.constant 0 : i32
    %1 = arith.cmpi eq, %arg2, %c0_i32 : i32
    %cst_0 = arith.constant 0.000000e+00 : bf16
    %2 = vector.broadcast %cst_0 : bf16 to vector<1x32x128xbf16>
    %c0 = arith.constant 0 : index
    %c0_1 = arith.constant 0 : index
    %c0_2 = arith.constant 0 : index
    %c0_3 = arith.constant 0 : index
    %3 = vector.load %arg4[%c0, %c0_1, %c0_2, %c0_3] : memref<1x1x32x128xbf16, #tpu.memory_space<vmem>>, vector<1x1x32x128xbf16>
    %4 = vector.shape_cast %3 : vector<1x1x32x128xbf16> to vector<1x32x128xbf16>
    %5 = arith.select %1, %2, %4 : vector<1x32x128xbf16>
    %c3_i32 = arith.constant 3 : i32
    %6 = arith.cmpi eq, %arg2, %c3_i32 : i32
    %cst_4 = arith.constant 0.000000e+00 : bf16
    %7 = vector.broadcast %cst_4 : bf16 to vector<1x32x128xbf16>
    %c0_5 = arith.constant 0 : index
    %c0_6 = arith.constant 0 : index
    %c0_7 = arith.constant 0 : index
    %c0_8 = arith.constant 0 : index
    %8 = vector.load %arg5[%c0_5, %c0_6, %c0_7, %c0_8] : memref<1x1x32x128xbf16, #tpu.memory_space<vmem>>, vector<1x1x32x128xbf16>
    %9 = vector.shape_cast %8 : vector<1x1x32x128xbf16> to vector<1x32x128xbf16>
    %10 = arith.select %6, %7, %9 : vector<1x32x128xbf16>
    %c0_9 = arith.constant 0 : index
    %c0_10 = arith.constant 0 : index
    %c0_11 = arith.constant 0 : index
    %c0_12 = arith.constant 0 : index
    %11 = vector.load %arg3[%c0_9, %c0_10, %c0_11, %c0_12] : memref<1x8x32x128xbf16, #tpu.memory_space<vmem>>, vector<1x8x32x128xbf16>
    %12 = vector.shape_cast %11 : vector<1x8x32x128xbf16> to vector<8x32x128xbf16>
    %13 = tpu.concatenate %5, %12, %10 in 0 : vector<1x32x128xbf16>, vector<8x32x128xbf16>, vector<1x32x128xbf16> -> vector<10x32x128xbf16>
    %cst_13 = arith.constant 0.000000e+00 : bf16
    %14 = vector.broadcast %cst_13 : bf16 to vector<10x1x128xbf16>
    %15 = tpu.concatenate %14, %13, %14 in 1 : vector<10x1x128xbf16>, vector<10x32x128xbf16>, vector<10x1x128xbf16> -> vector<10x34x128xbf16>
    %16 = vector.extract_strided_slice %15 {offsets = [0, 0, 0], sizes = [10, 32, 128], strides = [1, 1, 1]} : vector<10x34x128xbf16> to vector<10x32x128xbf16>
    %17 = vector.extract_strided_slice %15 {offsets = [0, 1, 0], sizes = [10, 32, 128], strides = [1, 1, 1]} : vector<10x34x128xbf16> to vector<10x32x128xbf16>
    %18 = vector.extract_strided_slice %15 {offsets = [0, 2, 0], sizes = [10, 32, 128], strides = [1, 1, 1]} : vector<10x34x128xbf16> to vector<10x32x128xbf16>
    %19 = tpu.concatenate %16, %17, %18 in 2 : vector<10x32x128xbf16>, vector<10x32x128xbf16>, vector<10x32x128xbf16> -> vector<10x32x384xbf16>
    %20 = vector.extract_strided_slice %19 {offsets = [0, 0, 0], sizes = [8, 32, 384], strides = [1, 1, 1]} : vector<10x32x384xbf16> to vector<8x32x384xbf16>
    %21 = vector.shape_cast %20 : vector<8x32x384xbf16> to vector<256x384xbf16>
    %c0_14 = arith.constant 0 : index
    %c0_15 = arith.constant 0 : index
    %c0_16 = arith.constant 0 : index
    %22 = vector.load %arg6[%c0_14, %c0_15, %c0_16] : memref<3x384x128xbf16, #tpu.memory_space<vmem>>, vector<1x384x128xbf16>
    %23 = vector.shape_cast %22 : vector<1x384x128xbf16> to vector<384x128xbf16>
    %cst_17 = arith.constant dense<0.000000e+00> : vector<256x128xf32>
    %24 = tpu.matmul %21, %23, %cst_17 {dimension_numbers = #tpu.dot_dimension_numbers<[1], [0], [0], [1], [0, 0, 1, 1], [], []>} : vector<256x384xbf16>, vector<384x128xbf16>, vector<256x128xf32> -> vector<256x128xf32>
    %25 = arith.addf %0, %24 : vector<256x128xf32>
    %26 = vector.extract_strided_slice %19 {offsets = [1, 0, 0], sizes = [8, 32, 384], strides = [1, 1, 1]} : vector<10x32x384xbf16> to vector<8x32x384xbf16>
    %27 = vector.shape_cast %26 : vector<8x32x384xbf16> to vector<256x384xbf16>
    %c1 = arith.constant 1 : index
    %c0_18 = arith.constant 0 : index
    %c0_19 = arith.constant 0 : index
    %28 = vector.load %arg6[%c1, %c0_18, %c0_19] : memref<3x384x128xbf16, #tpu.memory_space<vmem>>, vector<1x384x128xbf16>
    %29 = vector.shape_cast %28 : vector<1x384x128xbf16> to vector<384x128xbf16>
    %cst_20 = arith.constant dense<0.000000e+00> : vector<256x128xf32>
    %30 = tpu.matmul %27, %29, %cst_20 {dimension_numbers = #tpu.dot_dimension_numbers<[1], [0], [0], [1], [0, 0, 1, 1], [], []>} : vector<256x384xbf16>, vector<384x128xbf16>, vector<256x128xf32> -> vector<256x128xf32>
    %31 = arith.addf %25, %30 : vector<256x128xf32>
    %32 = vector.extract_strided_slice %19 {offsets = [2, 0, 0], sizes = [8, 32, 384], strides = [1, 1, 1]} : vector<10x32x384xbf16> to vector<8x32x384xbf16>
    %33 = vector.shape_cast %32 : vector<8x32x384xbf16> to vector<256x384xbf16>
    %c2 = arith.constant 2 : index
    %c0_21 = arith.constant 0 : index
    %c0_22 = arith.constant 0 : index
    %34 = vector.load %arg6[%c2, %c0_21, %c0_22] : memref<3x384x128xbf16, #tpu.memory_space<vmem>>, vector<1x384x128xbf16>
    %35 = vector.shape_cast %34 : vector<1x384x128xbf16> to vector<384x128xbf16>
    %cst_23 = arith.constant dense<0.000000e+00> : vector<256x128xf32>
    %36 = tpu.matmul %33, %35, %cst_23 {dimension_numbers = #tpu.dot_dimension_numbers<[1], [0], [0], [1], [0, 0, 1, 1], [], []>} : vector<256x384xbf16>, vector<384x128xbf16>, vector<256x128xf32> -> vector<256x128xf32>
    %37 = arith.addf %31, %36 : vector<256x128xf32>
    %c0_24 = arith.constant 0 : index
    %c0_25 = arith.constant 0 : index
    %38 = vector.load %arg7[%c0_24, %c0_25] : memref<1x128xf32, #tpu.memory_space<vmem>>, vector<1x128xf32>
    %39 = vector.broadcast %38 : vector<1x128xf32> to vector<256x128xf32>
    %40 = arith.addf %37, %39 : vector<256x128xf32>
    %cst_26 = arith.constant 0.000000e+00 : f32
    %41 = vector.broadcast %cst_26 : f32 to vector<256x128xf32>
    %42 = arith.maximumf %40, %41 : vector<256x128xf32>
    %c0_27 = arith.constant 0 : index
    %c0_28 = arith.constant 0 : index
    %43 = vector.load %arg8[%c0_27, %c0_28] : memref<1x128xf32, #tpu.memory_space<vmem>>, vector<1x128xf32>
    %44 = vector.broadcast %43 : vector<1x128xf32> to vector<256x128xf32>
    %45 = arith.mulf %42, %44 : vector<256x128xf32>
    %c0_29 = arith.constant 0 : index
    %c0_30 = arith.constant 0 : index
    %46 = vector.load %arg9[%c0_29, %c0_30] : memref<1x128xf32, #tpu.memory_space<vmem>>, vector<1x128xf32>
    %47 = vector.broadcast %46 : vector<1x128xf32> to vector<256x128xf32>
    %48 = arith.addf %45, %47 : vector<256x128xf32>
    %49 = vector.shape_cast %48 : vector<256x128xf32> to vector<1x8x32x128xf32>
    %c0_31 = arith.constant 0 : index
    %c0_32 = arith.constant 0 : index
    %c0_33 = arith.constant 0 : index
    %c0_34 = arith.constant 0 : index
    %50 = vector.load %arg10[%c0_31, %c0_32, %c0_33, %c0_34] : memref<1x8x32x128xf32, #tpu.memory_space<vmem>>, vector<1x8x32x128xf32>
    tpu.vector_store %arg10[%c0_31, %c0_32, %c0_33, %c0_34], %49 {strides = array<i32>} : memref<1x8x32x128xf32, #tpu.memory_space<vmem>>, vector<1x8x32x128xf32>,
    return
  }
  func.func @transform_0(%arg0: i32, %arg1: i32, %arg2: i32) -> (i32, i32, i32, i32) {
    %c0_i32 = arith.constant 0 : i32
    %c0_i32_0 = arith.constant 0 : i32
    %c0_i32_1 = arith.constant 0 : i32
    return %arg0, %arg2, %c0_i32, %c0_i32_0 : i32, i32, i32, i32
  }
  func.func @transform_1(%arg0: i32, %arg1: i32, %arg2: i32) -> (i32, i32, i32, i32) {
    %c8_i32 = arith.constant 8 : i32
    %0 = arith.muli %arg2, %c8_i32 : i32
    %c1_i32 = arith.constant 1 : i32
    %1 = arith.subi %0, %c1_i32 : i32
    %c0_i32 = arith.constant 0 : i32
    %2 = arith.maxsi %1, %c0_i32 : i32
    %c0_i32_0 = arith.constant 0 : i32
    %c0_i32_1 = arith.constant 0 : i32
    %c0_i32_2 = arith.constant 0 : i32
    return %arg0, %2, %c0_i32_0, %c0_i32_1 : i32, i32, i32, i32
  }
  func.func @transform_2(%arg0: i32, %arg1: i32, %arg2: i32) -> (i32, i32, i32, i32) {
    %c1_i32 = arith.constant 1 : i32
    %0 = arith.addi %arg2, %c1_i32 : i32
    %c8_i32 = arith.constant 8 : i32
    %1 = arith.muli %0, %c8_i32 : i32
    %c31_i32 = arith.constant 31 : i32
    %2 = arith.minsi %1, %c31_i32 : i32
    %c0_i32 = arith.constant 0 : i32
    %c0_i32_0 = arith.constant 0 : i32
    %c0_i32_1 = arith.constant 0 : i32
    return %arg0, %2, %c0_i32, %c0_i32_0 : i32, i32, i32, i32
  }
  func.func @transform_3(%arg0: i32, %arg1: i32, %arg2: i32) -> (i32, i32, i32) {
    %c0_i32 = arith.constant 0 : i32
    %c0_i32_0 = arith.constant 0 : i32
    %c0_i32_1 = arith.constant 0 : i32
    return %c0_i32, %c0_i32_0, %arg1 : i32, i32, i32
  }
  func.func @transform_4(%arg0: i32, %arg1: i32, %arg2: i32) -> (i32, i32) {
    %c0_i32 = arith.constant 0 : i32
    %c0_i32_0 = arith.constant 0 : i32
    return %c0_i32, %arg1 : i32, i32
  }
  func.func @transform_5(%arg0: i32, %arg1: i32, %arg2: i32) -> (i32, i32) {
    %c0_i32 = arith.constant 0 : i32
    %c0_i32_0 = arith.constant 0 : i32
    return %c0_i32, %arg1 : i32, i32
  }
  func.func @transform_6(%arg0: i32, %arg1: i32, %arg2: i32) -> (i32, i32) {
    %c0_i32 = arith.constant 0 : i32
    %c0_i32_0 = arith.constant 0 : i32
    return %c0_i32, %arg1 : i32, i32
  }
  func.func @transform_7(%arg0: i32, %arg1: i32, %arg2: i32) -> (i32, i32, i32, i32) {
    %c0_i32 = arith.constant 0 : i32
    %c0_i32_0 = arith.constant 0 : i32
    return %arg0, %arg2, %c0_i32, %arg1 : i32, i32, i32, i32
  }
}

</mosaic_0001>

<bundles_post_ra>
// kernel: _lambda_.3
= control target key start
LH: loop header
LB: loop body
LE: loop exit
PB: predicated region body
PF: predicated region fallthrough
CT: control target
= control target key end

     0   :  { %s2215_s15 = smov 0   ;;  %s2217_s16 = smov 0   ;;  %s2715_s0 = inlined_call_operand.vmem [shape: bf16[2,16,16,128], index: 0, kind: input, shape index: {}, may-alias: {0,1}]   ;;  %s2716_s1 = inlined_call_operand.vmem [shape: bf16[2,16,16,128], index: 1, kind: input, shape index: {}, may-alias: {0,1}]   ;;  %s2717_s2 = inlined_call_operand.vmem [shape: bf16[512,512], index: 2, kind: input, shape index: {}]   ;;  %s2718_s3 = inlined_call_operand.vmem [shape: f32[1,512], index: 3, kind: input, shape index: {}]   ;;  %s2719_s4 = inlined_call_operand.vmem [shape: bf16[2,16,16,512], index: 4, kind: output, shape index: {}]  }
   0x1   :  { %s2219_s17 = smov 0   ;;  %s2221_s18 = smov 0  }
   0x2   :  { %s2223_s19 = smov 0   ;;  %s2225_s20 = smov 0  }
   0x3   :  { %s2227_s21 = smov 0   ;;  %s2229_s22 = smov 0  }
   0x4   :  { %s2231_s23 = smov 0   ;;  %s2233_s24 = smov 0  }
   0x5   :  { %s2235_s25 = smov 0  }
   0x6 LB: > { %s26_s26 = sadd.s32 1, %s2175_s22  ;;  %s29_s27 = sadd.s32 1, %s2179_s23  ;;  %s2187_s25 = sphi %s2235_s25, %s14_s25   ;;  %s2183_s24 = sphi %s2233_s24, %s2741_s24   ;;  %s2179_s23 = sphi %s2231_s23, %s2740_s23   ;;  %s2175_s22 = sphi %s2229_s22, %s2739_s22   ;;  %s2171_s21 = sphi %s2227_s21, %s2738_s21   ;;  %s2167_s20 = sphi %s2225_s20, %s2737_s20   ;;  %s2163_s19 = sphi %s2223_s19, %s2736_s19   ;;  %s2159_s18 = sphi %s2221_s18, %s2735_s18   ;;  %s2155_s17 = sphi %s2219_s17, %s2734_s17   ;;  %s2151_s16 = sphi %s2217_s16, %s2733_s16   ;;  %s2147_s15 = sphi %s2215_s15, %s2732_s15  }
   0x7   : > { %p27_p0 = scmp.ge.s32.totalorder %s26_s26, 2  ;;  %s1763_s28 = sadd.s32 4294967295, %s2187_s25  }
   0x8   : > { %p111_p1 = scmp.ne.s32.totalorder %s2159_s18, %s2155_s17  ;;  %p112_p2 = scmp.eq.s32.totalorder %s2187_s25, 0 }
   0x9   : > { %s2743_s26 = smov (%p27_p0, %s26_s26), 0  ;;  %s2745_s27 = smov (!%p27_p0, %s29_s27), %s2179_s23 }
   0xa   : > { %2723 = sst [smem:[#allocation4_spill]] %s2743_s26  ;;  %p31_p3 = scmp.ge.s32.totalorder %s2745_s27, 2 }
   0xb   : > { %s33_s29 = sadd.s32 1, %s2183_s24  ;;  %s104_s30 = sadd.s32 1, %s2159_s18 }
   0xc   : > { %p2281_p4 = por %p112_p2, %p111_p1  ;;  %s2747_s27 = smov (%p31_p3, %s2745_s27), 0 }
   0xd   : > { %2725 = sst [smem:[#allocation5_spill]] %s2747_s27  ;;  %s2749_s29 = smov (!%p31_p3, %s33_s29), %s2183_s24 }
   0xe   : > { %s101_s6 = ssub.s32 %s2179_s23, %s2747_s27  ;;  %p170_p5 = scmp.ne.s32.totalorder %s2151_s16, %s2147_s15 }
   0xf   : > { %p35_p6 = scmp.ge.s32.totalorder %s2749_s29, 2  ;;  %p102_p7 = scmp.eq.s32.totalorder %s101_s6, 0 }
  0x10   : > { %s154_s7 = ssub.s32 %s2175_s22, %s2743_s26  ;;  %p171_p8 = scmp.eq.s32.totalorder %s1763_s28, 7 }
  0x11   : > { %s2751_s29 = smov (%p35_p6, %s2749_s29), 0  ;;  %s160_s13 = sadd.s32 1, %s2151_s16 }
  0x12   : > { %2726 = sst [smem:[#allocation6_spill]] %s2751_s29  ;;  %s153_s9 = ssub.s32 %s2183_s24, %s2751_s29 }
  0x13   : > { %s2297_s8 = scalar_select %p102_p7, %s2159_s18, %s104_s30  }
  0x14   : > { %p2301_p9 = por %p171_p8, %p170_p5  ;;  %s155_s11 = sor.u32 %s154_s7, %s153_s9 }
  0x15   : > { %s157_s12 = sor.u32 %s155_s11, %s101_s6  ;;  %p1768_p11 = scmp.ge.s32.totalorder %s2187_s25, 8 }
  0x16   : > { %p158_p10 = scmp.eq.s32.totalorder %s157_s12, 0 }
  0x17   : > { %193 = sbr.rel (%p1768_p11) target bundleno = 64 (0x40), region = 16 }
  0x18   : > { %s2307_s14 = scalar_select %p158_p10, %s2151_s16, %s160_s13  }
  0x1c   : > { %230 = sbr.rel (!%p2281_p4) target bundleno = 64 (0x40), region = 28  ;;  %s232_s28 = sand.u32 (%p2281_p4), 1, %s2159_s18  }
  0x1d   : > { %s1888_s30 = sshll.u32 (%p2281_p4), %s2179_s23, 3  ;;  %s1769_s29 = sshll.u32 (%p2281_p4), %s232_s28, 9 }
  0x1e   : > { %s2317_s7 = scalar_lea.vmem (%p2281_p4), %s2717_s2, %s1888_s30  ;;  %s2322_s5 = scalar_lea.vmem (%p2281_p4), [#allocation2], %s1769_s29 }
  0x1f   : > { %v392_v0 = vld [vmem:[%s2317_s7] sm:$0xff] (%p2281_p4)  ;;  %v394_v1 = vld [vmem:[%s2317_s7 + $0x10] sm:$0xff] (%p2281_p4) }
  0x20   : > { %v396_v2 = vld [vmem:[%s2317_s7 + $0x20] sm:$0xff] (%p2281_p4)  ;;  %393 = vst [vmem:[%s2322_s5] sm:$0xff] (%p2281_p4), %v392_v0  ;;  %395 = vst [vmem:[%s2322_s5 + $0x8] sm:$0xff] (%p2281_p4), %v394_v1  ;;  %v398_v3 = vld [vmem:[%s2317_s7 + $0x30] sm:$0xff] (%p2281_p4) }
  0x21   : > { %397 = vst [vmem:[%s2322_s5 + $0x10] sm:$0xff] %v396_v2  ;;  %v400_v4 = vld [vmem:[%s2317_s7 + $0x40] sm:$0xff]  ;;  %v402_v5 = vld [vmem:[%s2317_s7 + $0x50] sm:$0xff]  ;;  %399 = vst [vmem:[%s2322_s5 + $0x18] sm:$0xff] %v398_v3 }
  0x22   : > { %401 = vst [vmem:[%s2322_s5 + $0x20] sm:$0xff] %v400_v4  ;;  %403 = vst [vmem:[%s2322_s5 + $0x28] sm:$0xff] %v402_v5  ;;  %v404_v6 = vld [vmem:[%s2317_s7 + $0x60] sm:$0xff]  ;;  %v406_v7 = vld [vmem:[%s2317_s7 + $0x70] sm:$0xff] }
  0x23   : > { %v408_v8 = vld [vmem:[%s2317_s7 + $0x80] sm:$0xff]  ;;  %405 = vst [vmem:[%s2322_s5 + $0x30] sm:$0xff] %v404_v6  ;;  %407 = vst [vmem:[%s2322_s5 + $0x38] sm:$0xff] %v406_v7  ;;  %v410_v9 = vld [vmem:[%s2317_s7 + $0x90] sm:$0xff] }
  0x24   : > { %409 = vst [vmem:[%s2322_s5 + $0x40] sm:$0xff] %v408_v8  ;;  %v412_v10 = vld [vmem:[%s2317_s7 + $0xa0] sm:$0xff]  ;;  %v414_v11 = vld [vmem:[%s2317_s7 + $0xb0] sm:$0xff]  ;;  %411 = vst [vmem:[%s2322_s5 + $0x48] sm:$0xff] %v410_v9 }
  0x25   : > { %413 = vst [vmem:[%s2322_s5 + $0x50] sm:$0xff] %v412_v10  ;;  %415 = vst [vmem:[%s2322_s5 + $0x58] sm:$0xff] %v414_v11  ;;  %v416_v12 = vld [vmem:[%s2317_s7 + $0xc0] sm:$0xff]  ;;  %v418_v13 = vld [vmem:[%s2317_s7 + $0xd0] sm:$0xff] }
  0x26   : > { %v420_v14 = vld [vmem:[%s2317_s7 + $0xe0] sm:$0xff]  ;;  %417 = vst [vmem:[%s2322_s5 + $0x60] sm:$0xff] %v416_v12  ;;  %419 = vst [vmem:[%s2322_s5 + $0x68] sm:$0xff] %v418_v13  ;;  %v422_v15 = vld [vmem:[%s2317_s7 + $0xf0] sm:$0xff] }
  0x27   : > { %421 = vst [vmem:[%s2322_s5 + $0x70] sm:$0xff] %v420_v14  ;;  %v424_v16 = vld [vmem:[%s2317_s7 + $0x100] sm:$0xff]  ;;  %v426_v17 = vld [vmem:[%s2317_s7 + $0x110] sm:$0xff]  ;;  %423 = vst [vmem:[%s2322_s5 + $0x78] sm:$0xff] %v422_v15 }
  0x28   : > { %425 = vst [vmem:[%s2322_s5 + $0x80] sm:$0xff] %v424_v16  ;;  %427 = vst [vmem:[%s2322_s5 + $0x88] sm:$0xff] %v426_v17  ;;  %v428_v18 = vld [vmem:[%s2317_s7 + $0x120] sm:$0xff]  ;;  %v430_v19 = vld [vmem:[%s2317_s7 + $0x130] sm:$0xff] }
  0x29   : > { %v432_v20 = vld [vmem:[%s2317_s7 + $0x140] sm:$0xff]  ;;  %429 = vst [vmem:[%s2322_s5 + $0x90] sm:$0xff] %v428_v18  ;;  %431 = vst [vmem:[%s2322_s5 + $0x98] sm:$0xff] %v430_v19  ;;  %v434_v21 = vld [vmem:[%s2317_s7 + $0x150] sm:$0xff] }
  0x2a   : > { %433 = vst [vmem:[%s2322_s5 + $0xa0] sm:$0xff] %v432_v20  ;;  %v436_v22 = vld [vmem:[%s2317_s7 + $0x160] sm:$0xff]  ;;  %v438_v23 = vld [vmem:[%s2317_s7 + $0x170] sm:$0xff]  ;;  %435 = vst [vmem:[%s2322_s5 + $0xa8] sm:$0xff] %v434_v21 }
  0x2b   : > { %437 = vst [vmem:[%s2322_s5 + $0xb0] sm:$0xff] %v436_v22  ;;  %439 = vst [vmem:[%s2322_s5 + $0xb8] sm:$0xff] %v438_v23  ;;  %v440_v24 = vld [vmem:[%s2317_s7 + $0x180] sm:$0xff]  ;;  %v442_v25 = vld [vmem:[%s2317_s7 + $0x190] sm:$0xff] }
  0x2c   : > { %v444_v26 = vld [vmem:[%s2317_s7 + $0x1a0] sm:$0xff]  ;;  %441 = vst [vmem:[%s2322_s5 + $0xc0] sm:$0xff] %v440_v24  ;;  %443 = vst [vmem:[%s2322_s5 + $0xc8] sm:$0xff] %v442_v25  ;;  %v446_v27 = vld [vmem:[%s2317_s7 + $0x1b0] sm:$0xff] }
  0x2d   : > { %445 = vst [vmem:[%s2322_s5 + $0xd0] sm:$0xff] %v444_v26  ;;  %v448_v28 = vld [vmem:[%s2317_s7 + $0x1c0] sm:$0xff]  ;;  %v450_v29 = vld [vmem:[%s2317_s7 + $0x1d0] sm:$0xff]  ;;  %447 = vst [vmem:[%s2322_s5 + $0xd8] sm:$0xff] %v446_v27 }
  0x2e   : > { %449 = vst [vmem:[%s2322_s5 + $0xe0] sm:$0xff] %v448_v28  ;;  %451 = vst [vmem:[%s2322_s5 + $0xe8] sm:$0xff] %v450_v29  ;;  %v452_v30 = vld [vmem:[%s2317_s7 + $0x1e0] sm:$0xff]  ;;  %v454_v31 = vld [vmem:[%s2317_s7 + $0x1f0] sm:$0xff] }
  0x2f   : > { %v456_v32 = vld [vmem:[%s2317_s7 + $0x200] sm:$0xff]  ;;  %453 = vst [vmem:[%s2322_s5 + $0xf0] sm:$0xff] %v452_v30  ;;  %455 = vst [vmem:[%s2322_s5 + $0xf8] sm:$0xff] %v454_v31  ;;  %v458_v33 = vld [vmem:[%s2317_s7 + $0x210] sm:$0xff] }
  0x30   : > { %457 = vst [vmem:[%s2322_s5 + $0x100] sm:$0xff] %v456_v32  ;;  %v460_v34 = vld [vmem:[%s2317_s7 + $0x220] sm:$0xff]  ;;  %v462_v35 = vld [vmem:[%s2317_s7 + $0x230] sm:$0xff]  ;;  %459 = vst [vmem:[%s2322_s5 + $0x108] sm:$0xff] %v458_v33 }
  0x31   : > { %461 = vst [vmem:[%s2322_s5 + $0x110] sm:$0xff] %v460_v34  ;;  %463 = vst [vmem:[%s2322_s5 + $0x118] sm:$0xff] %v462_v35  ;;  %v464_v36 = vld [vmem:[%s2317_s7 + $0x240] sm:$0xff]  ;;  %v466_v37 = vld [vmem:[%s2317_s7 + $0x250] sm:$0xff] }
  0x32   : > { %v468_v38 = vld [vmem:[%s2317_s7 + $0x260] sm:$0xff]  ;;  %465 = vst [vmem:[%s2322_s5 + $0x120] sm:$0xff] %v464_v36  ;;  %467 = vst [vmem:[%s2322_s5 + $0x128] sm:$0xff] %v466_v37  ;;  %v470_v39 = vld [vmem:[%s2317_s7 + $0x270] sm:$0xff] }
  0x33   : > { %469 = vst [vmem:[%s2322_s5 + $0x130] sm:$0xff] %v468_v38  ;;  %v472_v40 = vld [vmem:[%s2317_s7 + $0x280] sm:$0xff]  ;;  %v474_v41 = vld [vmem:[%s2317_s7 + $0x290] sm:$0xff]  ;;  %471 = vst [vmem:[%s2322_s5 + $0x138] sm:$0xff] %v470_v39 }
  0x34   : > { %473 = vst [vmem:[%s2322_s5 + $0x140] sm:$0xff] %v472_v40  ;;  %475 = vst [vmem:[%s2322_s5 + $0x148] sm:$0xff] %v474_v41  ;;  %v476_v42 = vld [vmem:[%s2317_s7 + $0x2a0] sm:$0xff]  ;;  %v478_v43 = vld [vmem:[%s2317_s7 + $0x2b0] sm:$0xff] }
  0x35   : > { %v480_v44 = vld [vmem:[%s2317_s7 + $0x2c0] sm:$0xff]  ;;  %477 = vst [vmem:[%s2322_s5 + $0x150] sm:$0xff] %v476_v42  ;;  %479 = vst [vmem:[%s2322_s5 + $0x158] sm:$0xff] %v478_v43  ;;  %v482_v45 = vld [vmem:[%s2317_s7 + $0x2d0] sm:$0xff] }
  0x36   : > { %481 = vst [vmem:[%s2322_s5 + $0x160] sm:$0xff] %v480_v44  ;;  %v484_v46 = vld [vmem:[%s2317_s7 + $0x2e0] sm:$0xff]  ;;  %v486_v47 = vld [vmem:[%s2317_s7 + $0x2f0] sm:$0xff]  ;;  %483 = vst [vmem:[%s2322_s5 + $0x168] sm:$0xff] %v482_v45 }
  0x37   : > { %485 = vst [vmem:[%s2322_s5 + $0x170] sm:$0xff] %v484_v46  ;;  %487 = vst [vmem:[%s2322_s5 + $0x178] sm:$0xff] %v486_v47  ;;  %v488_v48 = vld [vmem:[%s2317_s7 + $0x300] sm:$0xff]  ;;  %v490_v49 = vld [vmem:[%s2317_s7 + $0x310] sm:$0xff] }
  0x38   : > { %v492_v50 = vld [vmem:[%s2317_s7 + $0x320] sm:$0xff]  ;;  %489 = vst [vmem:[%s2322_s5 + $0x180] sm:$0xff] %v488_v48  ;;  %491 = vst [vmem:[%s2322_s5 + $0x188] sm:$0xff] %v490_v49  ;;  %v494_v51 = vld [vmem:[%s2317_s7 + $0x330] sm:$0xff] }
  0x39   : > { %493 = vst [vmem:[%s2322_s5 + $0x190] sm:$0xff] %v492_v50  ;;  %v496_v52 = vld [vmem:[%s2317_s7 + $0x340] sm:$0xff]  ;;  %v498_v53 = vld [vmem:[%s2317_s7 + $0x350] sm:$0xff]  ;;  %495 = vst [vmem:[%s2322_s5 + $0x198] sm:$0xff] %v494_v51 }
  0x3a   : > { %497 = vst [vmem:[%s2322_s5 + $0x1a0] sm:$0xff] %v496_v52  ;;  %499 = vst [vmem:[%s2322_s5 + $0x1a8] sm:$0xff] %v498_v53  ;;  %v500_v54 = vld [vmem:[%s2317_s7 + $0x360] sm:$0xff]  ;;  %v502_v55 = vld [vmem:[%s2317_s7 + $0x370] sm:$0xff] }
  0x3b   : > { %v504_v56 = vld [vmem:[%s2317_s7 + $0x380] sm:$0xff]  ;;  %501 = vst [vmem:[%s2322_s5 + $0x1b0] sm:$0xff] %v500_v54  ;;  %503 = vst [vmem:[%s2322_s5 + $0x1b8] sm:$0xff] %v502_v55  ;;  %v506_v57 = vld [vmem:[%s2317_s7 + $0x390] sm:$0xff] }
  0x3c   : > { %505 = vst [vmem:[%s2322_s5 + $0x1c0] sm:$0xff] %v504_v56  ;;  %v508_v58 = vld [vmem:[%s2317_s7 + $0x3a0] sm:$0xff]  ;;  %v510_v59 = vld [vmem:[%s2317_s7 + $0x3b0] sm:$0xff]  ;;  %507 = vst [vmem:[%s2322_s5 + $0x1c8] sm:$0xff] %v506_v57 }
  0x3d   : > { %509 = vst [vmem:[%s2322_s5 + $0x1d0] sm:$0xff] %v508_v58  ;;  %511 = vst [vmem:[%s2322_s5 + $0x1d8] sm:$0xff] %v510_v59  ;;  %v512_v60 = vld [vmem:[%s2317_s7 + $0x3c0] sm:$0xff]  ;;  %v514_v61 = vld [vmem:[%s2317_s7 + $0x3d0] sm:$0xff] }
  0x3e   : > { %v516_v62 = vld [vmem:[%s2317_s7 + $0x3e0] sm:$0xff]  ;;  %513 = vst [vmem:[%s2322_s5 + $0x1e0] sm:$0xff] %v512_v60  ;;  %515 = vst [vmem:[%s2322_s5 + $0x1e8] sm:$0xff] %v514_v61  ;;  %v518_v63 = vld [vmem:[%s2317_s7 + $0x3f0] sm:$0xff] }
  0x3f   : > { %517 = vst [vmem:[%s2322_s5 + $0x1f0] sm:$0xff] %v516_v62  ;;  %519 = vst [vmem:[%s2322_s5 + $0x1f8] sm:$0xff] %v518_v63 }
  0x40 PF: > { %p1772_p12 = scmp.ge.s32.totalorder %s2187_s25, 1  ;;  %p532_p13 = scmp.lt.s32.totalorder %s2187_s25, 9 }
  0x42   : > { %p533_p0 = pnand %p1772_p12, %p532_p13 }
  0x43   : > { %s539_s26 = sand.u32 (!%p533_p0), 1, %s2155_s17   ;;  %s2480_s17 = sshll.u32 (!%p533_p0), %s2163_s19, 3 }
  0x44   : > { %536 = sbr.rel (%p533_p0) target bundleno = 408 (0x198), region = 70  ;;  %s1773_s27 = sshll.u32 (!%p533_p0), %s539_s26, 9 }
  0x45   : > { %s2452_s29 = scalar_lea.vmem (!%p533_p0), [#allocation2], %s1773_s27  ;;  %p591_p1 = scmp.lt.s32.totalorder (!%p533_p0), %s2171_s21, 1 }
  0x46   : > { %p593_p2 = scmp.lt.s32.totalorder (!%p533_p0), %s2480_s17, 15  ;;  %s1890_s26 = sadd.s32 (!%p533_p0), 8, %s2480_s17 }
  0x47   : > { %p2563_p3 = scmp.lt.s32.totalorder (!%p533_p0), %s1890_s26, 15  ;;  %p627_p4 = scmp.eq.s32.totalorder (!%p533_p0), %s2163_s19, 1 }
  0x49   : > { %v1997_v0 = vld [vmem:[%s2452_s29 + $0x74] ss:$8 sps:$4 sm:$0xff]   ;;  %v2001_v2 = vld [vmem:[%s2452_s29 + $0x70] ss:$8 sps:$4 sm:$0xff]   ;;  %v2003_v4 = vld [vmem:[%s2452_s29 + $0x64] ss:$8 sps:$4 sm:$0xff]  }
  0x4a   : > { %v1999_v1 = vld [vmem:[%s2452_s29 + $0x174] ss:$8 sps:$4 sm:$0xff]   ;;  %1187 = vmatprep.subr.bf16.mxu0 %v1997_v0  ;;  %v2002_v3 = vld [vmem:[%s2452_s29 + $0x170] ss:$8 sps:$4 sm:$0xff]   ;;  %v2005_v5 = vld [vmem:[%s2452_s29 + $0x164] ss:$8 sps:$4 sm:$0xff]  }
  0x4b   : > { %1300 = vmatprep.subr.bf16.mxu1 %v1999_v1  ;;  %1188 = vmatpush1.bf16.msra.mxu0 %v2001_v2  ;;  %v2007_v6 = vld [vmem:[%s2452_s29 + $0x60] ss:$8 sps:$4 sm:$0xff]   ;;  %v2009_v8 = vld [vmem:[%s2452_s29 + $0x54] ss:$8 sps:$4 sm:$0xff]   ;;  %v2013_v10 = vld [vmem:[%s2452_s29 + $0x50] ss:$8 sps:$4 sm:$0xff]  }
  0x4c   : > { %1301 = vmatpush1.bf16.msra.mxu1 %v2002_v3  ;;  %1189 = vmatprep.subr.bf16.mxu0 %v2003_v4  ;;  %v2008_v7 = vld [vmem:[%s2452_s29 + $0x160] ss:$8 sps:$4 sm:$0xff]   ;;  %v2011_v9 = vld [vmem:[%s2452_s29 + $0x154] ss:$8 sps:$4 sm:$0xff]   ;;  %v2014_v11 = vld [vmem:[%s2452_s29 + $0x150] ss:$8 sps:$4 sm:$0xff]  }
  0x4d   : > { %1302 = vmatprep.subr.bf16.mxu1 %v2005_v5  ;;  %v2015_v12 = vld [vmem:[%s2452_s29 + $0x44] ss:$8 sps:$4 sm:$0xff]   ;;  %v2019_v14 = vld [vmem:[%s2452_s29 + $0x40] ss:$8 sps:$4 sm:$0xff]   ;;  %v2021_v16 = vld [vmem:[%s2452_s29 + $0x34] ss:$8 sps:$4 sm:$0xff]  }
  0x4e   : > { %v2017_v13 = vld [vmem:[%s2452_s29 + $0x144] ss:$8 sps:$4 sm:$0xff]   ;;  %v2020_v15 = vld [vmem:[%s2452_s29 + $0x140] ss:$8 sps:$4 sm:$0xff]   ;;  %v2023_v17 = vld [vmem:[%s2452_s29 + $0x134] ss:$8 sps:$4 sm:$0xff]  }
  0x4f   : > { %1190 = vmatpush1.bf16.msra.mxu0 %v2007_v6  ;;  %v2025_v18 = vld [vmem:[%s2452_s29 + $0x30] ss:$8 sps:$4 sm:$0xff]   ;;  %v2027_v20 = vld [vmem:[%s2452_s29 + $0x24] ss:$8 sps:$4 sm:$0xff]   ;;  %v2031_v22 = vld [vmem:[%s2452_s29 + $0x20] ss:$8 sps:$4 sm:$0xff]  }
  0x50   : > { %1303 = vmatpush1.bf16.msra.mxu1 %v2008_v7  ;;  %1191 = vmatprep.subr.bf16.mxu0 %v2009_v8  ;;  %v2026_v19 = vld [vmem:[%s2452_s29 + $0x130] ss:$8 sps:$4 sm:$0xff]   ;;  %v2029_v21 = vld [vmem:[%s2452_s29 + $0x124] ss:$8 sps:$4 sm:$0xff]   ;;  %v2032_v23 = vld [vmem:[%s2452_s29 + $0x120] ss:$8 sps:$4 sm:$0xff]  }
  0x51   : > { %1304 = vmatprep.subr.bf16.mxu1 %v2011_v9  ;;  %v2033_v24 = vld [vmem:[%s2452_s29 + $0x14] ss:$8 sps:$4 sm:$0xff]   ;;  %v2037_v26 = vld [vmem:[%s2452_s29 + $0x10] ss:$8 sps:$4 sm:$0xff]   ;;  %v2039_v28 = vld [vmem:[%s2452_s29 + $0x4] ss:$8 sps:$4 sm:$0xff]  }
  0x52   : > { %v2035_v25 = vld [vmem:[%s2452_s29 + $0x114] ss:$8 sps:$4 sm:$0xff]   ;;  %v2038_v27 = vld [vmem:[%s2452_s29 + $0x110] ss:$8 sps:$4 sm:$0xff]   ;;  %v2041_v29 = vld [vmem:[%s2452_s29 + $0x104] ss:$8 sps:$4 sm:$0xff]  }
  0x53   : > { %1192 = vmatpush1.bf16.msra.mxu0 %v2013_v10  ;;  %s2490_s6 = scalar_select %p591_p1, %s2171_s21, 1  ;;  %v2043_v30 = vld [vmem:[%s2452_s29] ss:$8 sps:$4 sm:$0xff]   ;;  %v2045_v32 = vld [vmem:[%s2452_s29 + $0xf4] ss:$8 sps:$4 sm:$0xff]   ;;  %v2189_v60 = vmov 0  }
  0x54   : > { %1305 = vmatpush1.bf16.msra.mxu1 %v2014_v11  ;;  %1193 = vmatprep.subr.bf16.mxu0 %v2015_v12  ;;  %s594_s9 = scalar_select %p593_p2, %s2480_s17, 15  ;;  %v2044_v31 = vld [vmem:[%s2452_s29 + $0x100] ss:$8 sps:$4 sm:$0xff]   ;;  %v2047_v33 = vld [vmem:[%s2452_s29 + $0x1f4] ss:$8 sps:$4 sm:$0xff]   ;;  %v2534_v61 = vrot.slane %v2189_v60, 1 }
  0x55   : > { %1306 = vmatprep.subr.bf16.mxu1 %v2017_v13  ;;  %v2049_v34 = vld [vmem:[%s2452_s29 + $0xf0] ss:$8 sps:$4 sm:$0xff]   ;;  %s1777_s12 = sshll.u32 %s2490_s6, 5  ;;  %v2051_v36 = vld [vmem:[%s2452_s29 + $0xe4] ss:$8 sps:$4 sm:$0xff]   ;;  %s2753_s26 = smov (!%p2563_p3, %s1890_s26), 15 }
  0x56   : > { %v2050_v35 = vld [vmem:[%s2452_s29 + $0x1f0] ss:$8 sps:$4 sm:$0xff]   ;;  %s1776_s11 = sshll.u32 %s594_s9, 1  ;;  %v2053_v37 = vld [vmem:[%s2452_s29 + $0x1e4] ss:$8 sps:$4 sm:$0xff]   ;;  %s2755_s26 = smov (!%p2563_p3, %s2753_s26), 15 }
  0x57   : > { %1194 = vmatpush1.bf16.msra.mxu0 %v2019_v14  ;;  %s597_s13 = sadd.s32 %s1777_s12, %s1776_s11  ;;  %v2055_v38 = vld [vmem:[%s2452_s29 + $0xe0] ss:$8 sps:$4 sm:$0xff]   ;;  %v2057_v40 = vld [vmem:[%s2452_s29 + $0xd4] ss:$8 sps:$4 sm:$0xff]   ;;  %v2061_v42 = vld [vmem:[%s2452_s29 + $0xd0] ss:$8 sps:$4 sm:$0xff]  }
  0x58   : > { %1307 = vmatpush1.bf16.msra.mxu1 %v2020_v15  ;;  %1195 = vmatprep.subr.bf16.mxu0 %v2021_v16  ;;  %v2056_v39 = vld [vmem:[%s2452_s29 + $0x1e0] ss:$8 sps:$4 sm:$0xff]   ;;  %v2059_v41 = vld [vmem:[%s2452_s29 + $0x1d4] ss:$8 sps:$4 sm:$0xff]   ;;  %s1778_s28 = sshll.u32 %s597_s13, 2  ;;  %s2596_s6 = sshll.u32 %s2167_s20, 1 }
  0x59   : > { %1308 = vmatprep.subr.bf16.mxu1 %v2023_v17  ;;  %v2062_v43 = vld [vmem:[%s2452_s29 + $0x1d0] ss:$8 sps:$4 sm:$0xff]   ;;  %v2063_v44 = vld [vmem:[%s2452_s29 + $0xc4] ss:$8 sps:$4 sm:$0xff]   ;;  %s2514_s5 = scalar_lea.vmem %s2715_s0, %s1778_s28  ;;  %vm705_vm0 = vsmask.f32 7424 }
  0x5a   : > { %v2065_v45 = vld [vmem:[%s2452_s29 + $0x1c4] ss:$8 sps:$4 sm:$0xff]   ;;  %v2067_v46 = vld [vmem:[%s2452_s29 + $0xc0] ss:$8 sps:$4 sm:$0xff]   ;;  %v2069_v48 = vld [vmem:[%s2452_s29 + $0xb4] ss:$8 sps:$4 sm:$0xff]  }
  0x5b   : > { %1196 = vmatpush1.bf16.msra.mxu0 %v2025_v18  ;;  %v2068_v47 = vld [vmem:[%s2452_s29 + $0x1c0] ss:$8 sps:$4 sm:$0xff]   ;;  %v2071_v51 = vld [vmem:[%s2452_s29 + $0x1b4] ss:$8 sps:$4 sm:$0xff]   ;;  %v2073_v54 = vld [vmem:[%s2452_s29 + $0xb0] ss:$8 sps:$4 sm:$0xff]  }
  0x5c   : > { %1309 = vmatpush1.bf16.msra.mxu1 %v2026_v19  ;;  %1197 = vmatprep.subr.bf16.mxu0 %v2027_v20  ;;  %v2521_v49 = vld [vmem:[%s2514_s5] sm:$0xff]   ;;  %v2524_v50 = vld [vmem:[%s2514_s5 + $0x8] sm:$0xff]   ;;  %v2074_v55 = vld [vmem:[%s2452_s29 + $0x1b0] ss:$8 sps:$4 sm:$0xff]   ;;  %s630_s9 = scalar_select %p627_p4, 1, 0 }
  0x5d   : > { %1310 = vmatprep.subr.bf16.mxu1 %v2029_v21  ;;  %v707_v52 = vshrl.u32 %v2521_v49, 16  ;;  %v709_v53 = vshll.u32 %v2521_v49, 16  ;;  %v719_v56 = vshrl.u32 %v2524_v50, 16  ;;  %v721_v57 = vshll.u32 %v2524_v50, 16  ;;  %v2075_v58 = vld [vmem:[%s2452_s29 + $0xa4] ss:$8 sps:$4 sm:$0xff]  }
  0x5e   : > { %v2077_v62 = vld [vmem:[%s2452_s29 + $0x1a4] ss:$8 sps:$4 sm:$0xff]   ;;  %v2538_v1 = vld [vmem:[%s2514_s5 + $0x10] sm:$0xff]   ;;  %v2079_v4 = vld [vmem:[%s2452_s29 + $0xa0] ss:$8 sps:$4 sm:$0xff]   ;;  %p620_p5 = scmp.lt.s32.totalorder %s2596_s6, 3 }
  0x5f   : > { %1198 = vmatpush1.bf16.msra.mxu0 %v2031_v22  ;;  %v711_v59 = vrot.slane %v709_v53, 1  ;;  %v723_v63 = vrot.slane %v721_v57, 1  ;;  %v2080_v5 = vld [vmem:[%s2452_s29 + $0x1a0] ss:$8 sps:$4 sm:$0xff]   ;;  %v2081_v7 = vld [vmem:[%s2452_s29 + $0x94] ss:$8 sps:$4 sm:$0xff]  }
  0x60   : > { %1311 = vmatpush1.bf16.msra.mxu1 %v2032_v23  ;;  %1199 = vmatprep.subr.bf16.mxu0 %v2033_v24  ;;  %v2083_v8 = vld [vmem:[%s2452_s29 + $0x194] ss:$8 sps:$4 sm:$0xff]   ;;  %v729_v9 = vshll.u32 %v2538_v1, 16  ;;  %v2085_v10 = vld [vmem:[%s2452_s29 + $0x90] ss:$8 sps:$4 sm:$0xff]   ;;  %v727_v14 = vshrl.u32 %v2538_v1, 16 }
  0x61   : > { %1312 = vmatprep.subr.bf16.mxu1 %v2035_v25  ;;  %v712_v0 = vor.u32 %v711_v59, %v707_v52  ;;  %v724_v2 = vor.u32 %v723_v63, %v719_v56  ;;  %v2086_v11 = vld [vmem:[%s2452_s29 + $0x190] ss:$8 sps:$4 sm:$0xff]   ;;  %v2087_v12 = vld [vmem:[%s2452_s29 + $0x84] ss:$8 sps:$4 sm:$0xff]   ;;  %v2091_v17 = vld [vmem:[%s2452_s29 + $0x80] ss:$8 sps:$4 sm:$0xff]  }
  0x62   : > { %v2089_v13 = vld [vmem:[%s2452_s29 + $0x184] ss:$8 sps:$4 sm:$0xff]   ;;  %v731_v15 = vrot.slane %v729_v9, 1  ;;  %v2096_v16 = vld [vmem:[%s2514_s5 + $0x18] sm:$0xff]   ;;  %v2092_v18 = vld [vmem:[%s2452_s29 + $0x180] ss:$8 sps:$4 sm:$0xff]  }
  0x63   : > { %1200 = vmatpush1.bf16.msra.mxu0 %v2037_v26  ;;  %v717_v3 = vsel %vm705_vm0, %v712_v0, %v2534_v61  ;;  %v725_v6 = vsel %vm705_vm0, %v724_v2, %v2534_v61  ;;  %v737_v20 = vshll.u32 %v2096_v16, 16  ;;  %v735_v22 = vshrl.u32 %v2096_v16, 16  ;;  %v2097_v24 = vld [vmem:[%s2514_s5 + $0x20] sm:$0xff]   ;;  %s1783_s29 = sshll.u32 %s2755_s26, 1  ;;  %s587_s20 = sand.u32 1, %s2147_s15  }
  0x64   : > { %1313 = vmatpush1.bf16.msra.mxu1 %v2038_v27  ;;  %1201 = vmatprep.subr.bf16.mxu0 %v2039_v28  ;;  %v732_v19 = vor.u32 %v731_v15, %v727_v14  ;;  %v745_v26 = vshll.u32 %v2097_v24, 16  ;;  %v743_v28 = vshrl.u32 %v2097_v24, 16  ;;  %s611_s17 = sadd.s32 %s1783_s29, %s1777_s12  ;;  %s1774_s27 = sshll.u32 %s587_s20, 7 }
  0x65   : > { %1314 = vmatprep.subr.bf16.mxu1 %v2041_v29  ;;  %1219 = vmatprep.mubr.bf16.mxu0 %v717_v3  ;;  %v739_v23 = vrot.slane %v737_v20, 1  ;;  %s1785_s11 = sshll.u32 %s611_s17, 2  ;;  %s2612_s15 = scalar_lea.vmem [#allocation3], %s1774_s27 }
  0x66   : > { %1332 = vmatprep.mubr.bf16.mxu1 %v725_v6  ;;  %v733_v21 = vsel %vm705_vm0, %v732_v19, %v2534_v61  ;;  %v747_v29 = vrot.slane %v745_v26, 1  ;;  %s613_s30 = scalar_lea.vmem %s2716_s1, %s1785_s11  ;;  %s1907_s29 = sshll.u32 (%p2301_p9), %s2163_s19, 6 }
  0x67   : > { %1202 = vmatpush1.bf16.msra.mxu0 %v2043_v30  ;;  %v740_v25 = vor.u32 %v739_v23, %v735_v22  ;;  %v2098_v30 = vld [vmem:[%s2514_s5 + $0x28] sm:$0xff]   ;;  %s621_s12 = scalar_select %p620_p5, %s2596_s6, 3 }
  0x68   : > { %1315 = vmatpush1.bf16.msra.mxu1 %v2044_v31  ;;  %1203 = vmatprep.subr.bf16.mxu0 %v2045_v32  ;;  %v748_v31 = vor.u32 %v747_v29, %v743_v28  ;;  %v753_v32 = vshll.u32 %v2098_v30, 16  ;;  %s1880_s17 = sshll.u32 (%p2301_p9), %s2171_s21, 7  ;;  %s1535_s10 = sadd.s32 (%p2301_p9), %s1907_s29, %s2596_s6 }
  0x69   : > { %1316 = vmatprep.subr.bf16.mxu1 %v2047_v33  ;;  %v741_v27 = vsel %vm705_vm0, %v740_v25, %v2534_v61  ;;  %s622_s26 = scalar_lea.vmem %s2718_s3, %s621_s12 }
  0x6a   : > { %v749_v33 = vsel %vm705_vm0, %v748_v31, %v2534_v61  ;;  %v855_v0 = vld [vmem:[%s622_s26] sm:$0x3] }
  0x6b   : > { %1204 = vmatpush2.bf16.msra.mxu0 %v2049_v34  ;;  %v751_v34 = vshrl.u32 %v2098_v30, 16 }
  0x6c   : > { %1317 = vmatpush2.bf16.msra.mxu1 %v2050_v35  ;;  %1205 = vmatprep.subr.bf16.mxu0 %v2051_v36  ;;  %v755_v35 = vrot.slane %v753_v32, 1  ;;  %v2099_v36 = vld [vmem:[%s2514_s5 + $0x30] sm:$0xff]  }
  0x6d   : > { %1318 = vmatprep.subr.bf16.mxu1 %v2053_v37 }
  0x6e   : > { %v756_v37 = vor.u32 %v755_v35, %v751_v34 }
  0x6f   : > { %1206 = vmatpush2.bf16.msra.mxu0 %v2055_v38  ;;  %v761_v38 = vshll.u32 %v2099_v36, 16 }
  0x70   : > { %1319 = vmatpush2.bf16.msra.mxu1 %v2056_v39  ;;  %1207 = vmatprep.subr.bf16.mxu0 %v2057_v40  ;;  %v631_v39 = vstv %s630_s9  ;;  %v757_v40 = vsel %vm705_vm0, %v756_v37, %v2534_v61  ;;  %s1537_s9 = sadd.s32 (%p2301_p9), %s1880_s17, %s1535_s10 }
  0x71   : > { %1320 = vmatprep.subr.bf16.mxu1 %v2059_v41  ;;  %v759_v41 = vshrl.u32 %v2099_v36, 16  ;;  %vm632_vm1 = vcmp.eq.s32.totalorder %v631_v39, 1  ;;  %s1881_s11 = sshll.u32 (%p2301_p9), %s1537_s9, 2 }
  0x72   : > { %s1539_s13 = scalar_lea.vmem (%p2301_p9), %s2719_s4, %s1881_s11 }
  0x73   : > { %1208 = vmatpush2.bf16.msra.mxu0 %v2061_v42  ;;  %v763_v42 = vrot.slane %v761_v38, 1 }
  0x74   : > { %1321 = vmatpush2.bf16.msra.mxu1 %v2062_v43  ;;  %1209 = vmatprep.subr.bf16.mxu0 %v2063_v44  ;;  %v2100_v43 = vld [vmem:[%s2514_s5 + $0x38] sm:$0xff]   ;;  %v628_v44 = vld [vmem:[%s613_s30] sm:$0xf] }
  0x75   : > { %1322 = vmatprep.subr.bf16.mxu1 %v2065_v45  ;;  %v629_v45 = vld [vmem:[%s613_s30 + $0x4] sm:$0xf] }
  0x77   : > { %1210 = vmatpush2.bf16.msra.mxu0 %v2067_v46  ;;  %v764_v46 = vor.u32 %v763_v42, %v759_v41 }
  0x78   : > { %1323 = vmatpush2.bf16.msra.mxu1 %v2068_v47  ;;  %1211 = vmatprep.subr.bf16.mxu0 %v2069_v48  ;;  %v769_v47 = vshll.u32 %v2100_v43, 16  ;;  %v633_v48 = vsel %vm632_vm1, 0, %v628_v44 }
  0x79   : > { %1324 = vmatprep.subr.bf16.mxu1 %v2071_v51  ;;  %v767_v51 = vshrl.u32 %v2100_v43, 16 }
  0x7a   : > { %v771_v52 = vrot.slane %v769_v47, 1 }
  0x7b   : > { %1212 = vmatpush2.bf16.msra.mxu0 %v2073_v54 }
  0x7c   : > { %1325 = vmatpush2.bf16.msra.mxu1 %v2074_v55  ;;  %1213 = vmatprep.subr.bf16.mxu0 %v2075_v58  ;;  %v772_v54 = vor.u32 %v771_v52, %v767_v51 }
  0x7d   : > { %1326 = vmatprep.subr.bf16.mxu1 %v2077_v62  ;;  %v857_v62 = vlaneseq }
  0x7e   : > { %v773_v56 = vsel %vm705_vm0, %v772_v54, %v2534_v61 }
  0x7f   : > { %1214 = vmatpush2.bf16.msra.mxu0 %v2079_v4  ;;  %v858_v63 = vshrl.u32 %v857_v62, 7 }
  0x80   : > { %1327 = vmatpush2.bf16.msra.mxu1 %v2080_v5  ;;  %1215 = vmatprep.subr.bf16.mxu0 %v2081_v7 }
  0x81   : > { %1328 = vmatprep.subr.bf16.mxu1 %v2083_v8 }
  0x83   : > { %1216 = vmatpush2.bf16.msra.mxu0 %v2085_v10 }
  0x84   : > { %1329 = vmatpush2.bf16.msra.mxu1 %v2086_v11  ;;  %1217 = vmatprep.subr.bf16.mxu0 %v2087_v12 }
  0x85   : > { %1330 = vmatprep.subr.bf16.mxu1 %v2089_v13 }
  0x87   : > { %1218 = vmatpush2.bf16.msra.mxu0 %v2091_v17 }
  0x88   : > { %1331 = vmatpush2.bf16.msra.mxu1 %v2092_v18 }
  0x8a   : > { %1220 = vmatmul.mubr.bf16.vlgmr.msra.gmra.mxu0 %v2521_v49  ;;  %v634_v49 = vsel %vm632_vm1, 0, %v629_v45 }
  0x8b   : > { %1333 = vmatmul.mubr.bf16.vlgmr.msra.gmra.mxu1 %v2524_v50  ;;  %1229 = vmatprep.mubr.bf16.mxu0 %v725_v6  ;;  %v1795_v53 = vcombine.low %v633_v48, %v634_v49 }
  0x8c   : > { %1342 = vmatprep.mubr.bf16.mxu1 %v733_v21 }
  0x8d   : > { %v785_v55 = vshll.u32 %v1795_v53, 16  ;;  %v783_v57 = vshrl.u32 %v1795_v53, 16 }
  0x8f   : > { %v787_v58 = vrot.slane %v785_v55, 1 }
  0x91   : > { %v788_v59 = vor.u32 %v787_v58, %v783_v57 }
  0x92   : > { %1230 = vmatmul.mubr.bf16.gmra.mxu0 %v2524_v50  ;;  %v765_v50 = vsel %vm705_vm0, %v764_v46, %v2534_v61 }
  0x93   : > { %1343 = vmatmul.mubr.bf16.gmra.mxu1 %v2538_v1  ;;  %1239 = vmatprep.mubr.bf16.mxu0 %v733_v21  ;;  %v789_v60 = vsel %vm705_vm0, %v788_v59, %v2534_v61  ;;  %v859_v61 = vsub.s32 0, %v858_v63 }
  0x94   : > { %1352 = vmatprep.mubr.bf16.mxu1 %v741_v27 }
  0x95   : > { %v2603_v2 = vrot.slane %v855_v0, %v859_v61 }
  0x9a   : > { %1240 = vmatmul.mubr.bf16.gmra.mxu0 %v2538_v1  ;;  %v863_v1 = vsub.s32 1, %v858_v63 }
  0x9b   : > { %1353 = vmatmul.mubr.bf16.gmra.mxu1 %v2096_v16  ;;  %1249 = vmatprep.mubr.bf16.mxu0 %v741_v27 }
  0x9c   : > { %1362 = vmatprep.mubr.bf16.mxu1 %v749_v33  ;;  %v2605_v3 = vrot.slane %v855_v0, %v863_v1 }
  0xa2   : > { %1250 = vmatmul.mubr.bf16.gmra.mxu0 %v2096_v16 }
  0xa3   : > { %1363 = vmatmul.mubr.bf16.gmra.mxu1 %v2097_v24  ;;  %1259 = vmatprep.mubr.bf16.mxu0 %v749_v33 }
  0xa4   : > { %1372 = vmatprep.mubr.bf16.mxu1 %v757_v40 }
  0xaa   : > { %1260 = vmatmul.mubr.bf16.gmra.mxu0 %v2097_v24 }
  0xab   : > { %1373 = vmatmul.mubr.bf16.gmra.mxu1 %v2098_v30  ;;  %1269 = vmatprep.mubr.bf16.mxu0 %v757_v40 }
  0xac   : > { %1382 = vmatprep.mubr.bf16.mxu1 %v765_v50 }
  0xb2   : > { %1270 = vmatmul.mubr.bf16.gmra.mxu0 %v2098_v30 }
  0xb3   : > { %1383 = vmatmul.mubr.bf16.gmra.mxu1 %v2099_v36  ;;  %1279 = vmatprep.mubr.bf16.mxu0 %v765_v50 }
  0xb4   : > { %1392 = vmatprep.mubr.bf16.mxu1 %v773_v56 }
  0xba   : > { %1280 = vmatmul.mubr.bf16.gmra.mxu0 %v2099_v36 }
  0xbb   : > { %1393 = vmatmul.mubr.bf16.gmra.mxu1 %v2100_v43  ;;  %1289 = vmatprep.mubr.bf16.mxu0 %v773_v56 }
  0xbc   : > { %1402 = vmatprep.mubr.bf16.mxu1 %v789_v60 }
  0xc2   : > { %1290 = vmatmul.mubr.bf16.gmra.mxu0 %v2100_v43 }
  0xc3   : > { %1403 = vmatmul.mubr.bf16.gmra.mxu1 %v1795_v53 }
 0x14a   : > { %v1221_v4 = vpop.f32.mrf.mxu0 }
 0x14b   : > { %v1334_v5 = vpop.f32.mrf.mxu1  ;;  %v1222_v6 = vadd.f32 %v1221_v4, %v2603_v2 }
 0x14c   : > { %v1223_v7 = vpop.f32.mrf.mxu0 }
 0x14d   : > { %v1336_v8 = vpop.f32.mrf.mxu1  ;;  %v1224_v9 = vadd.f32 %v1223_v7, %v2605_v3  ;;  %v1335_v12 = vadd.f32 %v1334_v5, %v1222_v6 }
 0x14e   : > { %v1225_v10 = vpop.f32.mrf.mxu0 }
 0x14f   : > { %v1338_v11 = vpop.f32.mrf.mxu1  ;;  %v1337_v13 = vadd.f32 %v1336_v8, %v1224_v9  ;;  %v1226_v14 = vadd.f32 %v1225_v10, %v2603_v2 }
 0x150   : > { %v1227_v15 = vpop.f32.mrf.mxu0 }
 0x151   : > { %v1340_v16 = vpop.f32.mrf.mxu1  ;;  %v1891_v17 = vpack.c.bf16 %v1337_v13, %v1335_v12  ;;  %v1228_v18 = vadd.f32 %v1227_v15, %v2605_v3  ;;  %v1339_v21 = vadd.f32 %v1338_v11, %v1226_v14 }
 0x152   : > { %v1231_v19 = vpop.f32.mrf.mxu0 }
 0x153   : > { %v1344_v20 = vpop.f32.mrf.mxu1  ;;  %1509 = vst [vmem:[%s2612_s15] sm:$0xff] %v1891_v17  ;;  %v1341_v22 = vadd.f32 %v1340_v16, %v1228_v18  ;;  %v1232_v23 = vadd.f32 %v1231_v19, %v2603_v2 }
 0x154   : > { %v1233_v24 = vpop.f32.mrf.mxu0 }
 0x155   : > { %v1346_v25 = vpop.f32.mrf.mxu1  ;;  %v1892_v26 = vpack.c.bf16 %v1341_v22, %v1339_v21  ;;  %v1234_v27 = vadd.f32 %v1233_v24, %v2605_v3  ;;  %v1345_v30 = vadd.f32 %v1344_v20, %v1232_v23 }
 0x156   : > { %v1235_v28 = vpop.f32.mrf.mxu0 }
 0x157   : > { %v1348_v29 = vpop.f32.mrf.mxu1  ;;  %1510 = vst [vmem:[%s2612_s15 + $0x8] sm:$0xff] %v1892_v26  ;;  %v1347_v31 = vadd.f32 %v1346_v25, %v1234_v27  ;;  %v1236_v32 = vadd.f32 %v1235_v28, %v2603_v2 }
 0x158   : > { %v1237_v33 = vpop.f32.mrf.mxu0 }
 0x159   : > { %v1350_v34 = vpop.f32.mrf.mxu1  ;;  %v1893_v35 = vpack.c.bf16 %v1347_v31, %v1345_v30  ;;  %v1238_v36 = vadd.f32 %v1237_v33, %v2605_v3  ;;  %v1349_v39 = vadd.f32 %v1348_v29, %v1236_v32 }
 0x15a   : > { %v1241_v37 = vpop.f32.mrf.mxu0 }
 0x15b   : > { %v1354_v38 = vpop.f32.mrf.mxu1  ;;  %1511 = vst [vmem:[%s2612_s15 + $0x10] sm:$0xff] %v1893_v35  ;;  %v1351_v40 = vadd.f32 %v1350_v34, %v1238_v36  ;;  %v1242_v41 = vadd.f32 %v1241_v37, %v2603_v2 }
 0x15c   : > { %v1243_v42 = vpop.f32.mrf.mxu0 }
 0x15d   : > { %v1356_v43 = vpop.f32.mrf.mxu1  ;;  %v1894_v44 = vpack.c.bf16 %v1351_v40, %v1349_v39  ;;  %v1244_v45 = vadd.f32 %v1243_v42, %v2605_v3  ;;  %v1355_v48 = vadd.f32 %v1354_v38, %v1242_v41 }
 0x15e   : > { %v1245_v46 = vpop.f32.mrf.mxu0 }
 0x15f   : > { %v1358_v47 = vpop.f32.mrf.mxu1  ;;  %1512 = vst [vmem:[%s2612_s15 + $0x18] sm:$0xff] %v1894_v44  ;;  %v1357_v49 = vadd.f32 %v1356_v43, %v1244_v45  ;;  %v1246_v50 = vadd.f32 %v1245_v46, %v2603_v2 }
 0x160   : > { %v1247_v51 = vpop.f32.mrf.mxu0 }
 0x161   : > { %v1360_v52 = vpop.f32.mrf.mxu1  ;;  %v1895_v53 = vpack.c.bf16 %v1357_v49, %v1355_v48  ;;  %v1248_v54 = vadd.f32 %v1247_v51, %v2605_v3  ;;  %v1359_v57 = vadd.f32 %v1358_v47, %v1246_v50 }
 0x162   : > { %v1251_v55 = vpop.f32.mrf.mxu0 }
 0x163   : > { %v1364_v56 = vpop.f32.mrf.mxu1  ;;  %1513 = vst [vmem:[%s2612_s15 + $0x20] sm:$0xff] %v1895_v53  ;;  %v1361_v58 = vadd.f32 %v1360_v52, %v1248_v54  ;;  %v1252_v59 = vadd.f32 %v1251_v55, %v2603_v2 }
 0x164   : > { %v1253_v60 = vpop.f32.mrf.mxu0 }
 0x165   : > { %v1366_v62 = vpop.f32.mrf.mxu1  ;;  %v1896_v63 = vpack.c.bf16 %v1361_v58, %v1359_v57  ;;  %v1254_v61 = vadd.f32 %v1253_v60, %v2605_v3  ;;  %v1365_v4 = vadd.f32 %v1364_v56, %v1252_v59 }
 0x166   : > { %v1255_v0 = vpop.f32.mrf.mxu0 }
 0x167   : > { %v1368_v1 = vpop.f32.mrf.mxu1  ;;  %1514 = vst [vmem:[%s2612_s15 + $0x28] sm:$0xff] %v1896_v63  ;;  %v1367_v5 = vadd.f32 %v1366_v62, %v1254_v61  ;;  %v1256_v6 = vadd.f32 %v1255_v0, %v2603_v2 }
 0x168   : > { %v1257_v7 = vpop.f32.mrf.mxu0 }
 0x169   : > { %v1370_v8 = vpop.f32.mrf.mxu1  ;;  %v1897_v9 = vpack.c.bf16 %v1367_v5, %v1365_v4  ;;  %v1258_v10 = vadd.f32 %v1257_v7, %v2605_v3  ;;  %v1369_v13 = vadd.f32 %v1368_v1, %v1256_v6 }
 0x16a   : > { %v1261_v11 = vpop.f32.mrf.mxu0 }
 0x16b   : > { %v1374_v12 = vpop.f32.mrf.mxu1  ;;  %1515 = vst [vmem:[%s2612_s15 + $0x30] sm:$0xff] %v1897_v9  ;;  %v1371_v14 = vadd.f32 %v1370_v8, %v1258_v10  ;;  %v1262_v15 = vadd.f32 %v1261_v11, %v2603_v2 }
 0x16c   : > { %v1263_v16 = vpop.f32.mrf.mxu0 }
 0x16d   : > { %v1376_v17 = vpop.f32.mrf.mxu1  ;;  %v1898_v18 = vpack.c.bf16 %v1371_v14, %v1369_v13  ;;  %v1264_v19 = vadd.f32 %v1263_v16, %v2605_v3  ;;  %v1375_v22 = vadd.f32 %v1374_v12, %v1262_v15 }
 0x16e   : > { %v1265_v20 = vpop.f32.mrf.mxu0 }
 0x16f   : > { %v1378_v21 = vpop.f32.mrf.mxu1  ;;  %1516 = vst [vmem:[%s2612_s15 + $0x38] sm:$0xff] %v1898_v18  ;;  %v1377_v23 = vadd.f32 %v1376_v17, %v1264_v19  ;;  %v1266_v24 = vadd.f32 %v1265_v20, %v2603_v2 }
 0x170   : > { %v1267_v25 = vpop.f32.mrf.mxu0 }
 0x171   : > { %v1380_v26 = vpop.f32.mrf.mxu1  ;;  %v1899_v27 = vpack.c.bf16 %v1377_v23, %v1375_v22  ;;  %v1268_v28 = vadd.f32 %v1267_v25, %v2605_v3  ;;  %v1379_v31 = vadd.f32 %v1378_v21, %v1266_v24  ;;  %v1602_v24 = vld [vmem:[%s2612_s15 + $0x10] sm:$0xff] (%p2301_p9)  ;;  %v1604_v25 = vld [vmem:[%s2612_s15 + $0x18] sm:$0xff] (%p2301_p9) }
 0x172   : > { %v1271_v29 = vpop.f32.mrf.mxu0  ;;  %1603 = vst [vmem:[%s1539_s13 + $0x20] sm:$0xff] (%p2301_p9), %v1602_v24  ;;  %1605 = vst [vmem:[%s1539_s13 + $0x30] sm:$0xff] (%p2301_p9), %v1604_v25 }
 0x173   : > { %v1384_v30 = vpop.f32.mrf.mxu1  ;;  %1517 = vst [vmem:[%s2612_s15 + $0x40] sm:$0xff] %v1899_v27  ;;  %v1381_v32 = vadd.f32 %v1380_v26, %v1268_v28  ;;  %v1272_v33 = vadd.f32 %v1271_v29, %v2603_v2  ;;  %v1606_v26 = vld [vmem:[%s2612_s15 + $0x20] sm:$0xff] (%p2301_p9)  ;;  %v1608_v27 = vld [vmem:[%s2612_s15 + $0x28] sm:$0xff] (%p2301_p9)  ;;  %v1610_v28 = vld [vmem:[%s2612_s15 + $0x30] sm:$0xff] (%p2301_p9) }
 0x174   : > { %v1273_v34 = vpop.f32.mrf.mxu0  ;;  %1607 = vst [vmem:[%s1539_s13 + $0x40] sm:$0xff] (%p2301_p9), %v1606_v26  ;;  %1609 = vst [vmem:[%s1539_s13 + $0x50] sm:$0xff] (%p2301_p9), %v1608_v27 }
 0x175   : > { %v1386_v35 = vpop.f32.mrf.mxu1  ;;  %v1900_v36 = vpack.c.bf16 %v1381_v32, %v1379_v31  ;;  %v1274_v37 = vadd.f32 %v1273_v34, %v2605_v3  ;;  %v1385_v40 = vadd.f32 %v1384_v30, %v1272_v33  ;;  %1611 = vst [vmem:[%s1539_s13 + $0x60] sm:$0xff] (%p2301_p9), %v1610_v28 }
 0x176   : > { %v1275_v38 = vpop.f32.mrf.mxu0  ;;  %v1612_v29 = vld [vmem:[%s2612_s15 + $0x38] sm:$0xff] (%p2301_p9) }
 0x177   : > { %v1388_v39 = vpop.f32.mrf.mxu1  ;;  %1518 = vst [vmem:[%s2612_s15 + $0x48] sm:$0xff] %v1900_v36  ;;  %v1387_v41 = vadd.f32 %v1386_v35, %v1274_v37  ;;  %v1276_v42 = vadd.f32 %v1275_v38, %v2603_v2  ;;  %1613 = vst [vmem:[%s1539_s13 + $0x70] sm:$0xff] (%p2301_p9), %v1612_v29 }
 0x178   : > { %v1277_v43 = vpop.f32.mrf.mxu0 }
 0x179   : > { %v1390_v44 = vpop.f32.mrf.mxu1  ;;  %v1901_v45 = vpack.c.bf16 %v1387_v41, %v1385_v40  ;;  %v1278_v46 = vadd.f32 %v1277_v43, %v2605_v3  ;;  %v1389_v49 = vadd.f32 %v1388_v39, %v1276_v42 }
 0x17a   : > { %v1281_v47 = vpop.f32.mrf.mxu0  ;;  %v1614_v30 = vld [vmem:[%s2612_s15 + $0x40] sm:$0xff] (%p2301_p9) }
 0x17b   : > { %v1394_v48 = vpop.f32.mrf.mxu1  ;;  %1519 = vst [vmem:[%s2612_s15 + $0x50] sm:$0xff] %v1901_v45  ;;  %v1391_v50 = vadd.f32 %v1390_v44, %v1278_v46  ;;  %v1282_v51 = vadd.f32 %v1281_v47, %v2603_v2  ;;  %1615 = vst [vmem:[%s1539_s13 + $0x80] sm:$0xff] (%p2301_p9), %v1614_v30 }
 0x17c   : > { %v1283_v52 = vpop.f32.mrf.mxu0 }
 0x17d   : > { %v1396_v53 = vpop.f32.mrf.mxu1  ;;  %v1902_v54 = vpack.c.bf16 %v1391_v50, %v1389_v49  ;;  %v1284_v55 = vadd.f32 %v1283_v52, %v2605_v3  ;;  %v1395_v58 = vadd.f32 %v1394_v48, %v1282_v51 }
 0x17e   : > { %v1285_v56 = vpop.f32.mrf.mxu0  ;;  %v1616_v31 = vld [vmem:[%s2612_s15 + $0x48] sm:$0xff] (%p2301_p9) }
 0x17f   : > { %v1398_v57 = vpop.f32.mrf.mxu1  ;;  %1520 = vst [vmem:[%s2612_s15 + $0x58] sm:$0xff] %v1902_v54  ;;  %v1397_v59 = vadd.f32 %v1396_v53, %v1284_v55  ;;  %v1286_v60 = vadd.f32 %v1285_v56, %v2603_v2  ;;  %1617 = vst [vmem:[%s1539_s13 + $0x90] sm:$0xff] (%p2301_p9), %v1616_v31 }
 0x180   : > { %v1287_v62 = vpop.f32.mrf.mxu0 }
 0x181   : > { %v1400_v63 = vpop.f32.mrf.mxu1  ;;  %v1903_v61 = vpack.c.bf16 %v1397_v59, %v1395_v58  ;;  %v1288_v0 = vadd.f32 %v1287_v62, %v2605_v3  ;;  %v1399_v5 = vadd.f32 %v1398_v57, %v1286_v60 }
 0x182   : > { %v1291_v1 = vpop.f32.mrf.mxu0  ;;  %v1618_v32 = vld [vmem:[%s2612_s15 + $0x50] sm:$0xff] (%p2301_p9) }
 0x183   : > { %v1404_v4 = vpop.f32.mrf.mxu1  ;;  %1521 = vst [vmem:[%s2612_s15 + $0x60] sm:$0xff] %v1903_v61  ;;  %v1401_v6 = vadd.f32 %v1400_v63, %v1288_v0  ;;  %v1292_v7 = vadd.f32 %v1291_v1, %v2603_v2  ;;  %1619 = vst [vmem:[%s1539_s13 + $0xa0] sm:$0xff] (%p2301_p9), %v1618_v32 }
 0x184   : > { %v1293_v8 = vpop.f32.mrf.mxu0 }
 0x185   : > { %v1406_v9 = vpop.f32.mrf.mxu1  ;;  %v1904_v10 = vpack.c.bf16 %v1401_v6, %v1399_v5  ;;  %v1294_v11 = vadd.f32 %v1293_v8, %v2605_v3  ;;  %v1405_v14 = vadd.f32 %v1404_v4, %v1292_v7 }
 0x186   : > { %v1295_v12 = vpop.f32.mrf.mxu0  ;;  %v1620_v33 = vld [vmem:[%s2612_s15 + $0x58] sm:$0xff] (%p2301_p9) }
 0x187   : > { %v1408_v13 = vpop.f32.mrf.mxu1  ;;  %1522 = vst [vmem:[%s2612_s15 + $0x68] sm:$0xff] %v1904_v10  ;;  %v1407_v15 = vadd.f32 %v1406_v9, %v1294_v11  ;;  %v1296_v16 = vadd.f32 %v1295_v12, %v2603_v2  ;;  %v1598_v2 = vld [vmem:[%s2612_s15] sm:$0xff] (%p2301_p9)  ;;  %1621 = vst [vmem:[%s1539_s13 + $0xb0] sm:$0xff] (%p2301_p9), %v1620_v33 }
 0x188   : > { %v1297_v17 = vpop.f32.mrf.mxu0  ;;  %1599 = vst [vmem:[%s1539_s13] sm:$0xff] (%p2301_p9), %v1598_v2 }
 0x189   : > { %v1905_v18 = vpack.c.bf16 %v1407_v15, %v1405_v14  ;;  %v1298_v19 = vadd.f32 %v1297_v17, %v2605_v3  ;;  %v1410_v20 = vpop.f32.mrf.mxu1  ;;  %v1409_v21 = vadd.f32 %v1408_v13, %v1296_v16  ;;  %v1600_v3 = vld [vmem:[%s2612_s15 + $0x8] sm:$0xff] (%p2301_p9) }
 0x18a   : > { %v1622_v34 = vld [vmem:[%s2612_s15 + $0x60] sm:$0xff] (%p2301_p9)  ;;  %1601 = vst [vmem:[%s1539_s13 + $0x10] sm:$0xff] (%p2301_p9), %v1600_v3 }
 0x18b   : > { %1523 = vst [vmem:[%s2612_s15 + $0x70] sm:$0xff] %v1905_v18  ;;  %v1411_v22 = vadd.f32 %v1410_v20, %v1298_v19  ;;  %1531 = sbr.rel (!%p2301_p9) target bundleno = 408 (0x198), region = 78  ;;  %1623 = vst [vmem:[%s1539_s13 + $0xc0] sm:$0xff] (%p2301_p9), %v1622_v34 }
 0x18d   : > { %v1906_v23 = vpack.c.bf16 %v1411_v22, %v1409_v21 }
 0x18e   : > { %v1624_v35 = vld [vmem:[%s2612_s15 + $0x68] sm:$0xff] (%p2301_p9) }
 0x18f   : > { %1524 = vst [vmem:[%s2612_s15 + $0x78] sm:$0xff] %v1906_v23  ;;  %1625 = vst [vmem:[%s1539_s13 + $0xd0] sm:$0xff] (%p2301_p9), %v1624_v35 }
 0x192   : > { %v1626_v36 = vld [vmem:[%s2612_s15 + $0x70] sm:$0xff] }
 0x193   : > { %1627 = vst [vmem:[%s1539_s13 + $0xe0] sm:$0xff] %v1626_v36 }
 0x196   : > { %v1628_v37 = vld [vmem:[%s2612_s15 + $0x78] sm:$0xff] }
 0x197   : > { %1629 = vst [vmem:[%s1539_s13 + $0xf0] sm:$0xff] %v1628_v37 }
 0x198 PF: > { %s14_s25 = sadd.s32 1, %s2187_s25   ;;  %s2729_s28 = sld [smem:[#allocation4_spill]] }
 0x199   : > { %p11_p6 = scmp.ge.s32.totalorder %s14_s25, 10   ;;  %s2730_s30 = sld [smem:[#allocation5_spill]] }
 0x19a   : > { %s2731_s6 = sld [smem:[#allocation6_spill]]  ;;  %s2732_s15 = smov %s2151_s16 }
 0x19b   : > { %s2733_s16 = smov %s2307_s14  ;;  %s2734_s17 = smov %s2159_s18 }
 0x19c   : > { %s2735_s18 = smov %s2297_s8  ;;  %s2736_s19 = smov %s2175_s22 }
 0x19d   : > { %s2737_s20 = smov %s2179_s23  ;;  %s2738_s21 = smov %s2183_s24 }
 0x19e   : > { %s2739_s22 = smov %s2729_s28  ;;  %13 = sbr.rel (!%p11_p6) target bundleno = 6 (0x6), region = 156 }
 0x19f   : > { %s2740_s23 = smov %s2730_s30 }
 0x1a0   : > { %s2741_s24 = smov %s2731_s6 }

// kernel: _lambda_.5
= control target key start
LH: loop header
LB: loop body
LE: loop exit
PB: predicated region body
PF: predicated region fallthrough
CT: control target
= control target key end

     0   :  { %s4172_s24 = smov 0   ;;  %s4174_s25 = smov 0   ;;  %s5548_s0 = inlined_call_operand.vmem [shape: bf16[2,32,32,128], index: 0, kind: input, shape index: {}, may-alias: {0,1,2}]   ;;  %s5549_s1 = inlined_call_operand.vmem [shape: bf16[2,32,32,128], index: 1, kind: input, shape index: {}, may-alias: {0,1,2}]   ;;  %s5550_s2 = inlined_call_operand.vmem [shape: bf16[2,32,32,128], index: 2, kind: input, shape index: {}, may-alias: {0,1,2}]   ;;  %s5551_s3 = inlined_call_operand.vmem [shape: bf16[3,384,128], index: 3, kind: input, shape index: {}]   ;;  %s5552_s4 = inlined_call_operand.vmem [shape: f32[1,128], index: 4, kind: input, shape index: {}]   ;;  %s5553_s5 = inlined_call_operand.vmem [shape: f32[1,128], index: 5, kind: input, shape index: {}]   ;;  %s5554_s6 = inlined_call_operand.vmem [shape: f32[1,128], index: 6, kind: input, shape index: {}]   ;;  %s5555_s7 = inlined_call_operand.vmem [shape: f32[2,32,32,128], index: 7, kind: output, shape index: {}]  }
   0x1   :  { %s4176_s26 = smov 0   ;;  %s4178_s27 = smov 0  }
   0x2   :  { %s4180_s28 = smov 0  }
   0x3 LB: > { %s29_s29 = sadd.s32 1, %s4122_s26  ;;  %s36_s30 = sadd.s32 1, %s4126_s27  ;;  %s4130_s28 = sphi %s4180_s28, %s17_s28   ;;  %s4126_s27 = sphi %s4178_s27, %s5618_s27   ;;  %s4122_s26 = sphi %s4176_s26, %s5617_s26   ;;  %s4118_s25 = sphi %s4174_s25, %s5616_s25   ;;  %s4114_s24 = sphi %s4172_s24, %s5615_s24  }
   0x4   : > { %p30_p0 = scmp.ge.s32.totalorder %s29_s29, 4  ;;  %p3169_p1 = scmp.ge.s32.totalorder %s4130_s28, 1 }
   0x5   : > { %p365_p2 = scmp.lt.s32.totalorder %s4130_s28, 9 }
   0x6   : > { %s5620_s29 = smov (%p30_p0, %s29_s29), 0  ;;  %s5622_s30 = smov (!%p30_p0, %s36_s30), %s4126_s27 }
   0x7   : > { %p366_p3 = pnand %p3169_p1, %p365_p2  ;;  %p38_p4 = scmp.ge.s32.totalorder %s5622_s30, 2 }
   0x9   : > { %s5624_s30 = smov (%p38_p4, %s5622_s30), 0  ;;  %369 = sbr.rel (%p366_p3) target bundleno = 541 (0x21d), region = 48 }
   0xe   : > { %v4004_v0 = vld [vmem:[%s5551_s3 + $0x138] sm:$0xff]   ;;  %s4208_s10 = sshll.u32 %s4114_s24, 3  ;;  %p450_p5 = scmp.lt.s32.totalorder %s4118_s25, 1  ;;  %v4006_v2 = vld [vmem:[%s5551_s3 + $0x130] sm:$0xff]   ;;  %v4008_v4 = vld [vmem:[%s5551_s3 + $0x128] sm:$0xff]   ;;  %vm859_vm0 = vcmask 1040384  }
   0xf   : > { %v4005_v1 = vld [vmem:[%s5551_s3 + $0xf8] sm:$0xff]   ;;  %3396 = vmatprep.subr.bf16.mxu0 %v4004_v0  ;;  %3948 = vmatprep.subr.bf16.mxu1 %v4004_v0  ;;  %p452_p6 = scmp.lt.s32.totalorder %s4208_s10, 31  ;;  %v4007_v3 = vld [vmem:[%s5551_s3 + $0xf0] sm:$0xff]   ;;  %v4009_v5 = vld [vmem:[%s5551_s3 + $0xe8] sm:$0xff]   ;;  %vm678_vm1 = vsmask.f32 256 }
  0x10   : > { %3397 = vmatpush3.bf16.msra.mxu0 %v4005_v1  ;;  %3956 = vmatpush3.bf16.msra.mxu1 %v4005_v1  ;;  %s5626_s25 = smov (!%p450_p5, %s4118_s25), 1  ;;  %v4010_v6 = vld [vmem:[%s5551_s3 + $0x120] sm:$0xff]   ;;  %v4012_v8 = vld [vmem:[%s5551_s3 + $0x118] sm:$0xff]   ;;  %v4014_v10 = vld [vmem:[%s5551_s3 + $0x110] sm:$0xff]   ;;  %vm881_vm3 = vsmask.f32 7424 }
  0x11   : > { %3398 = vmatprep.subr.bf16.mxu0 %v4006_v2  ;;  %3949 = vmatprep.subr.bf16.mxu1 %v4006_v2  ;;  %s453_s19 = scalar_select %p452_p6, %s4208_s10, 31  ;;  %v4011_v7 = vld [vmem:[%s5551_s3 + $0xe0] sm:$0xff]   ;;  %v4013_v9 = vld [vmem:[%s5551_s3 + $0xd8] sm:$0xff]   ;;  %v4015_v11 = vld [vmem:[%s5551_s3 + $0xd0] sm:$0xff]   ;;  %vm1122_vm4 = vcmask 1046528  }
  0x12   : > { %s4224_s20 = sshll.u32 %s5626_s25, 7  ;;  %v4016_v14 = vld [vmem:[%s5551_s3 + $0x108] sm:$0xff]   ;;  %vm4268_vm2 = vmand %vm859_vm0, %vm678_vm1  ;;  %v4018_v31 = vld [vmem:[%s5551_s3 + $0x100] sm:$0xff]   ;;  %p522_p9 = scmp.eq.s32.totalorder %s4114_s24, 0 }
  0x13   : > { %s3171_s21 = sshll.u32 %s453_s19, 2  ;;  %v4017_v23 = vld [vmem:[%s5551_s3 + $0xc8] sm:$0xff]   ;;  %v4019_v35 = vld [vmem:[%s5551_s3 + $0xc0] sm:$0xff]   ;;  %v4024_v43 = vld [vmem:[%s5551_s3 + $0x178] sm:$0xff]   ;;  %p534_p11 = scmp.eq.s32.totalorder %s4114_s24, 3 }
  0x14   : > { %3399 = vmatpush3.bf16.msra.mxu0 %v4007_v3  ;;  %3957 = vmatpush3.bf16.msra.mxu1 %v4007_v3  ;;  %s4233_s11 = sadd.s32 %s4224_s20, %s3171_s21  ;;  %v4025_v45 = vld [vmem:[%s5551_s3 + $0xb8] sm:$0xff]   ;;  %v4029_v61 = vld [vmem:[%s5551_s3 + $0xb0] sm:$0xff]  }
  0x15   : > { %3400 = vmatprep.subr.bf16.mxu0 %v4008_v4  ;;  %3950 = vmatprep.subr.bf16.mxu1 %v4008_v4  ;;  %s3173_s13 = sshll.u32 %s4233_s11, 2 }
  0x16   : > { %s4248_s21 = scalar_lea.vmem %s5548_s0, %s3173_s13  ;;  %s4419_s13 = sadd.s32 4294967295, %s4208_s10 }
  0x17   : > { %v4020_v12 = vld [vmem:[%s4248_s21] sm:$0xff]   ;;  %v4021_v13 = vld [vmem:[%s4248_s21 + $0x8] sm:$0xff]   ;;  %v4030_v2 = vld [vmem:[%s4248_s21 + $0x10] sm:$0xff]   ;;  %p462_p7 = scmp.gt.s32.totalorder %s4419_s13, 0  ;;  %p3176_p8 = scmp.lt.s32.totalorder %s4419_s13, 31 }
  0x18   : > { %3401 = vmatpush3.bf16.msra.mxu0 %v4009_v5  ;;  %3958 = vmatpush3.bf16.msra.mxu1 %v4009_v5  ;;  %v695_v15 = vshrl.u32 %v4020_v12, 16  ;;  %v698_v16 = vshll.u32 %v4020_v12, 16  ;;  %v702_v17 = vshrl.u32 %v4021_v13, 16  ;;  %v705_v18 = vshll.u32 %v4021_v13, 16  ;;  %v4022_v19 = vld [vmem:[%s4248_s21 + $0x60] sm:$0xff]   ;;  %v4023_v20 = vld [vmem:[%s4248_s21 + $0x68] sm:$0xff]  }
  0x19   : > { %3402 = vmatprep.subr.bf16.mxu0 %v4010_v6  ;;  %3951 = vmatprep.subr.bf16.mxu1 %v4010_v6  ;;  %v785_v25 = vshrl.u32 %v4022_v19, 16  ;;  %v788_v26 = vshll.u32 %v4022_v19, 16  ;;  %v792_v27 = vshrl.u32 %v4023_v20, 16  ;;  %v795_v28 = vshll.u32 %v4023_v20, 16  ;;  %v4031_v3 = vld [vmem:[%s4248_s21 + $0x18] sm:$0xff]   ;;  %v4026_v12 = vld [vmem:[%s5551_s3 + $0x170] sm:$0xff]  }
  0x1a   : > { %v697_v21 = vrot.slane %v695_v15, 7  ;;  %v704_v22 = vrot.slane %v702_v17, 7  ;;  %v710_v6 = vshrl.u32 %v4030_v2, 16  ;;  %v720_v13 = vshll.u32 %v4031_v3, 16  ;;  %s463_s8 = scalar_select %p462_p7, %s4419_s13, 0 }
  0x1b   : > { %v787_v32 = vrot.slane %v785_v25, 7  ;;  %v794_v33 = vrot.slane %v792_v27, 7  ;;  %s527_s18 = scalar_select %p522_p9, 1, 0 }
  0x1c   : > { %3403 = vmatpush3.bf16.msra.mxu0 %v4011_v7  ;;  %3959 = vmatpush3.bf16.msra.mxu1 %v4011_v7  ;;  %v700_v29 = vor.u32 %v698_v16, %v697_v21  ;;  %v707_v30 = vor.u32 %v705_v18, %v704_v22  ;;  %v4277_v34 = vsel %vm4268_vm2, %v704_v22, 0  ;;  %v713_v7 = vshll.u32 %v4030_v2, 16  ;;  %v4027_v18 = vld [vmem:[%s5551_s3 + $0x168] sm:$0xff]   ;;  %v4034_v2 = vld [vmem:[%s5551_s3 + $0x158] sm:$0xff]   ;;  %s5628_s8 = smov (!%p3176_p8, %s463_s8), 31 }
  0x1d   : > { %3404 = vmatprep.subr.bf16.mxu0 %v4012_v8  ;;  %3952 = vmatprep.subr.bf16.mxu1 %v4012_v8  ;;  %v918_v38 = vshll.u32 %v4277_v34, 16  ;;  %v790_v42 = vor.u32 %v788_v26, %v787_v32  ;;  %v797_v44 = vor.u32 %v795_v28, %v794_v33  ;;  %v4302_v48 = vsel %vm4268_vm2, %v794_v33, 0  ;;  %v4037_v22 = vld [vmem:[%s5551_s3 + $0xa8] sm:$0xff]   ;;  %v4028_v33 = vld [vmem:[%s5551_s3 + $0x160] sm:$0xff]   ;;  %s3181_s12 = sshll.u32 %s5628_s8, 2 }
  0x1e   : > { %v4283_v36 = vsel %vm678_vm1, %v697_v21, %v707_v30  ;;  %v4287_v37 = vsel %vm4268_vm2, 0, %v700_v29  ;;  %v1038_v52 = vshll.u32 %v4302_v48, 16  ;;  %v717_v8 = vshrl.u32 %v4031_v3, 16  ;;  %s470_s17 = sadd.s32 %s3181_s12, %s4224_s20 }
  0x1f   : > { %v903_v39 = vshrl.u32 %v4287_v37, 16  ;;  %v905_v40 = vshll.u32 %v4287_v37, 16  ;;  %v910_v41 = vshll.u32 %v4283_v36, 16  ;;  %v914_v46 = vshrl.u32 %v4283_v36, 16  ;;  %s3183_s9 = sshll.u32 %s470_s17, 2  ;;  %s3395_s17 = sadd.s32 8, %s4208_s10 }
  0x20   : > { %3405 = vmatpush3.bf16.msra.mxu0 %v4013_v9  ;;  %3960 = vmatpush3.bf16.msra.mxu1 %v4013_v9  ;;  %v920_v47 = vrot.slane %v918_v38, 1  ;;  %v4306_v51 = vsel %vm4268_vm2, 0, %v790_v42  ;;  %v4310_v53 = vsel %vm678_vm1, %v787_v32, %v797_v44  ;;  %v1040_v1 = vrot.slane %v1038_v52, 1  ;;  %v4032_v9 = vld [vmem:[%s4248_s21 + $0x70] sm:$0xff]   ;;  %v4040_v52 = vld [vmem:[%s4248_s21 + $0x28] sm:$0xff]   ;;  %s4598_s14 = scalar_lea.vmem %s5549_s1, %s3183_s9  ;;  %p4866_p10 = scmp.lt.s32.totalorder %s3395_s17, 31 }
  0x21   : > { %3406 = vmatprep.subr.bf16.mxu0 %v4014_v10  ;;  %3953 = vmatprep.subr.bf16.mxu1 %v4014_v10  ;;  %v907_v49 = vrot.slane %v905_v40, 1  ;;  %v912_v50 = vrot.slane %v910_v41, 1  ;;  %5564 = vst [vmem:[#allocation2_spill] sm:$0xff] %v4310_v53  ;;  %v1023_v54 = vshrl.u32 %v4306_v51, 16  ;;  %v1025_v55 = vshll.u32 %v4306_v51, 16  ;;  %v4033_v10 = vld [vmem:[%s4248_s21 + $0x78] sm:$0xff]  }
  0x22   : > { %v1030_v57 = vshll.u32 %v4310_v53, 16  ;;  %v1034_v59 = vshrl.u32 %v4310_v53, 16  ;;  %v712_v15 = vrot.slane %v710_v6, 7  ;;  %v719_v16 = vrot.slane %v717_v8, 7  ;;  %v4039_v41 = vld [vmem:[%s4248_s21 + $0x20] sm:$0xff]   ;;  %s5630_s17 = smov (!%p4866_p10, %s3395_s17), 31 }
  0x23   : > { %v908_v56 = vor.u32 %v907_v49, %v903_v39  ;;  %v916_v58 = vor.u32 %v914_v46, %v912_v50  ;;  %v1027_v60 = vrot.slane %v1025_v55, 1  ;;  %v800_v17 = vshrl.u32 %v4032_v9, 16  ;;  %s5632_s17 = smov (!%p4866_p10, %s5630_s17), 31 }
  0x24   : > { %3407 = vmatpush3.bf16.msra.mxu0 %v4015_v11  ;;  %3961 = vmatpush3.bf16.msra.mxu1 %v4015_v11  ;;  %v1032_v63 = vrot.slane %v1030_v57, 1  ;;  %v803_v19 = vshll.u32 %v4032_v9, 16  ;;  %v807_v20 = vshrl.u32 %v4033_v10, 16  ;;  %v810_v21 = vshll.u32 %v4033_v10, 16  ;;  %s3188_s10 = sshll.u32 %s5632_s17, 2 }
  0x25   : > { %3408 = vmatprep.subr.bf16.mxu0 %v4016_v14  ;;  %3954 = vmatprep.subr.bf16.mxu1 %v4016_v14  ;;  %v4320_v62 = vsel %vm881_vm3, %v908_v56, %v912_v50  ;;  %v4323_v0 = vsel %vm881_vm3, %v916_v58, %v920_v47  ;;  %v1028_v4 = vor.u32 %v1027_v60, %v1023_v54  ;;  %v802_v26 = vrot.slane %v800_v17, 7  ;;  %s487_s19 = sadd.s32 %s3188_s10, %s4224_s20 }
  0x26   : > { %1466 = vmatprep.mubr.bf16.mxu0 %v4320_v62  ;;  %v1036_v5 = vor.u32 %v1034_v59, %v1032_v63  ;;  %v722_v25 = vor.u32 %v720_v13, %v719_v16  ;;  %v4352_v27 = vsel %vm4268_vm2, %v719_v16, 0  ;;  %v809_v28 = vrot.slane %v807_v20, 7  ;;  %s539_s22 = scalar_select %p534_p11, 1, 0 }
  0x27   : > { %v4332_v11 = vsel %vm881_vm3, %v1028_v4, %v1032_v63  ;;  %v938_v29 = vshll.u32 %v4352_v27, 16  ;;  %v805_v32 = vor.u32 %v803_v19, %v802_v26  ;;  %v725_v60 = vshrl.u32 %v4039_v41, 16  ;;  %s3190_s23 = sshll.u32 %s487_s19, 2 }
  0x28   : > { %3409 = vmatpush3.bf16.msra.mxu0 %v4017_v23  ;;  %3962 = vmatpush3.bf16.msra.mxu1 %v4017_v23  ;;  %v4340_v14 = vsel %vm881_vm3, %v1036_v5, %v1040_v1  ;;  %v715_v23 = vor.u32 %v713_v7, %v712_v15  ;;  %v4356_v30 = vsel %vm678_vm1, %v712_v15, %v722_v25  ;;  %v732_v4 = vshrl.u32 %v4040_v52, 16  ;;  %v4043_v15 = vld [vmem:[%s5551_s3 + $0xa0] sm:$0xff]   ;;  %s489_s9 = scalar_lea.vmem %s5550_s2, %s3190_s23 }
  0x29   : > { %3410 = vmatprep.subr.bf16.mxu0 %v4018_v31  ;;  %3955 = vmatprep.subr.bf16.mxu1 %v4018_v31  ;;  %v930_v39 = vshll.u32 %v4356_v30, 16  ;;  %v812_v40 = vor.u32 %v810_v21, %v809_v28  ;;  %v4372_v42 = vsel %vm4268_vm2, 0, %v805_v32  ;;  %v940_v44 = vrot.slane %v938_v29, 1  ;;  %v4046_v21 = vld [vmem:[%s4248_s21 + $0x30] sm:$0xff]   ;;  %v4047_v32 = vld [vmem:[%s4248_s21 + $0x38] sm:$0xff]  }
  0x2a   : > { %1562 = vmatprep.mubr.bf16.mxu1 %v4332_v11  ;;  %v4360_v31 = vsel %vm4268_vm2, 0, %v715_v23  ;;  %v1043_v50 = vshrl.u32 %v4372_v42, 16  ;;  %v1045_v54 = vshll.u32 %v4372_v42, 16  ;;  %v727_v6 = vrot.slane %v725_v60, 7 }
  0x2b   : > { %v925_v38 = vshll.u32 %v4360_v31, 16  ;;  %v932_v47 = vrot.slane %v930_v39, 1  ;;  %v4380_v49 = vsel %vm678_vm1, %v802_v26, %v812_v40  ;;  %v735_v7 = vshll.u32 %v4040_v52, 16 }
  0x2c   : > { %3411 = vmatpush3.bf16.msra.mxu0 %v4019_v35  ;;  %3963 = vmatpush3.bf16.msra.mxu1 %v4019_v35  ;;  %v923_v35 = vshrl.u32 %v4360_v31, 16  ;;  %5565 = vst [vmem:[#allocation3_spill] sm:$0xff] %v4380_v49  ;;  %v1050_v55 = vshll.u32 %v4380_v49, 16  ;;  %v1054_v56 = vshrl.u32 %v4380_v49, 16  ;;  %v1047_v63 = vrot.slane %v1045_v54, 1  ;;  %v4048_v54 = vld [vmem:[%s5551_s3 + $0x98] sm:$0xff]  }
  0x2d   : > { %3804 = vmatprep.subr.bf16.mxu1 %v4024_v43  ;;  %3852 = vmatprep.subr.bf16.mxu0 %v4025_v45  ;;  %v927_v46 = vrot.slane %v925_v38, 1  ;;  %v734_v10 = vrot.slane %v732_v4, 7  ;;  %v740_v38 = vshrl.u32 %v4046_v21, 16  ;;  %v743_v39 = vshll.u32 %v4046_v21, 16 }
  0x2e   : > { %v1052_v1 = vrot.slane %v1050_v55, 1  ;;  %v1048_v8 = vor.u32 %v1047_v63, %v1043_v50 }
  0x2f   : > { %1467 = vmatmul.mubr.bf16.vlgmr.msra.gmra.mxu0 %v4287_v37  ;;  %1563 = vmatmul.mubr.bf16.vlgmr.msra.gmra.mxu1 %v4306_v51  ;;  %v928_v58 = vor.u32 %v927_v46, %v923_v35  ;;  %v737_v17 = vor.u32 %v735_v7, %v734_v10  ;;  %v4432_v29 = vsel %vm4268_vm2, %v734_v10, 0  ;;  %v742_v52 = vrot.slane %v740_v38, 7 }
  0x30   : > { %3853 = vmatpush3.bf16.msra.mxu0 %v4025_v45  ;;  %1474 = vmatprep.mubr.bf16.mxu0 %v4323_v0  ;;  %v4377_v45 = vsel %vm4268_vm2, %v809_v28, 0  ;;  %v1056_v9 = vor.u32 %v1054_v56, %v1052_v1  ;;  %v4403_v16 = vsel %vm881_vm3, %v1048_v8, %v1052_v1  ;;  %v1128_v28 = vrot.slane %v4287_v37, 1 }
  0x31   : > { %3854 = vmatprep.subr.bf16.mxu0 %v4029_v61  ;;  %3805 = vmatpush3.bf16.msra.mxu1 %v4024_v43  ;;  %v934_v43 = vshrl.u32 %v4356_v30, 16  ;;  %v1058_v57 = vshll.u32 %v4377_v45, 16  ;;  %v4393_v5 = vsel %vm881_vm3, %v928_v58, %v932_v47  ;;  %5566 = vst [vmem:[#allocation4_spill] sm:$0xff] %v4403_v16  ;;  %v958_v50 = vshll.u32 %v4432_v29, 16  ;;  %v4038_v58 = vld [vmem:[%s5551_s3 + $0x140] sm:$0xff]  }
  0x32   : > { %1570 = vmatprep.mubr.bf16.mxu1 %v4340_v14  ;;  %3806 = vmatprep.subr.bf16.mxu1 %v4026_v12  ;;  %v1133_v7 = vrot.slane %v4360_v31, 1  ;;  %v1134_v8 = vrot.slane %v4356_v30, 1 }
  0x33   : > { %v936_v59 = vor.u32 %v934_v43, %v932_v47  ;;  %v1060_v3 = vrot.slane %v1058_v57, 1  ;;  %v747_v43 = vshrl.u32 %v4047_v32, 16  ;;  %v745_v57 = vor.u32 %v743_v39, %v742_v52 }
  0x34   : > { %3855 = vmatpush3.bf16.msra.mxu0 %v4029_v61  ;;  %v728_v61 = vshll.u32 %v4039_v41, 16  ;;  %v1129_v41 = vrot.slane %v4283_v36, 1  ;;  %v960_v63 = vrot.slane %v958_v50, 1 }
  0x35   : > { %3856 = vmatprep.subr.bf16.mxu0 %v4037_v22  ;;  %3807 = vmatpush3.bf16.msra.mxu1 %v4026_v12  ;;  %v4397_v12 = vsel %vm881_vm3, %v936_v59, %v940_v44  ;;  %v4411_v19 = vsel %vm881_vm3, %v1056_v9, %v1060_v3  ;;  %v750_v44 = vshll.u32 %v4047_v32, 16  ;;  %v749_v55 = vrot.slane %v747_v43, 7 }
  0x36   : > { %3808 = vmatprep.subr.bf16.mxu1 %v4027_v18  ;;  %v730_v13 = vor.u32 %v728_v61, %v727_v6  ;;  %5567 = vst [vmem:[#allocation5_spill] sm:$0xff] %v4411_v19  ;;  %v4455_v59 = vsel %vm1122_vm4, %v1128_v28, %v1129_v41  ;;  %v4459_v1 = vsel %vm4268_vm2, 0, %v745_v57  ;;  %v4500_v32 = vsel %vm1122_vm4, %v1133_v7, %v1134_v8 }
  0x37   : > { %1475 = vmatmul.mubr.bf16.gmra.mxu0 %v4283_v36  ;;  %1571 = vmatmul.mubr.bf16.gmra.mxu1 %v4310_v53  ;;  %v752_v60 = vor.u32 %v750_v44, %v749_v55  ;;  %v965_v4 = vshll.u32 %v4459_v1, 16  ;;  %v963_v9 = vshrl.u32 %v4459_v1, 16 }
  0x38   : > { %3857 = vmatpush3.bf16.msra.mxu0 %v4037_v22  ;;  %1482 = vmatprep.mubr.bf16.mxu0 %v4393_v5  ;;  %v4415_v20 = vsel %vm4268_vm2, 0, %v730_v13  ;;  %v4423_v22 = vsel %vm678_vm1, %v727_v6, %v737_v17  ;;  %v4053_v6 = vld [vmem:[%s5551_s3 + $0x90] sm:$0xff]   ;;  %v4054_v13 = vld [vmem:[%s4248_s21 + $0x40] sm:$0xff]  }
  0x39   : > { %3809 = vmatpush3.bf16.msra.mxu1 %v4027_v18  ;;  %1578 = vmatprep.mubr.bf16.mxu1 %v4403_v16  ;;  %v4035_v18 = vld [vmem:[%s5551_s3 + $0x150] sm:$0xff]   ;;  %v943_v23 = vshrl.u32 %v4415_v20, 16  ;;  %v945_v25 = vshll.u32 %v4415_v20, 16  ;;  %v950_v26 = vshll.u32 %v4423_v22, 16  ;;  %v954_v47 = vshrl.u32 %v4423_v22, 16 }
  0x3a   : > { %3810 = vmatprep.subr.bf16.mxu1 %v4028_v33  ;;  %3858 = vmatprep.subr.bf16.mxu0 %v4043_v15  ;;  %v4465_v3 = vsel %vm678_vm1, %v742_v52, %v752_v60  ;;  %v967_v17 = vrot.slane %v965_v4, 1  ;;  %v755_v21 = vshrl.u32 %v4054_v13, 16  ;;  %v1138_v50 = vrot.slane %v4415_v20, 1  ;;  %v4060_v52 = vld [vmem:[%s5551_s3 + $0x88] sm:$0xff]   ;;  %v4529_v60 = vld [vmem:[%s4248_s21 + $0x50] sm:$0xff]  }
  0x3b   : > { %v947_v35 = vrot.slane %v945_v25, 1  ;;  %v952_v40 = vrot.slane %v950_v26, 1  ;;  %v970_v10 = vshll.u32 %v4465_v3, 16  ;;  %v4042_v26 = vld [vmem:[%s5551_s3 + $0x38] sm:$0xff]   ;;  %v4050_v4 = vld [vmem:[%s5551_s3 + $0x28] sm:$0xff]  }
  0x3c   : > { %3859 = vmatpush3.bf16.msra.mxu0 %v4043_v15  ;;  %v968_v38 = vor.u32 %v967_v17, %v963_v9  ;;  %v1141_v17 = vrot.slane %v4432_v29, 1 }
  0x3d   : > { %3811 = vmatpush3.bf16.msra.mxu1 %v4028_v33  ;;  %v4036_v33 = vld [vmem:[%s5551_s3 + $0x148] sm:$0xff]   ;;  %v948_v46 = vor.u32 %v947_v35, %v943_v23  ;;  %v956_v61 = vor.u32 %v954_v47, %v952_v40  ;;  %3860 = vmatprep.subr.bf16.mxu0 %v4048_v54  ;;  %v758_v23 = vshll.u32 %v4054_v13, 16  ;;  %v757_v35 = vrot.slane %v755_v21, 7  ;;  %v4045_v47 = vld [vmem:[%s5551_s3 + $0x30] sm:$0xff]   ;;  %v4052_v21 = vld [vmem:[%s5551_s3 + $0x20] sm:$0xff]  }
  0x3e   : > { %3812 = vmatprep.subr.bf16.mxu1 %v4034_v2  ;;  %v972_v39 = vrot.slane %v970_v10, 1  ;;  %v770_v13 = vshrl.u32 %v4529_v60, 16 }
  0x3f   : > { %1483 = vmatmul.mubr.bf16.gmra.mxu0 %v4360_v31  ;;  %1579 = vmatmul.mubr.bf16.gmra.mxu1 %v4372_v42  ;;  %v4448_v56 = vsel %vm881_vm3, %v948_v46, %v952_v40  ;;  %v4484_v15 = vsel %vm881_vm3, %v956_v61, %v960_v63  ;;  %v4507_v40 = vsel %vm4268_vm2, %v749_v55, 0  ;;  %v1136_v46 = vrot.slane %v4352_v27, 1  ;;  %v4049_v55 = vld [vmem:[%s5551_s3 + $0x68] sm:$0xff]  }
  0x40   : > { %1490 = vmatprep.mubr.bf16.mxu0 %v4397_v12  ;;  %1586 = vmatprep.mubr.bf16.mxu1 %v4411_v19  ;;  %v974_v27 = vshrl.u32 %v4465_v3, 16  ;;  %v978_v57 = vshll.u32 %v4507_v40, 16 }
  0x41   : > { %3813 = vmatpush3.bf16.msra.mxu1 %v4034_v2  ;;  %v1131_v2 = vrot.slane %v4277_v34, 1  ;;  %3861 = vmatpush3.bf16.msra.mxu0 %v4048_v54  ;;  %v4041_v34 = vld [vmem:[%s5551_s3 + $0x78] sm:$0xff]   ;;  %v1139_v54 = vrot.slane %v4423_v22, 1 }
  0x42   : > { %3814 = vmatprep.subr.bf16.mxu1 %v4035_v18  ;;  %3862 = vmatprep.subr.bf16.mxu0 %v4053_v6  ;;  %v976_v7 = vor.u32 %v974_v27, %v972_v39  ;;  %v980_v9 = vrot.slane %v978_v57, 1  ;;  %v4068_v57 = vld [vmem:[%s5551_s3 + $0x1f8] sm:$0xff]  }
  0x43   : > { %v4489_v25 = vsel %vm1122_vm4, %v1129_v41, %v1131_v2  ;;  %v760_v41 = vor.u32 %v758_v23, %v757_v35  ;;  %v4537_v2 = vsel %vm1122_vm4, %v1134_v8, %v1136_v46  ;;  %v4051_v8 = vld [vmem:[%s5551_s3 + $0x60] sm:$0xff]  }
  0x45   : > { %3815 = vmatpush3.bf16.msra.mxu1 %v4035_v18  ;;  %v4055_v18 = vld [vmem:[%s4248_s21 + $0x48] sm:$0xff]   ;;  %3863 = vmatpush3.bf16.msra.mxu0 %v4053_v6  ;;  %v4533_v63 = vsel %vm4268_vm2, 0, %v760_v41  ;;  %v4059_v6 = vld [vmem:[%s4248_s21 + $0x58] sm:$0xff]   ;;  %s3194_s21 = sshll.u32 %s4233_s11, 3 }
  0x46   : > { %3816 = vmatprep.subr.bf16.mxu1 %v4036_v33  ;;  %v762_v28 = vshrl.u32 %v4055_v18, 16  ;;  %v765_v44 = vshll.u32 %v4055_v18, 16  ;;  %3864 = vmatprep.subr.bf16.mxu0 %v4060_v52  ;;  %v985_v10 = vshll.u32 %v4533_v63, 16  ;;  %v1143_v18 = vrot.slane %v4459_v1, 1  ;;  %s5306_s17 = scalar_lea.vmem %s5555_s7, %s3194_s21 }
  0x47   : > { %1491 = vmatmul.mubr.bf16.gmra.mxu0 %v4356_v30  ;;  %1587 = vmatmul.mubr.bf16.gmra.mxu1 %v4380_v49  ;;  %v777_v29 = vshrl.u32 %v4059_v6, 16  ;;  %v983_v41 = vshrl.u32 %v4533_v63, 16 }
  0x48   : > { %1498 = vmatprep.mubr.bf16.mxu0 %v4448_v56  ;;  %3820 = vmatprep.mubr.bf16.mxu1 %v4455_v59  ;;  %v764_v43 = vrot.slane %v762_v28, 7  ;;  %v1144_v28 = vrot.slane %v4465_v3, 1 }
  0x49   : > { %3817 = vmatpush3.bf16.msra.mxu1 %v4036_v33  ;;  %v4044_v33 = vld [vmem:[%s5551_s3 + $0x70] sm:$0xff]   ;;  %3865 = vmatpush3.bf16.msra.mxu0 %v4060_v52  ;;  %v4593_v27 = vrot.slane %v777_v29, 7 }
  0x4a   : > { %3818 = vmatprep.subr.bf16.mxu1 %v4038_v58  ;;  %v767_v61 = vor.u32 %v765_v44, %v764_v43  ;;  %v987_v44 = vrot.slane %v985_v10, 1  ;;  %v4587_v52 = vsel %vm1122_vm4, %v1143_v18, %v1144_v28  ;;  %v4062_v10 = vld [vmem:[%s5551_s3 + $0x10] sm:$0xff]   ;;  %v524_v18 = vld [vmem:[%s4598_s14 + $0x4] sm:$0xf] }
  0x4c   : > { %v4560_v23 = vsel %vm678_vm1, %v757_v35, %v767_v61  ;;  %v4056_v35 = vld [vmem:[%s5551_s3 + $0x58] sm:$0xff]  }
  0x4d   : > { %3819 = vmatpush3.bf16.msra.mxu1 %v4038_v58  ;;  %v4526_v58 = vsel %vm881_vm3, %v968_v38, %v972_v39  ;;  %v1146_v38 = vrot.slane %v4507_v40, 1  ;;  %v773_v39 = vshll.u32 %v4529_v60, 16  ;;  %v990_v46 = vshll.u32 %v4560_v23, 16  ;;  %v4057_v40 = vld [vmem:[%s5551_s3 + $0x18] sm:$0xff]  }
  0x4e   : > { %3532 = vmatprep.subr.bf16.mxu1 %v4041_v34  ;;  %v4546_v34 = vsel %vm1122_vm4, %v1138_v50, %v1139_v54  ;;  %v4580_v50 = vsel %vm1122_vm4, %v1139_v54, %v1141_v17  ;;  %v780_v54 = vshll.u32 %v4059_v6, 16  ;;  %v1148_v60 = vrot.slane %v4533_v63, 1  ;;  %v4061_v6 = vld [vmem:[%s5551_s3 + $0x50] sm:$0xff]  }
  0x4f   : > { %1499 = vmatmul.mubr.bf16.gmra.mxu0 %v4415_v20  ;;  %v994_v61 = vshrl.u32 %v4560_v23, 16 }
  0x50   : > { %1506 = vmatprep.mubr.bf16.mxu0 %v4484_v15  ;;  %3821 = vmatmul.mubr.bf16.vlgmr.msra.gmra.mxu1 %v4489_v25  ;;  %v782_v17 = vor.u32 %v780_v54, %v4593_v27  ;;  %v4645_v54 = vsel %vm1122_vm4, %v1144_v28, %v1146_v38  ;;  %v4066_v28 = vld [vmem:[%s5551_s3 + $0x40] sm:$0xff]  }
  0x51   : > { %3533 = vmatpush3.bf16.msra.mxu1 %v4042_v26  ;;  %3824 = vmatprep.mubr.bf16.mxu1 %v4500_v32  ;;  %v4065_v26 = vld [vmem:[%s5551_s3 + $0x80] sm:$0xff]  }
  0x52   : > { %3534 = vmatprep.subr.bf16.mxu1 %v4044_v33  ;;  %v4569_v33 = vsel %vm881_vm3, %v976_v7, %v980_v9  ;;  %3866 = vmatprep.subr.bf16.mxu0 %v4065_v26  ;;  %v988_v7 = vor.u32 %v987_v44, %v983_v41  ;;  %v992_v9 = vrot.slane %v990_v46, 1  ;;  %v4064_v41 = vld [vmem:[%s5551_s3 + $0x8] sm:$0xff]  }
  0x53   : > { %3867 = vmatpush3.bf16.msra.mxu0 %v4065_v26  ;;  %v4063_v26 = vld [vmem:[%s5551_s3 + $0x48] sm:$0xff]  }
  0x54   : > { %3668 = vmatprep.subr.bf16.mxu0 %v4068_v57  ;;  %v525_v44 = vld [vmem:[%s4598_s14 + $0x8] sm:$0xf]  ;;  %v996_v38 = vor.u32 %v994_v61, %v992_v9 }
  0x55   : > { %3535 = vmatpush3.bf16.msra.mxu1 %v4045_v47  ;;  %v772_v47 = vrot.slane %v770_v13, 7  ;;  %v523_v13 = vld [vmem:[%s4598_s14] sm:$0xf] }
  0x56   : > { %3536 = vmatprep.subr.bf16.mxu1 %v4049_v55  ;;  %v4591_v55 = vsel %vm4268_vm2, %v764_v43, 0  ;;  %v1149_v43 = vrot.slane %v4560_v23, 1 }
  0x57   : > { %1507 = vmatmul.mubr.bf16.gmra.mxu0 %v4423_v22  ;;  %v4648_v57 = vsel %vm678_vm1, %v772_v47, %v782_v17 }
  0x58   : > { %1514 = vmatprep.mubr.bf16.mxu0 %v4526_v58  ;;  %3825 = vmatmul.mubr.bf16.gmra.mxu1 %v4537_v2  ;;  %v1010_v61 = vshll.u32 %v4648_v57, 16 }
  0x59   : > { %3828 = vmatprep.mubr.bf16.mxu1 %v4546_v34  ;;  %3537 = vmatpush3.bf16.msra.mxu1 %v4050_v4  ;;  %v998_v4 = vshll.u32 %v4591_v55, 16 }
  0x5a   : > { %3538 = vmatprep.subr.bf16.mxu1 %v4051_v8  ;;  %v775_v8 = vor.u32 %v773_v39, %v772_v47 }
  0x5c   : > { %v4633_v39 = vsel %vm4268_vm2, 0, %v775_v8  ;;  %v1151_v8 = vrot.slane %v4591_v55, 1  ;;  %v4067_v55 = vld [vmem:[%s5551_s3] sm:$0xff]  }
  0x5d   : > { %3539 = vmatpush3.bf16.msra.mxu1 %v4052_v21  ;;  %v528_v21 = vstv %s527_s18  ;;  %v1003_v47 = vshrl.u32 %v4633_v39, 16 }
  0x5e   : > { %3540 = vmatprep.subr.bf16.mxu1 %v4056_v35  ;;  %vm4624_vm5 = vcmp.eq.s32.totalorder %v528_v21, 1  ;;  %v4629_v35 = vsel %vm881_vm3, %v988_v7, %v992_v9  ;;  %v4653_v7 = vsel %vm1122_vm4, %v1148_v60, %v1149_v43  ;;  %v1154_v60 = vrot.slane %v4648_v57, 1  ;;  %v4676_v9 = vld [vmem:[%s5551_s3 + $0x238] sm:$0xff]  }
  0x5f   : > { %1515 = vmatmul.mubr.bf16.gmra.mxu0 %v4459_v1  ;;  %v530_v46 = vsel %vm4624_vm5, 0, %v523_v13  ;;  %v1000_v13 = vrot.slane %v998_v4, 1  ;;  %v532_v4 = vsel %vm4624_vm5, 0, %v525_v44  ;;  %v4683_v29 = vsel %vm1122_vm4, %v1149_v43, %v1151_v8 }
  0x60   : > { %1522 = vmatprep.mubr.bf16.mxu0 %v4569_v33  ;;  %3829 = vmatmul.mubr.bf16.gmra.mxu1 %v4580_v50  ;;  %v1158_v43 = vrot.slane %v4306_v51, 1 }
  0x61   : > { %3832 = vmatprep.mubr.bf16.mxu1 %v4587_v52  ;;  %3541 = vmatpush3.bf16.msra.mxu1 %v4057_v40  ;;  %v531_v40 = vsel %vm4624_vm5, 0, %v524_v18  ;;  %v1153_v18 = vrot.slane %v4633_v39, 1 }
  0x62   : > { %3542 = vmatprep.subr.bf16.mxu1 %v4061_v6  ;;  %v526_v6 = vld [vmem:[%s4598_s14 + $0xc] sm:$0xf]  ;;  %v3195_v17 = vcombine.low %v530_v46, %v531_v40 }
  0x63   : > { %v533_v21 = vsel %vm4624_vm5, 0, %v526_v6  ;;  %v877_v6 = vsel %vm4268_vm2, %v4593_v27, 0 }
  0x64   : > { %v3196_v40 = vcombine.low %v532_v4, %v533_v21  ;;  %v680_v44 = vshrl.u32 %v3195_v17, 16  ;;  %v1156_v8 = vrot.slane %v877_v6, 1  ;;  %v1018_v21 = vshll.u32 %v877_v6, 16 }
  0x65   : > { %3543 = vmatpush3.bf16.msra.mxu1 %v4062_v10  ;;  %v1005_v10 = vshll.u32 %v4633_v39, 16 }
  0x66   : > { %3544 = vmatprep.subr.bf16.mxu1 %v4063_v26  ;;  %v4679_v26 = vsel %vm881_vm3, %v996_v38, %v1000_v13  ;;  %v1012_v13 = vrot.slane %v1010_v61, 1  ;;  %v687_v4 = vshrl.u32 %v3196_v40, 16  ;;  %v1020_v16 = vrot.slane %v1018_v21, 1 }
  0x67   : > { %1523 = vmatmul.mubr.bf16.gmra.mxu0 %v4465_v3  ;;  %v1007_v46 = vrot.slane %v1005_v10, 1  ;;  %v682_v10 = vrot.slane %v680_v44, 7 }
  0x68   : > { %1530 = vmatprep.mubr.bf16.mxu0 %v4629_v35  ;;  %3833 = vmatmul.mubr.bf16.gmra.mxu1 %v4645_v54  ;;  %v689_v61 = vrot.slane %v687_v4, 7 }
  0x69   : > { %3836 = vmatprep.mubr.bf16.mxu1 %v4653_v7  ;;  %3545 = vmatpush3.bf16.msra.mxu1 %v4064_v41  ;;  %v4687_v41 = vsel %vm1122_vm4, %v1153_v18, %v1154_v60  ;;  %v1008_v38 = vor.u32 %v1007_v46, %v1003_v47  ;;  %v1159_v18 = vrot.slane %v4310_v53, 1  ;;  %v690_v47 = vshll.u32 %v3196_v40, 16 }
  0x6a   : > { %3546 = vmatprep.subr.bf16.mxu1 %v4066_v28  ;;  %v683_v28 = vshll.u32 %v3195_v17, 16  ;;  %v4703_v46 = vsel %vm1122_vm4, %v1154_v60, %v1156_v8  ;;  %v1161_v40 = vrot.slane %v4302_v48, 1  ;;  %v1163_v60 = vrot.slane %v4372_v42, 1 }
  0x6b   : > { %v4699_v27 = vsel %vm881_vm3, %v1008_v38, %v1012_v13  ;;  %v4707_v44 = vsel %vm1122_vm4, %v1158_v43, %v1159_v18  ;;  %v692_v53 = vor.u32 %v690_v47, %v689_v61 }
  0x6c   : > { %v685_v17 = vor.u32 %v683_v28, %v682_v10  ;;  %v1164_v28 = vrot.slane %v4380_v49, 1  ;;  %v4722_v43 = vsel %vm1122_vm4, %v1159_v18, %v1161_v40  ;;  %v871_v18 = vsel %vm4268_vm2, %v689_v61, 0  ;;  %v4069_v61 = vld [vmem:[%s5551_s3 + $0x1b8] sm:$0xff]  }
  0x6d   : > { %3547 = vmatpush3.bf16.msra.mxu1 %v4067_v55  ;;  %v1014_v55 = vshrl.u32 %v4648_v57, 16 }
  0x6e   : > { %3900 = vmatprep.subr.bf16.mxu1 %v4676_v9  ;;  %v861_v6 = vsel %vm4268_vm2, 0, %v685_v17  ;;  %v4726_v8 = vsel %vm1122_vm4, %v1163_v60, %v1164_v28 }
  0x6f   : > { %1531 = vmatmul.mubr.bf16.gmra.mxu0 %v4533_v63  ;;  %v1016_v19 = vor.u32 %v1014_v55, %v1012_v13  ;;  %v885_v38 = vshll.u32 %v861_v6, 16  ;;  %v693_v13 = vsel %vm678_vm1, %v682_v10, %v692_v53  ;;  %5570 = vst [vmem:[#allocation6_spill] sm:$0xff] %v4726_v8  ;;  %v883_v48 = vshrl.u32 %v861_v6, 16 }
  0x70   : > { %1538 = vmatprep.mubr.bf16.mxu0 %v4679_v26  ;;  %3837 = vmatmul.mubr.bf16.gmra.mxu1 %v4683_v29  ;;  %v890_v21 = vshll.u32 %v693_v13, 16  ;;  %v1123_v17 = vrot.slane %v861_v6, 1  ;;  %v1124_v47 = vrot.slane %v693_v13, 1  ;;  %v1166_v53 = vrot.slane %v4377_v45, 1 }
  0x71   : > { %3840 = vmatprep.mubr.bf16.mxu1 %v4687_v41  ;;  %v4717_v4 = vsel %vm881_vm3, %v1016_v19, %v1020_v16  ;;  %v887_v55 = vrot.slane %v885_v38, 1  ;;  %v1126_v38 = vrot.slane %v871_v18, 1  ;;  %v894_v49 = vshrl.u32 %v693_v13, 16 }
  0x72   : > { %v892_v19 = vrot.slane %v890_v21, 1  ;;  %v1125_v10 = vsel %vm1122_vm4, %v1123_v17, %v1124_v47  ;;  %v4736_v40 = vsel %vm1122_vm4, %v1164_v28, %v1166_v53  ;;  %v4071_v28 = vld [vmem:[%s5551_s3 + $0x1f0] sm:$0xff]   ;;  %v4080_v53 = vld [vmem:[%s5551_s3 + $0x228] sm:$0xff]  }
  0x73   : > { %v888_v16 = vor.u32 %v887_v55, %v883_v48  ;;  %v1127_v45 = vsel %vm1122_vm4, %v1124_v47, %v1126_v38  ;;  %v4072_v17 = vld [vmem:[%s5551_s3 + $0x1b0] sm:$0xff]   ;;  %v4086_v38 = vld [vmem:[%s5551_s3 + $0x1c0] sm:$0xff]  }
  0x74   : > { %v896_v48 = vor.u32 %v894_v49, %v892_v19  ;;  %v4075_v47 = vld [vmem:[%s5551_s3 + $0x230] sm:$0xff]   ;;  %v4073_v49 = vld [vmem:[%s5551_s3 + $0x1e8] sm:$0xff]  }
  0x75   : > { %v893_v60 = vsel %vm881_vm3, %v888_v16, %v892_v19  ;;  %v4078_v16 = vld [vmem:[%s5551_s3 + $0x1d8] sm:$0xff]   ;;  %v4081_v19 = vld [vmem:[%s5551_s3 + $0x1d0] sm:$0xff]  }
  0x77   : > { %1539 = vmatmul.mubr.bf16.gmra.mxu0 %v4560_v23 }
  0x78   : > { %1546 = vmatprep.mubr.bf16.mxu0 %v4699_v27  ;;  %3841 = vmatmul.mubr.bf16.gmra.mxu1 %v4703_v46 }
  0x79   : > { %3844 = vmatprep.mubr.bf16.mxu1 %v4707_v44 }
  0x7f   : > { %1547 = vmatmul.mubr.bf16.gmra.mxu0 %v4633_v39 }
  0x80   : > { %1554 = vmatprep.mubr.bf16.mxu0 %v4717_v4  ;;  %3845 = vmatmul.mubr.bf16.gmra.mxu1 %v4722_v43 }
  0x81   : > { %3848 = vmatprep.mubr.bf16.mxu1 %v4726_v8  ;;  %v898_v8 = vshll.u32 %v871_v18, 16  ;;  %v4083_v18 = vld [vmem:[%s5551_s3 + $0x1c8] sm:$0xff]  }
  0x83   : > { %v900_v55 = vrot.slane %v898_v8, 1  ;;  %v4076_v8 = vld [vmem:[%s5551_s3 + $0x1e0] sm:$0xff]  }
  0x85   : > { %v901_v21 = vsel %vm881_vm3, %v896_v48, %v900_v55 }
  0x87   : > { %1555 = vmatmul.mubr.bf16.gmra.mxu0 %v4648_v57 }
  0x88   : > { %3868 = vmatprep.mubr.bf16.mxu0 %v1125_v10  ;;  %3849 = vmatmul.mubr.bf16.gmra.mxu1 %v4736_v40  ;;  %v4088_v10 = vld [vmem:[%s5551_s3 + $0x218] sm:$0xff]  }
  0x89   : > { %1932 = vmatprep.mubr.bf16.mxu1 %v893_v60  ;;  %v4084_v60 = vld [vmem:[%s5551_s3 + $0x188] sm:$0xff]  }
  0x8f   : > { %3869 = vmatmul.mubr.bf16.vlgmr.msra.gmra.mxu0 %v1127_v45  ;;  %v4090_v45 = vld [vmem:[%s5551_s3 + $0x208] sm:$0xff]  }
  0x90   : > { %3669 = vmatpush3.bf16.msra.mxu0 %v4069_v61  ;;  %3872 = vmatprep.mubr.bf16.mxu0 %v4455_v59  ;;  %v4074_v59 = vld [vmem:[%s5551_s3 + $0x1a8] sm:$0xff]  }
  0x91   : > { %3670 = vmatprep.subr.bf16.mxu0 %v4071_v28  ;;  %1933 = vmatmul.mubr.bf16.vlgmr.msra.gmra.mxu1 %v861_v6  ;;  %v4085_v6 = vld [vmem:[%s5551_s3 + $0x220] sm:$0xff]  }
  0x92   : > { %3901 = vmatpush3.bf16.msra.mxu1 %v4676_v9  ;;  %1940 = vmatprep.mubr.bf16.mxu1 %v901_v21  ;;  %v4077_v9 = vld [vmem:[%s5551_s3 + $0x1a0] sm:$0xff]  }
  0x93   : > { %3902 = vmatprep.subr.bf16.mxu1 %v4075_v47 }
  0x94   : > { %3671 = vmatpush3.bf16.msra.mxu0 %v4072_v17 }
  0x95   : > { %3672 = vmatprep.subr.bf16.mxu0 %v4073_v49 }
  0x96   : > { %3903 = vmatpush3.bf16.msra.mxu1 %v4075_v47 }
  0x97   : > { %3873 = vmatmul.mubr.bf16.gmra.mxu0 %v4489_v25  ;;  %3904 = vmatprep.subr.bf16.mxu1 %v4080_v53  ;;  %v4079_v25 = vld [vmem:[%s5551_s3 + $0x198] sm:$0xff]  }
  0x98   : > { %3876 = vmatprep.mubr.bf16.mxu0 %v4500_v32  ;;  %3673 = vmatpush3.bf16.msra.mxu0 %v4074_v59 }
  0x99   : > { %3674 = vmatprep.subr.bf16.mxu0 %v4076_v8  ;;  %1941 = vmatmul.mubr.bf16.gmra.mxu1 %v693_v13  ;;  %v4089_v13 = vld [vmem:[%s5551_s3 + $0x210] sm:$0xff]  }
  0x9a   : > { %1948 = vmatprep.mubr.bf16.mxu1 %v4320_v62  ;;  %3905 = vmatpush3.bf16.msra.mxu1 %v4080_v53  ;;  %v4082_v62 = vld [vmem:[%s5551_s3 + $0x190] sm:$0xff]  }
  0x9b   : > { %3906 = vmatprep.subr.bf16.mxu1 %v4085_v6 }
  0x9c   : > { %3675 = vmatpush3.bf16.msra.mxu0 %v4077_v9 }
  0x9d   : > { %3676 = vmatprep.subr.bf16.mxu0 %v4078_v16 }
  0x9e   : > { %3907 = vmatpush3.bf16.msra.mxu1 %v4085_v6 }
  0x9f   : > { %3877 = vmatmul.mubr.bf16.gmra.mxu0 %v4537_v2  ;;  %3908 = vmatprep.subr.bf16.mxu1 %v4088_v10 }
  0xa0   : > { %3880 = vmatprep.mubr.bf16.mxu0 %v4546_v34  ;;  %3677 = vmatpush3.bf16.msra.mxu0 %v4079_v25 }
  0xa1   : > { %3678 = vmatprep.subr.bf16.mxu0 %v4081_v19  ;;  %1949 = vmatmul.mubr.bf16.gmra.mxu1 %v4287_v37  ;;  %v4087_v37 = vld [vmem:[%s5551_s3 + $0x180] sm:$0xff]  }
  0xa2   : > { %1956 = vmatprep.mubr.bf16.mxu1 %v4323_v0  ;;  %3909 = vmatpush3.bf16.msra.mxu1 %v4088_v10  ;;  %v4091_v0 = vld [vmem:[%s5551_s3 + $0x200] sm:$0xff]  }
  0xa3   : > { %3910 = vmatprep.subr.bf16.mxu1 %v4089_v13 }
  0xa4   : > { %3679 = vmatpush3.bf16.msra.mxu0 %v4082_v62 }
  0xa5   : > { %3680 = vmatprep.subr.bf16.mxu0 %v4083_v18 }
  0xa6   : > { %3911 = vmatpush3.bf16.msra.mxu1 %v4089_v13 }
  0xa7   : > { %3881 = vmatmul.mubr.bf16.gmra.mxu0 %v4580_v50  ;;  %3912 = vmatprep.subr.bf16.mxu1 %v4090_v45 }
  0xa8   : > { %3884 = vmatprep.mubr.bf16.mxu0 %v4587_v52  ;;  %3681 = vmatpush3.bf16.msra.mxu0 %v4084_v60 }
  0xa9   : > { %3682 = vmatprep.subr.bf16.mxu0 %v4086_v38  ;;  %1957 = vmatmul.mubr.bf16.gmra.mxu1 %v4283_v36 }
  0xaa   : > { %1964 = vmatprep.mubr.bf16.mxu1 %v4393_v5  ;;  %3913 = vmatpush3.bf16.msra.mxu1 %v4090_v45 }
  0xab   : > { %3914 = vmatprep.subr.bf16.mxu1 %v4091_v0 }
  0xac   : > { %3683 = vmatpush3.bf16.msra.mxu0 %v4087_v37  ;;  %v5572_v37 = vld [vmem:[#allocation2_spill] sm:$0xff] }
  0xae   : > { %3915 = vmatpush3.bf16.msra.mxu1 %v4091_v0 }
  0xaf   : > { %3885 = vmatmul.mubr.bf16.gmra.mxu0 %v4645_v54 }
  0xb0   : > { %3888 = vmatprep.mubr.bf16.mxu0 %v4653_v7 }
  0xb1   : > { %1965 = vmatmul.mubr.bf16.gmra.mxu1 %v4360_v31 }
  0xb2   : > { %1972 = vmatprep.mubr.bf16.mxu1 %v4397_v12 }
  0xb7   : > { %3889 = vmatmul.mubr.bf16.gmra.mxu0 %v4683_v29 }
  0xb8   : > { %3892 = vmatprep.mubr.bf16.mxu0 %v4687_v41 }
  0xb9   : > { %1973 = vmatmul.mubr.bf16.gmra.mxu1 %v4356_v30 }
  0xba   : > { %1980 = vmatprep.mubr.bf16.mxu1 %v4448_v56 }
  0xbf   : > { %3893 = vmatmul.mubr.bf16.gmra.mxu0 %v4703_v46 }
  0xc0   : > { %3896 = vmatprep.mubr.bf16.mxu0 %v4707_v44 }
  0xc1   : > { %1981 = vmatmul.mubr.bf16.gmra.mxu1 %v4415_v20 }
  0xc2   : > { %1988 = vmatprep.mubr.bf16.mxu1 %v4484_v15 }
  0xc7   : > { %3897 = vmatmul.mubr.bf16.gmra.mxu0 %v4722_v43 }
  0xc8   : > { %2447 = vmatprep.mubr.bf16.mxu0 %v4393_v5 }
  0xc9   : > { %1989 = vmatmul.mubr.bf16.gmra.mxu1 %v4423_v22 }
  0xca   : > { %1996 = vmatprep.mubr.bf16.mxu1 %v4526_v58 }
  0xcf   : > { %2448 = vmatmul.mubr.bf16.vlgmr.msra.gmra.mxu0 %v4360_v31 }
  0xd0   : > { %2455 = vmatprep.mubr.bf16.mxu0 %v4397_v12 }
  0xd1   : > { %1997 = vmatmul.mubr.bf16.gmra.mxu1 %v4459_v1 }
  0xd2   : > { %2004 = vmatprep.mubr.bf16.mxu1 %v4569_v33 }
  0xd7   : > { %2456 = vmatmul.mubr.bf16.gmra.mxu0 %v4356_v30 }
  0xd8   : > { %2463 = vmatprep.mubr.bf16.mxu0 %v4448_v56 }
  0xd9   : > { %2005 = vmatmul.mubr.bf16.gmra.mxu1 %v4465_v3 }
  0xda   : > { %2012 = vmatprep.mubr.bf16.mxu1 %v4629_v35 }
  0xdf   : > { %2464 = vmatmul.mubr.bf16.gmra.mxu0 %v4415_v20 }
  0xe0   : > { %2471 = vmatprep.mubr.bf16.mxu0 %v4484_v15 }
  0xe1   : > { %2013 = vmatmul.mubr.bf16.gmra.mxu1 %v4533_v63 }
  0xe2   : > { %2020 = vmatprep.mubr.bf16.mxu1 %v4679_v26 }
  0xe7   : > { %2472 = vmatmul.mubr.bf16.gmra.mxu0 %v4423_v22 }
  0xe8   : > { %2479 = vmatprep.mubr.bf16.mxu0 %v4526_v58 }
  0xe9   : > { %2021 = vmatmul.mubr.bf16.gmra.mxu1 %v4560_v23 }
  0xea   : > { %2028 = vmatprep.mubr.bf16.mxu1 %v4699_v27 }
  0xef   : > { %v3412_v36 = vpop.f32.mrf.mxu0  ;;  %2480 = vmatmul.mubr.bf16.gmra.mxu0 %v4459_v1  ;;  %v3484_v31 = vpop.f32.mrf.mxu1 }
  0xf0   : > { %2487 = vmatprep.mubr.bf16.mxu0 %v4569_v33 }
  0xf1   : > { %v3413_v30 = vpop.f32.mrf.mxu0  ;;  %2029 = vmatmul.mubr.bf16.gmra.mxu1 %v4633_v39  ;;  %v3485_v20 = vpop.f32.mrf.mxu1 }
  0xf2   : > { %v4856_v5 = vadd.f32 %v3413_v30, %v3412_v36  ;;  %2036 = vmatprep.mubr.bf16.mxu1 %v4717_v4  ;;  %v4859_v22 = vadd.f32 %v3485_v20, %v3484_v31 }
  0xf3   : > { %v3415_v12 = vpop.f32.mrf.mxu0  ;;  %v3487_v15 = vpop.f32.mrf.mxu1 }
  0xf5   : > { %v3416_v56 = vpop.f32.mrf.mxu0  ;;  %v3488_v33 = vpop.f32.mrf.mxu1 }
  0xf6   : > { %v4862_v58 = vadd.f32 %v3416_v56, %v3415_v12  ;;  %v4870_v61 = vadd.f32 %v3488_v33, %v3487_v15  ;;  %v536_v33 = vld [vmem:[%s489_s9 + $0x4] sm:$0xf] }
  0xf7   : > { %v3418_v1 = vpop.f32.mrf.mxu0  ;;  %2488 = vmatmul.mubr.bf16.gmra.mxu0 %v4465_v3  ;;  %v3490_v55 = vpop.f32.mrf.mxu1 }
  0xf8   : > { %2495 = vmatprep.mubr.bf16.mxu0 %v4629_v35 }
  0xf9   : > { %v3419_v48 = vpop.f32.mrf.mxu0  ;;  %2037 = vmatmul.mubr.bf16.gmra.mxu1 %v4648_v57  ;;  %v3491_v3 = vpop.f32.mrf.mxu1 }
  0xfa   : > { %v3420_v28 = vadd.f32 %v3419_v48, %v3418_v1  ;;  %2044 = vmatprep.mubr.bf16.mxu1 %v4332_v11  ;;  %v4876_v35 = vadd.f32 %v3491_v3, %v3490_v55  ;;  %v535_v1 = vld [vmem:[%s489_s9] sm:$0xf] }
  0xfb   : > { %v3421_v21 = vpop.f32.mrf.mxu0  ;;  %v3493_v47 = vpop.f32.mrf.mxu1 }
  0xfd   : > { %v3422_v17 = vpop.f32.mrf.mxu0  ;;  %v3494_v8 = vpop.f32.mrf.mxu1 }
  0xfe   : > { %v4878_v49 = vadd.f32 %v3422_v17, %v3421_v21  ;;  %v4884_v53 = vadd.f32 %v3494_v8, %v3493_v47  ;;  %v537_v8 = vld [vmem:[%s489_s9 + $0x8] sm:$0xf] }
  0xff   : > { %v3424_v59 = vpop.f32.mrf.mxu0  ;;  %2496 = vmatmul.mubr.bf16.gmra.mxu0 %v4533_v63  ;;  %v3496_v6 = vpop.f32.mrf.mxu1 }
 0x100   : > { %2503 = vmatprep.mubr.bf16.mxu0 %v4679_v26 }
 0x101   : > { %v3425_v9 = vpop.f32.mrf.mxu0  ;;  %2045 = vmatmul.mubr.bf16.gmra.mxu1 %v4306_v51  ;;  %v3497_v19 = vpop.f32.mrf.mxu1 }
 0x102   : > { %v4887_v16 = vadd.f32 %v3425_v9, %v3424_v59  ;;  %2052 = vmatprep.mubr.bf16.mxu1 %v4340_v14  ;;  %v4890_v63 = vadd.f32 %v3497_v19, %v3496_v6  ;;  %v538_v9 = vld [vmem:[%s489_s9 + $0xc] sm:$0xf] }
 0x103   : > { %v3427_v25 = vpop.f32.mrf.mxu0  ;;  %v3499_v26 = vpop.f32.mrf.mxu1 }
 0x105   : > { %v3428_v10 = vpop.f32.mrf.mxu0  ;;  %v3500_v18 = vpop.f32.mrf.mxu1 }
 0x106   : > { %v4893_v62 = vadd.f32 %v3428_v10, %v3427_v25  ;;  %v4898_v60 = vadd.f32 %v3500_v18, %v3499_v26 }
 0x107   : > { %v3430_v13 = vpop.f32.mrf.mxu0  ;;  %2504 = vmatmul.mubr.bf16.gmra.mxu0 %v4560_v23  ;;  %v3502_v45 = vpop.f32.mrf.mxu1 }
 0x108   : > { %2511 = vmatprep.mubr.bf16.mxu0 %v4699_v27  ;;  %v540_v27 = vstv %s539_s22 }
 0x109   : > { %v3431_v38 = vpop.f32.mrf.mxu0  ;;  %2053 = vmatmul.mubr.bf16.gmra.mxu1 %v5572_v37  ;;  %v3503_v30 = vpop.f32.mrf.mxu1  ;;  %vm4909_vm6 = vcmp.eq.s32.totalorder %v540_v27, 1 }
 0x10a   : > { %v3432_v0 = vadd.f32 %v3431_v38, %v3430_v13  ;;  %3916 = vmatprep.mubr.bf16.mxu1 %v4500_v32  ;;  %v4902_v31 = vadd.f32 %v3503_v30, %v3502_v45  ;;  %v544_v26 = vsel %vm4909_vm6, 0, %v537_v8  ;;  %v545_v13 = vsel %vm4909_vm6, 0, %v538_v9 }
 0x10b   : > { %v3433_v36 = vpop.f32.mrf.mxu0  ;;  %v3505_v12 = vpop.f32.mrf.mxu1 }
 0x10d   : > { %v3434_v23 = vpop.f32.mrf.mxu0  ;;  %v3506_v15 = vpop.f32.mrf.mxu1 }
 0x10e   : > { %v3435_v20 = vadd.f32 %v3434_v23, %v3433_v36  ;;  %v4913_v48 = vadd.f32 %v3506_v15, %v3505_v12  ;;  %v3214_v36 = vcombine.low %v544_v26, %v545_v13  ;;  %v5575_v26 = vld [vmem:[#allocation4_spill] sm:$0xff] }
 0x10f   : > { %v3436_v56 = vpop.f32.mrf.mxu0  ;;  %2512 = vmatmul.mubr.bf16.gmra.mxu0 %v4633_v39  ;;  %v542_v39 = vsel %vm4909_vm6, 0, %v535_v1 }
 0x110   : > { %2519 = vmatprep.mubr.bf16.mxu0 %v4717_v4  ;;  %v3822_v21 = vpop.f32.mrf.mxu1  ;;  %v543_v4 = vsel %vm4909_vm6, 0, %v536_v33  ;;  %v822_v33 = vshrl.u32 %v3214_v36, 16 }
 0x111   : > { %v3437_v55 = vpop.f32.mrf.mxu0  ;;  %3917 = vmatmul.mubr.bf16.vlgmr.msra.gmra.mxu1 %v4537_v2  ;;  %v4916_v17 = vadd.f32 %v3822_v21, %v3420_v28  ;;  %v3213_v28 = vcombine.low %v542_v39, %v543_v4  ;;  %v825_v4 = vshll.u32 %v3214_v36, 16 }
 0x112   : > { %v3438_v3 = vadd.f32 %v3437_v55, %v3436_v56  ;;  %3920 = vmatprep.mubr.bf16.mxu1 %v4546_v34  ;;  %v1629_v59 = vpop.f32.mrf.mxu1  ;;  %v824_v39 = vrot.slane %v822_v33, 7 }
 0x113   : > { %v3439_v47 = vpop.f32.mrf.mxu0  ;;  %v4924_v6 = vadd.f32 %v4856_v5, %v1629_v59  ;;  %v815_v30 = vshrl.u32 %v3213_v28, 16  ;;  %v818_v1 = vshll.u32 %v3213_v28, 16 }
 0x114   : > { %v3823_v2 = vpop.f32.mrf.mxu1 }
 0x115   : > { %v3440_v25 = vpop.f32.mrf.mxu0  ;;  %v4927_v10 = vadd.f32 %v3823_v2, %v4878_v49  ;;  %v817_v15 = vrot.slane %v815_v30, 7 }
 0x116   : > { %v3441_v19 = vadd.f32 %v3440_v25, %v3439_v47  ;;  %v1632_v18 = vpop.f32.mrf.mxu1  ;;  %v827_v25 = vor.u32 %v825_v4, %v824_v39 }
 0x117   : > { %v3442_v34 = vpop.f32.mrf.mxu0  ;;  %2520 = vmatmul.mubr.bf16.gmra.mxu0 %v4648_v57  ;;  %v4936_v5 = vadd.f32 %v4862_v58, %v1632_v18  ;;  %v820_v47 = vor.u32 %v818_v1, %v817_v15 }
 0x118   : > { %2527 = vmatprep.mubr.bf16.mxu0 %v4332_v11  ;;  %v3826_v45 = vpop.f32.mrf.mxu1 }
 0x119   : > { %v3443_v38 = vpop.f32.mrf.mxu0  ;;  %3921 = vmatmul.mubr.bf16.gmra.mxu1 %v4580_v50  ;;  %v4939_v57 = vadd.f32 %v3826_v45, %v3432_v0  ;;  %v4960_v2 = vsel %vm4268_vm2, 0, %v820_v47  ;;  %v4971_v45 = vsel %vm678_vm1, %v817_v15, %v827_v25  ;;  %v880_v47 = vsel %vm4268_vm2, %v824_v39, 0 }
 0x11a   : > { %v3444_v49 = vadd.f32 %v3443_v38, %v3442_v34  ;;  %3924 = vmatprep.mubr.bf16.mxu1 %v4587_v52  ;;  %v1645_v27 = vpop.f32.mrf.mxu1  ;;  %v1065_v13 = vshll.u32 %v4960_v2, 16 }
 0x11b   : > { %v3445_v23 = vpop.f32.mrf.mxu0  ;;  %v4943_v12 = vadd.f32 %v4887_v16, %v1645_v27 }
 0x11c   : > { %v3827_v56 = vpop.f32.mrf.mxu1  ;;  %v1067_v27 = vrot.slane %v1065_v13, 1 }
 0x11d   : > { %v3446_v11 = vpop.f32.mrf.mxu0  ;;  %v4945_v32 = vadd.f32 %v3827_v56, %v3435_v20 }
 0x11e   : > { %v3447_v58 = vadd.f32 %v3446_v11, %v3445_v23  ;;  %v1648_v0 = vpop.f32.mrf.mxu1  ;;  %v1063_v23 = vshrl.u32 %v4960_v2, 16  ;;  %v1070_v11 = vshll.u32 %v4971_v45, 16 }
 0x11f   : > { %v3448_v50 = vpop.f32.mrf.mxu0  ;;  %2528 = vmatmul.mubr.bf16.gmra.mxu0 %v4306_v51  ;;  %v4950_v52 = vadd.f32 %v4893_v62, %v1648_v0 }
 0x120   : > { %2535 = vmatprep.mubr.bf16.mxu0 %v4340_v14  ;;  %v3830_v16 = vpop.f32.mrf.mxu1  ;;  %v1068_v0 = vor.u32 %v1067_v27, %v1063_v23  ;;  %v1168_v23 = vrot.slane %v4960_v2, 1  ;;  %v1169_v27 = vrot.slane %v4971_v45, 1 }
 0x121   : > { %v3449_v55 = vpop.f32.mrf.mxu0  ;;  %3925 = vmatmul.mubr.bf16.gmra.mxu1 %v4645_v54  ;;  %v4953_v59 = vadd.f32 %v3830_v16, %v3444_v49 }
 0x122   : > { %v3450_v21 = vadd.f32 %v3449_v55, %v3448_v50  ;;  %3928 = vmatprep.mubr.bf16.mxu1 %v4653_v7  ;;  %v1661_v51 = vpop.f32.mrf.mxu1  ;;  %v1072_v55 = vrot.slane %v1070_v11, 1 }
 0x123   : > { %v3451_v20 = vpop.f32.mrf.mxu0  ;;  %v4956_v8 = vadd.f32 %v3438_v3, %v1661_v51 }
 0x124   : > { %v3831_v9 = vpop.f32.mrf.mxu1 }
 0x125   : > { %v3452_v14 = vpop.f32.mrf.mxu0  ;;  %v4962_v54 = vadd.f32 %v3831_v9, %v3447_v58  ;;  %v1074_v9 = vshrl.u32 %v4971_v45, 16 }
 0x126   : > { %v3453_v62 = vadd.f32 %v3452_v14, %v3451_v20  ;;  %v1664_v34 = vpop.f32.mrf.mxu1  ;;  %v1073_v14 = vsel %vm881_vm3, %v1068_v0, %v1072_v55 }
 0x127   : > { %v3454_v28 = vpop.f32.mrf.mxu0  ;;  %2536 = vmatmul.mubr.bf16.gmra.mxu0 %v5572_v37  ;;  %v4966_v7 = vadd.f32 %v3441_v19, %v1664_v34 }
 0x128   : > { %2543 = vmatprep.mubr.bf16.mxu0 %v5575_v26  ;;  %v3834_v18 = vpop.f32.mrf.mxu1 }
 0x129   : > { %v3455_v3 = vpop.f32.mrf.mxu0  ;;  %3929 = vmatmul.mubr.bf16.gmra.mxu1 %v4683_v29 }
 0x12a   : > { %v3456_v38 = vadd.f32 %v3455_v3, %v3454_v28  ;;  %3932 = vmatprep.mubr.bf16.mxu1 %v4687_v41  ;;  %v1677_v37 = vpop.f32.mrf.mxu1  ;;  %v5576_v41 = vld [vmem:[#allocation5_spill] sm:$0xff] }
 0x12b   : > { %v3457_v49 = vpop.f32.mrf.mxu0  ;;  %v4976_v30 = vadd.f32 %v3450_v21, %v1677_v37 }
 0x12c   : > { %v4974_v36 = vadd.f32 %v3834_v18, %v3456_v38  ;;  %v3835_v56 = vpop.f32.mrf.mxu1 }
 0x12d   : > { %v3458_v19 = vpop.f32.mrf.mxu0 }
 0x12e   : > { %v3459_v29 = vadd.f32 %v3458_v19, %v3457_v49  ;;  %v1680_v1 = vpop.f32.mrf.mxu1  ;;  %v5578_v49 = vld [vmem:[#allocation6_spill] sm:$0xff] }
 0x12f   : > { %v3460_v58 = vpop.f32.mrf.mxu0  ;;  %2544 = vmatmul.mubr.bf16.gmra.mxu0 %v4372_v42  ;;  %v4984_v33 = vadd.f32 %v3453_v62, %v1680_v1  ;;  %v1078_v62 = vshll.u32 %v880_v47, 16 }
 0x130   : > { %v4981_v15 = vadd.f32 %v3835_v56, %v3459_v29  ;;  %2551 = vmatprep.mubr.bf16.mxu0 %v5576_v41  ;;  %v3838_v16 = vpop.f32.mrf.mxu1 }
 0x131   : > { %v3461_v50 = vpop.f32.mrf.mxu0  ;;  %3933 = vmatmul.mubr.bf16.gmra.mxu1 %v4703_v46  ;;  %v5577_v46 = vld [vmem:[#allocation3_spill] sm:$0xff]  ;;  %v1080_v3 = vrot.slane %v1078_v62, 1 }
 0x132   : > { %v3462_v21 = vadd.f32 %v3461_v50, %v3460_v58  ;;  %3936 = vmatprep.mubr.bf16.mxu1 %v4707_v44  ;;  %v1693_v42 = vpop.f32.mrf.mxu1  ;;  %v1076_v44 = vor.u32 %v1074_v9, %v1072_v55  ;;  %v1170_v50 = vsel %vm1122_vm4, %v1168_v23, %v1169_v27 }
 0x133   : > { %v3463_v4 = vpop.f32.mrf.mxu0 }
 0x134   : > { %v4990_v20 = vadd.f32 %v3462_v21, %v1693_v42  ;;  %v3839_v25 = vpop.f32.mrf.mxu1  ;;  %v1081_v56 = vsel %vm881_vm3, %v1076_v44, %v1080_v3  ;;  %v1171_v42 = vrot.slane %v880_v47, 1 }
 0x135   : > { %v3464_v51 = vpop.f32.mrf.mxu0 }
 0x136   : > { %v3465_v28 = vadd.f32 %v3464_v51, %v3463_v4  ;;  %v1696_v26 = vpop.f32.mrf.mxu1 }
 0x137   : > { %v3466_v34 = vpop.f32.mrf.mxu0  ;;  %2552 = vmatmul.mubr.bf16.gmra.mxu0 %v5577_v46 }
 0x138   : > { %2559 = vmatprep.mubr.bf16.mxu0 %v1073_v14  ;;  %v4995_v24 = vadd.f32 %v3465_v28, %v1696_v26  ;;  %v3842_v13 = vpop.f32.mrf.mxu1 }
 0x139   : > { %v3467_v39 = vpop.f32.mrf.mxu0  ;;  %3937 = vmatmul.mubr.bf16.gmra.mxu1 %v4722_v43 }
 0x13a   : > { %v3468_v18 = vadd.f32 %v3467_v39, %v3466_v34  ;;  %3940 = vmatprep.mubr.bf16.mxu1 %v5578_v49  ;;  %v1709_v19 = vpop.f32.mrf.mxu1 }
 0x13b   : > { %v3469_v38 = vpop.f32.mrf.mxu0 }
 0x13c   : > { %v4999_v37 = vadd.f32 %v3838_v16, %v3468_v18  ;;  %v3843_v29 = vpop.f32.mrf.mxu1 }
 0x13d   : > { %v3470_v11 = vpop.f32.mrf.mxu0 }
 0x13e   : > { %v3471_v58 = vadd.f32 %v3470_v11, %v3469_v38  ;;  %v1712_v41 = vpop.f32.mrf.mxu1 }
 0x13f   : > { %v3472_v1 = vpop.f32.mrf.mxu0  ;;  %2560 = vmatmul.mubr.bf16.gmra.mxu0 %v4960_v2 }
 0x140   : > { %v5005_v43 = vadd.f32 %v3839_v25, %v3471_v58  ;;  %2567 = vmatprep.mubr.bf16.mxu0 %v1081_v56  ;;  %v3846_v55 = vpop.f32.mrf.mxu1 }
 0x141   : > { %v3473_v0 = vpop.f32.mrf.mxu0  ;;  %3941 = vmatmul.mubr.bf16.gmra.mxu1 %v4736_v40  ;;  %v5010_v21 = vadd.f32 %v3846_v55, %v4876_v35  ;;  %v1172_v35 = vsel %vm1122_vm4, %v1169_v27, %v1171_v42 }
 0x142   : > { %v3474_v16 = vadd.f32 %v3473_v0, %v3472_v1  ;;  %3944 = vmatprep.mubr.bf16.mxu1 %v1170_v50  ;;  %v1725_v2 = vpop.f32.mrf.mxu1 }
 0x143   : > { %v3475_v4 = vpop.f32.mrf.mxu0  ;;  %v5015_v14 = vadd.f32 %v4859_v22, %v1725_v2 }
 0x144   : > { %v5012_v51 = vadd.f32 %v3474_v16, %v1709_v19  ;;  %v3847_v62 = vpop.f32.mrf.mxu1 }
 0x145   : > { %v3476_v9 = vpop.f32.mrf.mxu0  ;;  %v5018_v28 = vadd.f32 %v3847_v62, %v4884_v53 }
 0x146   : > { %v3477_v25 = vadd.f32 %v3476_v9, %v3475_v4  ;;  %v1728_v47 = vpop.f32.mrf.mxu1 }
 0x147   : > { %v3478_v40 = vpop.f32.mrf.mxu0  ;;  %2568 = vmatmul.mubr.bf16.gmra.mxu0 %v4971_v45  ;;  %v5025_v46 = vadd.f32 %v4870_v61, %v1728_v47 }
 0x148   : > { %v5022_v34 = vadd.f32 %v3477_v25, %v1712_v41  ;;  %v3850_v22 = vpop.f32.mrf.mxu1 }
 0x149   : > { %v3479_v26 = vpop.f32.mrf.mxu0  ;;  %3945 = vmatmul.mubr.bf16.gmra.mxu1 %v1172_v35  ;;  %v5028_v44 = vadd.f32 %v3850_v22, %v4902_v31 }
 0x14a   : > { %v3480_v39 = vadd.f32 %v3479_v26, %v3478_v40  ;;  %v1741_v18 = vpop.f32.mrf.mxu1 }
 0x14b   : > { %5579 = vst [vmem:[#allocation2_spill] sm:$0xff] %v5028_v44  ;;  %v3481_v53 = vpop.f32.mrf.mxu0  ;;  %v5033_v45 = vadd.f32 %v4890_v63, %v1741_v18 }
 0x14c   : > { %v5030_v3 = vadd.f32 %v3842_v13, %v3480_v39  ;;  %v3851_v49 = vpop.f32.mrf.mxu1 }
 0x14d   : > { %v3482_v38 = vpop.f32.mrf.mxu0  ;;  %v5036_v61 = vadd.f32 %v3851_v49, %v4913_v48 }
 0x14e   : > { %v3483_v19 = vadd.f32 %v3482_v38, %v3481_v53  ;;  %v1744_v11 = vpop.f32.mrf.mxu1 }
 0x14f   : > { %5580 = vst [vmem:[#allocation4_spill] sm:$0xff] %v5036_v61  ;;  %v3870_v23 = vpop.f32.mrf.mxu0  ;;  %v5041_v31 = vadd.f32 %v4898_v60, %v1744_v11 }
 0x150   : > { %v5038_v27 = vadd.f32 %v3843_v29, %v3483_v19 }
 0x151   : > { %v2095_v56 = vpop.f32.mrf.mxu0  ;;  %v3548_v13 = vpop.f32.mrf.mxu1 }
 0x153   : > { %v3871_v58 = vpop.f32.mrf.mxu0  ;;  %v3549_v1 = vpop.f32.mrf.mxu1 }
 0x154   : > { %v3550_v41 = vadd.f32 %v3549_v1, %v3548_v13 }
 0x155   : > { %v2098_v63 = vpop.f32.mrf.mxu0  ;;  %v3551_v50 = vpop.f32.mrf.mxu1 }
 0x156   : > { %v1935_v0 = vadd.f32 %v3550_v41, %v4924_v6 }
 0x157   : > { %v3874_v55 = vpop.f32.mrf.mxu0  ;;  %v3552_v16 = vpop.f32.mrf.mxu1 }
 0x158   : > { %v5044_v48 = vadd.f32 %v2095_v56, %v1935_v0  ;;  %v3553_v4 = vadd.f32 %v3552_v16, %v3551_v50 }
 0x159   : > { %v2111_v29 = vpop.f32.mrf.mxu0  ;;  %v3554_v42 = vpop.f32.mrf.mxu1 }
 0x15a   : > { %v1938_v2 = vadd.f32 %v3553_v4, %v4936_v5 }
 0x15b   : > { %v3875_v60 = vpop.f32.mrf.mxu0  ;;  %v3555_v9 = vpop.f32.mrf.mxu1 }
 0x15c   : > { %v5047_v62 = vadd.f32 %v2098_v63, %v1938_v2  ;;  %v3556_v25 = vadd.f32 %v3555_v9, %v3554_v42 }
 0x15d   : > { %v2114_v40 = vpop.f32.mrf.mxu0  ;;  %v3557_v35 = vpop.f32.mrf.mxu1 }
 0x15e   : > { %v1943_v47 = vadd.f32 %v3556_v25, %v4916_v17 }
 0x15f   : > { %v3878_v26 = vpop.f32.mrf.mxu0  ;;  %v3558_v6 = vpop.f32.mrf.mxu1 }
 0x160   : > { %v3559_v22 = vadd.f32 %v3558_v6, %v3557_v35  ;;  %v5050_v53 = vadd.f32 %v3870_v23, %v1943_v47 }
 0x161   : > { %v2127_v39 = vpop.f32.mrf.mxu0  ;;  %v3560_v18 = vpop.f32.mrf.mxu1 }
 0x162   : > { %v1946_v38 = vadd.f32 %v3559_v22, %v4927_v10 }
 0x163   : > { %v3879_v49 = vpop.f32.mrf.mxu0  ;;  %v3561_v5 = vpop.f32.mrf.mxu1 }
 0x164   : > { %v3562_v19 = vadd.f32 %v3561_v5, %v3560_v18  ;;  %v5053_v56 = vadd.f32 %v3871_v58, %v1946_v38 }
 0x165   : > { %v2130_v11 = vpop.f32.mrf.mxu0  ;;  %v3563_v13 = vpop.f32.mrf.mxu1 }
 0x166   : > { %v1951_v1 = vadd.f32 %v3562_v19, %v4943_v12 }
 0x167   : > { %v5056_v41 = vpop.f32.mrf.mxu0  ;;  %v3564_v17 = vpop.f32.mrf.mxu1 }
 0x168   : > { %v3565_v63 = vadd.f32 %v3564_v17, %v3563_v13  ;;  %v5058_v0 = vadd.f32 %v2111_v29, %v1951_v1 }
 0x169   : > { %v2143_v50 = vpop.f32.mrf.mxu0  ;;  %v3566_v23 = vpop.f32.mrf.mxu1 }
 0x16a   : > { %v1954_v16 = vadd.f32 %v3565_v63, %v4950_v52 }
 0x16b   : > { %v5061_v10 = vpop.f32.mrf.mxu0  ;;  %v3567_v4 = vpop.f32.mrf.mxu1 }
 0x16c   : > { %v3568_v42 = vadd.f32 %v3567_v4, %v3566_v23  ;;  %v5063_v58 = vadd.f32 %v2114_v40, %v1954_v16 }
 0x16d   : > { %v2146_v2 = vpop.f32.mrf.mxu0  ;;  %v3569_v9 = vpop.f32.mrf.mxu1 }
 0x16e   : > { %v1959_v12 = vadd.f32 %v3568_v42, %v4939_v57 }
 0x16f   : > { %v5066_v25 = vpop.f32.mrf.mxu0  ;;  %v3570_v35 = vpop.f32.mrf.mxu1 }
 0x170   : > { %v3571_v47 = vadd.f32 %v3570_v35, %v3569_v9  ;;  %v5070_v29 = vadd.f32 %v3874_v55, %v1959_v12 }
 0x171   : > { %v5068_v6 = vpop.f32.mrf.mxu0  ;;  %v3572_v22 = vpop.f32.mrf.mxu1 }
 0x172   : > { %v1962_v52 = vadd.f32 %v3571_v47, %v4945_v32 }
 0x173   : > { %v5073_v18 = vpop.f32.mrf.mxu0  ;;  %v3573_v38 = vpop.f32.mrf.mxu1 }
 0x174   : > { %v3574_v5 = vadd.f32 %v3573_v38, %v3572_v22  ;;  %v5077_v19 = vadd.f32 %v3875_v60, %v1962_v52 }
 0x175   : > { %v5075_v40 = vpop.f32.mrf.mxu0  ;;  %v3575_v57 = vpop.f32.mrf.mxu1 }
 0x176   : > { %v1967_v13 = vadd.f32 %v3574_v5, %v4956_v8 }
 0x177   : > { %v5080_v1 = vpop.f32.mrf.mxu0  ;;  %v3576_v17 = vpop.f32.mrf.mxu1 }
 0x178   : > { %v3577_v63 = vadd.f32 %v3576_v17, %v3575_v57  ;;  %v5084_v23 = vadd.f32 %v2127_v39, %v1967_v13 }
 0x179   : > { %v5082_v55 = vpop.f32.mrf.mxu0  ;;  %v3578_v32 = vpop.f32.mrf.mxu1 }
 0x17a   : > { %v1970_v16 = vadd.f32 %v3577_v63, %v4966_v7 }
 0x17b   : > { %v5087_v4 = vpop.f32.mrf.mxu0  ;;  %v3579_v42 = vpop.f32.mrf.mxu1 }
 0x17c   : > { %v3580_v9 = vadd.f32 %v3579_v42, %v3578_v32  ;;  %v5091_v12 = vadd.f32 %v2130_v11, %v1970_v16 }
 0x17d   : > { %v5089_v60 = vpop.f32.mrf.mxu0  ;;  %v3581_v8 = vpop.f32.mrf.mxu1 }
 0x17e   : > { %v1975_v35 = vadd.f32 %v3580_v9, %v4953_v59 }
 0x17f   : > { %v5094_v47 = vpop.f32.mrf.mxu0  ;;  %v3582_v22 = vpop.f32.mrf.mxu1 }
 0x180   : > { %v3583_v52 = vadd.f32 %v3582_v22, %v3581_v8  ;;  %v5098_v38 = vadd.f32 %v3878_v26, %v1975_v35 }
 0x181   : > { %v5096_v39 = vpop.f32.mrf.mxu0  ;;  %v3584_v7 = vpop.f32.mrf.mxu1 }
 0x182   : > { %v1978_v5 = vadd.f32 %v3583_v52, %v4962_v54 }
 0x183   : > { %v5101_v57 = vpop.f32.mrf.mxu0  ;;  %v3585_v13 = vpop.f32.mrf.mxu1 }
 0x184   : > { %v3586_v17 = vadd.f32 %v3585_v13, %v3584_v7  ;;  %v5105_v63 = vadd.f32 %v3879_v49, %v1978_v5 }
 0x185   : > { %v5103_v11 = vpop.f32.mrf.mxu0  ;;  %v3587_v59 = vpop.f32.mrf.mxu1 }
 0x186   : > { %v1983_v32 = vadd.f32 %v3586_v17, %v4976_v30 }
 0x187   : > { %v5108_v16 = vpop.f32.mrf.mxu0  ;;  %v3588_v42 = vpop.f32.mrf.mxu1 }
 0x188   : > { %5581 = vst [vmem:[#allocation5_spill] sm:$0xff] %v5108_v16  ;;  %v3589_v9 = vadd.f32 %v3588_v42, %v3587_v59  ;;  %v5112_v8 = vadd.f32 %v2143_v50, %v1983_v32 }
 0x189   : > { %v5110_v26 = vpop.f32.mrf.mxu0  ;;  %v3590_v54 = vpop.f32.mrf.mxu1 }
 0x18a   : > { %v1986_v35 = vadd.f32 %v3589_v9, %v4984_v33 }
 0x18b   : > { %v5115_v22 = vpop.f32.mrf.mxu0  ;;  %v3591_v52 = vpop.f32.mrf.mxu1 }
 0x18c   : > { %5582 = vst [vmem:[#allocation3_spill] sm:$0xff] %v5115_v22  ;;  %v3592_v7 = vadd.f32 %v3591_v52, %v3590_v54  ;;  %v5119_v5 = vadd.f32 %v2146_v2, %v1986_v35 }
 0x18d   : > { %v5117_v49 = vpop.f32.mrf.mxu0  ;;  %v3593_v30 = vpop.f32.mrf.mxu1 }
 0x18e   : > { %v1991_v13 = vadd.f32 %v3592_v7, %v4974_v36 }
 0x18f   : > { %v3684_v17 = vpop.f32.mrf.mxu0  ;;  %v3594_v59 = vpop.f32.mrf.mxu1 }
 0x190   : > { %v3595_v42 = vadd.f32 %v3594_v59, %v3593_v30  ;;  %v5123_v50 = vadd.f32 %v5056_v41, %v1991_v13 }
 0x191   : > { %v3685_v61 = vpop.f32.mrf.mxu0  ;;  %v3596_v32 = vpop.f32.mrf.mxu1 }
 0x192   : > { %v5125_v33 = vadd.f32 %v3685_v61, %v3684_v17  ;;  %v1994_v9 = vadd.f32 %v3595_v42, %v4981_v15 }
 0x193   : > { %v3687_v54 = vpop.f32.mrf.mxu0  ;;  %v3597_v52 = vpop.f32.mrf.mxu1 }
 0x194   : > { %v3598_v22 = vadd.f32 %v3597_v52, %v3596_v32  ;;  %v5129_v35 = vadd.f32 %v5061_v10, %v1994_v9 }
 0x195   : > { %v3688_v2 = vpop.f32.mrf.mxu0  ;;  %v3599_v36 = vpop.f32.mrf.mxu1 }
 0x196   : > { %v5131_v7 = vadd.f32 %v3688_v2, %v3687_v54  ;;  %v1999_v30 = vadd.f32 %v3598_v22, %v4990_v20 }
 0x197   : > { %v5134_v59 = vpop.f32.mrf.mxu0  ;;  %v3600_v41 = vpop.f32.mrf.mxu1 }
 0x198   : > { %v3601_v13 = vadd.f32 %v3600_v41, %v3599_v36  ;;  %v5139_v15 = vadd.f32 %v5068_v6, %v1999_v30 }
 0x199   : > { %v5136_v61 = vpop.f32.mrf.mxu0  ;;  %v3602_v17 = vpop.f32.mrf.mxu1 }
 0x19a   : > { %v2002_v42 = vadd.f32 %v3601_v13, %v4995_v24 }
 0x19b   : > { %v5142_v32 = vpop.f32.mrf.mxu0  ;;  %v3603_v10 = vpop.f32.mrf.mxu1 }
 0x19c   : > { %v3604_v9 = vadd.f32 %v3603_v10, %v3602_v17  ;;  %v5147_v20 = vadd.f32 %v5075_v40, %v2002_v42 }
 0x19d   : > { %v5144_v54 = vpop.f32.mrf.mxu0  ;;  %v3605_v22 = vpop.f32.mrf.mxu1 }
 0x19e   : > { %5583 = vst [vmem:[#allocation6_spill] sm:$0xff] %v5147_v20  ;;  %v2007_v52 = vadd.f32 %v3604_v9, %v4999_v37 }
 0x19f   : > { %v5150_v2 = vpop.f32.mrf.mxu0  ;;  %v3606_v36 = vpop.f32.mrf.mxu1 }
 0x1a0   : > { %v3607_v6 = vadd.f32 %v3606_v36, %v3605_v22  ;;  %v5155_v24 = vadd.f32 %v5066_v25, %v2007_v52 }
 0x1a1   : > { %v5152_v30 = vpop.f32.mrf.mxu0  ;;  %v3608_v41 = vpop.f32.mrf.mxu1 }
 0x1a2   : > { %v2010_v13 = vadd.f32 %v3607_v6, %v5005_v43 }
 0x1a3   : > { %v5158_v17 = vpop.f32.mrf.mxu0  ;;  %v3609_v10 = vpop.f32.mrf.mxu1 }
 0x1a4   : > { %v3610_v40 = vadd.f32 %v3609_v10, %v3608_v41  ;;  %v5163_v37 = vadd.f32 %v5073_v18, %v2010_v13 }
 0x1a5   : > { %v5160_v42 = vpop.f32.mrf.mxu0  ;;  %v3611_v9 = vpop.f32.mrf.mxu1 }
 0x1a6   : > { %v2015_v22 = vadd.f32 %v3610_v40, %v5012_v51 }
 0x1a7   : > { %v5166_v36 = vpop.f32.mrf.mxu0  ;;  %v3612_v16 = vpop.f32.mrf.mxu1 }
 0x1a8   : > { %v3613_v25 = vadd.f32 %v3612_v16, %v3611_v9  ;;  %v5171_v43 = vadd.f32 %v5082_v55, %v2015_v22 }
 0x1a9   : > { %v5168_v52 = vpop.f32.mrf.mxu0  ;;  %v3614_v6 = vpop.f32.mrf.mxu1 }
 0x1aa   : > { %5584 = vst [vmem:[#allocation7_spill] sm:$0xff] %v5171_v43  ;;  %v2018_v41 = vadd.f32 %v3613_v25, %v5022_v34 }
 0x1ab   : > { %v5174_v10 = vpop.f32.mrf.mxu0  ;;  %v3615_v44 = vpop.f32.mrf.mxu1 }
 0x1ac   : > { %v3616_v18 = vadd.f32 %v3615_v44, %v3614_v6  ;;  %v5179_v51 = vadd.f32 %v5089_v60, %v2018_v41 }
 0x1ad   : > { %v5176_v13 = vpop.f32.mrf.mxu0  ;;  %v3617_v40 = vpop.f32.mrf.mxu1 }
 0x1ae   : > { %5585 = vst [vmem:[#allocation8_spill] sm:$0xff] %v5179_v51  ;;  %v2023_v16 = vadd.f32 %v3616_v18, %v5030_v3 }
 0x1af   : > { %v5182_v9 = vpop.f32.mrf.mxu0  ;;  %v3618_v20 = vpop.f32.mrf.mxu1 }
 0x1b0   : > { %v3619_v55 = vadd.f32 %v3618_v20, %v3617_v40  ;;  %v5187_v34 = vadd.f32 %v5080_v1, %v2023_v16 }
 0x1b1   : > { %v5184_v22 = vpop.f32.mrf.mxu0  ;;  %v3620_v25 = vpop.f32.mrf.mxu1 }
 0x1b2   : > { %5586 = vst [vmem:[#allocation9_spill] sm:$0xff] %v5187_v34  ;;  %v2026_v44 = vadd.f32 %v3619_v55, %v5038_v27 }
 0x1b3   : > { %v5190_v6 = vpop.f32.mrf.mxu0  ;;  %v3621_v43 = vpop.f32.mrf.mxu1 }
 0x1b4   : > { %v3622_v60 = vadd.f32 %v3621_v43, %v3620_v25  ;;  %v5195_v3 = vadd.f32 %v5087_v4, %v2026_v44 }
 0x1b5   : > { %v5192_v41 = vpop.f32.mrf.mxu0  ;;  %v3623_v18 = vpop.f32.mrf.mxu1 }
 0x1b6   : > { %5587 = vst [vmem:[#allocation10_spill] sm:$0xff] %v5195_v3  ;;  %v2031_v20 = vadd.f32 %v3622_v60, %v5015_v14 }
 0x1b7   : > { %v5198_v40 = vpop.f32.mrf.mxu0  ;;  %v3624_v51 = vpop.f32.mrf.mxu1 }
 0x1b8   : > { %v3625_v1 = vadd.f32 %v3624_v51, %v3623_v18  ;;  %v5203_v27 = vadd.f32 %v5096_v39, %v2031_v20 }
 0x1b9   : > { %v5200_v16 = vpop.f32.mrf.mxu0  ;;  %v3626_v55 = vpop.f32.mrf.mxu1 }
 0x1ba   : > { %5588 = vst [vmem:[#allocation11_spill] sm:$0xff] %v5203_v27  ;;  %v2034_v43 = vadd.f32 %v3625_v1, %v5025_v46 }
 0x1bb   : > { %v5206_v25 = vpop.f32.mrf.mxu0  ;;  %v3627_v34 = vpop.f32.mrf.mxu1 }
 0x1bc   : > { %v3628_v4 = vadd.f32 %v3627_v34, %v3626_v55  ;;  %v5211_v14 = vadd.f32 %v5103_v11, %v2034_v43 }
 0x1bd   : > { %v5208_v44 = vpop.f32.mrf.mxu0  ;;  %v3629_v60 = vpop.f32.mrf.mxu1 }
 0x1be   : > { %5589 = vst [vmem:[#allocation12_spill] sm:$0xff] %v5211_v14  ;;  %v2039_v51 = vadd.f32 %v3628_v4, %v5010_v21 }
 0x1bf   : > { %v5214_v18 = vpop.f32.mrf.mxu0  ;;  %v3630_v3 = vpop.f32.mrf.mxu1 }
 0x1c0   : > { %v3631_v39 = vadd.f32 %v3630_v3, %v3629_v60  ;;  %v5219_v46 = vadd.f32 %v5094_v47, %v2039_v51 }
 0x1c1   : > { %v5216_v20 = vpop.f32.mrf.mxu0  ;;  %v3632_v1 = vpop.f32.mrf.mxu1 }
 0x1c2   : > { %5590 = vst [vmem:[#allocation13_spill] sm:$0xff] %v5219_v46  ;;  %v2042_v34 = vadd.f32 %v3631_v39, %v5018_v28 }
 0x1c3   : > { %v5222_v55 = vpop.f32.mrf.mxu0  ;;  %v3633_v27 = vpop.f32.mrf.mxu1 }
 0x1c4   : > { %v3634_v11 = vadd.f32 %v3633_v27, %v3632_v1  ;;  %v5227_v21 = vadd.f32 %v5101_v57, %v2042_v34 }
 0x1c5   : > { %v5224_v43 = vpop.f32.mrf.mxu0  ;;  %v3635_v4 = vpop.f32.mrf.mxu1 }
 0x1c6   : > { %5591 = vst [vmem:[#allocation14_spill] sm:$0xff] %v5227_v21  ;;  %v2047_v3 = vadd.f32 %v3634_v11, %v5033_v45 }
 0x1c7   : > { %v5230_v60 = vpop.f32.mrf.mxu0  ;;  %v3636_v14 = vpop.f32.mrf.mxu1 }
 0x1c8   : > { %v3637_v47 = vadd.f32 %v3636_v14, %v3635_v4  ;;  %v5235_v28 = vadd.f32 %v5110_v26, %v2047_v3  ;;  %v3692_v26 = vadd.f32 %v5136_v61, %v5134_v59 }
 0x1c9   : > { %v5232_v51 = vpop.f32.mrf.mxu0  ;;  %v5237_v39 = vpop.f32.mrf.mxu1 }
 0x1ca   : > { %5592 = vst [vmem:[#allocation15_spill] sm:$0xff] %v5235_v28  ;;  %v2050_v27 = vadd.f32 %v3637_v47, %v5041_v31 }
 0x1cb   : > { %v5240_v1 = vpop.f32.mrf.mxu0  ;;  %v5242_v57 = vpop.f32.mrf.mxu1 }
 0x1cc   : > { %5593 = vst [vmem:[#allocation16_spill] sm:$0xff] %v5242_v57  ;;  %v5247_v45 = vadd.f32 %v5117_v49, %v2050_v27  ;;  %v5264_v49 = vld [vmem:[%s5552_s4] ss:$0 sm:$0xff] }
 0x1cd   : > { %v5244_v34 = vpop.f32.mrf.mxu0  ;;  %v5249_v11 = vpop.f32.mrf.mxu1  ;;  %v5279_v57 = vld [vmem:[%s5553_s5] ss:$0 sm:$0xff] }
 0x1ce   : > { %5594 = vst [vmem:[#allocation17_spill] sm:$0xff] %v5247_v45  ;;  %5595 = vst [vmem:[#allocation18_spill] sm:$0xff] %v5249_v11  ;;  %v3695_v45 = vadd.f32 %v5144_v54, %v5142_v32 }
 0x1cf   : > { %v5251_v14 = vpop.f32.mrf.mxu0  ;;  %v5253_v4 = vpop.f32.mrf.mxu1 }
 0x1d0   : > { %5596 = vst [vmem:[#allocation19_spill] sm:$0xff] %v5253_v4 }
 0x1d1   : > { %v5257_v3 = vpop.f32.mrf.mxu0  ;;  %v3918_v31 = vpop.f32.mrf.mxu1 }
 0x1d2   : > { %v2619_v47 = vadd.f32 %v3918_v31, %v3692_v26 }
 0x1d3   : > { %v5259_v28 = vpop.f32.mrf.mxu0  ;;  %v2610_v27 = vpop.f32.mrf.mxu1 }
 0x1d4   : > { %v2739_v21 = vadd.f32 %v2619_v47, %v5050_v53  ;;  %v2611_v59 = vadd.f32 %v5125_v33, %v2610_v27 }
 0x1d5   : > { %v5270_v61 = vpop.f32.mrf.mxu0  ;;  %v3919_v4 = vpop.f32.mrf.mxu1 }
 0x1d6   : > { %v2778_v26 = vadd.f32 %v5264_v49, %v2739_v21  ;;  %v2737_v31 = vadd.f32 %v2611_v59, %v5044_v48  ;;  %v2622_v11 = vadd.f32 %v3919_v4, %v3695_v45  ;;  %v3704_v48 = vadd.f32 %v5168_v52, %v5166_v36  ;;  %v5292_v45 = vld [vmem:[%s5554_s6] ss:$0 sm:$0xff] }
 0x1d7   : > { %v5274_v46 = vpop.f32.mrf.mxu0  ;;  %v2613_v32 = vpop.f32.mrf.mxu1  ;;  %v3707_v36 = vadd.f32 %v5176_v13, %v5174_v10 }
 0x1d8   : > { %v2810_v53 = vmax.f32 %v2778_v26, 0.0  ;;  %v2776_v33 = vadd.f32 %v5264_v49, %v2737_v31  ;;  %v2740_v54 = vadd.f32 %v2622_v11, %v5053_v56  ;;  %v2614_v47 = vadd.f32 %v5131_v7, %v2613_v32 }
 0x1d9   : > { %v5285_v21 = vpop.f32.mrf.mxu0  ;;  %v3922_v4 = vpop.f32.mrf.mxu1  ;;  %v3698_v7 = vadd.f32 %v5152_v30, %v5150_v2  ;;  %v3701_v30 = vadd.f32 %v5160_v42, %v5158_v17 }
 0x1da   : > { %v2849_v27 = vmul.f32 %v5279_v57, %v2810_v53  ;;  %v2808_v59 = vmax.f32 %v2776_v33, 0.0  ;;  %v2779_v26 = vadd.f32 %v5264_v49, %v2740_v54  ;;  %v2738_v56 = vadd.f32 %v2614_v47, %v5047_v62 }
 0x1db   : > { %v5297_v11 = vpop.f32.mrf.mxu0  ;;  %v2635_v52 = vadd.f32 %v3922_v4, %v3704_v48  ;;  %v2626_v31 = vpop.f32.mrf.mxu1 }
 0x1dc   : > { %v2888_v32 = vadd.f32 %v5292_v45, %v2849_v27  ;;  %v2847_v62 = vmul.f32 %v5279_v57, %v2808_v59  ;;  %v2811_v53 = vmax.f32 %v2779_v26, 0.0  ;;  %v2777_v33 = vadd.f32 %v5264_v49, %v2738_v56 }
 0x1dd   : > { %v5311_v2 = vpop.f32.mrf.mxu0  ;;  %v2743_v10 = vadd.f32 %v2635_v52, %v5070_v29  ;;  %v2627_v13 = vadd.f32 %v3698_v7, %v2626_v31  ;;  %v3923_v54 = vpop.f32.mrf.mxu1  ;;  %v3716_v26 = vadd.f32 %v5200_v16, %v5198_v40 }
 0x1de   : > { %2920 = vst [vmem:[%s5306_s17 + $0x10] sm:$0xff] %v2888_v32  ;;  %v2886_v47 = vadd.f32 %v5292_v45, %v2847_v62  ;;  %v2850_v48 = vmul.f32 %v5279_v57, %v2811_v53  ;;  %v2809_v4 = vmax.f32 %v2777_v33, 0.0  ;;  %v2638_v27 = vadd.f32 %v3923_v54, %v3707_v36 }
 0x1df   : > { %v5319_v59 = vpop.f32.mrf.mxu0  ;;  %v2782_v56 = vadd.f32 %v5264_v49, %v2743_v10  ;;  %v2741_v17 = vadd.f32 %v2627_v13, %v5058_v0  ;;  %v2629_v29 = vpop.f32.mrf.mxu1  ;;  %v3710_v32 = vadd.f32 %v5184_v22, %v5182_v9 }
 0x1e0   : > { %2918 = vst [vmem:[%s5306_s17] sm:$0xff] %v2886_v47  ;;  %v2889_v42 = vadd.f32 %v5292_v45, %v2850_v48  ;;  %v2848_v7 = vmul.f32 %v5279_v57, %v2809_v4  ;;  %v2744_v52 = vadd.f32 %v2638_v27, %v5077_v19  ;;  %v2630_v36 = vadd.f32 %v3701_v30, %v2629_v29 }
 0x1e1   : > { %v5329_v31 = vpop.f32.mrf.mxu0  ;;  %v2814_v40 = vmax.f32 %v2782_v56, 0.0  ;;  %v2780_v16 = vadd.f32 %v5264_v49, %v2741_v17  ;;  %v3926_v62 = vpop.f32.mrf.mxu1 }
 0x1e2   : > { %2921 = vst [vmem:[%s5306_s17 + $0x18] sm:$0xff] %v2889_v42  ;;  %v2887_v0 = vadd.f32 %v5292_v45, %v2848_v7  ;;  %v2783_v53 = vadd.f32 %v5264_v49, %v2744_v52  ;;  %v2742_v33 = vadd.f32 %v2630_v36, %v5063_v58  ;;  %v2651_v10 = vadd.f32 %v3926_v62, %v3716_v26 }
 0x1e3   : > { %v5338_v19 = vpop.f32.mrf.mxu0  ;;  %v2853_v30 = vmul.f32 %v5279_v57, %v2814_v40  ;;  %v2812_v13 = vmax.f32 %v2780_v16, 0.0  ;;  %v2642_v54 = vpop.f32.mrf.mxu1  ;;  %v3719_v58 = vadd.f32 %v5208_v44, %v5206_v25  ;;  %v3713_v52 = vadd.f32 %v5192_v41, %v5190_v6 }
 0x1e4   : > { %2919 = vst [vmem:[%s5306_s17 + $0x8] sm:$0xff] %v2887_v0  ;;  %v2815_v9 = vmax.f32 %v2783_v53, 0.0  ;;  %v2781_v22 = vadd.f32 %v5264_v49, %v2742_v33  ;;  %v2747_v47 = vadd.f32 %v2651_v10, %v5098_v38  ;;  %v2643_v48 = vadd.f32 %v3710_v32, %v2642_v54 }
 0x1e5   : > { %v5344_v4 = vpop.f32.mrf.mxu0  ;;  %v2892_v27 = vadd.f32 %v5292_v45, %v2853_v30  ;;  %v2851_v26 = vmul.f32 %v5279_v57, %v2812_v13  ;;  %v3927_v56 = vpop.f32.mrf.mxu1  ;;  %v3728_v25 = vadd.f32 %v5232_v51, %v5230_v60  ;;  %v3722_v6 = vadd.f32 %v5216_v20, %v5214_v18 }
 0x1e6   : > { %v2854_v17 = vmul.f32 %v5279_v57, %v2815_v9  ;;  %v2813_v29 = vmax.f32 %v2781_v22, 0.0  ;;  %v2786_v42 = vadd.f32 %v5264_v49, %v2747_v47  ;;  %v2745_v7 = vadd.f32 %v2643_v48, %v5084_v23 }
 0x1e7   : > { %v5353_v38 = vpop.f32.mrf.mxu0  ;;  %2924 = vst [vmem:[%s5306_s17 + $0x30] sm:$0xff] %v2892_v27  ;;  %v2890_v44 = vadd.f32 %v5292_v45, %v2851_v26  ;;  %v2654_v36 = vadd.f32 %v3927_v56, %v3719_v58  ;;  %v2645_v32 = vpop.f32.mrf.mxu1  ;;  %v3731_v54 = vadd.f32 %v5244_v34, %v5240_v1  ;;  %v3725_v27 = vadd.f32 %v5224_v43, %v5222_v55 }
 0x1e8   : > { %v2893_v40 = vadd.f32 %v5292_v45, %v2854_v17  ;;  %v2852_v16 = vmul.f32 %v5279_v57, %v2813_v29  ;;  %v2818_v62 = vmax.f32 %v2786_v42, 0.0  ;;  %v2784_v23 = vadd.f32 %v5264_v49, %v2745_v7 }
 0x1e9   : > { %v5364_v0 = vpop.f32.mrf.mxu0  ;;  %2922 = vst [vmem:[%s5306_s17 + $0x20] sm:$0xff] %v2890_v44  ;;  %v2748_v41 = vadd.f32 %v2654_v36, %v5105_v63  ;;  %v2646_v60 = vadd.f32 %v3713_v52, %v2645_v32  ;;  %v3930_v51 = vpop.f32.mrf.mxu1 }
 0x1ea   : > { %2925 = vst [vmem:[%s5306_s17 + $0x38] sm:$0xff] %v2893_v40  ;;  %v2891_v53 = vadd.f32 %v5292_v45, %v2852_v16  ;;  %v2857_v33 = vmul.f32 %v5279_v57, %v2818_v62  ;;  %v2816_v10 = vmax.f32 %v2784_v23, 0.0  ;;  %v2667_v30 = vadd.f32 %v3930_v51, %v3728_v25 }
 0x1eb   : > { %v5373_v13 = vpop.f32.mrf.mxu0  ;;  %v2787_v18 = vadd.f32 %v5264_v49, %v2748_v41  ;;  %v2746_v20 = vadd.f32 %v2646_v60, %v5091_v12  ;;  %v2658_v63 = vpop.f32.mrf.mxu1  ;;  %v3734_v60 = vadd.f32 %v5257_v3, %v5251_v14  ;;  %v3737_v14 = vadd.f32 %v5270_v61, %v5259_v28 }
 0x1ec   : > { %2923 = vst [vmem:[%s5306_s17 + $0x28] sm:$0xff] %v2891_v53  ;;  %v2896_v9 = vadd.f32 %v5292_v45, %v2857_v33  ;;  %v2855_v22 = vmul.f32 %v5279_v57, %v2816_v10  ;;  %v2751_v47 = vadd.f32 %v2667_v30, %v5123_v50  ;;  %v2659_v48 = vadd.f32 %v3722_v6, %v2658_v63 }
 0x1ed   : > { %v5383_v58 = vpop.f32.mrf.mxu0  ;;  %v2819_v1 = vmax.f32 %v2787_v18, 0.0  ;;  %v2785_v34 = vadd.f32 %v5264_v49, %v2746_v20  ;;  %v3931_v26 = vpop.f32.mrf.mxu1 }
 0x1ee   : > { %2928 = vst [vmem:[%s5306_s17 + $0x50] sm:$0xff] %v2896_v9  ;;  %v2894_v12 = vadd.f32 %v5292_v45, %v2855_v22  ;;  %v2790_v56 = vadd.f32 %v5264_v49, %v2751_v47  ;;  %v2749_v17 = vadd.f32 %v2659_v48, %v5112_v8  ;;  %v2670_v29 = vadd.f32 %v3931_v26, %v3731_v54 }
 0x1ef   : > { %v5392_v50 = vpop.f32.mrf.mxu0  ;;  %v2858_v42 = vmul.f32 %v5279_v57, %v2819_v1  ;;  %v2817_v7 = vmax.f32 %v2785_v34, 0.0  ;;  %v2661_v52 = vpop.f32.mrf.mxu1  ;;  %v3740_v8 = vadd.f32 %v5285_v21, %v5274_v46  ;;  %v3743_v46 = vadd.f32 %v5311_v2, %v5297_v11 }
 0x1f0   : > { %2926 = vst [vmem:[%s5306_s17 + $0x40] sm:$0xff] %v2894_v12  ;;  %v2822_v55 = vmax.f32 %v2790_v56, 0.0  ;;  %v2788_v43 = vadd.f32 %v5264_v49, %v2749_v17  ;;  %v2752_v25 = vadd.f32 %v2670_v29, %v5129_v35  ;;  %v2662_v44 = vadd.f32 %v3725_v27, %v2661_v52  ;;  %v5597_v29 = vld [vmem:[#allocation6_spill] sm:$0xff] }
 0x1f1   : > { %v5398_v36 = vpop.f32.mrf.mxu0  ;;  %v2897_v32 = vadd.f32 %v5292_v45, %v2858_v42  ;;  %v2856_v40 = vmul.f32 %v5279_v57, %v2817_v7  ;;  %v3934_v16 = vpop.f32.mrf.mxu1  ;;  %v3752_v47 = vadd.f32 %v5364_v0, %v5353_v38  ;;  %v3746_v12 = vadd.f32 %v5329_v31, %v5319_v59 }
 0x1f2   : > { %v2861_v62 = vmul.f32 %v5279_v57, %v2822_v55  ;;  %v2820_v23 = vmax.f32 %v2788_v43, 0.0  ;;  %v2791_v6 = vadd.f32 %v5264_v49, %v2752_v25  ;;  %v2750_v41 = vadd.f32 %v2662_v44, %v5119_v5  ;;  %v5598_v25 = vld [vmem:[#allocation9_spill] sm:$0xff] }
 0x1f3   : > { %v5407_v35 = vpop.f32.mrf.mxu0  ;;  %2929 = vst [vmem:[%s5306_s17 + $0x58] sm:$0xff] %v2897_v32  ;;  %v2895_v21 = vadd.f32 %v5292_v45, %v2856_v40  ;;  %v2683_v51 = vadd.f32 %v3934_v16, %v3740_v8  ;;  %v2674_v53 = vpop.f32.mrf.mxu1  ;;  %v3755_v40 = vadd.f32 %v5383_v58, %v5373_v13 }
 0x1f4   : > { %v2900_v33 = vadd.f32 %v5292_v45, %v2861_v62  ;;  %v2859_v10 = vmul.f32 %v5279_v57, %v2820_v23  ;;  %v2823_v30 = vmax.f32 %v2791_v6, 0.0  ;;  %v2789_v5 = vadd.f32 %v5264_v49, %v2750_v41 }
 0x1f5   : > { %v5418_v54 = vpop.f32.mrf.mxu0  ;;  %2927 = vst [vmem:[%s5306_s17 + $0x48] sm:$0xff] %v2895_v21  ;;  %v2755_v3 = vadd.f32 %v2683_v51, %v5155_v24  ;;  %v2675_v11 = vadd.f32 %v3734_v60, %v2674_v53  ;;  %v3935_v2 = vpop.f32.mrf.mxu1  ;;  %v3749_v53 = vadd.f32 %v5344_v4, %v5338_v19  ;;  %v3758_v19 = vadd.f32 %v5398_v36, %v5392_v50  ;;  %v5601_v4 = vld [vmem:[#allocation10_spill] sm:$0xff] }
 0x1f6   : > { %2932 = vst [vmem:[%s5306_s17 + $0x70] sm:$0xff] %v2900_v33  ;;  %v2898_v18 = vadd.f32 %v5292_v45, %v2859_v10  ;;  %v2862_v20 = vmul.f32 %v5279_v57, %v2823_v30  ;;  %v2821_v63 = vmax.f32 %v2789_v5, 0.0  ;;  %v2686_v9 = vadd.f32 %v3935_v2, %v3743_v46  ;;  %v5599_v46 = vld [vmem:[#allocation7_spill] sm:$0xff]  ;;  %v5600_v2 = vld [vmem:[#allocation16_spill] sm:$0xff] }
 0x1f7   : > { %v3762_v22 = vpop.f32.mrf.mxu0  ;;  %v2794_v48 = vadd.f32 %v5264_v49, %v2755_v3  ;;  %v2753_v28 = vadd.f32 %v2675_v11, %v5139_v15  ;;  %v2677_v61 = vpop.f32.mrf.mxu1 }
 0x1f8   : > { %2930 = vst [vmem:[%s5306_s17 + $0x60] sm:$0xff] %v2898_v18  ;;  %v2901_v24 = vadd.f32 %v5292_v45, %v2862_v20  ;;  %v2860_v27 = vmul.f32 %v5279_v57, %v2821_v63  ;;  %v2756_v1 = vadd.f32 %v2686_v9, %v5163_v37  ;;  %v2678_v34 = vadd.f32 %v3737_v14, %v2677_v61 }
 0x1f9   : > { %v3763_v26 = vpop.f32.mrf.mxu0  ;;  %v2826_v56 = vmax.f32 %v2794_v48, 0.0  ;;  %v2792_v38 = vadd.f32 %v5264_v49, %v2753_v28  ;;  %v3938_v0 = vpop.f32.mrf.mxu1  ;;  %v3640_v18 = vadd.f32 %v5600_v2, %v5237_v39  ;;  %v5611_v2 = vld [vmem:[#allocation4_spill] sm:$0xff] }
 0x1fa   : > { %2933 = vst [vmem:[%s5306_s17 + $0x78] sm:$0xff] %v2901_v24  ;;  %v2899_v15 = vadd.f32 %v5292_v45, %v2860_v27  ;;  %v2795_v17 = vadd.f32 %v5264_v49, %v2756_v1  ;;  %v2754_v42 = vadd.f32 %v2678_v34, %v5597_v29  ;;  %v2699_v7 = vadd.f32 %v3938_v0, %v3752_v47  ;;  %v5602_v27 = vld [vmem:[#allocation8_spill] sm:$0xff]  ;;  %v5604_v0 = vld [vmem:[#allocation2_spill] sm:$0xff] }
 0x1fb   : > { %v3765_v52 = vpop.f32.mrf.mxu0  ;;  %v2865_v37 = vmul.f32 %v5279_v57, %v2826_v56  ;;  %v2824_v55 = vmax.f32 %v2792_v38, 0.0  ;;  %v2690_v43 = vpop.f32.mrf.mxu1  ;;  %v3764_v58 = vadd.f32 %v3763_v26, %v3762_v22  ;;  %v5603_v26 = vld [vmem:[#allocation13_spill] sm:$0xff] }
 0x1fc   : > { %2931 = vst [vmem:[%s5306_s17 + $0x68] sm:$0xff] %v2899_v15  ;;  %v2827_v59 = vmax.f32 %v2795_v17, 0.0  ;;  %v2793_v31 = vadd.f32 %v5264_v49, %v2754_v42  ;;  %v2759_v44 = vadd.f32 %v2699_v7, %v5598_v25  ;;  %v2691_v8 = vadd.f32 %v3746_v12, %v2690_v43  ;;  %v5606_v25 = vld [vmem:[#allocation18_spill] sm:$0xff] }
 0x1fd   : > { %v3766_v32 = vpop.f32.mrf.mxu0  ;;  %v2904_v16 = vadd.f32 %v5292_v45, %v2865_v37  ;;  %v2863_v62 = vmul.f32 %v5279_v57, %v2824_v55  ;;  %v3939_v23 = vpop.f32.mrf.mxu1  ;;  %v2055_v15 = vadd.f32 %v3640_v18, %v5604_v0  ;;  %v3761_v17 = vadd.f32 %v5418_v54, %v5407_v35  ;;  %v5605_v55 = vld [vmem:[#allocation11_spill] sm:$0xff] }
 0x1fe   : > { %v2866_v6 = vmul.f32 %v5279_v57, %v2827_v59  ;;  %v2825_v41 = vmax.f32 %v2793_v31, 0.0  ;;  %v2798_v60 = vadd.f32 %v5264_v49, %v2759_v44  ;;  %v2757_v21 = vadd.f32 %v2691_v8, %v5599_v46  ;;  %v5607_v44 = vld [vmem:[#allocation19_spill] sm:$0xff] }
 0x1ff   : > { %v5453_v51 = vpop.f32.mrf.mxu0  ;;  %2936 = vst [vmem:[%s5306_s17 + $0x90] sm:$0xff] %v2904_v16  ;;  %v2902_v13 = vadd.f32 %v5292_v45, %v2863_v62  ;;  %v2702_v33 = vadd.f32 %v3939_v23, %v3755_v40  ;;  %v2693_v10 = vpop.f32.mrf.mxu1  ;;  %v3767_v24 = vadd.f32 %v3766_v32, %v3765_v52  ;;  %v3643_v8 = vadd.f32 %v5607_v44, %v5606_v25  ;;  %v5608_v62 = vld [vmem:[#allocation14_spill] sm:$0xff] }
 0x200   : > { %v2905_v30 = vadd.f32 %v5292_v45, %v2866_v6  ;;  %v2864_v5 = vmul.f32 %v5279_v57, %v2825_v41  ;;  %v2830_v14 = vmax.f32 %v2798_v60, 0.0  ;;  %v2796_v3 = vadd.f32 %v5264_v49, %v2757_v21  ;;  %v5609_v60 = vld [vmem:[#allocation5_spill] sm:$0xff] }
 0x201   : > { %v3769_v11 = vpop.f32.mrf.mxu0  ;;  %2934 = vst [vmem:[%s5306_s17 + $0x80] sm:$0xff] %v2902_v13  ;;  %v2760_v20 = vadd.f32 %v2702_v33, %v5601_v4  ;;  %v2694_v63 = vadd.f32 %v3749_v53, %v2693_v10  ;;  %v3942_v9 = vpop.f32.mrf.mxu1  ;;  %v2216_v46 = vadd.f32 %v5609_v60, %v2055_v15  ;;  %v2058_v18 = vadd.f32 %v3643_v8, %v5611_v2 }
 0x202   : > { %2937 = vst [vmem:[%s5306_s17 + $0x98] sm:$0xff] %v2905_v30  ;;  %v2903_v22 = vadd.f32 %v5292_v45, %v2864_v5  ;;  %v2869_v47 = vmul.f32 %v5279_v57, %v2830_v14  ;;  %v2828_v48 = vmax.f32 %v2796_v3, 0.0  ;;  %v2715_v28 = vadd.f32 %v3942_v9, %v3764_v58  ;;  %v5610_v5 = vld [vmem:[#allocation12_spill] sm:$0xff] }
 0x203   : > { %v3771_v61 = vpop.f32.mrf.mxu0  ;;  %v2799_v39 = vadd.f32 %v5264_v49, %v2760_v20  ;;  %v2758_v1 = vadd.f32 %v2694_v63, %v5602_v27  ;;  %v2706_v50 = vpop.f32.mrf.mxu1  ;;  %v3770_v4 = vadd.f32 %v3769_v11, %v5453_v51 }
 0x204   : > { %2935 = vst [vmem:[%s5306_s17 + $0x88] sm:$0xff] %v2903_v22  ;;  %v2908_v36 = vadd.f32 %v5292_v45, %v2869_v47  ;;  %v2867_v34 = vmul.f32 %v5279_v57, %v2828_v48  ;;  %v2763_v12 = vadd.f32 %v2715_v28, %v5603_v26  ;;  %v2707_v56 = vadd.f32 %v3758_v19, %v2706_v50 }
 0x205   : > { %v3772_v38 = vpop.f32.mrf.mxu0  ;;  %v2831_v29 = vmax.f32 %v2799_v39, 0.0  ;;  %v2797_v42 = vadd.f32 %v5264_v49, %v2758_v1  ;;  %v3943_v7 = vpop.f32.mrf.mxu1 }
 0x206   : > { %2940 = vst [vmem:[%s5306_s17 + $0xb0] sm:$0xff] %v2908_v36  ;;  %v2906_v52 = vadd.f32 %v5292_v45, %v2867_v34  ;;  %v2802_v37 = vadd.f32 %v5264_v49, %v2763_v12  ;;  %v2761_v43 = vadd.f32 %v2707_v56, %v5605_v55  ;;  %v2718_v59 = vadd.f32 %v3943_v7, %v3767_v24  ;;  %v5612_v34 = vld [vmem:[#allocation3_spill] sm:$0xff]  ;;  %v5614_v55 = vld [vmem:[#allocation17_spill] sm:$0xff] }
 0x207   : > { %v3774_v31 = vpop.f32.mrf.mxu0  ;;  %v2870_v32 = vmul.f32 %v5279_v57, %v2831_v29  ;;  %v2829_v40 = vmax.f32 %v2797_v42, 0.0  ;;  %v2709_v35 = vpop.f32.mrf.mxu1  ;;  %v3773_v11 = vadd.f32 %v3772_v38, %v3771_v61  ;;  %v2219_v26 = vadd.f32 %v5612_v34, %v2058_v18  ;;  %v5613_v56 = vld [vmem:[#allocation15_spill] sm:$0xff] }
 0x208   : > { %2938 = vst [vmem:[%s5306_s17 + $0xa0] sm:$0xff] %v2906_v52  ;;  %v2834_v54 = vmax.f32 %v2802_v37, 0.0  ;;  %v2800_v16 = vadd.f32 %v5264_v49, %v2761_v43  ;;  %v2764_v23 = vadd.f32 %v2718_v59, %v5608_v62  ;;  %v2710_v6 = vadd.f32 %v3761_v17, %v2709_v35 }
 0x209   : > { %v3775_v41 = vpop.f32.mrf.mxu0  ;;  %v2909_v21 = vadd.f32 %v5292_v45, %v2870_v32  ;;  %v2868_v53 = vmul.f32 %v5279_v57, %v2829_v40  ;;  %v3946_v13 = vpop.f32.mrf.mxu1 }
 0x20a   : > { %v3776_v58 = vadd.f32 %v3775_v41, %v3774_v31  ;;  %v2873_v33 = vmul.f32 %v5279_v57, %v2834_v54  ;;  %v2832_v10 = vmax.f32 %v2800_v16, 0.0  ;;  %v2803_v30 = vadd.f32 %v5264_v49, %v2764_v23 }
 0x20b   : > { %v2762_v14 = vadd.f32 %v2710_v6, %v5610_v5  ;;  %v3777_v3 = vpop.f32.mrf.mxu0  ;;  %2941 = vst [vmem:[%s5306_s17 + $0xb8] sm:$0xff] %v2909_v21  ;;  %v2907_v19 = vadd.f32 %v5292_v45, %v2868_v53  ;;  %v2722_v63 = vpop.f32.mrf.mxu1 }
 0x20c   : > { %v2731_v20 = vadd.f32 %v3946_v13, %v3776_v58  ;;  %v2912_v9 = vadd.f32 %v5292_v45, %v2873_v33  ;;  %v2871_v22 = vmul.f32 %v5279_v57, %v2832_v10  ;;  %v2835_v47 = vmax.f32 %v2803_v30, 0.0 }
 0x20d   : > { %v2801_v48 = vadd.f32 %v5264_v49, %v2762_v14  ;;  %v3778_v28 = vpop.f32.mrf.mxu0  ;;  %2939 = vst [vmem:[%s5306_s17 + $0xa8] sm:$0xff] %v2907_v19  ;;  %v2723_v24 = vadd.f32 %v3770_v4, %v2722_v63  ;;  %v3947_v27 = vpop.f32.mrf.mxu1 }
 0x20e   : > { %v2767_v39 = vadd.f32 %v2731_v20, %v2216_v46  ;;  %v3779_v1 = vadd.f32 %v3778_v28, %v3777_v3  ;;  %2944 = vst [vmem:[%s5306_s17 + $0xd0] sm:$0xff] %v2912_v9  ;;  %v2910_v50 = vadd.f32 %v5292_v45, %v2871_v22  ;;  %v2874_v51 = vmul.f32 %v5279_v57, %v2835_v47 }
 0x20f   : > { %v2833_v36 = vmax.f32 %v2801_v48, 0.0  ;;  %v2765_v0 = vadd.f32 %v2723_v24, %v5613_v56  ;;  %v2725_v17 = vpop.f32.mrf.mxu1 }
 0x210   : > { %v2806_v12 = vadd.f32 %v5264_v49, %v2767_v39  ;;  %v2734_v15 = vadd.f32 %v3947_v27, %v3779_v1  ;;  %2942 = vst [vmem:[%s5306_s17 + $0xc0] sm:$0xff] %v2910_v50  ;;  %v2913_v29 = vadd.f32 %v5292_v45, %v2874_v51  ;;  %v2726_v7 = vadd.f32 %v3773_v11, %v2725_v17 }
 0x211   : > { %v2872_v42 = vmul.f32 %v5279_v57, %v2833_v36  ;;  %v2804_v61 = vadd.f32 %v5264_v49, %v2765_v0 }
 0x212   : > { %v2838_v52 = vmax.f32 %v2806_v12, 0.0  ;;  %v2768_v38 = vadd.f32 %v2734_v15, %v2219_v26  ;;  %2945 = vst [vmem:[%s5306_s17 + $0xd8] sm:$0xff] %v2913_v29  ;;  %v2766_v43 = vadd.f32 %v2726_v7, %v5614_v55 }
 0x213   : > { %v2911_v37 = vadd.f32 %v5292_v45, %v2872_v42  ;;  %v2836_v31 = vmax.f32 %v2804_v61, 0.0 }
 0x214   : > { %v2877_v59 = vmul.f32 %v5279_v57, %v2838_v52  ;;  %v2807_v25 = vadd.f32 %v5264_v49, %v2768_v38  ;;  %v2805_v44 = vadd.f32 %v5264_v49, %v2766_v43 }
 0x215   : > { %2943 = vst [vmem:[%s5306_s17 + $0xc8] sm:$0xff] %v2911_v37  ;;  %v2875_v32 = vmul.f32 %v5279_v57, %v2836_v31 }
 0x216   : > { %v2916_v8 = vadd.f32 %v5292_v45, %v2877_v59  ;;  %v2839_v40 = vmax.f32 %v2807_v25, 0.0  ;;  %v2837_v35 = vmax.f32 %v2805_v44, 0.0 }
 0x217   : > { %v2914_v54 = vadd.f32 %v5292_v45, %v2875_v32 }
 0x218   : > { %2948 = vst [vmem:[%s5306_s17 + $0xf0] sm:$0xff] %v2916_v8  ;;  %v2878_v16 = vmul.f32 %v5279_v57, %v2839_v40  ;;  %v2876_v62 = vmul.f32 %v5279_v57, %v2837_v35 }
 0x219   : > { %2946 = vst [vmem:[%s5306_s17 + $0xe0] sm:$0xff] %v2914_v54 }
 0x21a   : > { %v2917_v23 = vadd.f32 %v5292_v45, %v2878_v16  ;;  %v2915_v6 = vadd.f32 %v5292_v45, %v2876_v62 }
 0x21c   : > { %2949 = vst [vmem:[%s5306_s17 + $0xf8] sm:$0xff] %v2917_v23  ;;  %2947 = vst [vmem:[%s5306_s17 + $0xe8] sm:$0xff] %v2915_v6 }
 0x21d PF: > { %s17_s28 = sadd.s32 1, %s4130_s28   ;;  %s5615_s24 = smov %s4122_s26 }
 0x21e   : > { %p14_p12 = scmp.ge.s32.totalorder %s17_s28, 10   ;;  %s5616_s25 = smov %s4126_s27 }
 0x21f   : > { %s5617_s26 = smov %s5620_s29  ;;  %s5618_s27 = smov %s5624_s30 }
 0x220   :  { %16 = sbr.rel (!%p14_p12) target bundleno = 3 (0x3), region = 98 }

// kernel: _lambda_.4
= control target key start
LH: loop header
LB: loop body
LE: loop exit
PB: predicated region body
PF: predicated region fallthrough
CT: control target
= control target key end

     0   :  { %s7991_s17 = smov 0   ;;  %s7993_s18 = smov 0   ;;  %s10661_s0 = inlined_call_operand.vmem [shape: bf16[2,32,32,128], index: 0, kind: input, shape index: {}, may-alias: {0,1,2}]   ;;  %s10662_s1 = inlined_call_operand.vmem [shape: bf16[2,32,32,128], index: 1, kind: input, shape index: {}, may-alias: {0,1,2}]   ;;  %s10663_s2 = inlined_call_operand.vmem [shape: bf16[2,32,32,128], index: 2, kind: input, shape index: {}, may-alias: {0,1,2}]   ;;  %s10664_s3 = inlined_call_operand.vmem [shape: bf16[2,32,32,128], index: 3, kind: input, shape index: {}, may-alias: {3,4,5}]   ;;  %s10665_s4 = inlined_call_operand.vmem [shape: bf16[2,32,32,128], index: 4, kind: input, shape index: {}, may-alias: {3,4,5}]   ;;  %s10666_s5 = inlined_call_operand.vmem [shape: bf16[2,32,32,128], index: 5, kind: input, shape index: {}, may-alias: {3,4,5}]   ;;  %s10667_s6 = inlined_call_operand.vmem [shape: bf16[3,384,128], index: 6, kind: input, shape index: {}]   ;;  %s10668_s7 = inlined_call_operand.vmem [shape: bf16[3,384,128], index: 7, kind: input, shape index: {}]   ;;  %s10669_s8 = inlined_call_operand.vmem [shape: f32[1,128], index: 8, kind: input, shape index: {}]   ;;  %s10670_s9 = inlined_call_operand.vmem [shape: f32[1,128], index: 9, kind: input, shape index: {}]   ;;  %s10671_s10 = inlined_call_operand.vmem [shape: f32[1,128], index: 10, kind: input, shape index: {}]   ;;  %s10672_s11 = inlined_call_operand.vmem [shape: bf16[2,32,32,128], index: 11, kind: output, shape index: {}]  }
   0x1   :  { %10748 = sst [smem:[#allocation46_spill]] %s10661_s0  ;;  %s7995_s19 = smov 0  }
   0x2   :  { %s7997_s20 = smov 0   ;;  %s7999_s21 = smov 0  }
   0x3 LB: > { %s33_s22 = sadd.s32 1, %s7921_s19  ;;  %s40_s23 = sadd.s32 1, %s7925_s20  ;;  %s7929_s21 = sphi %s7999_s21, %s21_s21   ;;  %s7925_s20 = sphi %s7997_s20, %s10972_s20   ;;  %s7921_s19 = sphi %s7995_s19, %s10971_s19   ;;  %s7917_s18 = sphi %s7993_s18, %s10970_s18   ;;  %s7913_s17 = sphi %s7991_s17, %s10969_s17  }
   0x4   : > { %p34_p0 = scmp.ge.s32.totalorder %s33_s22, 4  ;;  %p5968_p1 = scmp.ge.s32.totalorder %s7929_s21, 1 }
   0x5   : > { %p556_p2 = scmp.lt.s32.totalorder %s7929_s21, 9 }
   0x6   : > { %s10974_s22 = smov (%p34_p0, %s33_s22), 0  ;;  %s10976_s23 = smov (!%p34_p0, %s40_s23), %s7925_s20 }
   0x7   : > { %p557_p3 = pnand %p5968_p1, %p556_p2  ;;  %p42_p4 = scmp.ge.s32.totalorder %s10976_s23, 2 }
   0x9   : > { %s10978_s23 = smov (%p42_p4, %s10976_s23), 0  ;;  %560 = sbr.rel (%p557_p3) target bundleno = 833 (0x341), region = 64 }
   0xa   : > { %10749 = sst [smem:[#allocation2_spill]] %s10978_s23 }
   0xe   : > { %v7715_v0 = vld [vmem:[%s10667_s6 + $0x138] sm:$0xff]   ;;  %s8035_s30 = sshll.u32 %s7913_s17, 3  ;;  %v7718_v3 = vld [vmem:[%s10667_s6 + $0x130] sm:$0xff]   ;;  %p689_p5 = scmp.lt.s32.totalorder %s7917_s18, 1  ;;  %v7721_v6 = vld [vmem:[%s10667_s6 + $0x128] sm:$0xff]   ;;  %vm1147_vm0 = vcmask 1040384  }
   0xf   : > { %v7716_v1 = vld [vmem:[%s10667_s6 + $0x178] sm:$0xff]   ;;  %6571 = vmatprep.subr.bf16.mxu0 %v7715_v0  ;;  %v7719_v4 = vld [vmem:[%s10667_s6 + $0x170] sm:$0xff]   ;;  %p691_p6 = scmp.lt.s32.totalorder %s8035_s30, 31  ;;  %v7722_v7 = vld [vmem:[%s10667_s6 + $0x168] sm:$0xff]   ;;  %s10750_s0 = sld [smem:[#allocation46_spill]]  ;;  %vm1410_vm2 = vcmask 1046528  }
  0x10   : > { %v7717_v2 = vld [vmem:[%s10667_s6 + $0xf8] sm:$0xff]   ;;  %7387 = vmatprep.subr.bf16.mxu1 %v7716_v1  ;;  %v7720_v5 = vld [vmem:[%s10667_s6 + $0xf0] sm:$0xff]   ;;  %v7723_v8 = vld [vmem:[%s10667_s6 + $0xe8] sm:$0xff]   ;;  %s10980_s18 = smov (!%p689_p5, %s7917_s18), 1  ;;  %vm966_vm1 = vsmask.f32 256 }
  0x11   : > { %6572 = vmatpush3.bf16.msra.mxu0 %v7717_v2  ;;  %7388 = vmatpush3.bf16.msra.mxu1 %v7716_v1  ;;  %v7724_v9 = vld [vmem:[%s10667_s6 + $0x120] sm:$0xff]   ;;  %s692_s15 = scalar_select %p691_p6, %s8035_s30, 31  ;;  %v7727_v12 = vld [vmem:[%s10667_s6 + $0x118] sm:$0xff]   ;;  %v7730_v15 = vld [vmem:[%s10667_s6 + $0x110] sm:$0xff]   ;;  %v10751_v30 = vmov 0 }
  0x12   : > { %6573 = vmatprep.subr.bf16.mxu0 %v7718_v3  ;;  %7389 = vmatprep.subr.bf16.mxu1 %v7719_v4  ;;  %v7725_v10 = vld [vmem:[%s10667_s6 + $0x160] sm:$0xff]   ;;  %s8071_s29 = sshll.u32 %s10980_s18, 7  ;;  %v7728_v13 = vld [vmem:[%s10667_s6 + $0x158] sm:$0xff]   ;;  %v7731_v16 = vld [vmem:[%s10667_s6 + $0x150] sm:$0xff]   ;;  %vm1169_vm4 = vsmask.f32 7424 }
  0x13   : > { %v7726_v11 = vld [vmem:[%s10667_s6 + $0xe0] sm:$0xff]   ;;  %s5970_s14 = sshll.u32 %s692_s15, 2  ;;  %v7729_v14 = vld [vmem:[%s10667_s6 + $0xd8] sm:$0xff]   ;;  %v7732_v17 = vld [vmem:[%s10667_s6 + $0xd0] sm:$0xff]   ;;  %p810_p9 = scmp.eq.s32.totalorder %s7913_s17, 0 }
  0x14   : > { %s695_s18 = sadd.s32 %s8071_s29, %s5970_s14  ;;  %v7733_v18 = vld [vmem:[%s10667_s6 + $0x108] sm:$0xff]   ;;  %v7736_v21 = vld [vmem:[%s10667_s6 + $0x100] sm:$0xff]   ;;  %s8113_s14 = sadd.s32 4294967295, %s8035_s30  ;;  %vm8123_vm3 = vmand %vm1147_vm0, %vm966_vm1 }
  0x15   : > { %6574 = vmatpush3.bf16.msra.mxu0 %v7720_v5  ;;  %7390 = vmatpush3.bf16.msra.mxu1 %v7719_v4  ;;  %s8089_s13 = sshll.u32 %s695_s18, 2  ;;  %v7734_v19 = vld [vmem:[%s10667_s6 + $0x148] sm:$0xff]   ;;  %v7737_v22 = vld [vmem:[%s10667_s6 + $0x140] sm:$0xff]   ;;  %p701_p7 = scmp.gt.s32.totalorder %s8113_s14, 0  ;;  %v10752_v30 = vsel %vm8123_vm3, 4294967295, %v10751_v30  ;;  %v7741_v31 = vld [vmem:[%s10667_s6 + $0x78] sm:$0xff]  }
  0x16   : > { %6575 = vmatprep.subr.bf16.mxu0 %v7721_v6  ;;  %7391 = vmatprep.subr.bf16.mxu1 %v7722_v7  ;;  %v7735_v20 = vld [vmem:[%s10667_s6 + $0xc8] sm:$0xff]   ;;  %s8104_s12 = scalar_lea.vmem %s10750_s0, %s8089_s13  ;;  %v7738_v25 = vld [vmem:[%s10667_s6 + $0xc0] sm:$0xff]   ;;  %10753 = vst [vmem:[#allocation3_spill] sm:$0xff] %v10752_v30  ;;  %v8133_v34 = vld [vmem:[%s10667_s6 + $0xb8] sm:$0xff]   ;;  %p5975_p8 = scmp.lt.s32.totalorder %s8113_s14, 31 }
  0x17   : > { %v7739_v23 = vld [vmem:[%s8104_s12] sm:$0xff]   ;;  %v7740_v24 = vld [vmem:[%s8104_s12 + $0x8] sm:$0xff]   ;;  %v7744_v35 = vld [vmem:[%s8104_s12 + $0x10] sm:$0xff]   ;;  %s8143_s15 = scalar_select %p701_p7, %s8113_s14, 0 }
  0x18   : > { %v983_v26 = vshrl.u32 %v7739_v23, 16  ;;  %v986_v27 = vshll.u32 %v7739_v23, 16  ;;  %v990_v28 = vshrl.u32 %v7740_v24, 16  ;;  %v993_v29 = vshll.u32 %v7740_v24, 16  ;;  %v7745_v39 = vld [vmem:[%s8104_s12 + $0x18] sm:$0xff]   ;;  %v7748_v48 = vld [vmem:[%s8104_s12 + $0x20] sm:$0xff]  }
  0x19   : > { %6576 = vmatpush3.bf16.msra.mxu0 %v7723_v8  ;;  %7392 = vmatpush3.bf16.msra.mxu1 %v7722_v7  ;;  %v998_v40 = vshrl.u32 %v7744_v35, 16  ;;  %v1001_v43 = vshll.u32 %v7744_v35, 16  ;;  %v1005_v47 = vshrl.u32 %v7745_v39, 16  ;;  %v7742_v53 = vld [vmem:[%s10667_s6 + $0x38] sm:$0xff]   ;;  %v7746_v58 = vld [vmem:[%s10667_s6 + $0x70] sm:$0xff]   ;;  %v1008_v62 = vshll.u32 %v7745_v39, 16 }
  0x1a   : > { %6577 = vmatprep.subr.bf16.mxu0 %v7724_v9  ;;  %7393 = vmatprep.subr.bf16.mxu1 %v7725_v10  ;;  %v985_v32 = vrot.slane %v983_v26, 7  ;;  %v992_v33 = vrot.slane %v990_v28, 7  ;;  %v1013_v2 = vshrl.u32 %v7748_v48, 16  ;;  %v7747_v7 = vld [vmem:[%s10667_s6 + $0x30] sm:$0xff]   ;;  %v7749_v8 = vld [vmem:[%s8104_s12 + $0x28] sm:$0xff]   ;;  %v7755_v39 = vld [vmem:[%s10667_s6 + $0x60] sm:$0xff]  }
  0x1b   : > { %v1000_v46 = vrot.slane %v998_v40, 7  ;;  %v1007_v61 = vrot.slane %v1005_v47, 7  ;;  %v1023_v23 = vshll.u32 %v7749_v8, 16  ;;  %v7751_v24 = vld [vmem:[%s10667_s6 + $0x28] sm:$0xff]   ;;  %s10982_s15 = smov (!%p5975_p8, %s8143_s15), 31  ;;  %p822_p11 = scmp.eq.s32.totalorder %s7913_s17, 3 }
  0x1c   : > { %v988_v36 = vor.u32 %v986_v27, %v985_v32  ;;  %v995_v37 = vor.u32 %v993_v29, %v992_v33  ;;  %v1160_v38 = vsel %vm8123_vm3, %v992_v33, 0  ;;  %s5980_s27 = sshll.u32 %s10982_s15, 2 }
  0x1d   : > { %6578 = vmatpush3.bf16.msra.mxu0 %v7726_v11  ;;  %7394 = vmatpush3.bf16.msra.mxu1 %v7725_v10  ;;  %v1419_v41 = vrot.slane %v1160_v38, 1  ;;  %v1206_v42 = vshll.u32 %v1160_v38, 16  ;;  %v1003_v57 = vor.u32 %v1001_v43, %v1000_v46  ;;  %v1010_v5 = vor.u32 %v1008_v62, %v1007_v61  ;;  %s8303_s18 = sadd.s32 %s5980_s27, %s8071_s29 }
  0x1e   : > { %6579 = vmatprep.subr.bf16.mxu0 %v7727_v12  ;;  %7395 = vmatprep.subr.bf16.mxu1 %v7728_v13  ;;  %v8146_v44 = vsel %vm966_vm1, %v985_v32, %v995_v37  ;;  %v8150_v45 = vsel %vm8123_vm3, 0, %v988_v36  ;;  %v1161_v9 = vsel %vm8123_vm3, %v1007_v61, 0  ;;  %v1015_v12 = vrot.slane %v1013_v2, 7  ;;  %s5982_s24 = sshll.u32 %s8303_s18, 2 }
  0x1f   : > { %v1191_v49 = vshrl.u32 %v8150_v45, 16  ;;  %v1193_v50 = vshll.u32 %v8150_v45, 16  ;;  %v1198_v51 = vshll.u32 %v8146_v44, 16  ;;  %v1416_v52 = vrot.slane %v8150_v45, 1  ;;  %s711_s27 = scalar_lea.vmem %s10662_s1, %s5982_s24  ;;  %s8778_s17 = scalar_lea.vmem %s10665_s4, %s5982_s24 }
  0x20   : > { %v1417_v54 = vrot.slane %v8146_v44, 1  ;;  %v1202_v55 = vshrl.u32 %v8146_v44, 16  ;;  %v1208_v56 = vrot.slane %v1206_v42, 1  ;;  %v8174_v1 = vsel %vm8123_vm3, 0, %v1003_v57 }
  0x21   : > { %6580 = vmatpush3.bf16.msra.mxu0 %v7729_v14  ;;  %7396 = vmatpush3.bf16.msra.mxu1 %v7728_v13  ;;  %v1195_v59 = vrot.slane %v1193_v50, 1  ;;  %v1200_v60 = vrot.slane %v1198_v51, 1  ;;  %v1421_v6 = vrot.slane %v8174_v1, 1  ;;  %v1211_v10 = vshrl.u32 %v8174_v1, 16 }
  0x22   : > { %6581 = vmatprep.subr.bf16.mxu0 %v7730_v15  ;;  %7397 = vmatprep.subr.bf16.mxu1 %v7731_v16  ;;  %v8167_v63 = vsel %vm1410_vm2, %v1416_v52, %v1417_v54  ;;  %v8170_v0 = vsel %vm1410_vm2, %v1417_v54, %v1419_v41  ;;  %v1213_v11 = vshll.u32 %v8174_v1, 16  ;;  %v8194_v15 = vsel %vm966_vm1, %v1000_v46, %v1010_v5 }
  0x23   : > { %v1196_v3 = vor.u32 %v1195_v59, %v1191_v49  ;;  %7403 = vmatprep.mubr.bf16.mxu1 %v8167_v63  ;;  %v1204_v4 = vor.u32 %v1202_v55, %v1200_v60  ;;  %v1222_v26 = vshrl.u32 %v8194_v15, 16  ;;  %v1226_v36 = vshll.u32 %v1161_v9, 16  ;;  %v7756_v49 = vld [vmem:[%s10667_s6 + $0x20] sm:$0xff]  }
  0x25   : > { %6582 = vmatpush3.bf16.msra.mxu0 %v7732_v17  ;;  %7398 = vmatpush3.bf16.msra.mxu1 %v7731_v16  ;;  %v8188_v13 = vsel %vm1169_vm4, %v1196_v3, %v1200_v60  ;;  %v8191_v14 = vsel %vm1169_vm4, %v1204_v4, %v1208_v56  ;;  %v1424_v16 = vrot.slane %v1161_v9, 1  ;;  %v7750_v17 = vld [vmem:[%s10667_s6 + $0x68] sm:$0xff]   ;;  %v1228_v43 = vrot.slane %v1226_v36, 1  ;;  %v7759_v4 = vld [vmem:[%s10667_s6 + $0x58] sm:$0xff]  }
  0x26   : > { %6583 = vmatprep.subr.bf16.mxu0 %v7733_v18  ;;  %7399 = vmatprep.subr.bf16.mxu1 %v7734_v19  ;;  %v1422_v18 = vrot.slane %v8194_v15, 1  ;;  %v7758_v60 = vld [vmem:[%s8104_s12 + $0x48] sm:$0xff]  }
  0x27   : > { %1754 = vmatprep.mubr.bf16.mxu0 %v8188_v13 }
  0x28   : > { %v8213_v27 = vsel %vm1410_vm2, %v1421_v6, %v1422_v18  ;;  %v8216_v28 = vsel %vm1410_vm2, %v1422_v18, %v1424_v16  ;;  %v7760_v16 = vld [vmem:[%s10667_s6 + $0x18] sm:$0xff]   ;;  %v1050_v18 = vshrl.u32 %v7758_v60, 16 }
  0x29   : > { %6584 = vmatpush3.bf16.msra.mxu0 %v7735_v20  ;;  %7400 = vmatpush3.bf16.msra.mxu1 %v7734_v19  ;;  %v1215_v19 = vrot.slane %v1213_v11, 1  ;;  %v1218_v20 = vshll.u32 %v8194_v15, 16 }
  0x2a   : > { %6585 = vmatprep.subr.bf16.mxu0 %v7736_v21  ;;  %7401 = vmatprep.subr.bf16.mxu1 %v7737_v22  ;;  %v1016_v21 = vshll.u32 %v7748_v48, 16 }
  0x2b   : > { %v1220_v29 = vrot.slane %v1218_v20, 1  ;;  %v1216_v32 = vor.u32 %v1215_v19, %v1211_v10  ;;  %v1053_v19 = vshll.u32 %v7758_v60, 16  ;;  %v7761_v20 = vld [vmem:[%s10667_s6 + $0xa8] sm:$0xff]  }
  0x2c   : > { %v1018_v33 = vor.u32 %v1016_v21, %v1015_v12 }
  0x2d   : > { %6586 = vmatpush3.bf16.msra.mxu0 %v7738_v25  ;;  %7402 = vmatpush3.bf16.msra.mxu1 %v7737_v22  ;;  %v1020_v22 = vshrl.u32 %v7749_v8, 16  ;;  %v7752_v25 = vld [vmem:[%s10667_s6 + $0xb0] sm:$0xff]   ;;  %v8243_v50 = vsel %vm1169_vm4, %v1216_v32, %v1220_v29  ;;  %v1224_v62 = vor.u32 %v1222_v26, %v1220_v29  ;;  %v1052_v26 = vrot.slane %v1050_v18, 7  ;;  %v7763_v29 = vld [vmem:[%s8104_s12 + $0x58] sm:$0xff]  }
  0x2e   : > { %6707 = vmatprep.subr.bf16.mxu1 %v7741_v31  ;;  %7435 = vmatprep.subr.bf16.mxu0 %v8133_v34  ;;  %v7753_v31 = vld [vmem:[%s8104_s12 + $0x30] sm:$0xff]   ;;  %v8226_v41 = vsel %vm8123_vm3, 0, %v1018_v33 }
  0x2f   : > { %v1022_v35 = vrot.slane %v1020_v22, 7  ;;  %v1028_v37 = vshrl.u32 %v7753_v31, 16  ;;  %v1031_v38 = vshll.u32 %v7753_v31, 16  ;;  %v1426_v46 = vrot.slane %v8226_v41, 1 }
  0x30   : > { %7404 = vmatmul.mubr.bf16.vlgmr.msra.gmra.mxu1 %v8170_v0  ;;  %1755 = vmatmul.mubr.bf16.vlgmr.msra.gmra.mxu0 %v8150_v45  ;;  %v1233_v57 = vshll.u32 %v8226_v41, 16  ;;  %v1231_v59 = vshrl.u32 %v8226_v41, 16  ;;  %v1055_v36 = vor.u32 %v1053_v19, %v1052_v26 }
  0x31   : > { %6708 = vmatpush3.bf16.msra.mxu1 %v7742_v53  ;;  %7436 = vmatpush3.bf16.msra.mxu0 %v8133_v34  ;;  %v7754_v34 = vld [vmem:[%s8104_s12 + $0x38] sm:$0xff]   ;;  %v1025_v40 = vor.u32 %v1023_v23, %v1022_v35  ;;  %v8230_v42 = vsel %vm8123_vm3, %v1022_v35, 0  ;;  %v1030_v47 = vrot.slane %v1028_v37, 7  ;;  %v7762_v23 = vld [vmem:[%s8104_s12 + $0x50] sm:$0xff]   ;;  %v1065_v37 = vshrl.u32 %v7763_v29, 16 }
  0x32   : > { %6709 = vmatprep.subr.bf16.mxu1 %v7746_v58  ;;  %1762 = vmatprep.mubr.bf16.mxu0 %v8191_v14  ;;  %v1035_v48 = vshrl.u32 %v7754_v34, 16  ;;  %v1429_v52 = vrot.slane %v8230_v42, 1  ;;  %v1038_v53 = vshll.u32 %v7754_v34, 16  ;;  %v7757_v58 = vld [vmem:[%s8104_s12 + $0x40] sm:$0xff]   ;;  %v1235_v10 = vrot.slane %v1233_v57, 1  ;;  %v7767_v57 = vld [vmem:[%s8104_s12 + $0x68] sm:$0xff]  }
  0x33   : > { %7407 = vmatprep.mubr.bf16.mxu1 %v8213_v27  ;;  %7437 = vmatprep.subr.bf16.mxu0 %v7752_v25  ;;  %v8246_v51 = vsel %vm966_vm1, %v1015_v12, %v1025_v40  ;;  %v1033_v55 = vor.u32 %v1031_v38, %v1030_v47  ;;  %v1043_v11 = vshrl.u32 %v7757_v58, 16  ;;  %v1046_v12 = vshll.u32 %v7757_v58, 16  ;;  %v7764_v38 = vld [vmem:[%s10667_s6 + $0x50] sm:$0xff]  }
  0x34   : > { %v1427_v54 = vrot.slane %v8246_v51, 1  ;;  %v1037_v56 = vrot.slane %v1035_v48, 7  ;;  %v1238_v8 = vshll.u32 %v8246_v51, 16  ;;  %v1058_v33 = vshrl.u32 %v7762_v23, 16 }
  0x35   : > { %6710 = vmatpush3.bf16.msra.mxu1 %v7747_v7  ;;  %7438 = vmatpush3.bf16.msra.mxu0 %v7752_v25  ;;  %v8261_v3 = vsel %vm8123_vm3, 0, %v1033_v55  ;;  %v1045_v22 = vrot.slane %v1043_v11, 7  ;;  %v1236_v35 = vor.u32 %v1235_v10, %v1231_v59  ;;  %v1061_v34 = vshll.u32 %v7762_v23, 16 }
  0x36   : > { %6711 = vmatprep.subr.bf16.mxu1 %v7750_v17  ;;  %v8257_v61 = vsel %vm1410_vm2, %v1426_v46, %v1427_v54  ;;  %v1040_v2 = vor.u32 %v1038_v53, %v1037_v56  ;;  %v8268_v5 = vsel %vm1410_vm2, %v1427_v54, %v1429_v52  ;;  %v1431_v6 = vrot.slane %v8261_v3, 1  ;;  %7439 = vmatprep.subr.bf16.mxu0 %v7761_v20 }
  0x37   : > { %v8273_v7 = vsel %vm8123_vm3, %v1037_v56, 0  ;;  %v1240_v31 = vrot.slane %v1238_v8, 1  ;;  %v1048_v32 = vor.u32 %v1046_v12, %v1045_v22  ;;  %v1060_v46 = vrot.slane %v1058_v33, 7  ;;  %v7766_v56 = vld [vmem:[%s8104_s12 + $0x60] sm:$0xff]   ;;  %v7768_v12 = vld [vmem:[%s10667_s6 + $0x48] sm:$0xff]  }
  0x38   : > { %7408 = vmatmul.mubr.bf16.gmra.mxu1 %v8216_v28  ;;  %1763 = vmatmul.mubr.bf16.gmra.mxu0 %v8146_v44  ;;  %v8277_v9 = vsel %vm966_vm1, %v1030_v47, %v1040_v2  ;;  %v1434_v21 = vrot.slane %v8273_v7, 1  ;;  %v7765_v47 = vld [vmem:[%s10667_s6 + $0x10] sm:$0xff]   ;;  %v8321_v48 = vsel %vm966_vm1, %v1045_v22, %v1055_v36  ;;  %v1067_v52 = vrot.slane %v1065_v37, 7 }
  0x39   : > { %6712 = vmatpush3.bf16.msra.mxu1 %v7751_v24  ;;  %1770 = vmatprep.mubr.bf16.mxu0 %v8243_v50  ;;  %v1432_v17 = vrot.slane %v8277_v9, 1  ;;  %v8291_v24 = vsel %vm1169_vm4, %v1224_v62, %v1228_v43  ;;  %v8311_v40 = vsel %vm8123_vm3, 0, %v1048_v32  ;;  %v8315_v43 = vsel %vm8123_vm3, %v1052_v26, 0  ;;  %v7771_v36 = vld [vmem:[%s8104_s12 + $0x70] sm:$0xff]  }
  0x3a   : > { %6713 = vmatprep.subr.bf16.mxu1 %v7755_v39  ;;  %7411 = vmatprep.mubr.bf16.mxu1 %v8257_v61  ;;  %v1068_v53 = vshll.u32 %v7763_v29, 16  ;;  %v1437_v54 = vrot.slane %v8321_v48, 1  ;;  %v1063_v55 = vor.u32 %v1061_v34, %v1060_v46  ;;  %v1242_v58 = vshrl.u32 %v8246_v51, 16 }
  0x3b   : > { %v8294_v25 = vsel %vm1410_vm2, %v1431_v6, %v1432_v17  ;;  %7440 = vmatpush3.bf16.msra.mxu0 %v7761_v20  ;;  %v8307_v39 = vsel %vm1410_vm2, %v1432_v17, %v1434_v21  ;;  %v1246_v59 = vshll.u32 %v8230_v42, 16  ;;  %v8333_v62 = vsel %vm1169_vm4, %v1236_v35, %v1240_v31  ;;  %v7769_v21 = vld [vmem:[%s10667_s6 + $0x8] sm:$0xff]   ;;  %v7770_v35 = vld [vmem:[%s10667_s6 + $0xa0] sm:$0xff]  }
  0x3c   : > { %v1070_v60 = vor.u32 %v1068_v53, %v1067_v52  ;;  %v8341_v6 = vsel %vm8123_vm3, 0, %v1063_v55  ;;  %v8350_v10 = vsel %vm8123_vm3, %v1067_v52, 0  ;;  %v1253_v11 = vshll.u32 %v8261_v3, 16  ;;  %7441 = vmatprep.subr.bf16.mxu0 %v7770_v35  ;;  %v7773_v53 = vld [vmem:[%s10667_s6 + $0x40] sm:$0xff]  }
  0x3d   : > { %6714 = vmatpush3.bf16.msra.mxu1 %v7756_v49  ;;  %v1436_v49 = vrot.slane %v8311_v40, 1  ;;  %v1441_v42 = vrot.slane %v8341_v6, 1  ;;  %v1073_v17 = vshrl.u32 %v7766_v56, 16  ;;  %v1076_v18 = vshll.u32 %v7766_v56, 16 }
  0x3e   : > { %6715 = vmatprep.subr.bf16.mxu1 %v7759_v4  ;;  %v1439_v4 = vrot.slane %v8315_v43, 1  ;;  %v8345_v8 = vsel %vm966_vm1, %v1060_v46, %v1070_v60  ;;  %v1080_v19 = vshrl.u32 %v7767_v57, 16  ;;  %v1083_v20 = vshll.u32 %v7767_v57, 16 }
  0x3f   : > { %v8336_v2 = vsel %vm1410_vm2, %v1436_v49, %v1437_v54  ;;  %v1075_v22 = vrot.slane %v1073_v17, 7  ;;  %v1244_v29 = vor.u32 %v1242_v58, %v1240_v31  ;;  %v1248_v32 = vrot.slane %v1246_v59, 1  ;;  %7442 = vmatpush3.bf16.msra.mxu0 %v7770_v35  ;;  %v7774_v58 = vld [vmem:[%s10667_s6] sm:$0xff]  }
  0x40   : > { %7412 = vmatmul.mubr.bf16.gmra.mxu1 %v8268_v5  ;;  %1771 = vmatmul.mubr.bf16.gmra.mxu0 %v8174_v1  ;;  %v1082_v23 = vrot.slane %v1080_v19, 7  ;;  %v8363_v26 = vsel %vm1410_vm2, %v1437_v54, %v1439_v4  ;;  %v1251_v33 = vshrl.u32 %v8261_v3, 16  ;;  %v1258_v37 = vshll.u32 %v8277_v9, 16  ;;  %v7776_v19 = vld [vmem:[%s10667_s6 + $0x98] sm:$0xff]  }
  0x41   : > { %6716 = vmatpush3.bf16.msra.mxu1 %v7760_v16  ;;  %7415 = vmatprep.mubr.bf16.mxu1 %v8294_v25  ;;  %v1442_v16 = vrot.slane %v8345_v8, 1  ;;  %v1444_v49 = vrot.slane %v8350_v10, 1  ;;  %v1255_v31 = vrot.slane %v1253_v11, 1  ;;  %v1088_v52 = vshrl.u32 %v7771_v36, 16  ;;  %v8404_v11 = vld [vmem:[%s10667_s6 + $0x238] sm:$0xff]  }
  0x42   : > { %1778 = vmatprep.mubr.bf16.mxu0 %v8291_v24  ;;  %6717 = vmatprep.subr.bf16.mxu1 %v7764_v38  ;;  %v1078_v38 = vor.u32 %v1076_v18, %v1075_v22  ;;  %v1085_v46 = vor.u32 %v1083_v20, %v1082_v23  ;;  %v1091_v56 = vshll.u32 %v7771_v36, 16  ;;  %v8391_v59 = vsel %vm1169_vm4, %v1244_v29, %v1248_v32  ;;  %v811_v29 = vld [vmem:[%s711_s27] sm:$0xf] }
  0x43   : > { %v8371_v34 = vsel %vm1410_vm2, %v1441_v42, %v1442_v16  ;;  %v1090_v42 = vrot.slane %v1088_v52, 7  ;;  %v1260_v20 = vrot.slane %v1258_v37, 1  ;;  %v8414_v32 = vsel %vm1410_vm2, %v1442_v16, %v1444_v49  ;;  %7443 = vmatprep.subr.bf16.mxu0 %v7776_v19  ;;  %v814_v49 = vld [vmem:[%s711_s27 + $0xc] sm:$0xf] }
  0x44   : > { %10754 = vst [vmem:[#allocation4_spill] sm:$0xff] %v8371_v34  ;;  %v8381_v54 = vsel %vm966_vm1, %v1075_v22, %v1085_v46  ;;  %v8385_v55 = vsel %vm8123_vm3, 0, %v1078_v38  ;;  %10755 = vst [vmem:[#allocation5_spill] sm:$0xff] %v8414_v32  ;;  %v1256_v35 = vor.u32 %v1255_v31, %v1251_v33  ;;  %v8418_v36 = vsel %vm8123_vm3, %v1082_v23, 0  ;;  %v812_v46 = vld [vmem:[%s711_s27 + $0x4] sm:$0xf]  ;;  %7444 = vmatpush3.bf16.msra.mxu0 %v7776_v19 }
  0x45   : > { %6718 = vmatpush3.bf16.msra.mxu1 %v7765_v47  ;;  %v7772_v47 = vld [vmem:[%s8104_s12 + $0x78] sm:$0xff]   ;;  %v1446_v60 = vrot.slane %v8385_v55, 1  ;;  %v1447_v4 = vrot.slane %v8381_v54, 1  ;;  %v1093_v18 = vor.u32 %v1091_v56, %v1090_v42  ;;  %s815_s12 = scalar_select %p810_p9, 1, 0  ;;  %v7778_v23 = vld [vmem:[%s10667_s6 + $0x90] sm:$0xff]  }
  0x46   : > { %6719 = vmatprep.subr.bf16.mxu1 %v7768_v12  ;;  %v1095_v57 = vshrl.u32 %v7772_v47, 16  ;;  %v1098_v17 = vshll.u32 %v7772_v47, 16  ;;  %v1266_v47 = vshll.u32 %v8273_v7, 16  ;;  %v813_v33 = vld [vmem:[%s711_s27 + $0x8] sm:$0xf]  ;;  %v1449_v52 = vrot.slane %v8418_v36, 1  ;;  %7445 = vmatprep.subr.bf16.mxu0 %v7778_v23  ;;  %s8614_s27 = scalar_lea.vmem %s10664_s3, %s8089_s13 }
  0x47   : > { %v8422_v38 = vsel %vm8123_vm3, 0, %v1093_v18  ;;  %v8427_v37 = vsel %vm1410_vm2, %v1446_v60, %v1447_v4  ;;  %v816_v31 = vstv %s815_s12  ;;  %v10758_v7 = vmov 0  ;;  %s6439_s12 = sadd.s32 8, %s8035_s30  ;;  %s10464_s30 = scalar_lea.vmem %s10672_s11, %s8089_s13 }
  0x48   : > { %7416 = vmatmul.mubr.bf16.gmra.mxu1 %v8307_v39  ;;  %1779 = vmatmul.mubr.bf16.gmra.mxu0 %v8194_v15  ;;  %v1097_v12 = vrot.slane %v1095_v57, 7  ;;  %10756 = vst [vmem:[#allocation6_spill] sm:$0xff] %v8427_v37  ;;  %vm8440_vm5 = vcmp.eq.s32.totalorder %v816_v31, 1  ;;  %v8445_v57 = vsel %vm1169_vm4, %v1256_v35, %v1260_v20  ;;  %v1268_v35 = vrot.slane %v1266_v47, 1  ;;  %p8685_p10 = scmp.lt.s32.totalorder %s6439_s12, 31 }
  0x49   : > { %7419 = vmatprep.mubr.bf16.mxu1 %v8336_v2  ;;  %1786 = vmatprep.mubr.bf16.mxu0 %v8333_v62  ;;  %v10759_v7 = vsel %vm8440_vm5, 4294967295, %v10758_v7  ;;  %v819_v60 = vsel %vm8440_vm5, 0, %v812_v46  ;;  %v1273_v46 = vshll.u32 %v8311_v40, 16 }
  0x4a   : > { %6720 = vmatpush3.bf16.msra.mxu1 %v7769_v21  ;;  %v1262_v21 = vshrl.u32 %v8277_v9, 16  ;;  %v1100_v22 = vor.u32 %v1098_v17, %v1097_v12  ;;  %10760 = vst [vmem:[#allocation8_spill] sm:$0xff] %v10759_v7  ;;  %v821_v17 = vsel %vm8440_vm5, 0, %v814_v49  ;;  %7446 = vmatpush3.bf16.msra.mxu0 %v7778_v23  ;;  %v7780_v23 = vld [vmem:[%s10667_s6 + $0x88] sm:$0xff]   ;;  %s10984_s12 = smov (!%p8685_p10, %s6439_s12), 31 }
  0x4b   : > { %6721 = vmatprep.subr.bf16.mxu1 %v7773_v53  ;;  %v1451_v53 = vrot.slane %v8422_v38, 1  ;;  %7447 = vmatprep.subr.bf16.mxu0 %v7780_v23  ;;  %s10986_s12 = smov (!%p8685_p10, %s10984_s12), 31 }
  0x4c   : > { %v8431_v16 = vsel %vm966_vm1, %v1090_v42, %v1100_v22  ;;  %v820_v42 = vsel %vm8440_vm5, 0, %v813_v33  ;;  %v1264_v22 = vor.u32 %v1262_v21, %v1260_v20  ;;  %v8470_v20 = vsel %vm8123_vm3, %v1097_v12, 0  ;;  %s5987_s23 = sshll.u32 %s10986_s12, 2 }
  0x4d   : > { %10757 = vst [vmem:[#allocation7_spill] sm:$0xff] %v8431_v16  ;;  %v1452_v56 = vrot.slane %v8431_v16, 1  ;;  %v6016_v19 = vcombine.low %v820_v42, %v821_v17  ;;  %v1278_v12 = vshll.u32 %v8321_v48, 16  ;;  %v7782_v17 = vld [vmem:[%s10667_s6 + $0x80] sm:$0xff]   ;;  %s726_s14 = sadd.s32 %s5987_s23, %s8071_s29 }
  0x4e   : > { %6722 = vmatpush3.bf16.msra.mxu1 %v7774_v58  ;;  %v818_v58 = vsel %vm8440_vm5, 0, %v811_v29  ;;  %7448 = vmatpush3.bf16.msra.mxu0 %v7780_v23  ;;  %s8736_s29 = sshll.u32 %s726_s14, 2 }
  0x4f   : > { %7483 = vmatprep.subr.bf16.mxu1 %v8404_v11  ;;  %v6015_v18 = vcombine.low %v818_v58, %v819_v60  ;;  %v975_v33 = vshrl.u32 %v6016_v19, 16  ;;  %v8466_v49 = vsel %vm1410_vm2, %v1451_v53, %v1452_v56  ;;  %v1454_v53 = vrot.slane %v8470_v20, 1  ;;  %7449 = vmatprep.subr.bf16.mxu0 %v7782_v17  ;;  %s8747_s12 = scalar_select %p822_p11, 1, 0 }
  0x50   : > { %7420 = vmatmul.mubr.bf16.gmra.mxu1 %v8363_v26  ;;  %1787 = vmatmul.mubr.bf16.gmra.mxu0 %v8226_v41  ;;  %10762 = vst [vmem:[#allocation10_spill] sm:$0xff] %v8466_v49  ;;  %v1275_v60 = vrot.slane %v1273_v46, 1  ;;  %v1280_v23 = vrot.slane %v1278_v12, 1  ;;  %s728_s25 = scalar_lea.vmem %s10663_s2, %s8736_s29  ;;  %s773_s14 = scalar_lea.vmem %s10666_s5, %s8736_s29 }
  0x51   : > { %7423 = vmatprep.mubr.bf16.mxu1 %v8371_v34  ;;  %1794 = vmatprep.mubr.bf16.mxu0 %v8391_v59  ;;  %v968_v31 = vshrl.u32 %v6015_v18, 16  ;;  %v971_v29 = vshll.u32 %v6015_v18, 16  ;;  %v977_v47 = vrot.slane %v975_v33, 7  ;;  %v8494_v46 = vsel %vm1410_vm2, %v1452_v56, %v1454_v53 }
  0x52   : > { %7450 = vmatpush3.bf16.msra.mxu0 %v7782_v17 }
  0x53   : > { %v970_v21 = vrot.slane %v968_v31, 7 }
  0x55   : > { %v973_v58 = vor.u32 %v971_v29, %v970_v21 }
  0x57   : > { %v1149_v18 = vsel %vm8123_vm3, 0, %v973_v58 }
  0x58   : > { %7424 = vmatmul.mubr.bf16.gmra.mxu1 %v8414_v32  ;;  %1795 = vmatmul.mubr.bf16.gmra.mxu0 %v8246_v51  ;;  %v978_v32 = vshll.u32 %v6016_v19, 16  ;;  %v1159_v19 = vsel %vm8123_vm3, %v977_v47, 0  ;;  %v1171_v31 = vshrl.u32 %v1149_v18, 16 }
  0x59   : > { %7427 = vmatprep.mubr.bf16.mxu1 %v8427_v37  ;;  %1802 = vmatprep.mubr.bf16.mxu0 %v8445_v57  ;;  %v8459_v37 = vsel %vm1410_vm2, %v1447_v4, %v1449_v52  ;;  %v8474_v4 = vsel %vm1169_vm4, %v1264_v22, %v1268_v35  ;;  %v1271_v52 = vshrl.u32 %v8311_v40, 16  ;;  %v7784_v22 = vld [vmem:[%s10667_s6 + $0x1f8] sm:$0xff]   ;;  %v1186_v30 = vshll.u32 %v1159_v19, 16 }
  0x5a   : > { %10761 = vst [vmem:[#allocation9_spill] sm:$0xff] %v8459_v37  ;;  %v980_v42 = vor.u32 %v978_v32, %v977_v47  ;;  %v1173_v32 = vshll.u32 %v1149_v18, 16  ;;  %6843 = vmatprep.subr.bf16.mxu0 %v7784_v22 }
  0x5b   : > { %v1276_v33 = vor.u32 %v1275_v60, %v1271_v52  ;;  %v1286_v52 = vshll.u32 %v8315_v43, 16  ;;  %v1188_v12 = vrot.slane %v1186_v30, 1  ;;  %v7777_v30 = vld [vmem:[%s10667_s6 + $0x230] sm:$0xff]  }
  0x5c   : > { %v981_v35 = vsel %vm966_vm1, %v970_v21, %v980_v42  ;;  %v1175_v47 = vrot.slane %v1173_v32, 1  ;;  %v1282_v21 = vshrl.u32 %v8321_v48, 16  ;;  %v1411_v42 = vrot.slane %v1149_v18, 1 }
  0x5d   : > { %v1178_v29 = vshll.u32 %v981_v35, 16  ;;  %v8499_v34 = vsel %vm1169_vm4, %v1276_v33, %v1280_v23  ;;  %v1412_v53 = vrot.slane %v981_v35, 1  ;;  %v7779_v33 = vld [vmem:[%s10667_s6 + $0x228] sm:$0xff]  }
  0x5e   : > { %v1176_v7 = vor.u32 %v1175_v47, %v1171_v31  ;;  %v1284_v22 = vor.u32 %v1282_v21, %v1280_v23  ;;  %v1288_v31 = vrot.slane %v1286_v52, 1  ;;  %v1306_v47 = vshll.u32 %v8350_v10, 16  ;;  %v7783_v52 = vld [vmem:[%s10667_s6 + $0x218] sm:$0xff]  }
  0x5f   : > { %v1180_v58 = vrot.slane %v1178_v29, 1  ;;  %v8505_v17 = vsel %vm1410_vm2, %v1411_v42, %v1412_v53  ;;  %v1298_v29 = vshll.u32 %v8345_v8, 16  ;;  %v1302_v42 = vshrl.u32 %v8345_v8, 16 }
  0x60   : > { %7428 = vmatmul.mubr.bf16.gmra.mxu1 %v8459_v37  ;;  %1803 = vmatmul.mubr.bf16.gmra.mxu0 %v8261_v3  ;;  %v1414_v37 = vrot.slane %v1159_v19, 1  ;;  %v1308_v10 = vrot.slane %v1306_v47, 1 }
  0x61   : > { %7431 = vmatprep.mubr.bf16.mxu1 %v8466_v49  ;;  %1810 = vmatprep.mubr.bf16.mxu0 %v8474_v4  ;;  %v1182_v49 = vshrl.u32 %v981_v35, 16  ;;  %v1181_v56 = vsel %vm1169_vm4, %v1176_v7, %v1180_v58  ;;  %v1293_v7 = vshll.u32 %v8341_v6, 16  ;;  %v1300_v23 = vrot.slane %v1298_v29, 1 }
  0x62   : > { %v8508_v19 = vsel %vm1410_vm2, %v1412_v53, %v1414_v37  ;;  %v8519_v37 = vsel %vm1169_vm4, %v1284_v22, %v1288_v31  ;;  %v1318_v53 = vshll.u32 %v8381_v54, 16 }
  0x63   : > { %v1184_v60 = vor.u32 %v1182_v49, %v1180_v58  ;;  %v1291_v49 = vshrl.u32 %v8341_v6, 16  ;;  %v1295_v32 = vrot.slane %v1293_v7, 1  ;;  %v1313_v58 = vshll.u32 %v8385_v55, 16 }
  0x64   : > { %v1320_v31 = vrot.slane %v1318_v53, 1  ;;  %v1322_v7 = vshrl.u32 %v8381_v54, 16  ;;  %v7786_v53 = vld [vmem:[%s10667_s6 + $0x1f0] sm:$0xff]  }
  0x65   : > { %v1189_v43 = vsel %vm1169_vm4, %v1184_v60, %v1188_v12  ;;  %v1304_v60 = vor.u32 %v1302_v42, %v1300_v23  ;;  %v7793_v12 = vld [vmem:[%s10667_s6 + $0x208] sm:$0xff]   ;;  %v1346_v42 = vshll.u32 %v8470_v20, 16  ;;  %v7785_v20 = vld [vmem:[%s10667_s6 + $0x1b8] sm:$0xff]  }
  0x66   : > { %v1324_v29 = vor.u32 %v1322_v7, %v1320_v31  ;;  %v7797_v7 = vld [vmem:[%s10667_s6 + $0x190] sm:$0xff]  }
  0x67   : > { %v8552_v22 = vsel %vm1169_vm4, %v1304_v60, %v1308_v10  ;;  %v1348_v10 = vrot.slane %v1346_v42, 1  ;;  %v7790_v60 = vld [vmem:[%s10667_s6 + $0x1a8] sm:$0xff]  }
  0x68   : > { %7432 = vmatmul.mubr.bf16.gmra.mxu1 %v8494_v46  ;;  %1811 = vmatmul.mubr.bf16.gmra.mxu0 %v8277_v9  ;;  %v7808_v42 = vld [vmem:[%s10668_s7 + $0x68] sm:$0xff]  }
  0x69   : > { %2220 = vmatprep.mubr.bf16.mxu1 %v1181_v56  ;;  %1818 = vmatprep.mubr.bf16.mxu0 %v8499_v34  ;;  %v1311_v56 = vshrl.u32 %v8385_v55, 16 }
  0x70   : > { %2221 = vmatmul.mubr.bf16.vlgmr.msra.gmra.mxu1 %v1149_v18  ;;  %1819 = vmatmul.mubr.bf16.gmra.mxu0 %v8311_v40  ;;  %v1296_v18 = vor.u32 %v1295_v32, %v1291_v49 }
  0x71   : > { %7484 = vmatpush3.bf16.msra.mxu1 %v8404_v11  ;;  %2228 = vmatprep.mubr.bf16.mxu1 %v1189_v43  ;;  %v7781_v11 = vld [vmem:[%s10667_s6 + $0x220] sm:$0xff]  }
  0x72   : > { %7485 = vmatprep.subr.bf16.mxu1 %v7777_v30  ;;  %1826 = vmatprep.mubr.bf16.mxu0 %v8519_v37  ;;  %v8533_v21 = vsel %vm1169_vm4, %v1296_v18, %v1300_v23  ;;  %v1331_v18 = vshrl.u32 %v8422_v38, 16 }
  0x75   : > { %7486 = vmatpush3.bf16.msra.mxu1 %v7777_v30  ;;  %v7803_v30 = vld [vmem:[%s10668_s7 + $0x78] sm:$0xff]  }
  0x76   : > { %7487 = vmatprep.subr.bf16.mxu1 %v7779_v33 }
  0x78   : > { %2229 = vmatmul.mubr.bf16.gmra.mxu1 %v981_v35  ;;  %1827 = vmatmul.mubr.bf16.gmra.mxu0 %v8321_v48  ;;  %v1315_v35 = vrot.slane %v1313_v58, 1  ;;  %v1342_v58 = vshrl.u32 %v8431_v16, 16 }
  0x79   : > { %2236 = vmatprep.mubr.bf16.mxu1 %v8188_v13  ;;  %7488 = vmatpush3.bf16.msra.mxu1 %v7779_v33  ;;  %v7788_v13 = vld [vmem:[%s10667_s6 + $0x210] sm:$0xff]  }
  0x7a   : > { %7489 = vmatprep.subr.bf16.mxu1 %v7781_v11  ;;  %1834 = vmatprep.mubr.bf16.mxu0 %v8533_v21  ;;  %v1316_v43 = vor.u32 %v1315_v35, %v1311_v56 }
  0x7c   : > { %v8567_v49 = vsel %vm1169_vm4, %v1316_v43, %v1320_v31  ;;  %v7795_v31 = vld [vmem:[%s10667_s6 + $0x198] sm:$0xff]   ;;  %v7800_v43 = vld [vmem:[%s10667_s6 + $0x188] sm:$0xff]  }
  0x7d   : > { %7490 = vmatpush3.bf16.msra.mxu1 %v7781_v11 }
  0x7e   : > { %7491 = vmatprep.subr.bf16.mxu1 %v7783_v52 }
  0x80   : > { %2237 = vmatmul.mubr.bf16.gmra.mxu1 %v8150_v45  ;;  %1835 = vmatmul.mubr.bf16.gmra.mxu0 %v8341_v6  ;;  %v7798_v45 = vld [vmem:[%s10667_s6 + $0x200] sm:$0xff]  }
  0x81   : > { %2244 = vmatprep.mubr.bf16.mxu1 %v8191_v14  ;;  %7492 = vmatpush3.bf16.msra.mxu1 %v7783_v52  ;;  %v1326_v14 = vshll.u32 %v8418_v36, 16  ;;  %v1338_v36 = vshll.u32 %v8431_v16, 16 }
  0x82   : > { %7493 = vmatprep.subr.bf16.mxu1 %v7788_v13  ;;  %1842 = vmatprep.mubr.bf16.mxu0 %v8552_v22 }
  0x83   : > { %v1328_v32 = vrot.slane %v1326_v14, 1  ;;  %v1340_v11 = vrot.slane %v1338_v36, 1  ;;  %v7801_v14 = vld [vmem:[%s10667_s6 + $0x1c0] sm:$0xff]   ;;  %v10765_v36 = vld [vmem:[#allocation5_spill] sm:$0xff] }
  0x85   : > { %7494 = vmatpush3.bf16.msra.mxu1 %v7788_v13  ;;  %v8576_v33 = vsel %vm1169_vm4, %v1324_v29, %v1328_v32  ;;  %v1344_v52 = vor.u32 %v1342_v58, %v1340_v11  ;;  %v7789_v13 = vld [vmem:[%s10667_s6 + $0x1e8] sm:$0xff]   ;;  %v7805_v32 = vld [vmem:[%s10668_s7 + $0xb8] sm:$0xff]  }
  0x86   : > { %7495 = vmatprep.subr.bf16.mxu1 %v7793_v12  ;;  %v10766_v29 = vld [vmem:[#allocation6_spill] sm:$0xff] }
  0x87   : > { %v8593_v35 = vsel %vm1169_vm4, %v1344_v52, %v1348_v10  ;;  %v7809_v10 = vld [vmem:[%s10668_s7 + $0x28] sm:$0xff]  }
  0x88   : > { %2245 = vmatmul.mubr.bf16.gmra.mxu1 %v8146_v44  ;;  %1843 = vmatmul.mubr.bf16.gmra.mxu0 %v8345_v8  ;;  %v1333_v44 = vshll.u32 %v8422_v38, 16  ;;  %10763 = vst [vmem:[#allocation11_spill] sm:$0xff] %v8593_v35 }
  0x89   : > { %2252 = vmatprep.mubr.bf16.mxu1 %v8243_v50  ;;  %7496 = vmatpush3.bf16.msra.mxu1 %v7793_v12  ;;  %v7794_v12 = vld [vmem:[%s10667_s6 + $0x1d8] sm:$0xff]  }
  0x8a   : > { %7497 = vmatprep.subr.bf16.mxu1 %v7798_v45  ;;  %1850 = vmatprep.mubr.bf16.mxu0 %v8567_v49  ;;  %v1335_v23 = vrot.slane %v1333_v44, 1  ;;  %v10764_v44 = vld [vmem:[#allocation4_spill] sm:$0xff] }
  0x8c   : > { %v1336_v47 = vor.u32 %v1335_v23, %v1331_v18  ;;  %v10768_v18 = vld [vmem:[#allocation9_spill] sm:$0xff]  ;;  %v7804_v23 = vld [vmem:[%s10668_s7 + $0x38] sm:$0xff]  }
  0x8d   : > { %7498 = vmatpush3.bf16.msra.mxu1 %v7798_v45  ;;  %v7799_v45 = vld [vmem:[%s10667_s6 + $0x1c8] sm:$0xff]  }
  0x8e   : > { %6979 = vmatprep.subr.bf16.mxu1 %v7803_v30  ;;  %v8586_v56 = vsel %vm1169_vm4, %v1336_v47, %v1340_v11  ;;  %v7802_v30 = vld [vmem:[%s10667_s6 + $0x180] sm:$0xff]   ;;  %v7806_v11 = vld [vmem:[%s10668_s7 + $0x70] sm:$0xff]  }
  0x90   : > { %2253 = vmatmul.mubr.bf16.gmra.mxu1 %v8174_v1  ;;  %1851 = vmatmul.mubr.bf16.gmra.mxu0 %v8385_v55 }
  0x91   : > { %2260 = vmatprep.mubr.bf16.mxu1 %v8291_v24  ;;  %1858 = vmatprep.mubr.bf16.mxu0 %v8576_v33 }
  0x98   : > { %2261 = vmatmul.mubr.bf16.gmra.mxu1 %v8194_v15  ;;  %1859 = vmatmul.mubr.bf16.gmra.mxu0 %v8381_v54 }
  0x99   : > { %2268 = vmatprep.mubr.bf16.mxu1 %v8333_v62  ;;  %1866 = vmatprep.mubr.bf16.mxu0 %v8586_v56 }
  0xa0   : > { %2269 = vmatmul.mubr.bf16.gmra.mxu1 %v8226_v41  ;;  %1867 = vmatmul.mubr.bf16.gmra.mxu0 %v8422_v38 }
  0xa1   : > { %2276 = vmatprep.mubr.bf16.mxu1 %v8391_v59  ;;  %1874 = vmatprep.mubr.bf16.mxu0 %v8593_v35 }
  0xa8   : > { %2277 = vmatmul.mubr.bf16.gmra.mxu1 %v8246_v51  ;;  %1875 = vmatmul.mubr.bf16.gmra.mxu0 %v8431_v16 }
  0xa9   : > { %2284 = vmatprep.mubr.bf16.mxu1 %v8445_v57  ;;  %7451 = vmatprep.mubr.bf16.mxu0 %v8505_v17  ;;  %v7787_v17 = vld [vmem:[%s10667_s6 + $0x1b0] sm:$0xff]  }
  0xb0   : > { %2285 = vmatmul.mubr.bf16.gmra.mxu1 %v8261_v3  ;;  %7452 = vmatmul.mubr.bf16.vlgmr.msra.gmra.mxu0 %v8508_v19  ;;  %v7792_v19 = vld [vmem:[%s10667_s6 + $0x1a0] sm:$0xff]  }
  0xb1   : > { %2292 = vmatprep.mubr.bf16.mxu1 %v8474_v4  ;;  %6844 = vmatpush3.bf16.msra.mxu0 %v7785_v20 }
  0xb2   : > { %7455 = vmatprep.mubr.bf16.mxu0 %v8167_v63  ;;  %6845 = vmatprep.subr.bf16.mxu0 %v7786_v53  ;;  %v7791_v63 = vld [vmem:[%s10667_s6 + $0x1e0] sm:$0xff]  }
  0xb5   : > { %6846 = vmatpush3.bf16.msra.mxu0 %v7787_v17 }
  0xb6   : > { %6847 = vmatprep.subr.bf16.mxu0 %v7789_v13 }
  0xb8   : > { %2293 = vmatmul.mubr.bf16.gmra.mxu1 %v8277_v9  ;;  %7456 = vmatmul.mubr.bf16.gmra.mxu0 %v8170_v0  ;;  %v7796_v0 = vld [vmem:[%s10667_s6 + $0x1d0] sm:$0xff]  }
  0xb9   : > { %2300 = vmatprep.mubr.bf16.mxu1 %v8499_v34  ;;  %7459 = vmatprep.mubr.bf16.mxu0 %v8213_v27 }
  0xba   : > { %6848 = vmatpush3.bf16.msra.mxu0 %v7790_v60 }
  0xbb   : > { %6849 = vmatprep.subr.bf16.mxu0 %v7791_v63 }
  0xbe   : > { %6850 = vmatpush3.bf16.msra.mxu0 %v7792_v19  ;;  %v7812_v19 = vld [vmem:[%s10668_s7 + $0x20] sm:$0xff]  }
  0xbf   : > { %6851 = vmatprep.subr.bf16.mxu0 %v7794_v12  ;;  %v7820_v12 = vld [vmem:[%s10668_s7 + $0xa0] sm:$0xff]  }
  0xc0   : > { %2301 = vmatmul.mubr.bf16.gmra.mxu1 %v8311_v40  ;;  %7460 = vmatmul.mubr.bf16.gmra.mxu0 %v8216_v28 }
  0xc1   : > { %2308 = vmatprep.mubr.bf16.mxu1 %v8519_v37  ;;  %7463 = vmatprep.mubr.bf16.mxu0 %v8257_v61 }
  0xc2   : > { %6852 = vmatpush3.bf16.msra.mxu0 %v7795_v31 }
  0xc3   : > { %6853 = vmatprep.subr.bf16.mxu0 %v7796_v0 }
  0xc6   : > { %6854 = vmatpush3.bf16.msra.mxu0 %v7797_v7 }
  0xc7   : > { %6855 = vmatprep.subr.bf16.mxu0 %v7799_v45 }
  0xc8   : > { %2309 = vmatmul.mubr.bf16.gmra.mxu1 %v8321_v48  ;;  %7464 = vmatmul.mubr.bf16.gmra.mxu0 %v8268_v5 }
  0xc9   : > { %2316 = vmatprep.mubr.bf16.mxu1 %v8533_v21  ;;  %7467 = vmatprep.mubr.bf16.mxu0 %v8294_v25 }
  0xca   : > { %6856 = vmatpush3.bf16.msra.mxu0 %v7800_v43 }
  0xcb   : > { %6857 = vmatprep.subr.bf16.mxu0 %v7801_v14  ;;  %v7814_v14 = vld [vmem:[%s10668_s7 + $0x18] sm:$0xff]  }
  0xce   : > { %6858 = vmatpush3.bf16.msra.mxu0 %v7802_v30  ;;  %v828_v30 = vstv %s8747_s12 }
  0xcf   : > { %7531 = vmatprep.subr.bf16.mxu0 %v7805_v32  ;;  %vm8792_vm6 = vcmp.eq.s32.totalorder %v828_v30, 1 }
  0xd0   : > { %2317 = vmatmul.mubr.bf16.gmra.mxu1 %v8341_v6  ;;  %7468 = vmatmul.mubr.bf16.gmra.mxu0 %v8307_v39 }
  0xd1   : > { %2324 = vmatprep.mubr.bf16.mxu1 %v8552_v22  ;;  %7471 = vmatprep.mubr.bf16.mxu0 %v8336_v2 }
  0xd8   : > { %2325 = vmatmul.mubr.bf16.gmra.mxu1 %v8345_v8  ;;  %7472 = vmatmul.mubr.bf16.gmra.mxu0 %v8363_v26 }
  0xd9   : > { %2332 = vmatprep.mubr.bf16.mxu1 %v8567_v49  ;;  %7475 = vmatprep.mubr.bf16.mxu0 %v10764_v44 }
  0xe0   : > { %2333 = vmatmul.mubr.bf16.gmra.mxu1 %v8385_v55  ;;  %7476 = vmatmul.mubr.bf16.gmra.mxu0 %v10765_v36 }
  0xe1   : > { %2340 = vmatprep.mubr.bf16.mxu1 %v8576_v33  ;;  %7479 = vmatprep.mubr.bf16.mxu0 %v10766_v29 }
  0xe8   : > { %2341 = vmatmul.mubr.bf16.gmra.mxu1 %v8381_v54  ;;  %7480 = vmatmul.mubr.bf16.gmra.mxu0 %v10768_v18 }
  0xe9   : > { %7499 = vmatprep.mubr.bf16.mxu1 %v8213_v27  ;;  %2735 = vmatprep.mubr.bf16.mxu0 %v8243_v50  ;;  %v7807_v27 = vld [vmem:[%s10668_s7 + $0x30] sm:$0xff]  }
  0xea   : > { %v7810_v50 = vld [vmem:[%s10668_s7 + $0xb0] sm:$0xff]  }
  0xf0   : > { %v8703_v47 = vpop.f32.mrf.mxu1  ;;  %7500 = vmatmul.mubr.bf16.vlgmr.msra.gmra.mxu1 %v8216_v28  ;;  %v6587_v28 = vpop.f32.mrf.mxu0  ;;  %2736 = vmatmul.mubr.bf16.vlgmr.msra.gmra.mxu0 %v8174_v1  ;;  %v7811_v1 = vld [vmem:[%s10668_s7 + $0x60] sm:$0xff]  }
  0xf1   : > { %6980 = vmatpush3.bf16.msra.mxu1 %v7804_v23  ;;  %7503 = vmatprep.mubr.bf16.mxu1 %v8257_v61  ;;  %v7824_v23 = vld [vmem:[%s10668_s7 + $0x98] sm:$0xff]  }
  0xf2   : > { %v1917_v58 = vpop.f32.mrf.mxu1  ;;  %6981 = vmatprep.subr.bf16.mxu1 %v7806_v11  ;;  %7532 = vmatpush3.bf16.msra.mxu0 %v7805_v32  ;;  %v6588_v52 = vpop.f32.mrf.mxu0 }
  0xf3   : > { %2743 = vmatprep.mubr.bf16.mxu0 %v8291_v24  ;;  %7533 = vmatprep.subr.bf16.mxu0 %v7810_v50  ;;  %v6589_v20 = vadd.f32 %v6588_v52, %v6587_v28  ;;  %v7815_v24 = vld [vmem:[%s10668_s7 + $0xa8] sm:$0xff]   ;;  %v7817_v28 = vld [vmem:[%s10668_s7 + $0x10] sm:$0xff]  }
  0xf4   : > { %v8717_v61 = vpop.f32.mrf.mxu1  ;;  %v6590_v17 = vpop.f32.mrf.mxu0  ;;  %v825_v52 = vld [vmem:[%s728_s25 + $0x8] sm:$0xf] }
  0xf5   : > { %6982 = vmatpush3.bf16.msra.mxu1 %v7807_v27  ;;  %v8731_v13 = vadd.f32 %v6589_v20, %v1917_v58  ;;  %v823_v27 = vld [vmem:[%s728_s25] sm:$0xf]  ;;  %v10769_v20 = vmov 0 }
  0xf6   : > { %v1920_v53 = vpop.f32.mrf.mxu1  ;;  %6983 = vmatprep.subr.bf16.mxu1 %v7808_v42  ;;  %7534 = vmatpush3.bf16.msra.mxu0 %v7810_v50  ;;  %v6591_v63 = vpop.f32.mrf.mxu0  ;;  %v824_v50 = vld [vmem:[%s728_s25 + $0x4] sm:$0xf]  ;;  %v10770_v20 = vsel %vm8792_vm6, 4294967295, %v10769_v20 }
  0xf7   : > { %7535 = vmatprep.subr.bf16.mxu0 %v7815_v24  ;;  %10771 = vst [vmem:[#allocation4_spill] sm:$0xff] %v10770_v20 }
  0xf8   : > { %v8733_v60 = vpop.f32.mrf.mxu1  ;;  %7504 = vmatmul.mubr.bf16.gmra.mxu1 %v8268_v5  ;;  %v6592_v5 = vadd.f32 %v6591_v63, %v6590_v17  ;;  %v6593_v0 = vpop.f32.mrf.mxu0  ;;  %2744 = vmatmul.mubr.bf16.gmra.mxu0 %v8194_v15  ;;  %v7818_v63 = vld [vmem:[%s10668_s7 + $0x48] sm:$0xff]  }
  0xf9   : > { %7507 = vmatprep.mubr.bf16.mxu1 %v8294_v25  ;;  %6984 = vmatpush3.bf16.msra.mxu1 %v7809_v10  ;;  %v7813_v25 = vld [vmem:[%s10668_s7 + $0x58] sm:$0xff]   ;;  %v826_v10 = vld [vmem:[%s728_s25 + $0xc] sm:$0xf] }
  0xfa   : > { %v8749_v31 = vpop.f32.mrf.mxu1  ;;  %6985 = vmatprep.subr.bf16.mxu1 %v7811_v1  ;;  %v8755_v7 = vadd.f32 %v6592_v5, %v1920_v53  ;;  %2751 = vmatprep.mubr.bf16.mxu0 %v8333_v62  ;;  %v6594_v43 = vpop.f32.mrf.mxu0  ;;  %v7816_v62 = vld [vmem:[%s10668_s7 + $0x50] sm:$0xff]   ;;  %v3058_v1 = vld [vmem:[%s8778_s17 + $0x4] sm:$0xf]  ;;  %v832_v5 = vsel %vm8792_vm6, 0, %v825_v52 }
  0xfb   : > { %7536 = vmatpush3.bf16.msra.mxu0 %v7815_v24  ;;  %v6595_v15 = vadd.f32 %v6594_v43, %v6593_v0  ;;  %v3062_v30 = vsel %vm8440_vm5, 0, %v3058_v1 }
  0xfc   : > { %v8757_v45 = vpop.f32.mrf.mxu1  ;;  %7537 = vmatprep.subr.bf16.mxu0 %v7820_v12  ;;  %v6596_v11 = vpop.f32.mrf.mxu0 }
  0xfd   : > { %6986 = vmatpush3.bf16.msra.mxu1 %v7812_v19  ;;  %v8784_v58 = vadd.f32 %v8703_v47, %v6595_v15  ;;  %v3057_v47 = vld [vmem:[%s8778_s17] sm:$0xf] }
  0xfe   : > { %v8768_v32 = vpop.f32.mrf.mxu1  ;;  %6987 = vmatprep.subr.bf16.mxu1 %v7813_v25  ;;  %v6597_v53 = vpop.f32.mrf.mxu0  ;;  %v833_v25 = vsel %vm8792_vm6, 0, %v826_v10  ;;  %v7821_v10 = vld [vmem:[%s10668_s7 + $0x40] sm:$0xff]  }
  0xff   : > { %7538 = vmatpush3.bf16.msra.mxu0 %v7820_v12  ;;  %v6598_v24 = vadd.f32 %v6597_v53, %v6596_v11  ;;  %v831_v12 = vsel %vm8792_vm6, 0, %v824_v50  ;;  %v3059_v11 = vld [vmem:[%s8778_s17 + $0x8] sm:$0xf]  ;;  %v6034_v52 = vcombine.low %v832_v5, %v833_v25 }
 0x100   : > { %v8786_v42 = vpop.f32.mrf.mxu1  ;;  %7508 = vmatmul.mubr.bf16.gmra.mxu1 %v8307_v39  ;;  %v7828_v39 = vld [vmem:[%s10668_s7 + $0x90] sm:$0xff]   ;;  %7539 = vmatprep.subr.bf16.mxu0 %v7824_v23  ;;  %v6599_v19 = vpop.f32.mrf.mxu0 }
 0x101   : > { %7511 = vmatprep.mubr.bf16.mxu1 %v8336_v2  ;;  %6988 = vmatpush3.bf16.msra.mxu1 %v7814_v14  ;;  %v830_v2 = vsel %vm8792_vm6, 0, %v823_v27  ;;  %v8817_v0 = vadd.f32 %v8717_v61, %v6598_v24  ;;  %v3061_v14 = vsel %vm8440_vm5, 0, %v3057_v47  ;;  %v3060_v61 = vld [vmem:[%s8778_s17 + $0xc] sm:$0xf]  ;;  %v3063_v24 = vsel %vm8440_vm5, 0, %v3059_v11 }
 0x102   : > { %v8802_v17 = vpop.f32.mrf.mxu1  ;;  %6989 = vmatprep.subr.bf16.mxu1 %v7816_v62  ;;  %2752 = vmatmul.mubr.bf16.gmra.mxu0 %v8226_v41  ;;  %v6600_v15 = vpop.f32.mrf.mxu0  ;;  %v7819_v62 = vld [vmem:[%s10668_s7 + $0x8] sm:$0xff]   ;;  %v6203_v53 = vcombine.low %v3061_v14, %v3062_v30  ;;  %v1110_v25 = vshrl.u32 %v6034_v52, 16 }
 0x103   : > { %2759 = vmatprep.mubr.bf16.mxu0 %v8391_v59  ;;  %7540 = vmatpush3.bf16.msra.mxu0 %v7824_v23  ;;  %v6601_v27 = vadd.f32 %v6600_v15, %v6599_v19  ;;  %v6033_v59 = vcombine.low %v830_v2, %v831_v12  ;;  %v7832_v23 = vld [vmem:[%s10668_s7 + $0x88] sm:$0xff]   ;;  %v7836_v2 = vld [vmem:[%s10668_s7 + $0x80] sm:$0xff]  }
 0x104   : > { %v8819_v43 = vpop.f32.mrf.mxu1  ;;  %7541 = vmatprep.subr.bf16.mxu0 %v7828_v39  ;;  %v3206_v14 = vshrl.u32 %v6203_v53, 16 }
 0x105   : > { %6990 = vmatpush3.bf16.msra.mxu1 %v7817_v28  ;;  %v6602_v28 = vpop.f32.mrf.mxu0  ;;  %v8840_v47 = vadd.f32 %v6601_v27, %v8749_v31  ;;  %v7822_v31 = vld [vmem:[%s10668_s7] sm:$0xff]   ;;  %v1103_v5 = vshrl.u32 %v6033_v59, 16  ;;  %v1106_v11 = vshll.u32 %v6033_v59, 16 }
 0x106   : > { %v8831_v50 = vpop.f32.mrf.mxu1  ;;  %6991 = vmatprep.subr.bf16.mxu1 %v7818_v63  ;;  %v3064_v63 = vsel %vm8440_vm5, 0, %v3060_v61  ;;  %v7840_v61 = vld [vmem:[%s10668_s7 + $0x138] sm:$0xff]  }
 0x107   : > { %7542 = vmatpush3.bf16.msra.mxu0 %v7828_v39  ;;  %v6603_v19 = vpop.f32.mrf.mxu0  ;;  %v8861_v39 = vld [vmem:[%s10668_s7 + $0x178] sm:$0xff]   ;;  %v6204_v41 = vcombine.low %v3063_v24, %v3064_v63  ;;  %v3208_v63 = vrot.slane %v3206_v14, 7 }
 0x108   : > { %v8842_v1 = vpop.f32.mrf.mxu1  ;;  %7512 = vmatmul.mubr.bf16.gmra.mxu1 %v8363_v26  ;;  %v6604_v26 = vadd.f32 %v6603_v19, %v6602_v28  ;;  %7543 = vmatprep.subr.bf16.mxu0 %v7832_v23  ;;  %v1112_v28 = vrot.slane %v1110_v25, 7 }
 0x109   : > { %7515 = vmatprep.mubr.bf16.mxu1 %v10764_v44  ;;  %6992 = vmatpush3.bf16.msra.mxu1 %v7819_v62  ;;  %v6605_v44 = vpop.f32.mrf.mxu0  ;;  %v3216_v14 = vshll.u32 %v6204_v41, 16 }
 0x10a   : > { %v8856_v12 = vpop.f32.mrf.mxu1  ;;  %6993 = vmatprep.subr.bf16.mxu1 %v7821_v10  ;;  %2760 = vmatmul.mubr.bf16.gmra.mxu0 %v8246_v51  ;;  %v8865_v30 = vadd.f32 %v6604_v26, %v8768_v32  ;;  %v1105_v10 = vrot.slane %v1103_v5, 7  ;;  %v1113_v32 = vshll.u32 %v6034_v52, 16 }
 0x10b   : > { %2767 = vmatprep.mubr.bf16.mxu0 %v8445_v57  ;;  %7544 = vmatpush3.bf16.msra.mxu0 %v7832_v23  ;;  %v6606_v62 = vpop.f32.mrf.mxu0  ;;  %v3209_v57 = vshll.u32 %v6203_v53, 16  ;;  %v3213_v23 = vshrl.u32 %v6204_v41, 16 }
 0x10c   : > { %v8867_v15 = vpop.f32.mrf.mxu1  ;;  %7545 = vmatprep.subr.bf16.mxu0 %v7836_v2  ;;  %v6607_v27 = vadd.f32 %v6606_v62, %v6605_v44  ;;  %v1108_v5 = vor.u32 %v1106_v11, %v1105_v10  ;;  %v1115_v25 = vor.u32 %v1113_v32, %v1112_v28 }
 0x10d   : > { %6994 = vmatpush3.bf16.msra.mxu1 %v7822_v31  ;;  %v6608_v24 = vpop.f32.mrf.mxu0  ;;  %v3215_v53 = vrot.slane %v3213_v23, 7  ;;  %v10775_v23 = vld [vmem:[#allocation10_spill] sm:$0xff] }
 0x10e   : > { %v8873_v51 = vpop.f32.mrf.mxu1  ;;  %7579 = vmatprep.subr.bf16.mxu1 %v8861_v39  ;;  %v8877_v59 = vadd.f32 %v8733_v60, %v6607_v27  ;;  %v3211_v60 = vor.u32 %v3209_v57, %v3208_v63  ;;  %v8895_v11 = vsel %vm966_vm1, %v1105_v10, %v1115_v25 }
 0x10f   : > { %7546 = vmatpush3.bf16.msra.mxu0 %v7836_v2  ;;  %v6609_v31 = vpop.f32.mrf.mxu0  ;;  %v3218_v41 = vor.u32 %v3216_v14, %v3215_v53  ;;  %v7826_v14 = vld [vmem:[%s8614_s27 + $0x8] sm:$0xff]  }
 0x110   : > { %v8879_v19 = vpop.f32.mrf.mxu1  ;;  %7516 = vmatmul.mubr.bf16.gmra.mxu1 %v10765_v36  ;;  %7115 = vmatprep.subr.bf16.mxu0 %v7840_v61  ;;  %v6610_v26 = vadd.f32 %v6609_v31, %v6608_v24  ;;  %v7825_v24 = vld [vmem:[%s8614_s27] sm:$0xff]  }
 0x111   : > { %7519 = vmatprep.mubr.bf16.mxu1 %v10766_v29  ;;  %v6611_v44 = vpop.f32.mrf.mxu0 }
 0x112   : > { %v8883_v52 = vpop.f32.mrf.mxu1  ;;  %2768 = vmatmul.mubr.bf16.gmra.mxu0 %v8261_v3  ;;  %v8887_v62 = vadd.f32 %v8757_v45, %v6610_v26  ;;  %v8899_v3 = vsel %vm8123_vm3, 0, %v1108_v5  ;;  %v8903_v45 = vsel %vm8123_vm3, 0, %v3211_v60  ;;  %v1457_v26 = vrot.slane %v8895_v11, 1 }
 0x113   : > { %2775 = vmatprep.mubr.bf16.mxu0 %v8474_v4  ;;  %v6612_v29 = vpop.f32.mrf.mxu0  ;;  %v1456_v31 = vrot.slane %v8899_v3, 1 }
 0x114   : > { %v8889_v36 = vpop.f32.mrf.mxu1  ;;  %v6613_v2 = vadd.f32 %v6612_v29, %v6611_v44  ;;  %v3408_v44 = vshll.u32 %v8903_v45, 16 }
 0x115   : > { %v6614_v32 = vpop.f32.mrf.mxu0 }
 0x116   : > { %v8892_v61 = vpop.f32.mrf.mxu1  ;;  %v8907_v4 = vadd.f32 %v6613_v2, %v8802_v17  ;;  %v8920_v17 = vsel %vm966_vm1, %v3208_v63, %v3218_v41  ;;  %v3406_v63 = vshrl.u32 %v8903_v45, 16  ;;  %v3410_v41 = vrot.slane %v3408_v44, 1 }
 0x117   : > { %v6615_v10 = vpop.f32.mrf.mxu0 }
 0x118   : > { %10774 = vst [vmem:[#allocation5_spill] sm:$0xff] %v8907_v4  ;;  %v8909_v57 = vpop.f32.mrf.mxu1  ;;  %7520 = vmatmul.mubr.bf16.gmra.mxu1 %v10768_v18  ;;  %v6616_v5 = vadd.f32 %v6615_v10, %v6614_v32  ;;  %v3221_v18 = vshrl.u32 %v7825_v24, 16  ;;  %v1458_v10 = vsel %vm1410_vm2, %v1456_v31, %v1457_v26  ;;  %v3228_v4 = vshrl.u32 %v7826_v14, 16 }
 0x119   : > { %7523 = vmatprep.mubr.bf16.mxu1 %v10775_v23  ;;  %v6617_v60 = vpop.f32.mrf.mxu0  ;;  %v8932_v23 = vsel %vm8123_vm3, %v1112_v28, 0  ;;  %v3411_v44 = vor.u32 %v3410_v41, %v3406_v63 }
 0x11a   : > { %v8915_v25 = vpop.f32.mrf.mxu1  ;;  %2776 = vmatmul.mubr.bf16.gmra.mxu0 %v8277_v9  ;;  %v8924_v29 = vadd.f32 %v6616_v5, %v8831_v50  ;;  %v3413_v50 = vshll.u32 %v8920_v17, 16  ;;  %v3223_v16 = vrot.slane %v3221_v18, 7 }
 0x11b   : > { %2783 = vmatprep.mubr.bf16.mxu0 %v8499_v34  ;;  %v6618_v32 = vpop.f32.mrf.mxu0 }
 0x11c   : > { %10776 = vst [vmem:[#allocation6_spill] sm:$0xff] %v8924_v29  ;;  %v8926_v2 = vpop.f32.mrf.mxu1  ;;  %v6619_v9 = vadd.f32 %v6618_v32, %v6617_v60  ;;  %v3224_v29 = vshll.u32 %v7825_v24, 16  ;;  %v1459_v60 = vrot.slane %v8932_v23, 1  ;;  %v8949_v24 = vsel %vm8123_vm3, %v3215_v53, 0 }
 0x11d   : > { %10777 = vst [vmem:[#allocation9_spill] sm:$0xff] %v8926_v2  ;;  %v6620_v5 = vpop.f32.mrf.mxu0  ;;  %v3415_v2 = vrot.slane %v3413_v50, 1  ;;  %10779 = vst [vmem:[#allocation10_spill] sm:$0xff] %v8949_v24  ;;  %v3417_v53 = vshrl.u32 %v8920_v17, 16  ;;  %v3421_v50 = vshll.u32 %v8949_v24, 16 }
 0x11e   : > { %v8934_v20 = vpop.f32.mrf.mxu1  ;;  %v8939_v34 = vadd.f32 %v8786_v42, %v6619_v9  ;;  %v3226_v42 = vor.u32 %v3224_v29, %v3223_v16  ;;  %v3230_v9 = vrot.slane %v3228_v4, 7  ;;  %v1460_v41 = vsel %vm1410_vm2, %v1457_v26, %v1459_v60 }
 0x11f   : > { %v6621_v28 = vpop.f32.mrf.mxu0  ;;  %v3416_v4 = vsel %vm1169_vm4, %v3411_v44, %v3415_v2 }
 0x120   : > { %v8941_v31 = vpop.f32.mrf.mxu1  ;;  %7524 = vmatmul.mubr.bf16.gmra.mxu1 %v8494_v46  ;;  %v6622_v32 = vadd.f32 %v6621_v28, %v6620_v5  ;;  %v3231_v46 = vshll.u32 %v7826_v14, 16 }
 0x121   : > { %10778 = vst [vmem:[#allocation8_spill] sm:$0xff] %v8941_v31  ;;  %7527 = vmatprep.mubr.bf16.mxu1 %v1458_v10  ;;  %v6623_v18 = vpop.f32.mrf.mxu0 }
 0x122   : > { %v8945_v35 = vpop.f32.mrf.mxu1  ;;  %2784 = vmatmul.mubr.bf16.gmra.mxu0 %v8311_v40  ;;  %v8953_v10 = vadd.f32 %v8819_v43, %v6622_v32  ;;  %v3233_v29 = vor.u32 %v3231_v46, %v3230_v9  ;;  %v8966_v43 = vsel %vm8123_vm3, 0, %v3226_v42  ;;  %v3419_v32 = vor.u32 %v3417_v53, %v3415_v2 }
 0x123   : > { %2791 = vmatprep.mubr.bf16.mxu0 %v8519_v37  ;;  %v6624_v63 = vpop.f32.mrf.mxu0  ;;  %10780 = vst [vmem:[#allocation12_spill] sm:$0xff] %v8966_v43  ;;  %v7829_v37 = vld [vmem:[%s8614_s27 + $0x10] sm:$0xff]   ;;  %v3428_v46 = vshll.u32 %v8966_v43, 16 }
 0x124   : > { %v8955_v31 = vpop.f32.mrf.mxu1  ;;  %v6625_v5 = vadd.f32 %v6624_v63, %v6623_v18  ;;  %v3423_v18 = vrot.slane %v3421_v50, 1  ;;  %v8979_v42 = vsel %vm966_vm1, %v3223_v16, %v3233_v29 }
 0x125   : > { %v6626_v14 = vpop.f32.mrf.mxu0  ;;  %10782 = vst [vmem:[#allocation14_spill] sm:$0xff] %v8979_v42  ;;  %v3433_v16 = vshll.u32 %v8979_v42, 16 }
 0x126   : > { %v8961_v40 = vpop.f32.mrf.mxu1  ;;  %v8970_v28 = vadd.f32 %v6625_v5, %v8856_v12  ;;  %v7830_v12 = vld [vmem:[%s8614_s27 + $0x18] sm:$0xff]   ;;  %v3236_v5 = vshrl.u32 %v7829_v37, 16  ;;  %v3424_v53 = vsel %vm1169_vm4, %v3419_v32, %v3423_v18 }
 0x127   : > { %v6627_v60 = vpop.f32.mrf.mxu0 }
 0x128   : > { %v8972_v26 = vpop.f32.mrf.mxu1  ;;  %7528 = vmatmul.mubr.bf16.gmra.mxu1 %v1460_v41  ;;  %v6628_v63 = vadd.f32 %v6627_v60, %v6626_v14  ;;  %v3430_v14 = vrot.slane %v3428_v46, 1  ;;  %v3238_v60 = vrot.slane %v3236_v5, 7  ;;  %v9003_v5 = vsel %vm8123_vm3, %v3230_v9, 0 }
 0x129   : > { %10781 = vst [vmem:[#allocation13_spill] sm:$0xff] %v8972_v26  ;;  %3939 = vmatprep.mubr.bf16.mxu1 %v3416_v4  ;;  %v6629_v24 = vpop.f32.mrf.mxu0 }
 0x12a   : > { %v8974_v44 = vpop.f32.mrf.mxu1  ;;  %2792 = vmatmul.mubr.bf16.gmra.mxu0 %v8321_v48  ;;  %v8983_v26 = vadd.f32 %v6628_v63, %v8873_v51  ;;  %v3426_v48 = vshrl.u32 %v8966_v43, 16  ;;  %v7827_v51 = vld [vmem:[%s10668_s7 + $0x170] sm:$0xff]   ;;  %v3239_v63 = vshll.u32 %v7829_v37, 16 }
 0x12b   : > { %2799 = vmatprep.mubr.bf16.mxu0 %v8533_v21  ;;  %v6630_v2 = vpop.f32.mrf.mxu0 }
 0x12c   : > { %v8985_v41 = vpop.f32.mrf.mxu1  ;;  %v6631_v50 = vadd.f32 %v6630_v2, %v6629_v24  ;;  %v3431_v2 = vor.u32 %v3430_v14, %v3426_v48 }
 0x12d   : > { %10783 = vst [vmem:[#allocation15_spill] sm:$0xff] %v8985_v41  ;;  %v6632_v29 = vpop.f32.mrf.mxu0  ;;  %v3243_v41 = vshrl.u32 %v7830_v12, 16 }
 0x12e   : > { %v8989_v4 = vpop.f32.mrf.mxu1  ;;  %v8997_v21 = vadd.f32 %v8842_v1, %v6631_v50  ;;  %v7831_v1 = vld [vmem:[%s10668_s7 + $0x168] sm:$0xff]  }
 0x12f   : > { %10784 = vst [vmem:[#allocation16_spill] sm:$0xff] %v8989_v4  ;;  %v6633_v24 = vpop.f32.mrf.mxu0  ;;  %v3435_v4 = vrot.slane %v3433_v16, 1  ;;  %v3437_v16 = vshrl.u32 %v8979_v42, 16 }
 0x130   : > { %10785 = vst [vmem:[#allocation17_spill] sm:$0xff] %v8997_v21  ;;  %v6723_v32 = vpop.f32.mrf.mxu1  ;;  %3940 = vmatmul.mubr.bf16.vlgmr.msra.gmra.mxu1 %v8903_v45  ;;  %v6634_v18 = vadd.f32 %v6633_v24, %v6632_v29  ;;  %v3241_v21 = vor.u32 %v3239_v63, %v3238_v60  ;;  %v3441_v29 = vshll.u32 %v9003_v5, 16 }
 0x131   : > { %7580 = vmatpush3.bf16.msra.mxu1 %v8861_v39  ;;  %3947 = vmatprep.mubr.bf16.mxu1 %v3424_v53  ;;  %v6635_v37 = vpop.f32.mrf.mxu0  ;;  %v9009_v39 = vrot.slane %v3243_v41, 7  ;;  %v3246_v53 = vshll.u32 %v7830_v12, 16  ;;  %v9021_v12 = vsel %vm1169_vm4, %v3431_v2, %v3435_v4 }
 0x132   : > { %v6724_v46 = vpop.f32.mrf.mxu1  ;;  %7581 = vmatprep.subr.bf16.mxu1 %v7827_v51  ;;  %2800 = vmatmul.mubr.bf16.gmra.mxu0 %v8341_v6  ;;  %v9012_v48 = vadd.f32 %v8867_v15, %v6634_v18  ;;  %10786 = vst [vmem:[#allocation18_spill] sm:$0xff] %v9021_v12  ;;  %v7835_v15 = vld [vmem:[%s10668_s7 + $0x160] sm:$0xff]   ;;  %v9029_v24 = vsel %vm8123_vm3, 0, %v3241_v21 }
 0x133   : > { %v6725_v50 = vadd.f32 %v6724_v46, %v6723_v32  ;;  %2807 = vmatprep.mubr.bf16.mxu0 %v8552_v22  ;;  %v6636_v9 = vpop.f32.mrf.mxu0 }
 0x134   : > { %v6726_v14 = vpop.f32.mrf.mxu1  ;;  %v6637_v63 = vadd.f32 %v6636_v9, %v6635_v37  ;;  %v3439_v37 = vor.u32 %v3437_v16, %v3435_v4  ;;  %v3448_v9 = vshll.u32 %v9029_v24, 16 }
 0x135   : > { %7582 = vmatpush3.bf16.msra.mxu1 %v7827_v51  ;;  %v9018_v6 = vadd.f32 %v6725_v50, %v8731_v13  ;;  %v6638_v22 = vpop.f32.mrf.mxu0  ;;  %v3248_v51 = vor.u32 %v3246_v53, %v9009_v39  ;;  %v7833_v13 = vld [vmem:[%s8614_s27 + $0x20] sm:$0xff]   ;;  %v3443_v50 = vrot.slane %v3441_v29, 1 }
 0x136   : > { %v6727_v41 = vpop.f32.mrf.mxu1  ;;  %7583 = vmatprep.subr.bf16.mxu1 %v7831_v1  ;;  %v9033_v18 = vadd.f32 %v6637_v63, %v8883_v52  ;;  %v7839_v52 = vld [vmem:[%s10668_s7 + $0x158] sm:$0xff]   ;;  %v3251_v16 = vshrl.u32 %v7833_v13, 16 }
 0x137   : > { %v6728_v32 = vadd.f32 %v6727_v41, %v6726_v14  ;;  %v6639_v2 = vpop.f32.mrf.mxu0  ;;  %v9046_v4 = vsel %vm966_vm1, %v3238_v60, %v3248_v51  ;;  %v3446_v60 = vshrl.u32 %v9029_v24, 16  ;;  %v3450_v51 = vrot.slane %v3448_v9, 1 }
 0x138   : > { %v6729_v46 = vpop.f32.mrf.mxu1  ;;  %3948 = vmatmul.mubr.bf16.gmra.mxu1 %v8920_v17  ;;  %v6640_v14 = vadd.f32 %v6639_v2, %v6638_v22 }
 0x139   : > { %3955 = vmatprep.mubr.bf16.mxu1 %v9021_v12  ;;  %7584 = vmatpush3.bf16.msra.mxu1 %v7831_v1  ;;  %v9038_v53 = vadd.f32 %v6728_v32, %v8755_v7  ;;  %v6641_v63 = vpop.f32.mrf.mxu0  ;;  %v7834_v1 = vld [vmem:[%s8614_s27 + $0x28] sm:$0xff]   ;;  %v9054_v32 = vsel %vm1169_vm4, %v3439_v37, %v3443_v50  ;;  %v3253_v37 = vrot.slane %v3251_v16, 7  ;;  %v3254_v50 = vshll.u32 %v7833_v13, 16 }
 0x13a   : > { %v6730_v21 = vpop.f32.mrf.mxu1  ;;  %7585 = vmatprep.subr.bf16.mxu1 %v7835_v15  ;;  %2808 = vmatmul.mubr.bf16.gmra.mxu0 %v8345_v8  ;;  %v9050_v7 = vadd.f32 %v6640_v14, %v8892_v61  ;;  %10788 = vst [vmem:[#allocation20_spill] sm:$0xff] %v9054_v32  ;;  %v9075_v13 = vsel %vm8123_vm3, %v9009_v39, 0 }
 0x13b   : > { %10787 = vst [vmem:[#allocation19_spill] sm:$0xff] %v9038_v53  ;;  %v6731_v41 = vadd.f32 %v6730_v21, %v6729_v46  ;;  %2815 = vmatprep.mubr.bf16.mxu0 %v8567_v49  ;;  %v6642_v22 = vpop.f32.mrf.mxu0  ;;  %v3453_v21 = vshll.u32 %v9046_v4, 16  ;;  %v7846_v49 = vld [vmem:[%s10668_s7 + $0x150] sm:$0xff]   ;;  %v3451_v53 = vor.u32 %v3450_v51, %v3446_v60 }
 0x13c   : > { %v6732_v29 = vpop.f32.mrf.mxu1  ;;  %v6643_v8 = vadd.f32 %v6642_v22, %v6641_v63 }
 0x13d   : > { %7586 = vmatpush3.bf16.msra.mxu1 %v7835_v15  ;;  %v9057_v2 = vadd.f32 %v6731_v41, %v8784_v58  ;;  %v6644_v61 = vpop.f32.mrf.mxu0  ;;  %v3258_v15 = vshrl.u32 %v7834_v1, 16 }
 0x13e   : > { %v6733_v46 = vpop.f32.mrf.mxu1  ;;  %7587 = vmatprep.subr.bf16.mxu1 %v7839_v52  ;;  %v9065_v58 = vadd.f32 %v8879_v19, %v6643_v8  ;;  %v7853_v19 = vld [vmem:[%s10668_s7 + $0x148] sm:$0xff]  }
 0x13f   : > { %v6734_v14 = vadd.f32 %v6733_v46, %v6732_v29  ;;  %v6645_v41 = vpop.f32.mrf.mxu0  ;;  %v3455_v29 = vrot.slane %v3453_v21, 1  ;;  %v9081_v8 = vrot.slane %v3258_v15, 7  ;;  %v3261_v46 = vshll.u32 %v7834_v1, 16 }
 0x140   : > { %v6735_v63 = vpop.f32.mrf.mxu1  ;;  %3956 = vmatmul.mubr.bf16.gmra.mxu1 %v8966_v43  ;;  %v6646_v22 = vadd.f32 %v6645_v41, %v6644_v61  ;;  %v3457_v21 = vshrl.u32 %v9046_v4, 16  ;;  %v3461_v61 = vshll.u32 %v9075_v13, 16 }
 0x141   : > { %3963 = vmatprep.mubr.bf16.mxu1 %v9054_v32  ;;  %7588 = vmatpush3.bf16.msra.mxu1 %v7839_v52  ;;  %v9070_v9 = vadd.f32 %v6734_v14, %v8817_v0  ;;  %v6647_v16 = vpop.f32.mrf.mxu0  ;;  %v3256_v0 = vor.u32 %v3254_v50, %v3253_v37  ;;  %v9093_v1 = vsel %vm1169_vm4, %v3451_v53, %v3455_v29 }
 0x142   : > { %v6736_v12 = vpop.f32.mrf.mxu1  ;;  %7589 = vmatprep.subr.bf16.mxu1 %v7846_v49  ;;  %2816 = vmatmul.mubr.bf16.gmra.mxu0 %v8385_v55  ;;  %v9084_v60 = vadd.f32 %v8889_v36, %v6646_v22  ;;  %10789 = vst [vmem:[#allocation21_spill] sm:$0xff] %v9093_v1  ;;  %v7860_v36 = vld [vmem:[%s10668_s7 + $0x140] sm:$0xff]   ;;  %v3263_v15 = vor.u32 %v3261_v46, %v9081_v8 }
 0x143   : > { %v6737_v52 = vadd.f32 %v6736_v12, %v6735_v63  ;;  %2823 = vmatprep.mubr.bf16.mxu0 %v8576_v33  ;;  %v6648_v39 = vpop.f32.mrf.mxu0  ;;  %v9101_v63 = vsel %vm8123_vm3, 0, %v3256_v0  ;;  %v3459_v22 = vor.u32 %v3457_v21, %v3455_v29  ;;  %v7838_v21 = vld [vmem:[%s8614_s27 + $0x38] sm:$0xff]  }
 0x144   : > { %v6738_v51 = vpop.f32.mrf.mxu1  ;;  %v6649_v55 = vadd.f32 %v6648_v39, %v6647_v16  ;;  %10790 = vst [vmem:[#allocation22_spill] sm:$0xff] %v9101_v63  ;;  %v3463_v16 = vrot.slane %v3461_v61, 1  ;;  %v9118_v29 = vsel %vm966_vm1, %v3253_v37, %v3263_v15  ;;  %v3273_v32 = vshrl.u32 %v7838_v21, 16 }
 0x145   : > { %v9090_v14 = vadd.f32 %v6737_v52, %v8840_v47  ;;  %7590 = vmatpush3.bf16.msra.mxu1 %v7846_v49  ;;  %v6650_v33 = vpop.f32.mrf.mxu0  ;;  %v7837_v47 = vld [vmem:[%s8614_s27 + $0x30] sm:$0xff]   ;;  %10791 = vst [vmem:[#allocation23_spill] sm:$0xff] %v9118_v29 }
 0x146   : > { %v6739_v12 = vpop.f32.mrf.mxu1  ;;  %7591 = vmatprep.subr.bf16.mxu1 %v7853_v19  ;;  %v9105_v49 = vadd.f32 %v6649_v55, %v8915_v25  ;;  %v7865_v25 = vld [vmem:[%s10668_s7 + $0x1f8] sm:$0xff]  }
 0x147   : > { %v6740_v50 = vadd.f32 %v6739_v12, %v6738_v51  ;;  %v6651_v53 = vpop.f32.mrf.mxu0  ;;  %v3468_v51 = vshll.u32 %v9101_v63, 16  ;;  %v1353_v12 = vshll.u32 %v8899_v3, 16 }
 0x148   : > { %v6741_v41 = vpop.f32.mrf.mxu1  ;;  %3964 = vmatmul.mubr.bf16.gmra.mxu1 %v8979_v42  ;;  %v6652_v46 = vadd.f32 %v6651_v53, %v6650_v33 }
 0x149   : > { %3971 = vmatprep.mubr.bf16.mxu1 %v9093_v1  ;;  %v9110_v52 = vadd.f32 %v6740_v50, %v8865_v30  ;;  %7592 = vmatpush3.bf16.msra.mxu1 %v7853_v19  ;;  %v6653_v39 = vpop.f32.mrf.mxu0  ;;  %v3266_v30 = vshrl.u32 %v7837_v47, 16  ;;  %v9127_v50 = vsel %vm1169_vm4, %v3459_v22, %v3463_v16  ;;  %v3470_v53 = vrot.slane %v3468_v51, 1 }
 0x14a   : > { %v6742_v0 = vpop.f32.mrf.mxu1  ;;  %7593 = vmatprep.subr.bf16.mxu1 %v7860_v36  ;;  %2824 = vmatmul.mubr.bf16.gmra.mxu0 %v8381_v54  ;;  %v9122_v19 = vadd.f32 %v6652_v46, %v8934_v20  ;;  %10793 = vst [vmem:[#allocation25_spill] sm:$0xff] %v9127_v50  ;;  %v3473_v20 = vshll.u32 %v9118_v29, 16  ;;  %v3269_v1 = vshll.u32 %v7837_v47, 16 }
 0x14b   : > { %v6743_v55 = vadd.f32 %v6742_v0, %v6741_v41  ;;  %2831 = vmatprep.mubr.bf16.mxu0 %v8586_v56  ;;  %v6654_v33 = vpop.f32.mrf.mxu0  ;;  %v3466_v41 = vshrl.u32 %v9101_v63, 16  ;;  %v3268_v0 = vrot.slane %v3266_v30, 7 }
 0x14c   : > { %10792 = vst [vmem:[#allocation24_spill] sm:$0xff] %v9122_v19  ;;  %v6744_v61 = vpop.f32.mrf.mxu1  ;;  %v6655_v37 = vadd.f32 %v6654_v33, %v6653_v39  ;;  %v1358_v39 = vshll.u32 %v8895_v11, 16 }
 0x14d   : > { %v9130_v54 = vadd.f32 %v6743_v55, %v8877_v59  ;;  %7594 = vmatpush3.bf16.msra.mxu1 %v7860_v36  ;;  %v6656_v46 = vpop.f32.mrf.mxu0  ;;  %v1351_v59 = vshrl.u32 %v8899_v3, 16  ;;  %v1355_v36 = vrot.slane %v1353_v12, 1  ;;  %v3471_v30 = vor.u32 %v3470_v53, %v3466_v41  ;;  %v10797_v41 = vld [vmem:[#allocation11_spill] sm:$0xff] }
 0x14e   : > { %v6745_v15 = vpop.f32.mrf.mxu1  ;;  %7251 = vmatprep.subr.bf16.mxu1 %v7865_v25  ;;  %v9135_v22 = vadd.f32 %v8909_v57, %v6655_v37  ;;  %v9147_v57 = vsel %vm8123_vm3, %v9081_v8, 0  ;;  %v3271_v37 = vor.u32 %v3269_v1, %v3268_v0  ;;  %v3477_v8 = vshrl.u32 %v9118_v29, 16 }
 0x14f   : > { %v6746_v56 = vadd.f32 %v6745_v15, %v6744_v61  ;;  %v6657_v51 = vpop.f32.mrf.mxu0  ;;  %v3475_v61 = vrot.slane %v3473_v20, 1  ;;  %v9150_v15 = vrot.slane %v3273_v32, 7  ;;  %v1356_v53 = vor.u32 %v1355_v36, %v1351_v59  ;;  %v7844_v36 = vld [vmem:[%s8614_s27 + $0x40] sm:$0xff]  }
 0x150   : > { %10794 = vst [vmem:[#allocation26_spill] sm:$0xff] %v9135_v22  ;;  %v6747_v16 = vpop.f32.mrf.mxu1  ;;  %3972 = vmatmul.mubr.bf16.gmra.mxu1 %v9029_v24  ;;  %v6658_v55 = vadd.f32 %v6657_v51, %v6656_v46  ;;  %v10795_v22 = vld [vmem:[#allocation9_spill] sm:$0xff]  ;;  %v1360_v20 = vrot.slane %v1358_v39, 1  ;;  %v3481_v51 = vshll.u32 %v9147_v57, 16  ;;  %v9167_v59 = vsel %vm8123_vm3, 0, %v3271_v37 }
 0x151   : > { %3979 = vmatprep.mubr.bf16.mxu1 %v9127_v50  ;;  %v9142_v25 = vadd.f32 %v6746_v56, %v8887_v62  ;;  %v6659_v33 = vpop.f32.mrf.mxu0  ;;  %v3276_v50 = vshll.u32 %v7838_v21, 16  ;;  %v9162_v21 = vsel %vm1169_vm4, %v3471_v30, %v3475_v61  ;;  %10801 = vst [vmem:[#allocation27_spill] sm:$0xff] %v9167_v59  ;;  %v1362_v30 = vshrl.u32 %v8895_v11, 16 }
 0x152   : > { %v6748_v47 = vpop.f32.mrf.mxu1  ;;  %2832 = vmatmul.mubr.bf16.gmra.mxu0 %v8422_v38  ;;  %v9153_v62 = vadd.f32 %v10795_v22, %v6658_v55  ;;  %v10798_v38 = vld [vmem:[#allocation5_spill] sm:$0xff]  ;;  %v3483_v37 = vrot.slane %v3481_v51, 1 }
 0x153   : > { %v6749_v12 = vadd.f32 %v6748_v47, %v6747_v16  ;;  %2839 = vmatprep.mubr.bf16.mxu0 %v10797_v41  ;;  %v6660_v56 = vpop.f32.mrf.mxu0  ;;  %10800 = vst [vmem:[#allocation5_spill] sm:$0xff] %v9162_v21  ;;  %v3278_v47 = vor.u32 %v3276_v50, %v9150_v15  ;;  %v1366_v50 = vshll.u32 %v8932_v23, 16  ;;  %v1364_v51 = vor.u32 %v1362_v30, %v1360_v20 }
 0x154   : > { %10796 = vst [vmem:[#allocation9_spill] sm:$0xff] %v9153_v62  ;;  %v6750_v46 = vpop.f32.mrf.mxu1  ;;  %v6661_v32 = vadd.f32 %v6660_v56, %v6659_v33  ;;  %v1361_v33 = vsel %vm1169_vm4, %v1356_v53, %v1360_v20  ;;  %v10803_v56 = vld [vmem:[#allocation6_spill] sm:$0xff]  ;;  %v10804_v62 = vld [vmem:[#allocation7_spill] sm:$0xff]  ;;  %v10808_v20 = vld [vmem:[#allocation8_spill] sm:$0xff] }
 0x155   : > { %v9159_v16 = vadd.f32 %v6749_v12, %v10798_v38  ;;  %v6662_v22 = vpop.f32.mrf.mxu0  ;;  %v9184_v19 = vsel %vm966_vm1, %v3268_v0, %v3278_v47  ;;  %v3486_v0 = vshrl.u32 %v9167_v59, 16 }
 0x156   : > { %v6751_v1 = vpop.f32.mrf.mxu1  ;;  %v9171_v39 = vadd.f32 %v6661_v32, %v8945_v35  ;;  %10805 = vst [vmem:[#allocation6_spill] sm:$0xff] %v9184_v19 }
 0x157   : > { %10799 = vst [vmem:[#allocation11_spill] sm:$0xff] %v9159_v16  ;;  %v6752_v55 = vadd.f32 %v6751_v1, %v6750_v46  ;;  %v6663_v12 = vpop.f32.mrf.mxu0  ;;  %v3479_v46 = vor.u32 %v3477_v8, %v3475_v61  ;;  %v3488_v1 = vshll.u32 %v9167_v59, 16  ;;  %v7845_v16 = vld [vmem:[%s8614_s27 + $0x48] sm:$0xff]  }
 0x158   : > { %10802 = vst [vmem:[#allocation28_spill] sm:$0xff] %v9171_v39  ;;  %v6753_v41 = vpop.f32.mrf.mxu1  ;;  %3980 = vmatmul.mubr.bf16.gmra.mxu1 %v9046_v4  ;;  %v6664_v35 = vadd.f32 %v6663_v12, %v6662_v22  ;;  %v1368_v22 = vrot.slane %v1366_v50, 1 }
 0x159   : > { %3987 = vmatprep.mubr.bf16.mxu1 %v9162_v21  ;;  %v9179_v38 = vadd.f32 %v6752_v55, %v10803_v56  ;;  %v6665_v39 = vpop.f32.mrf.mxu0  ;;  %v3281_v21 = vshrl.u32 %v7844_v36, 16  ;;  %v9191_v55 = vsel %vm1169_vm4, %v3479_v46, %v3483_v37  ;;  %v3490_v47 = vrot.slane %v3488_v1, 1 }
 0x15a   : > { %v6754_v32 = vpop.f32.mrf.mxu1  ;;  %2840 = vmatmul.mubr.bf16.gmra.mxu0 %v10804_v62  ;;  %v9188_v23 = vadd.f32 %v6664_v35, %v8961_v40  ;;  %10807 = vst [vmem:[#allocation29_spill] sm:$0xff] %v9191_v55  ;;  %v3493_v56 = vshll.u32 %v9184_v19, 16 }
 0x15b   : > { %v6755_v53 = vadd.f32 %v6754_v32, %v6753_v41  ;;  %2847 = vmatprep.mubr.bf16.mxu0 %v1361_v33  ;;  %v6666_v8 = vpop.f32.mrf.mxu0  ;;  %v3283_v32 = vrot.slane %v3281_v21, 7  ;;  %v3284_v33 = vshll.u32 %v7844_v36, 16  ;;  %v9210_v36 = vsel %vm8123_vm3, %v9150_v15, 0 }
 0x15c   : > { %10806 = vst [vmem:[#allocation7_spill] sm:$0xff] %v9188_v23  ;;  %v6756_v61 = vpop.f32.mrf.mxu1  ;;  %v6667_v62 = vadd.f32 %v6666_v8, %v6665_v39  ;;  %v3288_v23 = vshrl.u32 %v7845_v16, 16  ;;  %v1369_v39 = vsel %vm1169_vm4, %v1364_v51, %v1368_v22  ;;  %v3495_v21 = vrot.slane %v3493_v56, 1 }
 0x15d   : > { %v9194_v12 = vadd.f32 %v6755_v53, %v8939_v34  ;;  %v6668_v40 = vpop.f32.mrf.mxu0  ;;  %v3491_v53 = vor.u32 %v3490_v47, %v3486_v0  ;;  %v3291_v22 = vshll.u32 %v7845_v16, 16  ;;  %v3645_v0 = vrot.slane %v8903_v45, 1 }
 0x15e   : > { %v6757_v41 = vpop.f32.mrf.mxu1  ;;  %v9199_v30 = vadd.f32 %v10808_v20, %v6667_v62  ;;  %v3286_v62 = vor.u32 %v3284_v33, %v3283_v32  ;;  %v9213_v51 = vrot.slane %v3288_v23, 7  ;;  %v3646_v15 = vrot.slane %v8920_v17, 1  ;;  %v7851_v17 = vld [vmem:[%s8614_s27 + $0x50] sm:$0xff]  }
 0x15f   : > { %v6758_v35 = vadd.f32 %v6757_v41, %v6756_v61  ;;  %v6669_v34 = vpop.f32.mrf.mxu0  ;;  %v3497_v56 = vshrl.u32 %v9184_v19, 16 }
 0x160   : > { %v6759_v50 = vpop.f32.mrf.mxu1  ;;  %3988 = vmatmul.mubr.bf16.gmra.mxu1 %v9101_v63  ;;  %v6670_v37 = vadd.f32 %v6669_v34, %v6668_v40  ;;  %v3293_v20 = vor.u32 %v3291_v22, %v9213_v51  ;;  %v9231_v45 = vsel %vm8123_vm3, 0, %v3286_v62 }
 0x161   : > { %3995 = vmatprep.mubr.bf16.mxu1 %v9191_v55  ;;  %v9205_v46 = vadd.f32 %v6758_v35, %v8953_v10  ;;  %v6671_v61 = vpop.f32.mrf.mxu0  ;;  %10810 = vst [vmem:[#allocation30_spill] sm:$0xff] %v9231_v45  ;;  %v3508_v62 = vshll.u32 %v9231_v45, 16 }
 0x162   : > { %v6760_v1 = vpop.f32.mrf.mxu1  ;;  %2848 = vmatmul.mubr.bf16.gmra.mxu0 %v8899_v3  ;;  %v9216_v10 = vadd.f32 %v8955_v31, %v6670_v37  ;;  %v3501_v3 = vshll.u32 %v9210_v36, 16  ;;  %v9226_v31 = vsel %vm1169_vm4, %v3491_v53, %v3495_v21  ;;  %v3499_v37 = vor.u32 %v3497_v56, %v3495_v21  ;;  %v10813_v21 = vld [vmem:[#allocation16_spill] sm:$0xff] }
 0x163   : > { %v6761_v8 = vadd.f32 %v6760_v1, %v6759_v50  ;;  %2855 = vmatprep.mubr.bf16.mxu0 %v1369_v39  ;;  %v6672_v47 = vpop.f32.mrf.mxu0  ;;  %10809 = vst [vmem:[#allocation8_spill] sm:$0xff] %v9226_v31  ;;  %v3647_v39 = vsel %vm1410_vm2, %v3645_v0, %v3646_v15 }
 0x164   : > { %v6762_v41 = vpop.f32.mrf.mxu1  ;;  %v6673_v23 = vadd.f32 %v6672_v47, %v6671_v61  ;;  %v3503_v1 = vrot.slane %v3501_v3, 1  ;;  %v7852_v47 = vld [vmem:[%s8614_s27 + $0x58] sm:$0xff]  }
 0x165   : > { %v9223_v40 = vadd.f32 %v6761_v8, %v8970_v28  ;;  %v6674_v35 = vpop.f32.mrf.mxu0 }
 0x166   : > { %v6763_v16 = vpop.f32.mrf.mxu1  ;;  %v9235_v50 = vadd.f32 %v6673_v23, %v8974_v44  ;;  %v3296_v23 = vshrl.u32 %v7851_v17, 16 }
 0x167   : > { %v6764_v33 = vadd.f32 %v6763_v16, %v6762_v41  ;;  %v6675_v34 = vpop.f32.mrf.mxu0  ;;  %v9246_v41 = vsel %vm966_vm1, %v3283_v32, %v3293_v20  ;;  %v10812_v16 = vld [vmem:[#allocation10_spill] sm:$0xff] }
 0x168   : > { %v6765_v28 = vpop.f32.mrf.mxu1  ;;  %3996 = vmatmul.mubr.bf16.gmra.mxu1 %v9118_v29  ;;  %v6676_v61 = vadd.f32 %v6675_v34, %v6674_v35  ;;  %10811 = vst [vmem:[#allocation31_spill] sm:$0xff] %v9246_v41  ;;  %v3648_v0 = vrot.slane %v10812_v16, 1  ;;  %v9254_v35 = vsel %vm1169_vm4, %v3499_v37, %v3503_v1  ;;  %v3513_v16 = vshll.u32 %v9246_v41, 16 }
 0x169   : > { %4003 = vmatprep.mubr.bf16.mxu1 %v9226_v31  ;;  %v9241_v53 = vadd.f32 %v6764_v33, %v8983_v26  ;;  %v6677_v44 = vpop.f32.mrf.mxu0  ;;  %10814 = vst [vmem:[#allocation10_spill] sm:$0xff] %v9254_v35  ;;  %v3650_v33 = vrot.slane %v8966_v43, 1  ;;  %v9265_v31 = vrot.slane %v3296_v23, 7  ;;  %v3299_v37 = vshll.u32 %v7851_v17, 16  ;;  %v7842_v17 = vld [vmem:[%s10668_s7 + $0x130] sm:$0xff]  }
 0x16a   : > { %v6766_v8 = vpop.f32.mrf.mxu1  ;;  %2856 = vmatmul.mubr.bf16.gmra.mxu0 %v8895_v11  ;;  %v9251_v56 = vadd.f32 %v6676_v61, %v10813_v21  ;;  %v3651_v11 = vrot.slane %v8979_v42, 1  ;;  %v3510_v61 = vrot.slane %v3508_v62, 1  ;;  %v3303_v1 = vshrl.u32 %v7852_v47, 16 }
 0x16b   : > { %v6767_v22 = vadd.f32 %v6766_v8, %v6765_v28  ;;  %7547 = vmatprep.mubr.bf16.mxu0 %v3647_v39  ;;  %v6678_v3 = vpop.f32.mrf.mxu0  ;;  %v10815_v28 = vld [vmem:[#allocation17_spill] sm:$0xff]  ;;  %v3506_v8 = vshrl.u32 %v9231_v45, 16  ;;  %v3301_v42 = vor.u32 %v3299_v37, %v9265_v31 }
 0x16c   : > { %v6768_v26 = vpop.f32.mrf.mxu1  ;;  %v9261_v20 = vadd.f32 %v6678_v3, %v6677_v44  ;;  %v7841_v44 = vld [vmem:[%s10668_s7 + $0xf8] sm:$0xff]   ;;  %v9274_v62 = vsel %vm1410_vm2, %v3650_v33, %v3651_v11  ;;  %v9290_v43 = vrot.slane %v3303_v1, 7 }
 0x16d   : > { %v9259_v32 = vadd.f32 %v6767_v22, %v10815_v28  ;;  %v6680_v39 = vpop.f32.mrf.mxu0  ;;  %v3649_v22 = vsel %vm1410_vm2, %v3646_v15, %v3648_v0  ;;  %v3511_v0 = vor.u32 %v3510_v61, %v3506_v8  ;;  %v3515_v28 = vrot.slane %v3513_v16, 1 }
 0x16e   : > { %10816 = vst [vmem:[#allocation16_spill] sm:$0xff] %v9261_v20  ;;  %v6769_v34 = vpop.f32.mrf.mxu1  ;;  %v3306_v20 = vshll.u32 %v7852_v47, 16  ;;  %v3653_v8 = vrot.slane %v9003_v5, 1  ;;  %v10709_v47 = vrot.slane %v9046_v4, 1 }
 0x16f   : > { %v6770_v21 = vadd.f32 %v6769_v34, %v6768_v26  ;;  %v6681_v3 = vpop.f32.mrf.mxu0  ;;  %v9287_v34 = vsel %vm8123_vm3, %v9213_v51, 0  ;;  %v7843_v51 = vld [vmem:[%s10668_s7 + $0xf0] sm:$0xff]   ;;  %v9314_v1 = vsel %vm1169_vm4, %v3511_v0, %v3515_v28 }
 0x170   : > { %v6771_v55 = vpop.f32.mrf.mxu1  ;;  %4004 = vmatmul.mubr.bf16.gmra.mxu1 %v9167_v59  ;;  %v9282_v26 = vadd.f32 %v6681_v3, %v6680_v39  ;;  %v3521_v16 = vshll.u32 %v9287_v34, 16  ;;  %10817 = vst [vmem:[#allocation17_spill] sm:$0xff] %v9314_v1  ;;  %v3308_v3 = vor.u32 %v3306_v20, %v9290_v43  ;;  %v7848_v20 = vld [vmem:[%s10668_s7 + $0xe8] sm:$0xff]  }
 0x171   : > { %4011 = vmatprep.mubr.bf16.mxu1 %v9254_v35  ;;  %v9280_v23 = vadd.f32 %v6770_v21, %v9012_v48  ;;  %v7453_v35 = vpop.f32.mrf.mxu0 }
 0x172   : > { %v6772_v15 = vpop.f32.mrf.mxu1  ;;  %7548 = vmatmul.mubr.bf16.vlgmr.msra.gmra.mxu0 %v3649_v22  ;;  %v9293_v48 = vadd.f32 %v7453_v35, %v9057_v2  ;;  %v7847_v2 = vld [vmem:[%s10668_s7 + $0x128] sm:$0xff]   ;;  %v3517_v35 = vshrl.u32 %v9246_v41, 16 }
 0x173   : > { %v6773_v33 = vadd.f32 %v6772_v15, %v6771_v55  ;;  %7116 = vmatpush3.bf16.msra.mxu0 %v7841_v44  ;;  %7551 = vmatprep.mubr.bf16.mxu0 %v9274_v62  ;;  %v3655_v55 = vrot.slane %v9029_v24, 1  ;;  %v2383_v61 = vpop.f32.mrf.mxu0  ;;  %v9322_v15 = vld [vmem:[%s8614_s27 + $0x60] sm:$0xff]  }
 0x174   : > { %v6774_v39 = vpop.f32.mrf.mxu1  ;;  %7117 = vmatprep.subr.bf16.mxu0 %v7842_v17  ;;  %v9311_v21 = vadd.f32 %v2383_v61, %v9018_v6  ;;  %v9319_v17 = vsel %vm8123_vm3, 0, %v3301_v42  ;;  %v9329_v6 = vsel %vm1410_vm2, %v3651_v11, %v3653_v8  ;;  %v7849_v11 = vld [vmem:[%s10668_s7 + $0x120] sm:$0xff]  }
 0x175   : > { %v9308_v5 = vadd.f32 %v6773_v33, %v9033_v18  ;;  %v7454_v22 = vpop.f32.mrf.mxu0  ;;  %10818 = vst [vmem:[#allocation32_spill] sm:$0xff] %v9319_v17  ;;  %v9338_v42 = vsel %vm1410_vm2, %v3655_v55, %v10709_v47 }
 0x176   : > { %v6775_v37 = vpop.f32.mrf.mxu1  ;;  %v9325_v18 = vadd.f32 %v7454_v22, %v9070_v9  ;;  %v3519_v9 = vor.u32 %v3517_v35, %v3515_v28  ;;  %v3528_v22 = vshll.u32 %v9319_v17, 16  ;;  %v9353_v28 = vsel %vm966_vm1, %v9265_v31, %v3308_v3 }
 0x177   : > { %v6776_v44 = vadd.f32 %v6775_v37, %v6774_v39  ;;  %7118 = vmatpush3.bf16.msra.mxu0 %v7843_v51  ;;  %v2386_v0 = vpop.f32.mrf.mxu0  ;;  %v3523_v39 = vrot.slane %v3521_v16, 1  ;;  %v10819_v51 = vld [vmem:[#allocation19_spill] sm:$0xff]  ;;  %v3311_v35 = vshrl.u32 %v9322_v15, 16  ;;  %v3660_v3 = vrot.slane %v9101_v63, 1 }
 0x178   : > { %v6777_v33 = vpop.f32.mrf.mxu1  ;;  %4012 = vmatmul.mubr.bf16.gmra.mxu1 %v9184_v19  ;;  %7119 = vmatprep.subr.bf16.mxu0 %v7847_v2  ;;  %v9347_v61 = vadd.f32 %v2386_v0, %v10819_v51  ;;  %10820 = vst [vmem:[#allocation19_spill] sm:$0xff] %v9353_v28  ;;  %v9356_v2 = vld [vmem:[%s8614_s27 + $0x68] sm:$0xff]   ;;  %v3661_v51 = vrot.slane %v9118_v29, 1 }
 0x179   : > { %4019 = vmatprep.mubr.bf16.mxu1 %v9314_v1  ;;  %v9344_v8 = vadd.f32 %v6776_v44, %v9050_v7  ;;  %v7457_v1 = vpop.f32.mrf.mxu0  ;;  %v3658_v44 = vrot.slane %v9075_v13, 1  ;;  %v9368_v31 = vsel %vm1169_vm4, %v3519_v9, %v3523_v39  ;;  %v7854_v13 = vld [vmem:[%s10668_s7 + $0x118] sm:$0xff]   ;;  %v3530_v9 = vrot.slane %v3528_v22, 1 }
 0x17a   : > { %v6778_v37 = vpop.f32.mrf.mxu1  ;;  %7552 = vmatmul.mubr.bf16.gmra.mxu0 %v9329_v6  ;;  %v9360_v7 = vadd.f32 %v7457_v1, %v9130_v54  ;;  %10822 = vst [vmem:[#allocation34_spill] sm:$0xff] %v9368_v31  ;;  %v3533_v39 = vshll.u32 %v9353_v28, 16  ;;  %v9383_v29 = vrot.slane %v3311_v35, 7  ;;  %v7855_v35 = vld [vmem:[%s10668_s7 + $0xd8] sm:$0xff]  }
 0x17b   : > { %v6779_v55 = vadd.f32 %v6778_v37, %v6777_v33  ;;  %7555 = vmatprep.mubr.bf16.mxu0 %v9338_v42  ;;  %7120 = vmatpush3.bf16.msra.mxu0 %v7848_v20  ;;  %v7850_v33 = vld [vmem:[%s10668_s7 + $0xe0] sm:$0xff]   ;;  %v2399_v0 = vpop.f32.mrf.mxu0  ;;  %v3526_v37 = vshrl.u32 %v9319_v17, 16 }
 0x17c   : > { %10821 = vst [vmem:[#allocation33_spill] sm:$0xff] %v9360_v7  ;;  %v6780_v16 = vpop.f32.mrf.mxu1  ;;  %7121 = vmatprep.subr.bf16.mxu0 %v7849_v11  ;;  %v9379_v1 = vadd.f32 %v2399_v0, %v9090_v14  ;;  %v3318_v11 = vshrl.u32 %v9356_v2, 16  ;;  %v10823_v14 = vrot.slane %v9046_v4, 1 }
 0x17d   : > { %v9373_v54 = vadd.f32 %v6779_v55, %v9065_v58  ;;  %v7458_v47 = vpop.f32.mrf.mxu0  ;;  %v3314_v58 = vshll.u32 %v9322_v15, 16  ;;  %v9401_v15 = vsel %vm1410_vm2, %v3660_v3, %v3661_v51  ;;  %v3531_v0 = vor.u32 %v3530_v9, %v3526_v37 }
 0x17e   : > { %v6781_v20 = vpop.f32.mrf.mxu1  ;;  %v9388_v55 = vadd.f32 %v7458_v47, %v9142_v25  ;;  %v9394_v22 = vsel %vm1410_vm2, %v10823_v14, %v3658_v44  ;;  %10825 = vst [vmem:[#allocation36_spill] sm:$0xff] %v9401_v15  ;;  %v7856_v47 = vld [vmem:[%s10668_s7 + $0x110] sm:$0xff]   ;;  %v9415_v14 = vsel %vm8123_vm3, %v9290_v43, 0  ;;  %v3663_v9 = vrot.slane %v9147_v57, 1  ;;  %v7861_v57 = vld [vmem:[%s10668_s7 + $0x108] sm:$0xff]  }
 0x17f   : > { %v6782_v63 = vadd.f32 %v6781_v20, %v6780_v16  ;;  %10824 = vst [vmem:[#allocation35_spill] sm:$0xff] %v9394_v22  ;;  %7122 = vmatpush3.bf16.msra.mxu0 %v7850_v33  ;;  %v2402_v16 = vpop.f32.mrf.mxu0  ;;  %v3535_v20 = vrot.slane %v3533_v39, 1  ;;  %v3665_v43 = vrot.slane %v9167_v59, 1 }
 0x180   : > { %v6783_v7 = vpop.f32.mrf.mxu1  ;;  %4020 = vmatmul.mubr.bf16.gmra.mxu1 %v9231_v45  ;;  %7123 = vmatprep.subr.bf16.mxu0 %v7854_v13  ;;  %v9410_v44 = vadd.f32 %v2402_v16, %v9110_v52  ;;  %v9419_v13 = vrot.slane %v3318_v11, 7 }
 0x181   : > { %4027 = vmatprep.mubr.bf16.mxu1 %v9368_v31  ;;  %v9404_v25 = vadd.f32 %v6782_v63, %v9084_v60  ;;  %v7461_v3 = vpop.f32.mrf.mxu0  ;;  %v3316_v63 = vor.u32 %v3314_v58, %v9383_v29  ;;  %v3321_v31 = vshll.u32 %v9356_v2, 16  ;;  %v3666_v58 = vrot.slane %v9184_v19, 1 }
 0x182   : > { %v6784_v33 = vpop.f32.mrf.mxu1  ;;  %7556 = vmatmul.mubr.bf16.gmra.mxu0 %v9394_v22  ;;  %v9423_v52 = vadd.f32 %v7461_v3, %v9194_v12  ;;  %v3537_v2 = vshrl.u32 %v9353_v28, 16  ;;  %v3541_v12 = vshll.u32 %v9415_v14, 16  ;;  %v9444_v3 = vsel %vm1169_vm4, %v3531_v0, %v3535_v20  ;;  %v7862_v0 = vld [vmem:[%s10668_s7 + $0xc8] sm:$0xff]  }
 0x183   : > { %v6785_v60 = vadd.f32 %v6784_v33, %v6783_v7  ;;  %7559 = vmatprep.mubr.bf16.mxu0 %v9401_v15  ;;  %7124 = vmatpush3.bf16.msra.mxu0 %v7855_v35  ;;  %v7857_v7 = vld [vmem:[%s10668_s7 + $0xd0] sm:$0xff]   ;;  %v2415_v39 = vpop.f32.mrf.mxu0  ;;  %v10827_v35 = vld [vmem:[#allocation11_spill] sm:$0xff] }
 0x184   : > { %10826 = vst [vmem:[#allocation37_spill] sm:$0xff] %v9423_v52  ;;  %v6786_v37 = vpop.f32.mrf.mxu1  ;;  %7125 = vmatprep.subr.bf16.mxu0 %v7856_v47  ;;  %v9441_v16 = vadd.f32 %v2415_v39, %v10827_v35  ;;  %10828 = vst [vmem:[#allocation11_spill] sm:$0xff] %v9444_v3  ;;  %v3323_v52 = vor.u32 %v3321_v31, %v9419_v13  ;;  %v9456_v39 = vsel %vm1410_vm2, %v3661_v51, %v3663_v9  ;;  %v7863_v51 = vld [vmem:[%s10668_s7 + $0x100] sm:$0xff]  }
 0x185   : > { %v9435_v11 = vadd.f32 %v6785_v60, %v9105_v49  ;;  %v7462_v19 = vpop.f32.mrf.mxu0  ;;  %v9449_v49 = vsel %vm8123_vm3, 0, %v3316_v63  ;;  %10829 = vst [vmem:[#allocation38_spill] sm:$0xff] %v9456_v39  ;;  %v9463_v31 = vsel %vm1410_vm2, %v3665_v43, %v3666_v58  ;;  %v3539_v63 = vor.u32 %v3537_v2, %v3535_v20 }
 0x186   : > { %v6787_v33 = vpop.f32.mrf.mxu1  ;;  %v9452_v47 = vadd.f32 %v7462_v19, %v9205_v46  ;;  %10830 = vst [vmem:[#allocation39_spill] sm:$0xff] %v9463_v31  ;;  %v3543_v19 = vrot.slane %v3541_v12, 1  ;;  %v10831_v46 = vld [vmem:[#allocation24_spill] sm:$0xff]  ;;  %v9478_v20 = vsel %vm966_vm1, %v9383_v29, %v3323_v52  ;;  %v7864_v12 = vld [vmem:[%s10668_s7 + $0xc0] sm:$0xff]   ;;  %v3670_v29 = vrot.slane %v9231_v45, 1 }
 0x187   : > { %v6788_v59 = vadd.f32 %v6787_v33, %v6786_v37  ;;  %7126 = vmatpush3.bf16.msra.mxu0 %v7857_v7  ;;  %v2418_v37 = vpop.f32.mrf.mxu0  ;;  %v3548_v33 = vshll.u32 %v9449_v49, 16  ;;  %v3671_v52 = vrot.slane %v9246_v41, 1 }
 0x188   : > { %v6789_v60 = vpop.f32.mrf.mxu1  ;;  %4028 = vmatmul.mubr.bf16.gmra.mxu1 %v9246_v41  ;;  %7127 = vmatprep.subr.bf16.mxu0 %v7861_v57  ;;  %v9472_v9 = vadd.f32 %v2418_v37, %v9179_v38  ;;  %v3668_v38 = vrot.slane %v9210_v36, 1  ;;  %v9497_v36 = vld [vmem:[%s10668_s7 + $0x238] sm:$0xff]  }
 0x189   : > { %4035 = vmatprep.mubr.bf16.mxu1 %v9444_v3  ;;  %v9466_v35 = vadd.f32 %v6788_v59, %v10831_v46  ;;  %v7465_v3 = vpop.f32.mrf.mxu0  ;;  %v3546_v46 = vshrl.u32 %v9449_v49, 16 }
 0x18a   : > { %v6790_v7 = vpop.f32.mrf.mxu1  ;;  %7560 = vmatmul.mubr.bf16.gmra.mxu0 %v9456_v39  ;;  %v9481_v59 = vadd.f32 %v7465_v3, %v9259_v32  ;;  %v10833_v32 = vld [vmem:[#allocation26_spill] sm:$0xff] }
 0x18b   : > { %v6791_v43 = vadd.f32 %v6790_v7, %v6789_v60  ;;  %7563 = vmatprep.mubr.bf16.mxu0 %v9463_v31  ;;  %7128 = vmatpush3.bf16.msra.mxu0 %v7862_v0  ;;  %v2431_v57 = vpop.f32.mrf.mxu0  ;;  %v9489_v60 = vsel %vm1169_vm4, %v3539_v63, %v3543_v19  ;;  %v3550_v63 = vrot.slane %v3548_v33, 1  ;;  %v3553_v19 = vshll.u32 %v9478_v20, 16  ;;  %v10837_v33 = vld [vmem:[#allocation9_spill] sm:$0xff] }
 0x18c   : > { %v6792_v2 = vpop.f32.mrf.mxu1  ;;  %10832 = vst [vmem:[#allocation24_spill] sm:$0xff] %v9489_v60  ;;  %7129 = vmatprep.subr.bf16.mxu0 %v7863_v51  ;;  %v9500_v0 = vadd.f32 %v2431_v57, %v9223_v40  ;;  %v9513_v57 = vsel %vm1410_vm2, %v3670_v29, %v3671_v52 }
 0x18d   : > { %v2311_v3 = vadd.f32 %v6791_v43, %v10833_v32  ;;  %v7466_v7 = vpop.f32.mrf.mxu0  ;;  %v9509_v43 = vsel %vm1410_vm2, %v3666_v58, %v3668_v38  ;;  %10836 = vst [vmem:[#allocation41_spill] sm:$0xff] %v9513_v57  ;;  %v9524_v38 = vsel %vm8123_vm3, %v9419_v13, 0 }
 0x18e   : > { %v6793_v37 = vpop.f32.mrf.mxu1  ;;  %v9505_v41 = vadd.f32 %v7466_v7, %v9280_v23  ;;  %10835 = vst [vmem:[#allocation40_spill] sm:$0xff] %v9509_v43  ;;  %v3555_v7 = vrot.slane %v3553_v19, 1  ;;  %v10839_v19 = vld [vmem:[#allocation28_spill] sm:$0xff] }
 0x18f   : > { %v6794_v45 = vadd.f32 %v6793_v37, %v6792_v2  ;;  %7130 = vmatpush3.bf16.msra.mxu0 %v7864_v12  ;;  %v2434_v40 = vpop.f32.mrf.mxu0  ;;  %v3551_v37 = vor.u32 %v3550_v63, %v3546_v46  ;;  %v3675_v46 = vrot.slane %v9319_v17, 1  ;;  %v3676_v63 = vrot.slane %v9353_v28, 1 }
 0x190   : > { %10834 = vst [vmem:[#allocation26_spill] sm:$0xff] %v9505_v41  ;;  %v6795_v51 = vpop.f32.mrf.mxu1  ;;  %4036 = vmatmul.mubr.bf16.gmra.mxu1 %v9319_v17  ;;  %7627 = vmatprep.subr.bf16.mxu0 %v9497_v36  ;;  %v9518_v23 = vadd.f32 %v2434_v40, %v9241_v53  ;;  %v3673_v53 = vrot.slane %v9287_v34, 1 }
 0x191   : > { %4043 = vmatprep.mubr.bf16.mxu1 %v9489_v60  ;;  %v2314_v32 = vadd.f32 %v6794_v45, %v10837_v33  ;;  %v7469_v41 = vpop.f32.mrf.mxu0  ;;  %v9538_v33 = vsel %vm1169_vm4, %v3551_v37, %v3555_v7  ;;  %v9551_v37 = vsel %vm1410_vm2, %v3675_v46, %v3676_v63  ;;  %v3678_v46 = vrot.slane %v9415_v14, 1 }
 0x192   : > { %v6796_v2 = vpop.f32.mrf.mxu1  ;;  %7564 = vmatmul.mubr.bf16.gmra.mxu0 %v9509_v43  ;;  %v9527_v12 = vadd.f32 %v7469_v41, %v9373_v54  ;;  %10840 = vst [vmem:[#allocation28_spill] sm:$0xff] %v9538_v33  ;;  %v3557_v41 = vshrl.u32 %v9478_v20, 16  ;;  %v3561_v54 = vshll.u32 %v9524_v38, 16  ;;  %10842 = vst [vmem:[#allocation43_spill] sm:$0xff] %v9551_v37 }
 0x193   : > { %v6797_v58 = vadd.f32 %v6796_v2, %v6795_v51  ;;  %7567 = vmatprep.mubr.bf16.mxu0 %v9513_v57  ;;  %v2447_v29 = vpop.f32.mrf.mxu0 }
 0x194   : > { %10838 = vst [vmem:[#allocation9_spill] sm:$0xff] %v9527_v12  ;;  %v6798_v45 = vpop.f32.mrf.mxu1  ;;  %v9535_v40 = vadd.f32 %v2447_v29, %v9308_v5  ;;  %v10843_v29 = vld [vmem:[#allocation7_spill] sm:$0xff] }
 0x195   : > { %v2319_v51 = vadd.f32 %v6797_v58, %v10839_v19  ;;  %v7470_v2 = vpop.f32.mrf.mxu0  ;;  %v9547_v58 = vsel %vm1410_vm2, %v3671_v52, %v3673_v53 }
 0x196   : > { %v6799_v13 = vpop.f32.mrf.mxu1  ;;  %v9543_v60 = vadd.f32 %v7470_v2, %v9404_v25  ;;  %10841 = vst [vmem:[#allocation42_spill] sm:$0xff] %v9547_v58  ;;  %v3559_v25 = vor.u32 %v3557_v41, %v3555_v7 }
 0x197   : > { %v6800_v34 = vadd.f32 %v6799_v13, %v6798_v45  ;;  %v2450_v5 = vpop.f32.mrf.mxu0  ;;  %v3563_v13 = vrot.slane %v3561_v54, 1 }
 0x198   : > { %v6801_v17 = vpop.f32.mrf.mxu1  ;;  %4044 = vmatmul.mubr.bf16.gmra.mxu1 %v9353_v28  ;;  %v9555_v12 = vadd.f32 %v2450_v5, %v9344_v8  ;;  %v3680_v8 = vrot.slane %v9449_v49, 1  ;;  %v3681_v5 = vrot.slane %v9478_v20, 1 }
 0x199   : > { %4051 = vmatprep.mubr.bf16.mxu1 %v9538_v33  ;;  %v2322_v19 = vadd.f32 %v6800_v34, %v10843_v29  ;;  %v7473_v2 = vpop.f32.mrf.mxu0 }
 0x19a   : > { %v6802_v45 = vpop.f32.mrf.mxu1  ;;  %7568 = vmatmul.mubr.bf16.gmra.mxu0 %v9547_v58  ;;  %v9558_v52 = vadd.f32 %v7473_v2, %v2311_v3 }
 0x19b   : > { %v6803_v28 = vadd.f32 %v6802_v45, %v6801_v17  ;;  %7571 = vmatprep.mubr.bf16.mxu0 %v9551_v37  ;;  %v2463_v33 = vpop.f32.mrf.mxu0  ;;  %v9569_v17 = vsel %vm1169_vm4, %v3559_v25, %v3563_v13 }
 0x19c   : > { %v6804_v53 = vpop.f32.mrf.mxu1  ;;  %v9566_v7 = vadd.f32 %v2463_v33, %v9435_v11  ;;  %v9580_v11 = vsel %vm1410_vm2, %v3680_v8, %v3681_v5 }
 0x19d   : > { %v2327_v34 = vadd.f32 %v6803_v28, %v9199_v30  ;;  %v7474_v3 = vpop.f32.mrf.mxu0  ;;  %v9575_v30 = vsel %vm1410_vm2, %v3676_v63, %v3678_v46  ;;  %10845 = vst [vmem:[#allocation44_spill] sm:$0xff] %v9580_v11 }
 0x19e   : > { %v6805_v41 = vpop.f32.mrf.mxu1  ;;  %v9571_v29 = vadd.f32 %v7474_v3, %v2314_v32  ;;  %10844 = vst [vmem:[#allocation7_spill] sm:$0xff] %v9575_v30 }
 0x19f   : > { %v6806_v54 = vadd.f32 %v6805_v41, %v6804_v53  ;;  %v2466_v28 = vpop.f32.mrf.mxu0 }
 0x1a0   : > { %v6807_v45 = vpop.f32.mrf.mxu1  ;;  %4052 = vmatmul.mubr.bf16.gmra.mxu1 %v9449_v49  ;;  %v9583_v33 = vadd.f32 %v2466_v28, %v9466_v35 }
 0x1a1   : > { %v2330_v14 = vadd.f32 %v6806_v54, %v9216_v10  ;;  %4059 = vmatprep.mubr.bf16.mxu1 %v9569_v17  ;;  %v7477_v32 = vpop.f32.mrf.mxu0  ;;  %v3683_v10 = vrot.slane %v9524_v38, 1 }
 0x1a2   : > { %v6808_v25 = vpop.f32.mrf.mxu1  ;;  %7572 = vmatmul.mubr.bf16.gmra.mxu0 %v9575_v30  ;;  %v9586_v2 = vadd.f32 %v7477_v32, %v2327_v34  ;;  %v10848_v32 = vld [vmem:[#allocation13_spill] sm:$0xff] }
 0x1a3   : > { %v6809_v13 = vadd.f32 %v6808_v25, %v6807_v45  ;;  %7575 = vmatprep.mubr.bf16.mxu0 %v9580_v11  ;;  %v2479_v53 = vpop.f32.mrf.mxu0  ;;  %v9597_v34 = vsel %vm1410_vm2, %v3681_v5, %v3683_v10 }
 0x1a4   : > { %v6810_v63 = vpop.f32.mrf.mxu1  ;;  %v9591_v8 = vadd.f32 %v2479_v53, %v2319_v51  ;;  %10846 = vst [vmem:[#allocation45_spill] sm:$0xff] %v9597_v34  ;;  %v10847_v51 = vld [vmem:[#allocation16_spill] sm:$0xff] }
 0x1a5   : > { %v2335_v46 = vadd.f32 %v6809_v13, %v9235_v50  ;;  %v7478_v35 = vpop.f32.mrf.mxu0  ;;  %v2038_v13 = vadd.f32 %v10848_v32, %v10847_v51 }
 0x1a6   : > { %v6811_v41 = vpop.f32.mrf.mxu1  ;;  %v9593_v54 = vadd.f32 %v7478_v35, %v2330_v14  ;;  %v7868_v35 = vld [vmem:[%s10668_s7 + $0x1f0] sm:$0xff]  }
 0x1a7   : > { %v6812_v3 = vadd.f32 %v6811_v41, %v6810_v63  ;;  %v2482_v45 = vpop.f32.mrf.mxu0  ;;  %v10849_v41 = vld [vmem:[#allocation18_spill] sm:$0xff] }
 0x1a8   : > { %v6813_v28 = vpop.f32.mrf.mxu1  ;;  %4060 = vmatmul.mubr.bf16.gmra.mxu1 %v9478_v20  ;;  %v9601_v38 = vadd.f32 %v2482_v45, %v2322_v19 }
 0x1a9   : > { %v2338_v25 = vadd.f32 %v6812_v3, %v9251_v56  ;;  %7595 = vmatprep.mubr.bf16.mxu1 %v9274_v62  ;;  %v7481_v63 = vpop.f32.mrf.mxu0  ;;  %v7866_v56 = vld [vmem:[%s10668_s7 + $0x1b8] sm:$0xff]   ;;  %v10850_v3 = vld [vmem:[#allocation15_spill] sm:$0xff] }
 0x1aa   : > { %v6814_v50 = vpop.f32.mrf.mxu1  ;;  %7576 = vmatmul.mubr.bf16.gmra.mxu0 %v9597_v34  ;;  %v2041_v45 = vadd.f32 %v10850_v3, %v9282_v26  ;;  %v7872_v26 = vld [vmem:[%s10668_s7 + $0x230] sm:$0xff]  }
 0x1ab   : > { %v6815_v14 = vadd.f32 %v6814_v50, %v6813_v28  ;;  %4486 = vmatprep.mubr.bf16.mxu0 %v10849_v41  ;;  %v2495_v10 = vpop.f32.mrf.mxu0 }
 0x1ac   : > { %v6816_v53 = vpop.f32.mrf.mxu1  ;;  %v9610_v62 = vadd.f32 %v2495_v10, %v2335_v46  ;;  %v7869_v46 = vld [vmem:[%s10668_s7 + $0x1b0] sm:$0xff]   ;;  %v10854_v10 = vld [vmem:[#allocation12_spill] sm:$0xff] }
 0x1ad   : > { %v2343_v5 = vadd.f32 %v6815_v14, %v2038_v13  ;;  %v7482_v50 = vpop.f32.mrf.mxu0 }
 0x1ae   : > { %v6817_v19 = vpop.f32.mrf.mxu1 }
 0x1af   : > { %v9617_v28 = vadd.f32 %v7481_v63, %v2343_v5  ;;  %v6818_v51 = vadd.f32 %v6817_v19, %v6816_v53  ;;  %v2498_v14 = vpop.f32.mrf.mxu0  ;;  %v10855_v19 = vld [vmem:[#allocation20_spill] sm:$0xff] }
 0x1b0   : > { %v7501_v32 = vpop.f32.mrf.mxu1  ;;  %7596 = vmatmul.mubr.bf16.vlgmr.msra.gmra.mxu1 %v9329_v6  ;;  %v9627_v63 = vadd.f32 %v2498_v14, %v2338_v25  ;;  %v7870_v6 = vld [vmem:[%s10668_s7 + $0x1e8] sm:$0xff]  }
 0x1b1   : > { %10851 = vst [vmem:[#allocation16_spill] sm:$0xff] %v9617_v28  ;;  %v2346_v13 = vadd.f32 %v6818_v51, %v2041_v45  ;;  %7252 = vmatpush3.bf16.msra.mxu1 %v7866_v56  ;;  %7599 = vmatprep.mubr.bf16.mxu1 %v9338_v42  ;;  %v6859_v5 = vpop.f32.mrf.mxu0  ;;  %v7871_v25 = vld [vmem:[%s10668_s7 + $0x1a8] sm:$0xff]  }
 0x1b2   : > { %10852 = vst [vmem:[#allocation13_spill] sm:$0xff] %v9627_v63  ;;  %v2898_v41 = vpop.f32.mrf.mxu1  ;;  %7253 = vmatprep.subr.bf16.mxu1 %v7868_v35  ;;  %4487 = vmatmul.mubr.bf16.vlgmr.msra.gmra.mxu0 %v10854_v10 }
 0x1b3   : > { %v9632_v53 = vadd.f32 %v7482_v50, %v2346_v13  ;;  %7628 = vmatpush3.bf16.msra.mxu0 %v9497_v36  ;;  %4494 = vmatprep.mubr.bf16.mxu0 %v10855_v19  ;;  %v6860_v3 = vpop.f32.mrf.mxu0  ;;  %v7873_v50 = vld [vmem:[%s10668_s7 + $0x1e0] sm:$0xff]   ;;  %v7877_v36 = vld [vmem:[%s10668_s7 + $0x228] sm:$0xff]  }
 0x1b4   : > { %v7502_v56 = vpop.f32.mrf.mxu1  ;;  %7629 = vmatprep.subr.bf16.mxu0 %v7872_v26  ;;  %v6861_v35 = vadd.f32 %v6860_v3, %v6859_v5  ;;  %v7882_v5 = vld [vmem:[%s10668_s7 + $0x220] sm:$0xff]  }
 0x1b5   : > { %10853 = vst [vmem:[#allocation18_spill] sm:$0xff] %v9632_v53  ;;  %7254 = vmatpush3.bf16.msra.mxu1 %v7869_v46  ;;  %v6862_v51 = vpop.f32.mrf.mxu0 }
 0x1b6   : > { %v2901_v45 = vpop.f32.mrf.mxu1  ;;  %7255 = vmatprep.subr.bf16.mxu1 %v7870_v6  ;;  %v2899_v13 = vadd.f32 %v6861_v35, %v2898_v41  ;;  %v7874_v6 = vld [vmem:[%s10668_s7 + $0x1a0] sm:$0xff]  }
 0x1b7   : > { %7630 = vmatpush3.bf16.msra.mxu0 %v7872_v26  ;;  %v6863_v46 = vpop.f32.mrf.mxu0  ;;  %v7875_v26 = vld [vmem:[%s10668_s7 + $0x1d8] sm:$0xff]  }
 0x1b8   : > { %v9646_v14 = vpop.f32.mrf.mxu1  ;;  %7600 = vmatmul.mubr.bf16.gmra.mxu1 %v9394_v22  ;;  %v9657_v10 = vadd.f32 %v2899_v13, %v9311_v21  ;;  %v6864_v41 = vadd.f32 %v6863_v46, %v6862_v51  ;;  %7631 = vmatprep.subr.bf16.mxu0 %v7877_v36  ;;  %v7876_v21 = vld [vmem:[%s10668_s7 + $0x198] sm:$0xff]  }
 0x1b9   : > { %7603 = vmatprep.mubr.bf16.mxu1 %v9401_v15  ;;  %7256 = vmatpush3.bf16.msra.mxu1 %v7871_v25  ;;  %v6865_v3 = vpop.f32.mrf.mxu0  ;;  %v10857_v25 = vld [vmem:[#allocation14_spill] sm:$0xff]  ;;  %v10858_v15 = vld [vmem:[#allocation21_spill] sm:$0xff] }
 0x1ba   : > { %10856 = vst [vmem:[#allocation15_spill] sm:$0xff] %v9657_v10  ;;  %v2914_v19 = vpop.f32.mrf.mxu1  ;;  %7257 = vmatprep.subr.bf16.mxu1 %v7873_v50  ;;  %4495 = vmatmul.mubr.bf16.gmra.mxu0 %v10857_v25  ;;  %v2902_v35 = vadd.f32 %v6864_v41, %v2901_v45  ;;  %v7878_v45 = vld [vmem:[%s10668_s7 + $0x1d0] sm:$0xff]  }
 0x1bb   : > { %4502 = vmatprep.mubr.bf16.mxu0 %v10858_v15  ;;  %7632 = vmatpush3.bf16.msra.mxu0 %v7877_v36  ;;  %v6866_v22 = vpop.f32.mrf.mxu0  ;;  %v7887_v36 = vld [vmem:[%s10668_s7 + $0x218] sm:$0xff]  }
 0x1bc   : > { %v9663_v53 = vpop.f32.mrf.mxu1  ;;  %7633 = vmatprep.subr.bf16.mxu0 %v7882_v5  ;;  %v9670_v50 = vadd.f32 %v2902_v35, %v9347_v61  ;;  %v6867_v51 = vadd.f32 %v6866_v22, %v6865_v3  ;;  %v7879_v22 = vld [vmem:[%s10668_s7 + $0x190] sm:$0xff]  }
 0x1bd   : > { %7258 = vmatpush3.bf16.msra.mxu1 %v7874_v6  ;;  %v6868_v46 = vpop.f32.mrf.mxu0 }
 0x1be   : > { %10859 = vst [vmem:[#allocation12_spill] sm:$0xff] %v9670_v50  ;;  %v2917_v13 = vpop.f32.mrf.mxu1  ;;  %7259 = vmatprep.subr.bf16.mxu1 %v7875_v26  ;;  %v2907_v6 = vadd.f32 %v7501_v32, %v6867_v51  ;;  %v7888_v26 = vld [vmem:[%s10668_s7 + $0x210] sm:$0xff]   ;;  %v7880_v32 = vld [vmem:[%s10668_s7 + $0x1c8] sm:$0xff]   ;;  %v7884_v50 = vld [vmem:[%s8614_s27 + $0x78] sm:$0xff]  }
 0x1bf   : > { %7634 = vmatpush3.bf16.msra.mxu0 %v7882_v5  ;;  %v6869_v61 = vpop.f32.mrf.mxu0  ;;  %v3336_v63 = vshll.u32 %v7884_v50, 16 }
 0x1c0   : > { %v9678_v41 = vpop.f32.mrf.mxu1  ;;  %7604 = vmatmul.mubr.bf16.gmra.mxu1 %v9456_v39  ;;  %v6870_v3 = vadd.f32 %v6869_v61, %v6868_v46  ;;  %7635 = vmatprep.subr.bf16.mxu0 %v7887_v36  ;;  %v9694_v5 = vadd.f32 %v2907_v6, %v9293_v48  ;;  %v10861_v46 = vld [vmem:[#allocation25_spill] sm:$0xff]  ;;  %v7881_v61 = vld [vmem:[%s10668_s7 + $0x188] sm:$0xff]  }
 0x1c1   : > { %7607 = vmatprep.mubr.bf16.mxu1 %v9463_v31  ;;  %7260 = vmatpush3.bf16.msra.mxu1 %v7876_v21  ;;  %v7883_v31 = vld [vmem:[%s8614_s27 + $0x70] sm:$0xff]  }
 0x1c2   : > { %v9688_v25 = vpop.f32.mrf.mxu1  ;;  %7261 = vmatprep.subr.bf16.mxu1 %v7878_v45  ;;  %10860 = vst [vmem:[#allocation20_spill] sm:$0xff] %v9694_v5  ;;  %v6871_v35 = vpop.f32.mrf.mxu0  ;;  %4503 = vmatmul.mubr.bf16.gmra.mxu0 %v9029_v24  ;;  %v2910_v21 = vadd.f32 %v7502_v56, %v6870_v3  ;;  %v7885_v56 = vld [vmem:[%s10668_s7 + $0x1c0] sm:$0xff]   ;;  %v7889_v3 = vld [vmem:[%s10668_s7 + $0x208] sm:$0xff]  }
 0x1c3   : > { %4510 = vmatprep.mubr.bf16.mxu0 %v10861_v46  ;;  %7636 = vmatpush3.bf16.msra.mxu0 %v7887_v36 }
 0x1c4   : > { %v9697_v51 = vpop.f32.mrf.mxu1  ;;  %v6872_v45 = vpop.f32.mrf.mxu0  ;;  %7637 = vmatprep.subr.bf16.mxu0 %v7888_v26  ;;  %v9712_v36 = vadd.f32 %v2910_v21, %v9325_v18  ;;  %v7890_v18 = vld [vmem:[%s10668_s7 + $0x200] sm:$0xff]  }
 0x1c5   : > { %7262 = vmatpush3.bf16.msra.mxu1 %v7879_v22  ;;  %v6873_v48 = vadd.f32 %v6872_v45, %v6871_v35  ;;  %v7886_v35 = vld [vmem:[%s10668_s7 + $0x180] sm:$0xff]  }
 0x1c6   : > { %v9703_v6 = vpop.f32.mrf.mxu1  ;;  %7263 = vmatprep.subr.bf16.mxu1 %v7880_v32  ;;  %10862 = vst [vmem:[#allocation14_spill] sm:$0xff] %v9712_v36  ;;  %v6874_v22 = vpop.f32.mrf.mxu0  ;;  %v10864_v36 = vld [vmem:[#allocation5_spill] sm:$0xff] }
 0x1c7   : > { %v2915_v39 = vadd.f32 %v6873_v48, %v2914_v19  ;;  %7638 = vmatpush3.bf16.msra.mxu0 %v7888_v26  ;;  %v3333_v48 = vshrl.u32 %v7884_v50, 16 }
 0x1c8   : > { %v9716_v10 = vpop.f32.mrf.mxu1  ;;  %7608 = vmatmul.mubr.bf16.gmra.mxu1 %v9509_v43  ;;  %v6875_v32 = vpop.f32.mrf.mxu0  ;;  %7639 = vmatprep.subr.bf16.mxu0 %v7889_v3 }
 0x1c9   : > { %7611 = vmatprep.mubr.bf16.mxu1 %v9513_v57  ;;  %7264 = vmatpush3.bf16.msra.mxu1 %v7881_v61  ;;  %v6876_v21 = vadd.f32 %v6875_v32, %v6874_v22  ;;  %v9729_v19 = vadd.f32 %v2915_v39, %v9379_v1  ;;  %v3326_v61 = vshrl.u32 %v7883_v31, 16  ;;  %v3335_v28 = vrot.slane %v3333_v48, 7 }
 0x1ca   : > { %v9726_v45 = vpop.f32.mrf.mxu1  ;;  %7265 = vmatprep.subr.bf16.mxu1 %v7885_v56  ;;  %v6877_v26 = vpop.f32.mrf.mxu0  ;;  %4511 = vmatmul.mubr.bf16.gmra.mxu0 %v9046_v4 }
 0x1cb   : > { %10863 = vst [vmem:[#allocation21_spill] sm:$0xff] %v9729_v19  ;;  %v2918_v57 = vadd.f32 %v6876_v21, %v2917_v13  ;;  %4518 = vmatprep.mubr.bf16.mxu0 %v10864_v36  ;;  %7640 = vmatpush3.bf16.msra.mxu0 %v7889_v3  ;;  %v3328_v32 = vrot.slane %v3326_v61, 7  ;;  %v3329_v19 = vshll.u32 %v7883_v31, 16  ;;  %v10868_v31 = vld [vmem:[#allocation22_spill] sm:$0xff]  ;;  %v3338_v61 = vor.u32 %v3336_v63, %v3335_v28 }
 0x1cc   : > { %v9732_v43 = vpop.f32.mrf.mxu1  ;;  %v6878_v5 = vpop.f32.mrf.mxu0  ;;  %7641 = vmatprep.subr.bf16.mxu0 %v7890_v18 }
 0x1cd   : > { %7266 = vmatpush3.bf16.msra.mxu1 %v7886_v35  ;;  %v6879_v22 = vadd.f32 %v6878_v5, %v6877_v26  ;;  %v9738_v1 = vadd.f32 %v2918_v57, %v9410_v44  ;;  %v10866_v44 = vld [vmem:[#allocation33_spill] sm:$0xff]  ;;  %v3331_v50 = vor.u32 %v3329_v19, %v3328_v32 }
 0x1ce   : > { %v9735_v56 = vpop.f32.mrf.mxu1  ;;  %v6880_v39 = vpop.f32.mrf.mxu0 }
 0x1cf   : > { %10865 = vst [vmem:[#allocation25_spill] sm:$0xff] %v9738_v1  ;;  %v2923_v13 = vadd.f32 %v9646_v14, %v6879_v22  ;;  %7642 = vmatpush3.bf16.msra.mxu0 %v7890_v18  ;;  %v10869_v22 = vld [vmem:[#allocation29_spill] sm:$0xff]  ;;  %v9765_v63 = vsel %vm8123_vm3, 0, %v3331_v50 }
 0x1d0   : > { %v9741_v21 = vpop.f32.mrf.mxu1  ;;  %7612 = vmatmul.mubr.bf16.gmra.mxu1 %v9547_v58  ;;  %v6881_v3 = vpop.f32.mrf.mxu0 }
 0x1d1   : > { %7615 = vmatprep.mubr.bf16.mxu1 %v9551_v37  ;;  %v6882_v5 = vadd.f32 %v6881_v3, %v6880_v39  ;;  %v9748_v57 = vadd.f32 %v2923_v13, %v10866_v44  ;;  %v9761_v3 = vsel %vm966_vm1, %v3328_v32, %v3338_v61 }
 0x1d2   : > { %v9745_v35 = vpop.f32.mrf.mxu1  ;;  %v6883_v26 = vpop.f32.mrf.mxu0  ;;  %4519 = vmatmul.mubr.bf16.gmra.mxu0 %v10868_v31  ;;  %v3686_v32 = vrot.slane %v9761_v3, 1 }
 0x1d3   : > { %10867 = vst [vmem:[#allocation5_spill] sm:$0xff] %v9748_v57  ;;  %v2926_v14 = vadd.f32 %v9663_v53, %v6882_v5  ;;  %4526 = vmatprep.mubr.bf16.mxu0 %v10869_v22 }
 0x1d4   : > { %v9752_v48 = vpop.f32.mrf.mxu1  ;;  %v6884_v18 = vpop.f32.mrf.mxu0 }
 0x1d5   : > { %v6885_v58 = vadd.f32 %v6884_v18, %v6883_v26  ;;  %v9758_v39 = vadd.f32 %v2926_v14, %v9388_v55  ;;  %v3685_v26 = vrot.slane %v9765_v63, 1  ;;  %v10872_v14 = vld [vmem:[#allocation23_spill] sm:$0xff]  ;;  %v10873_v18 = vld [vmem:[#allocation8_spill] sm:$0xff] }
 0x1d6   : > { %v9755_v37 = vpop.f32.mrf.mxu1  ;;  %v6886_v13 = vpop.f32.mrf.mxu0 }
 0x1d7   : > { %10870 = vst [vmem:[#allocation33_spill] sm:$0xff] %v9758_v39  ;;  %v2931_v53 = vadd.f32 %v6885_v58, %v9688_v25 }
 0x1d8   : > { %v9768_v19 = vpop.f32.mrf.mxu1  ;;  %7616 = vmatmul.mubr.bf16.gmra.mxu1 %v9575_v30  ;;  %v6887_v5 = vpop.f32.mrf.mxu0  ;;  %v9787_v30 = vsel %vm1410_vm2, %v3685_v26, %v3686_v32 }
 0x1d9   : > { %7619 = vmatprep.mubr.bf16.mxu1 %v9580_v11  ;;  %v6888_v44 = vadd.f32 %v6887_v5, %v6886_v13  ;;  %v9777_v61 = vadd.f32 %v2931_v53, %v9441_v16  ;;  %10874 = vst [vmem:[#allocation29_spill] sm:$0xff] %v9787_v30  ;;  %v9791_v16 = vsel %vm8123_vm3, %v3335_v28, 0  ;;  %v10876_v28 = vld [vmem:[#allocation37_spill] sm:$0xff] }
 0x1da   : > { %v9772_v55 = vpop.f32.mrf.mxu1  ;;  %v6889_v50 = vpop.f32.mrf.mxu0  ;;  %4527 = vmatmul.mubr.bf16.gmra.mxu0 %v10872_v14  ;;  %v3688_v26 = vrot.slane %v9791_v16, 1 }
 0x1db   : > { %10871 = vst [vmem:[#allocation22_spill] sm:$0xff] %v9777_v61  ;;  %v2934_v58 = vadd.f32 %v6888_v44, %v9703_v6  ;;  %4534 = vmatprep.mubr.bf16.mxu0 %v10873_v18 }
 0x1dc   : > { %v9781_v25 = vpop.f32.mrf.mxu1  ;;  %v6890_v11 = vpop.f32.mrf.mxu0 }
 0x1dd   : > { %v6891_v13 = vadd.f32 %v6890_v11, %v6889_v50  ;;  %v9794_v53 = vadd.f32 %v2934_v58, %v9472_v9  ;;  %v10878_v58 = vld [vmem:[#allocation27_spill] sm:$0xff] }
 0x1de   : > { %v9784_v5 = vpop.f32.mrf.mxu1  ;;  %v6892_v61 = vpop.f32.mrf.mxu0 }
 0x1df   : > { %10875 = vst [vmem:[#allocation23_spill] sm:$0xff] %v9794_v53  ;;  %v2939_v6 = vadd.f32 %v9678_v41, %v6891_v13  ;;  %v10879_v53 = vld [vmem:[#allocation10_spill] sm:$0xff] }
 0x1e0   : > { %v9797_v44 = vpop.f32.mrf.mxu1  ;;  %7620 = vmatmul.mubr.bf16.gmra.mxu1 %v9597_v34  ;;  %v6893_v11 = vpop.f32.mrf.mxu0 }
 0x1e1   : > { %7623 = vmatprep.mubr.bf16.mxu1 %v9787_v30  ;;  %v6894_v50 = vadd.f32 %v6893_v11, %v6892_v61  ;;  %v9805_v27 = vadd.f32 %v2939_v6, %v10876_v28  ;;  %v9813_v30 = vsel %vm1410_vm2, %v3686_v32, %v3688_v26  ;;  %v10883_v26 = vld [vmem:[#allocation6_spill] sm:$0xff] }
 0x1e2   : > { %v9802_v1 = vpop.f32.mrf.mxu1  ;;  %v6895_v9 = vpop.f32.mrf.mxu0  ;;  %4535 = vmatmul.mubr.bf16.gmra.mxu0 %v10878_v58  ;;  %10880 = vst [vmem:[#allocation37_spill] sm:$0xff] %v9813_v30 }
 0x1e3   : > { %10877 = vst [vmem:[#allocation8_spill] sm:$0xff] %v9805_v27  ;;  %v2942_v41 = vadd.f32 %v9697_v51, %v6894_v50  ;;  %4542 = vmatprep.mubr.bf16.mxu0 %v10879_v53 }
 0x1e4   : > { %v9809_v13 = vpop.f32.mrf.mxu1  ;;  %v6896_v34 = vpop.f32.mrf.mxu0 }
 0x1e5   : > { %v6897_v39 = vadd.f32 %v6896_v34, %v6895_v9  ;;  %v9818_v11 = vadd.f32 %v2942_v41, %v9452_v47 }
 0x1e6   : > { %v9815_v61 = vpop.f32.mrf.mxu1  ;;  %v6898_v6 = vpop.f32.mrf.mxu0 }
 0x1e7   : > { %10881 = vst [vmem:[#allocation27_spill] sm:$0xff] %v9818_v11  ;;  %v2947_v28 = vadd.f32 %v6897_v39, %v9726_v45  ;;  %v10885_v45 = vld [vmem:[#allocation17_spill] sm:$0xff] }
 0x1e8   : > { %v9821_v27 = vpop.f32.mrf.mxu1  ;;  %7624 = vmatmul.mubr.bf16.gmra.mxu1 %v9813_v30  ;;  %v6899_v51 = vpop.f32.mrf.mxu0 }
 0x1e9   : > { %5033 = vmatprep.mubr.bf16.mxu1 %v10858_v15  ;;  %v6900_v50 = vadd.f32 %v6899_v51, %v6898_v6  ;;  %v9828_v34 = vadd.f32 %v2947_v28, %v9500_v0 }
 0x1ea   : > { %v9825_v57 = vpop.f32.mrf.mxu1  ;;  %v6901_v32 = vpop.f32.mrf.mxu0  ;;  %4543 = vmatmul.mubr.bf16.gmra.mxu0 %v10883_v26 }
 0x1eb   : > { %10882 = vst [vmem:[#allocation10_spill] sm:$0xff] %v9828_v34  ;;  %v2950_v47 = vadd.f32 %v6900_v50, %v9735_v56  ;;  %4550 = vmatprep.mubr.bf16.mxu0 %v10885_v45 }
 0x1ec   : > { %v9832_v9 = vpop.f32.mrf.mxu1  ;;  %v6902_v39 = vpop.f32.mrf.mxu0 }
 0x1ed   : > { %10884 = vst [vmem:[#allocation6_spill] sm:$0xff] %v9832_v9  ;;  %v6903_v41 = vadd.f32 %v6902_v39, %v6901_v32  ;;  %v9838_v15 = vadd.f32 %v2950_v47, %v9518_v23  ;;  %v10887_v39 = vld [vmem:[#allocation30_spill] sm:$0xff] }
 0x1ee   : > { %v9835_v30 = vpop.f32.mrf.mxu1  ;;  %v6904_v6 = vpop.f32.mrf.mxu0  ;;  %v10889_v9 = vld [vmem:[#allocation26_spill] sm:$0xff] }
 0x1ef   : > { %10886 = vst [vmem:[#allocation17_spill] sm:$0xff] %v9838_v15  ;;  %v2955_v0 = vadd.f32 %v9716_v10, %v6903_v41  ;;  %v10888_v10 = vld [vmem:[#allocation34_spill] sm:$0xff] }
 0x1f0   : > { %v6995_v28 = vpop.f32.mrf.mxu1  ;;  %5034 = vmatmul.mubr.bf16.vlgmr.msra.gmra.mxu1 %v9029_v24  ;;  %v6905_v51 = vpop.f32.mrf.mxu0 }
 0x1f1   : > { %5041 = vmatprep.mubr.bf16.mxu1 %v10861_v46  ;;  %v6906_v56 = vadd.f32 %v6905_v51, %v6904_v6  ;;  %v9844_v34 = vadd.f32 %v2955_v0, %v9481_v59 }
 0x1f2   : > { %v6996_v50 = vpop.f32.mrf.mxu1  ;;  %v6907_v32 = vpop.f32.mrf.mxu0  ;;  %4551 = vmatmul.mubr.bf16.gmra.mxu0 %v10887_v39 }
 0x1f3   : > { %v9847_v11 = vadd.f32 %v6996_v50, %v6995_v28  ;;  %v2958_v23 = vadd.f32 %v9732_v43, %v6906_v56  ;;  %4558 = vmatprep.mubr.bf16.mxu0 %v10888_v10 }
 0x1f4   : > { %v6998_v47 = vpop.f32.mrf.mxu1  ;;  %v6908_v41 = vpop.f32.mrf.mxu0 }
 0x1f5   : > { %v6909_v24 = vadd.f32 %v6908_v41, %v6907_v32  ;;  %v9852_v46 = vadd.f32 %v2958_v23, %v10889_v9  ;;  %v10891_v41 = vld [vmem:[#allocation31_spill] sm:$0xff] }
 0x1f6   : > { %v6999_v15 = vpop.f32.mrf.mxu1  ;;  %v6910_v6 = vpop.f32.mrf.mxu0 }
 0x1f7   : > { %v9854_v51 = vadd.f32 %v6999_v15, %v6998_v47  ;;  %v2963_v59 = vadd.f32 %v6909_v24, %v9745_v35  ;;  %v10892_v35 = vld [vmem:[#allocation11_spill] sm:$0xff] }
 0x1f8   : > { %v7001_v0 = vpop.f32.mrf.mxu1  ;;  %5042 = vmatmul.mubr.bf16.gmra.mxu1 %v9046_v4  ;;  %v6911_v28 = vpop.f32.mrf.mxu0 }
 0x1f9   : > { %5049 = vmatprep.mubr.bf16.mxu1 %v10864_v36  ;;  %v6912_v43 = vadd.f32 %v6911_v28, %v6910_v6  ;;  %v9860_v50 = vadd.f32 %v2963_v59, %v9535_v40 }
 0x1fa   : > { %v7002_v56 = vpop.f32.mrf.mxu1  ;;  %v6913_v32 = vpop.f32.mrf.mxu0  ;;  %4559 = vmatmul.mubr.bf16.gmra.mxu0 %v10891_v41 }
 0x1fb   : > { %10890 = vst [vmem:[#allocation30_spill] sm:$0xff] %v9860_v50  ;;  %v9863_v9 = vadd.f32 %v7002_v56, %v7001_v0  ;;  %v2966_v15 = vadd.f32 %v6912_v43, %v9755_v37  ;;  %4566 = vmatprep.mubr.bf16.mxu0 %v10892_v35  ;;  %v10893_v56 = vld [vmem:[#allocation9_spill] sm:$0xff] }
 0x1fc   : > { %v7004_v23 = vpop.f32.mrf.mxu1  ;;  %v6914_v47 = vpop.f32.mrf.mxu0 }
 0x1fd   : > { %v6915_v4 = vadd.f32 %v6914_v47, %v6913_v32  ;;  %v9868_v36 = vadd.f32 %v2966_v15, %v9555_v12  ;;  %v10894_v47 = vld [vmem:[#allocation32_spill] sm:$0xff] }
 0x1fe   : > { %v7005_v24 = vpop.f32.mrf.mxu1  ;;  %v6916_v6 = vpop.f32.mrf.mxu0 }
 0x1ff   : > { %v9870_v28 = vadd.f32 %v7005_v24, %v7004_v23  ;;  %v2971_v40 = vadd.f32 %v9741_v21, %v6915_v4  ;;  %v10895_v21 = vld [vmem:[#allocation24_spill] sm:$0xff] }
 0x200   : > { %v7007_v59 = vpop.f32.mrf.mxu1  ;;  %5050 = vmatmul.mubr.bf16.gmra.mxu1 %v10868_v31  ;;  %v6917_v0 = vpop.f32.mrf.mxu0 }
 0x201   : > { %5057 = vmatprep.mubr.bf16.mxu1 %v10869_v22  ;;  %v6918_v37 = vadd.f32 %v6917_v0, %v6916_v6  ;;  %v9876_v50 = vadd.f32 %v2971_v40, %v10893_v56 }
 0x202   : > { %v7008_v43 = vpop.f32.mrf.mxu1  ;;  %v6919_v32 = vpop.f32.mrf.mxu0  ;;  %4567 = vmatmul.mubr.bf16.gmra.mxu0 %v10894_v47 }
 0x203   : > { %v9879_v12 = vadd.f32 %v7008_v43, %v7007_v59  ;;  %v2974_v15 = vadd.f32 %v9752_v48, %v6918_v37  ;;  %4574 = vmatprep.mubr.bf16.mxu0 %v10895_v21 }
 0x204   : > { %v7010_v23 = vpop.f32.mrf.mxu1  ;;  %v6920_v4 = vpop.f32.mrf.mxu0 }
 0x205   : > { %v6921_v31 = vadd.f32 %v6920_v4, %v6919_v32  ;;  %v9884_v22 = vadd.f32 %v2974_v15, %v9543_v60  ;;  %v10897_v4 = vld [vmem:[#allocation19_spill] sm:$0xff] }
 0x206   : > { %v7011_v24 = vpop.f32.mrf.mxu1  ;;  %v6922_v6 = vpop.f32.mrf.mxu0 }
 0x207   : > { %v9886_v0 = vadd.f32 %v7011_v24, %v7010_v23  ;;  %v2979_v40 = vadd.f32 %v6921_v31, %v9772_v55  ;;  %v10898_v55 = vld [vmem:[#allocation28_spill] sm:$0xff] }
 0x208   : > { %v7013_v56 = vpop.f32.mrf.mxu1  ;;  %5058 = vmatmul.mubr.bf16.gmra.mxu1 %v10872_v14  ;;  %v6923_v59 = vpop.f32.mrf.mxu0  ;;  %v3568_v14 = vshll.u32 %v9765_v63, 16 }
 0x209   : > { %5065 = vmatprep.mubr.bf16.mxu1 %v10873_v18  ;;  %v6924_v48 = vadd.f32 %v6923_v59, %v6922_v6  ;;  %v9892_v43 = vadd.f32 %v2979_v40, %v9566_v7 }
 0x20a   : > { %v7014_v37 = vpop.f32.mrf.mxu1  ;;  %v6925_v32 = vpop.f32.mrf.mxu0  ;;  %4575 = vmatmul.mubr.bf16.gmra.mxu0 %v10897_v4 }
 0x20b   : > { %10896 = vst [vmem:[#allocation34_spill] sm:$0xff] %v9892_v43  ;;  %v9895_v60 = vadd.f32 %v7014_v37, %v7013_v56  ;;  %v2982_v15 = vadd.f32 %v6924_v48, %v9784_v5  ;;  %4582 = vmatprep.mubr.bf16.mxu0 %v10898_v55  ;;  %v3566_v48 = vshrl.u32 %v9765_v63, 16  ;;  %v3570_v37 = vrot.slane %v3568_v14, 1 }
 0x20c   : > { %v7016_v23 = vpop.f32.mrf.mxu1  ;;  %v6926_v31 = vpop.f32.mrf.mxu0 }
 0x20d   : > { %v6927_v24 = vadd.f32 %v6926_v31, %v6925_v32  ;;  %v9901_v6 = vadd.f32 %v2982_v15, %v9583_v33  ;;  %v3573_v32 = vshll.u32 %v9761_v3, 16 }
 0x20e   : > { %v7017_v18 = vpop.f32.mrf.mxu1  ;;  %v6928_v7 = vpop.f32.mrf.mxu0 }
 0x20f   : > { %10899 = vst [vmem:[#allocation26_spill] sm:$0xff] %v9901_v6  ;;  %v9903_v40 = vadd.f32 %v7017_v18, %v7016_v23  ;;  %v2987_v59 = vadd.f32 %v9768_v19, %v6927_v24  ;;  %v3571_v24 = vor.u32 %v3570_v37, %v3566_v48  ;;  %v3575_v14 = vrot.slane %v3573_v32, 1 }
 0x210   : > { %v7019_v56 = vpop.f32.mrf.mxu1  ;;  %5066 = vmatmul.mubr.bf16.gmra.mxu1 %v10878_v58  ;;  %v6929_v5 = vpop.f32.mrf.mxu0  ;;  %v3577_v48 = vshrl.u32 %v9761_v3, 16  ;;  %v3581_v37 = vshll.u32 %v9791_v16, 16 }
 0x211   : > { %5073 = vmatprep.mubr.bf16.mxu1 %v10879_v53  ;;  %v6930_v31 = vadd.f32 %v6929_v5, %v6928_v7  ;;  %v9911_v33 = vadd.f32 %v2987_v59, %v9558_v52 }
 0x212   : > { %v7020_v43 = vpop.f32.mrf.mxu1  ;;  %v6931_v15 = vpop.f32.mrf.mxu0  ;;  %4583 = vmatmul.mubr.bf16.gmra.mxu0 %v9449_v49 }
 0x213   : > { %v9914_v19 = vadd.f32 %v7020_v43, %v7019_v56  ;;  %v2990_v58 = vadd.f32 %v9781_v25, %v6930_v31  ;;  %4590 = vmatprep.mubr.bf16.mxu0 %v9569_v17  ;;  %v9926_v56 = vsel %vm1169_vm4, %v3571_v24, %v3575_v14 }
 0x214   : > { %v7022_v23 = vpop.f32.mrf.mxu1  ;;  %v6932_v53 = vpop.f32.mrf.mxu0 }
 0x215   : > { %v6933_v18 = vadd.f32 %v6932_v53, %v6931_v15  ;;  %v9919_v7 = vadd.f32 %v2990_v58, %v9571_v29  ;;  %v3579_v58 = vor.u32 %v3577_v48, %v3575_v14 }
 0x216   : > { %v7023_v6 = vpop.f32.mrf.mxu1  ;;  %v6934_v52 = vpop.f32.mrf.mxu0 }
 0x217   : > { %v9921_v59 = vadd.f32 %v7023_v6, %v7022_v23  ;;  %v2995_v5 = vadd.f32 %v6933_v18, %v9802_v1  ;;  %v3583_v23 = vrot.slane %v3581_v37, 1 }
 0x218   : > { %v7025_v43 = vpop.f32.mrf.mxu1  ;;  %5074 = vmatmul.mubr.bf16.gmra.mxu1 %v10883_v26  ;;  %v6935_v25 = vpop.f32.mrf.mxu0 }
 0x219   : > { %5081 = vmatprep.mubr.bf16.mxu1 %v10885_v45  ;;  %v6936_v29 = vadd.f32 %v6935_v25, %v6934_v52  ;;  %v9932_v6 = vadd.f32 %v2995_v5, %v9591_v8 }
 0x21a   : > { %v7026_v32 = vpop.f32.mrf.mxu1  ;;  %v6937_v31 = vpop.f32.mrf.mxu0  ;;  %4591 = vmatmul.mubr.bf16.gmra.mxu0 %v9478_v20 }
 0x21b   : > { %v9935_v1 = vadd.f32 %v7026_v32, %v7025_v43  ;;  %v2998_v26 = vadd.f32 %v6936_v29, %v9815_v61  ;;  %4598 = vmatprep.mubr.bf16.mxu0 %v9926_v56  ;;  %v9947_v43 = vsel %vm1169_vm4, %v3579_v58, %v3583_v23 }
 0x21c   : > { %v7028_v15 = vpop.f32.mrf.mxu1  ;;  %v6938_v45 = vpop.f32.mrf.mxu0 }
 0x21d   : > { %v6939_v53 = vadd.f32 %v6938_v45, %v6937_v31  ;;  %v9940_v24 = vadd.f32 %v2998_v26, %v9601_v38 }
 0x21e   : > { %v7029_v16 = vpop.f32.mrf.mxu1  ;;  %v6940_v8 = vpop.f32.mrf.mxu0 }
 0x21f   : > { %v9942_v18 = vadd.f32 %v7029_v16, %v7028_v15  ;;  %v3003_v52 = vadd.f32 %v9797_v44, %v6939_v53 }
 0x220   : > { %v7031_v5 = vpop.f32.mrf.mxu1  ;;  %5082 = vmatmul.mubr.bf16.gmra.mxu1 %v10887_v39  ;;  %v6941_v61 = vpop.f32.mrf.mxu0 }
 0x221   : > { %5089 = vmatprep.mubr.bf16.mxu1 %v10888_v10  ;;  %v6942_v14 = vadd.f32 %v6941_v61, %v6940_v8  ;;  %v9951_v48 = vadd.f32 %v3003_v52, %v9586_v2 }
 0x222   : > { %v7032_v25 = vpop.f32.mrf.mxu1  ;;  %v6943_v38 = vpop.f32.mrf.mxu0  ;;  %4599 = vmatmul.mubr.bf16.gmra.mxu0 %v9765_v63 }
 0x223   : > { %v9954_v37 = vadd.f32 %v7032_v25, %v7031_v5  ;;  %v3006_v44 = vadd.f32 %v9809_v13, %v6942_v14  ;;  %4606 = vmatprep.mubr.bf16.mxu0 %v9947_v43  ;;  %v10900_v5 = vld [vmem:[#allocation13_spill] sm:$0xff]  ;;  %v3065_v25 = vld [vmem:[%s773_s14] sm:$0xf] }
 0x224   : > { %v7034_v29 = vpop.f32.mrf.mxu1  ;;  %v6944_v39 = vpop.f32.mrf.mxu0 }
 0x225   : > { %v6945_v32 = vadd.f32 %v6944_v39, %v6943_v38  ;;  %v9959_v10 = vadd.f32 %v3006_v44, %v9593_v54  ;;  %v3066_v38 = vld [vmem:[%s773_s14 + $0x4] sm:$0xf] }
 0x226   : > { %v7035_v31 = vpop.f32.mrf.mxu1  ;;  %v6946_v26 = vpop.f32.mrf.mxu0 }
 0x227   : > { %v9961_v2 = vadd.f32 %v7035_v31, %v7034_v29  ;;  %v3011_v15 = vadd.f32 %v6945_v32, %v9825_v57  ;;  %v10901_v29 = vld [vmem:[#allocation16_spill] sm:$0xff] }
 0x228   : > { %v7037_v45 = vpop.f32.mrf.mxu1  ;;  %5090 = vmatmul.mubr.bf16.gmra.mxu1 %v10891_v41  ;;  %v6947_v58 = vpop.f32.mrf.mxu0 }
 0x229   : > { %5097 = vmatprep.mubr.bf16.mxu1 %v10892_v35  ;;  %v6948_v13 = vadd.f32 %v6947_v58, %v6946_v26  ;;  %v9967_v53 = vadd.f32 %v3011_v15, %v9610_v62  ;;  %v3069_v15 = vsel %vm8792_vm6, 0, %v3065_v25  ;;  %v10907_v25 = vld [vmem:[#allocation20_spill] sm:$0xff] }
 0x22a   : > { %v7038_v23 = vpop.f32.mrf.mxu1  ;;  %v6949_v16 = vpop.f32.mrf.mxu0  ;;  %4607 = vmatmul.mubr.bf16.gmra.mxu0 %v9761_v3 }
 0x22b   : > { %v9970_v54 = vadd.f32 %v7038_v23, %v7037_v45  ;;  %v3014_v8 = vadd.f32 %v6948_v13, %v9835_v30  ;;  %7643 = vmatprep.mubr.bf16.mxu0 %v9338_v42  ;;  %v3070_v45 = vsel %vm8792_vm6, 0, %v3066_v38  ;;  %v10903_v13 = vld [vmem:[#allocation35_spill] sm:$0xff] }
 0x22c   : > { %v7040_v52 = vpop.f32.mrf.mxu1  ;;  %v6950_v57 = vpop.f32.mrf.mxu0 }
 0x22d   : > { %v6951_v41 = vadd.f32 %v6950_v57, %v6949_v16  ;;  %v9979_v62 = vadd.f32 %v3014_v8, %v10900_v5  ;;  %v10905_v8 = vld [vmem:[#allocation36_spill] sm:$0xff]  ;;  %v10906_v5 = vld [vmem:[#allocation18_spill] sm:$0xff] }
 0x22e   : > { %v7041_v35 = vpop.f32.mrf.mxu1  ;;  %v6952_v61 = vpop.f32.mrf.mxu0  ;;  %v3068_v57 = vld [vmem:[%s773_s14 + $0xc] sm:$0xf] }
 0x22f   : > { %v9981_v14 = vadd.f32 %v7041_v35, %v7040_v52  ;;  %v3019_v30 = vadd.f32 %v9821_v27, %v6951_v41  ;;  %v3067_v52 = vld [vmem:[%s773_s14 + $0x8] sm:$0xf]  ;;  %v6221_v35 = vcombine.low %v3069_v15, %v3070_v45 }
 0x230   : > { %v7043_v44 = vpop.f32.mrf.mxu1  ;;  %5098 = vmatmul.mubr.bf16.gmra.mxu1 %v10894_v47  ;;  %v6953_v42 = vpop.f32.mrf.mxu0  ;;  %v10904_v47 = vld [vmem:[#allocation6_spill] sm:$0xff] }
 0x231   : > { %5105 = vmatprep.mubr.bf16.mxu1 %v10895_v21  ;;  %v9987_v39 = vadd.f32 %v3019_v30, %v10901_v29  ;;  %v6954_v32 = vadd.f32 %v6953_v42, %v6952_v61 }
 0x232   : > { %v7044_v31 = vpop.f32.mrf.mxu1  ;;  %v7549_v58 = vpop.f32.mrf.mxu0  ;;  %7644 = vmatmul.mubr.bf16.vlgmr.msra.gmra.mxu0 %v10903_v13 }
 0x233   : > { %v9994_v27 = vadd.f32 %v7044_v31, %v7043_v44  ;;  %v3022_v23 = vadd.f32 %v10904_v47, %v6954_v32  ;;  %v4111_v21 = vadd.f32 %v7549_v58, %v9863_v9  ;;  %7647 = vmatprep.mubr.bf16.mxu0 %v10905_v8  ;;  %v3071_v9 = vsel %vm8792_vm6, 0, %v3067_v52  ;;  %v10908_v31 = vld [vmem:[#allocation15_spill] sm:$0xff]  ;;  %v10909_v47 = vld [vmem:[#allocation14_spill] sm:$0xff] }
 0x234   : > { %v7046_v16 = vpop.f32.mrf.mxu1  ;;  %v4102_v41 = vpop.f32.mrf.mxu0  ;;  %v3072_v32 = vsel %vm8792_vm6, 0, %v3068_v57  ;;  %v10910_v52 = vld [vmem:[#allocation38_spill] sm:$0xff] }
 0x235   : > { %v10000_v61 = vadd.f32 %v3022_v23, %v10906_v5  ;;  %v10003_v38 = vadd.f32 %v4111_v21, %v10907_v25  ;;  %v4103_v30 = vadd.f32 %v9847_v11, %v4102_v41  ;;  %v3341_v11 = vshrl.u32 %v6221_v35, 16 }
 0x236   : > { %v7047_v44 = vpop.f32.mrf.mxu1  ;;  %v7550_v42 = vpop.f32.mrf.mxu0  ;;  %v6222_v26 = vcombine.low %v3071_v9, %v3072_v32 }
 0x237   : > { %v10006_v29 = vadd.f32 %v7047_v44, %v7046_v16  ;;  %v10013_v15 = vadd.f32 %v4103_v30, %v10908_v31  ;;  %v4114_v45 = vadd.f32 %v7550_v42, %v9870_v28  ;;  %v10911_v28 = vld [vmem:[#allocation12_spill] sm:$0xff]  ;;  %v3343_v30 = vrot.slane %v3341_v11, 7  ;;  %v10913_v42 = vld [vmem:[#allocation5_spill] sm:$0xff] }
 0x238   : > { %v7049_v58 = vpop.f32.mrf.mxu1  ;;  %5106 = vmatmul.mubr.bf16.gmra.mxu1 %v10897_v4  ;;  %v4105_v13 = vpop.f32.mrf.mxu0  ;;  %v3344_v44 = vshll.u32 %v6221_v35, 16  ;;  %v3348_v31 = vshrl.u32 %v6222_v26, 16 }
 0x239   : > { %5113 = vmatprep.mubr.bf16.mxu1 %v10898_v55  ;;  %v10019_v23 = vadd.f32 %v4114_v45, %v10909_v47  ;;  %v4106_v21 = vadd.f32 %v9854_v51, %v4105_v13  ;;  %v10912_v55 = vld [vmem:[#allocation39_spill] sm:$0xff]  ;;  %v10914_v13 = vld [vmem:[#allocation21_spill] sm:$0xff] }
 0x23a   : > { %v7050_v16 = vpop.f32.mrf.mxu1  ;;  %v7553_v8 = vpop.f32.mrf.mxu0  ;;  %7648 = vmatmul.mubr.bf16.gmra.mxu0 %v10910_v52  ;;  %v3346_v35 = vor.u32 %v3344_v44, %v3343_v30  ;;  %v10918_v44 = vld [vmem:[#allocation41_spill] sm:$0xff] }
 0x23b   : > { %v10023_v57 = vadd.f32 %v7050_v16, %v7049_v58  ;;  %v10026_v41 = vadd.f32 %v4106_v21, %v10911_v28  ;;  %v4127_v4 = vadd.f32 %v7553_v8, %v9895_v60  ;;  %7651 = vmatprep.mubr.bf16.mxu0 %v10912_v55  ;;  %v10915_v16 = vld [vmem:[#allocation33_spill] sm:$0xff]  ;;  %v3350_v28 = vrot.slane %v3348_v31, 7  ;;  %v10916_v55 = vld [vmem:[#allocation40_spill] sm:$0xff] }
 0x23c   : > { %v7052_v5 = vpop.f32.mrf.mxu1  ;;  %v4118_v25 = vpop.f32.mrf.mxu0 }
 0x23d   : > { %v10031_v51 = vadd.f32 %v4127_v4, %v10913_v42  ;;  %v4119_v9 = vadd.f32 %v9879_v12, %v4118_v25  ;;  %v3351_v4 = vshll.u32 %v6222_v26, 16 }
 0x23e   : > { %v7053_v32 = vpop.f32.mrf.mxu1  ;;  %v7554_v45 = vpop.f32.mrf.mxu0 }
 0x23f   : > { %v10034_v58 = vadd.f32 %v7053_v32, %v7052_v5  ;;  %v10037_v47 = vadd.f32 %v4119_v9, %v10914_v13  ;;  %v4130_v60 = vadd.f32 %v7554_v45, %v9903_v40  ;;  %v10917_v40 = vld [vmem:[#allocation25_spill] sm:$0xff]  ;;  %v10919_v32 = vld [vmem:[#allocation8_spill] sm:$0xff]  ;;  %v3353_v31 = vor.u32 %v3351_v4, %v3350_v28  ;;  %v10922_v4 = vld [vmem:[#allocation27_spill] sm:$0xff] }
 0x240   : > { %v7055_v21 = vpop.f32.mrf.mxu1  ;;  %5114 = vmatmul.mubr.bf16.gmra.mxu1 %v9449_v49  ;;  %v4121_v11 = vpop.f32.mrf.mxu0 }
 0x241   : > { %5121 = vmatprep.mubr.bf16.mxu1 %v9569_v17  ;;  %v10043_v8 = vadd.f32 %v4130_v60, %v10915_v16  ;;  %v4122_v12 = vadd.f32 %v9886_v0, %v4121_v11  ;;  %v10060_v60 = vsel %vm8123_vm3, 0, %v3346_v35  ;;  %v10921_v16 = vld [vmem:[#allocation22_spill] sm:$0xff] }
 0x242   : > { %v7056_v52 = vpop.f32.mrf.mxu1  ;;  %v7557_v5 = vpop.f32.mrf.mxu0  ;;  %7652 = vmatmul.mubr.bf16.gmra.mxu0 %v10916_v55 }
 0x243   : > { %v10047_v25 = vadd.f32 %v7056_v52, %v7055_v21  ;;  %v10050_v42 = vadd.f32 %v4122_v12, %v10917_v40  ;;  %v4143_v49 = vadd.f32 %v7557_v5, %v9935_v1  ;;  %7655 = vmatprep.mubr.bf16.mxu0 %v10918_v44  ;;  %v10923_v44 = vld [vmem:[#allocation42_spill] sm:$0xff] }
 0x244   : > { %v7058_v17 = vpop.f32.mrf.mxu1  ;;  %v4134_v9 = vpop.f32.mrf.mxu0 }
 0x245   : > { %v10055_v45 = vadd.f32 %v4143_v49, %v10919_v32  ;;  %v4135_v0 = vadd.f32 %v9914_v19, %v4134_v9  ;;  %v3588_v19 = vshll.u32 %v10060_v60, 16  ;;  %v10076_v49 = vsel %vm966_vm1, %v3343_v30, %v3353_v31  ;;  %v10924_v9 = vld [vmem:[#allocation23_spill] sm:$0xff] }
 0x246   : > { %v7059_v26 = vpop.f32.mrf.mxu1  ;;  %v7558_v21 = vpop.f32.mrf.mxu0 }
 0x247   : > { %v10062_v11 = vadd.f32 %v7059_v26, %v7058_v17  ;;  %v10065_v1 = vadd.f32 %v4135_v0, %v10921_v16  ;;  %v4146_v12 = vadd.f32 %v7558_v21, %v9942_v18  ;;  %v10925_v0 = vld [vmem:[#allocation43_spill] sm:$0xff]  ;;  %v3586_v21 = vshrl.u32 %v10060_v60, 16 }
 0x248   : > { %v7061_v52 = vpop.f32.mrf.mxu1  ;;  %5122 = vmatmul.mubr.bf16.gmra.mxu1 %v9478_v20  ;;  %v4137_v5 = vpop.f32.mrf.mxu0  ;;  %v3593_v16 = vshll.u32 %v10076_v49, 16 }
 0x249   : > { %5129 = vmatprep.mubr.bf16.mxu1 %v9926_v56  ;;  %v10072_v55 = vadd.f32 %v4146_v12, %v10922_v4  ;;  %v4138_v35 = vadd.f32 %v9921_v59, %v4137_v5  ;;  %v3590_v59 = vrot.slane %v3588_v19, 1  ;;  %v10926_v4 = vld [vmem:[#allocation10_spill] sm:$0xff] }
 0x24a   : > { %v7062_v40 = vpop.f32.mrf.mxu1  ;;  %v7561_v17 = vpop.f32.mrf.mxu0  ;;  %7656 = vmatmul.mubr.bf16.gmra.mxu0 %v10923_v44  ;;  %v3595_v44 = vrot.slane %v3593_v16, 1 }
 0x24b   : > { %v7063_v18 = vadd.f32 %v7062_v40, %v7061_v52  ;;  %v10080_v20 = vadd.f32 %v4138_v35, %v10924_v9  ;;  %v4159_v56 = vadd.f32 %v7561_v17, %v9970_v54  ;;  %7659 = vmatprep.mubr.bf16.mxu0 %v10925_v0  ;;  %v3591_v19 = vor.u32 %v3590_v59, %v3586_v21  ;;  %v10929_v59 = vld [vmem:[#allocation44_spill] sm:$0xff] }
 0x24c   : > { %v7064_v32 = vpop.f32.mrf.mxu1  ;;  %v4150_v26 = vpop.f32.mrf.mxu0 }
 0x24d   : > { %v10087_v30 = vadd.f32 %v4159_v56, %v9844_v34  ;;  %v4151_v31 = vadd.f32 %v9954_v37, %v4150_v26 }
 0x24e   : > { %v7065_v12 = vpop.f32.mrf.mxu1  ;;  %v7562_v52 = vpop.f32.mrf.mxu0 }
 0x24f   : > { %v7066_v5 = vadd.f32 %v7065_v12, %v7064_v32  ;;  %v10091_v35 = vadd.f32 %v4151_v31, %v10926_v4  ;;  %v4162_v54 = vadd.f32 %v7562_v52, %v9981_v14  ;;  %v10927_v32 = vld [vmem:[#allocation7_spill] sm:$0xff]  ;;  %v10103_v14 = vsel %vm8123_vm3, %v3350_v28, 0 }
 0x250   : > { %v7067_v40 = vpop.f32.mrf.mxu1  ;;  %5130 = vmatmul.mubr.bf16.gmra.mxu1 %v9765_v63  ;;  %v4153_v17 = vpop.f32.mrf.mxu0  ;;  %v10928_v63 = vld [vmem:[#allocation17_spill] sm:$0xff]  ;;  %v3597_v28 = vshrl.u32 %v10076_v49, 16  ;;  %v3601_v13 = vshll.u32 %v10103_v14, 16 }
 0x251   : > { %5137 = vmatprep.mubr.bf16.mxu1 %v9947_v43  ;;  %v10097_v34 = vadd.f32 %v4162_v54, %v9852_v46  ;;  %v4154_v37 = vadd.f32 %v9961_v2, %v4153_v17  ;;  %v3596_v2 = vsel %vm1169_vm4, %v3591_v19, %v3595_v44  ;;  %v10930_v54 = vld [vmem:[#allocation30_spill] sm:$0xff] }
 0x252   : > { %v7068_v9 = vpop.f32.mrf.mxu1  ;;  %v7565_v56 = vpop.f32.mrf.mxu0  ;;  %7660 = vmatmul.mubr.bf16.gmra.mxu0 %v10927_v32 }
 0x253   : > { %v7069_v0 = vadd.f32 %v7068_v9, %v7067_v40  ;;  %v10106_v26 = vadd.f32 %v4154_v37, %v10928_v63  ;;  %v4175_v43 = vadd.f32 %v7565_v56, %v10023_v57  ;;  %7663 = vmatprep.mubr.bf16.mxu0 %v10929_v59  ;;  %v3599_v9 = vor.u32 %v3597_v28, %v3595_v44  ;;  %v10931_v63 = vld [vmem:[#allocation45_spill] sm:$0xff] }
 0x254   : > { %v7070_v21 = vpop.f32.mrf.mxu1  ;;  %v4166_v46 = vpop.f32.mrf.mxu0  ;;  %v3603_v56 = vrot.slane %v3601_v13, 1  ;;  %v10933_v13 = vld [vmem:[#allocation34_spill] sm:$0xff] }
 0x255   : > { %v10112_v16 = vadd.f32 %v4175_v43, %v9876_v50  ;;  %v4167_v31 = vadd.f32 %v9994_v27, %v4166_v46 }
 0x256   : > { %v7071_v12 = vpop.f32.mrf.mxu1  ;;  %v7566_v52 = vpop.f32.mrf.mxu0 }
 0x257   : > { %v7072_v4 = vadd.f32 %v7071_v12, %v7070_v21  ;;  %v10118_v57 = vadd.f32 %v4167_v31, %v10930_v54  ;;  %v4178_v40 = vadd.f32 %v7566_v52, %v10034_v58  ;;  %v3604_v12 = vsel %vm1169_vm4, %v3599_v9, %v3603_v56  ;;  %v10935_v56 = vld [vmem:[#allocation26_spill] sm:$0xff] }
 0x258   : > { %v7073_v17 = vpop.f32.mrf.mxu1  ;;  %5138 = vmatmul.mubr.bf16.gmra.mxu1 %v9761_v3  ;;  %v4169_v19 = vpop.f32.mrf.mxu0  ;;  %v10932_v3 = vld [vmem:[#allocation29_spill] sm:$0xff] }
 0x259   : > { %5145 = vmatprep.mubr.bf16.mxu1 %v3596_v2  ;;  %v10123_v50 = vadd.f32 %v4178_v40, %v9884_v22  ;;  %v4170_v27 = vadd.f32 %v10006_v29, %v4169_v19  ;;  %v3690_v22 = vrot.slane %v10060_v60, 1  ;;  %v3691_v2 = vrot.slane %v10076_v49, 1 }
 0x25a   : > { %v7074_v37 = vpop.f32.mrf.mxu1  ;;  %v7569_v32 = vpop.f32.mrf.mxu0  ;;  %7664 = vmatmul.mubr.bf16.gmra.mxu0 %v10931_v63 }
 0x25b   : > { %v7075_v43 = vadd.f32 %v7074_v37, %v7073_v17  ;;  %v10128_v21 = vadd.f32 %v4170_v27, %v9868_v36  ;;  %v4191_v58 = vadd.f32 %v7569_v32, %v7063_v18  ;;  %7667 = vmatprep.mubr.bf16.mxu0 %v10932_v3  ;;  %v3692_v17 = vsel %vm1410_vm2, %v3690_v22, %v3691_v2  ;;  %v10934_v37 = vld [vmem:[#allocation37_spill] sm:$0xff] }
 0x25c   : > { %v7076_v59 = vpop.f32.mrf.mxu1  ;;  %v4182_v46 = vpop.f32.mrf.mxu0 }
 0x25d   : > { %v10134_v29 = vadd.f32 %v4191_v58, %v9911_v33  ;;  %v4183_v44 = vadd.f32 %v10047_v25, %v4182_v46 }
 0x25e   : > { %v7077_v31 = vpop.f32.mrf.mxu1  ;;  %v7570_v28 = vpop.f32.mrf.mxu0 }
 0x25f   : > { %v7078_v36 = vadd.f32 %v7077_v31, %v7076_v59  ;;  %v10139_v18 = vadd.f32 %v4183_v44, %v10933_v13  ;;  %v4194_v52 = vadd.f32 %v7570_v28, %v7066_v5 }
 0x260   : > { %v7079_v54 = vpop.f32.mrf.mxu1  ;;  %5146 = vmatmul.mubr.bf16.gmra.mxu1 %v10060_v60  ;;  %v4185_v40 = vpop.f32.mrf.mxu0  ;;  %v3693_v60 = vrot.slane %v10103_v14, 1 }
 0x261   : > { %5153 = vmatprep.mubr.bf16.mxu1 %v3604_v12  ;;  %v10144_v33 = vadd.f32 %v4194_v52, %v9919_v7  ;;  %v4186_v25 = vadd.f32 %v10062_v11, %v4185_v40 }
 0x262   : > { %v7080_v19 = vpop.f32.mrf.mxu1  ;;  %v7573_v27 = vpop.f32.mrf.mxu0  ;;  %7668 = vmatmul.mubr.bf16.gmra.mxu0 %v10934_v37 }
 0x263   : > { %v7081_v9 = vadd.f32 %v7080_v19, %v7079_v54  ;;  %v10149_v32 = vadd.f32 %v4186_v25, %v10935_v56  ;;  %v4207_v5 = vadd.f32 %v7573_v27, %v7075_v43  ;;  %7671 = vmatprep.mubr.bf16.mxu0 %v3692_v17  ;;  %v3694_v43 = vsel %vm1410_vm2, %v3691_v2, %v3693_v60 }
 0x264   : > { %v7082_v63 = vpop.f32.mrf.mxu1  ;;  %v4198_v58 = vpop.f32.mrf.mxu0 }
 0x265   : > { %v10153_v59 = vadd.f32 %v4207_v5, %v9951_v48  ;;  %v4199_v7 = vadd.f32 %v7069_v0, %v4198_v58 }
 0x266   : > { %v7083_v3 = vpop.f32.mrf.mxu1  ;;  %v7574_v11 = vpop.f32.mrf.mxu0 }
 0x267   : > { %v7084_v46 = vadd.f32 %v7083_v3, %v7082_v63  ;;  %v10156_v22 = vadd.f32 %v4199_v7, %v9932_v6  ;;  %v4210_v44 = vadd.f32 %v7574_v11, %v7078_v36 }
 0x268   : > { %v7085_v31 = vpop.f32.mrf.mxu1  ;;  %5154 = vmatmul.mubr.bf16.gmra.mxu1 %v10076_v49  ;;  %v4201_v12 = vpop.f32.mrf.mxu0 }
 0x269   : > { %v10161_v14 = vadd.f32 %v4210_v44, %v9959_v10  ;;  %v4202_v28 = vadd.f32 %v7072_v4, %v4201_v12 }
 0x26a   : > { %v7086_v48 = vpop.f32.mrf.mxu1  ;;  %v7577_v13 = vpop.f32.mrf.mxu0  ;;  %7672 = vmatmul.mubr.bf16.gmra.mxu0 %v3694_v43 }
 0x26b   : > { %v7087_v0 = vadd.f32 %v7086_v48, %v7085_v31  ;;  %v10164_v52 = vadd.f32 %v4202_v28, %v9940_v24 }
 0x26c   : > { %v7088_v6 = vpop.f32.mrf.mxu1  ;;  %v4214_v36 = vpop.f32.mrf.mxu0 }
 0x26d   : > { %v4223_v54 = vadd.f32 %v7577_v13, %v7087_v0  ;;  %v4215_v40 = vadd.f32 %v7081_v9, %v4214_v36 }
 0x26e   : > { %v7089_v17 = vpop.f32.mrf.mxu1  ;;  %v7578_v2 = vpop.f32.mrf.mxu0 }
 0x26f   : > { %v10167_v49 = vadd.f32 %v4223_v54, %v9987_v39  ;;  %v7090_v25 = vadd.f32 %v7089_v17, %v7088_v6  ;;  %v10170_v10 = vadd.f32 %v4215_v40, %v9967_v53 }
 0x270   : > { %v7597_v4 = vpop.f32.mrf.mxu1  ;;  %v4217_v27 = vpop.f32.mrf.mxu0 }
 0x271   : > { %v4226_v19 = vadd.f32 %v7578_v2, %v7090_v25  ;;  %v4218_v37 = vadd.f32 %v7084_v46, %v4217_v27 }
 0x272   : > { %v4649_v56 = vpop.f32.mrf.mxu1  ;;  %v7131_v5 = vpop.f32.mrf.mxu0 }
 0x273   : > { %v10173_v24 = vadd.f32 %v4226_v19, %v10000_v61  ;;  %v10176_v9 = vadd.f32 %v4218_v37, %v9979_v62 }
 0x274   : > { %v7598_v63 = vpop.f32.mrf.mxu1  ;;  %v7132_v39 = vpop.f32.mrf.mxu0 }
 0x275   : > { %10936 = vst [vmem:[#allocation31_spill] sm:$0xff] %v10173_v24  ;;  %v7133_v60 = vadd.f32 %v7132_v39, %v7131_v5 }
 0x276   : > { %v4652_v58 = vpop.f32.mrf.mxu1  ;;  %v7134_v7 = vpop.f32.mrf.mxu0 }
 0x277   : > { %v4650_v3 = vadd.f32 %v7133_v60, %v4649_v56 }
 0x278   : > { %v7601_v53 = vpop.f32.mrf.mxu1  ;;  %v7135_v11 = vpop.f32.mrf.mxu0 }
 0x279   : > { %v10179_v44 = vadd.f32 %v4650_v3, %v10013_v15  ;;  %v7136_v46 = vadd.f32 %v7135_v11, %v7134_v7 }
 0x27a   : > { %v4665_v31 = vpop.f32.mrf.mxu1  ;;  %v7137_v43 = vpop.f32.mrf.mxu0 }
 0x27b   : > { %v4653_v61 = vadd.f32 %v7136_v46, %v4652_v58 }
 0x27c   : > { %v7602_v12 = vpop.f32.mrf.mxu1  ;;  %v7138_v28 = vpop.f32.mrf.mxu0 }
 0x27d   : > { %v10182_v62 = vadd.f32 %v4653_v61, %v10026_v41  ;;  %v7139_v48 = vadd.f32 %v7138_v28, %v7137_v43 }
 0x27e   : > { %v4668_v13 = vpop.f32.mrf.mxu1  ;;  %v7140_v0 = vpop.f32.mrf.mxu0 }
 0x27f   : > { %v4658_v6 = vadd.f32 %v7597_v4, %v7139_v48 }
 0x280   : > { %v7605_v54 = vpop.f32.mrf.mxu1  ;;  %v7141_v36 = vpop.f32.mrf.mxu0 }
 0x281   : > { %v7142_v40 = vadd.f32 %v7141_v36, %v7140_v0  ;;  %v10185_v15 = vadd.f32 %v4658_v6, %v10003_v38 }
 0x282   : > { %v4681_v17 = vpop.f32.mrf.mxu1  ;;  %v7143_v2 = vpop.f32.mrf.mxu0 }
 0x283   : > { %v4661_v25 = vadd.f32 %v7598_v63, %v7142_v40 }
 0x284   : > { %v7606_v19 = vpop.f32.mrf.mxu1  ;;  %v7144_v27 = vpop.f32.mrf.mxu0 }
 0x285   : > { %v7145_v37 = vadd.f32 %v7144_v27, %v7143_v2  ;;  %v10188_v41 = vadd.f32 %v4661_v25, %v10019_v23 }
 0x286   : > { %v4684_v56 = vpop.f32.mrf.mxu1  ;;  %v7146_v5 = vpop.f32.mrf.mxu0 }
 0x287   : > { %v4666_v39 = vadd.f32 %v7145_v37, %v4665_v31 }
 0x288   : > { %v10190_v60 = vpop.f32.mrf.mxu1  ;;  %v7147_v4 = vpop.f32.mrf.mxu0 }
 0x289   : > { %v7148_v58 = vadd.f32 %v7147_v4, %v7146_v5  ;;  %v10193_v3 = vadd.f32 %v4666_v39, %v10037_v47 }
 0x28a   : > { %v4697_v7 = vpop.f32.mrf.mxu1  ;;  %v7149_v38 = vpop.f32.mrf.mxu0 }
 0x28b   : > { %v4669_v11 = vadd.f32 %v7148_v58, %v4668_v13 }
 0x28c   : > { %v10195_v63 = vpop.f32.mrf.mxu1  ;;  %v7150_v46 = vpop.f32.mrf.mxu0 }
 0x28d   : > { %v7151_v43 = vadd.f32 %v7150_v46, %v7149_v38  ;;  %v10198_v23 = vadd.f32 %v4669_v11, %v10050_v42 }
 0x28e   : > { %v4700_v61 = vpop.f32.mrf.mxu1  ;;  %v7152_v28 = vpop.f32.mrf.mxu0 }
 0x28f   : > { %v4674_v31 = vadd.f32 %v7601_v53, %v7151_v43 }
 0x290   : > { %v10200_v48 = vpop.f32.mrf.mxu1  ;;  %v7153_v0 = vpop.f32.mrf.mxu0 }
 0x291   : > { %v7154_v6 = vadd.f32 %v7153_v0, %v7152_v28  ;;  %v10205_v47 = vadd.f32 %v4674_v31, %v10031_v51 }
 0x292   : > { %v10202_v36 = vpop.f32.mrf.mxu1  ;;  %v7155_v13 = vpop.f32.mrf.mxu0 }
 0x293   : > { %v4677_v40 = vadd.f32 %v7602_v12, %v7154_v6 }
 0x294   : > { %v10207_v2 = vpop.f32.mrf.mxu1  ;;  %v7156_v25 = vpop.f32.mrf.mxu0 }
 0x295   : > { %v7157_v27 = vadd.f32 %v7156_v25, %v7155_v13  ;;  %v10212_v42 = vadd.f32 %v4677_v40, %v10043_v8 }
 0x296   : > { %v10209_v37 = vpop.f32.mrf.mxu1  ;;  %v7158_v53 = vpop.f32.mrf.mxu0 }
 0x297   : > { %v4682_v5 = vadd.f32 %v7157_v27, %v4681_v17 }
 0x298   : > { %v10214_v39 = vpop.f32.mrf.mxu1  ;;  %v7159_v4 = vpop.f32.mrf.mxu0 }
 0x299   : > { %v7160_v58 = vadd.f32 %v7159_v4, %v7158_v53  ;;  %v10219_v51 = vadd.f32 %v4682_v5, %v10065_v1 }
 0x29a   : > { %v10216_v38 = vpop.f32.mrf.mxu1  ;;  %v7161_v12 = vpop.f32.mrf.mxu0 }
 0x29b   : > { %v4685_v11 = vadd.f32 %v7160_v58, %v4684_v56 }
 0x29c   : > { %v10221_v46 = vpop.f32.mrf.mxu1  ;;  %v7162_v43 = vpop.f32.mrf.mxu0 }
 0x29d   : > { %v7163_v28 = vadd.f32 %v7162_v43, %v7161_v12  ;;  %v10226_v8 = vadd.f32 %v4685_v11, %v10080_v20 }
 0x29e   : > { %v10223_v31 = vpop.f32.mrf.mxu1  ;;  %v7164_v17 = vpop.f32.mrf.mxu0 }
 0x29f   : > { %v4690_v0 = vadd.f32 %v7605_v54, %v7163_v28 }
 0x2a0   : > { %v10228_v6 = vpop.f32.mrf.mxu1  ;;  %v7165_v13 = vpop.f32.mrf.mxu0 }
 0x2a1   : > { %v7166_v40 = vadd.f32 %v7165_v13, %v7164_v17  ;;  %v10233_v1 = vadd.f32 %v4690_v0, %v10055_v45 }
 0x2a2   : > { %v10230_v25 = vpop.f32.mrf.mxu1  ;;  %v7167_v56 = vpop.f32.mrf.mxu0 }
 0x2a3   : > { %v4693_v27 = vadd.f32 %v7606_v19, %v7166_v40 }
 0x2a4   : > { %v10235_v53 = vpop.f32.mrf.mxu1  ;;  %v7168_v5 = vpop.f32.mrf.mxu0 }
 0x2a5   : > { %v7169_v4 = vadd.f32 %v7168_v5, %v7167_v56  ;;  %v10240_v20 = vadd.f32 %v4693_v27, %v10072_v55 }
 0x2a6   : > { %v10237_v58 = vpop.f32.mrf.mxu1  ;;  %v7170_v54 = vpop.f32.mrf.mxu0 }
 0x2a7   : > { %v4698_v12 = vadd.f32 %v7169_v4, %v4697_v7 }
 0x2a8   : > { %v10242_v11 = vpop.f32.mrf.mxu1  ;;  %v7171_v43 = vpop.f32.mrf.mxu0 }
 0x2a9   : > { %v7172_v28 = vadd.f32 %v7171_v43, %v7170_v54  ;;  %v10247_v45 = vadd.f32 %v4698_v12, %v10091_v35 }
 0x2aa   : > { %v10244_v17 = vpop.f32.mrf.mxu1  ;;  %v7173_v19 = vpop.f32.mrf.mxu0 }
 0x2ab   : > { %v4701_v0 = vadd.f32 %v7172_v28, %v4700_v61 }
 0x2ac   : > { %v10249_v13 = vpop.f32.mrf.mxu1  ;;  %v7174_v40 = vpop.f32.mrf.mxu0 }
 0x2ad   : > { %10937 = vst [vmem:[#allocation11_spill] sm:$0xff] %v10249_v13  ;;  %v7175_v56 = vadd.f32 %v7174_v40, %v7173_v19  ;;  %v10254_v55 = vadd.f32 %v4701_v0, %v10106_v26 }
 0x2ae   : > { %v10251_v5 = vpop.f32.mrf.mxu1  ;;  %v7176_v7 = vpop.f32.mrf.mxu0 }
 0x2af   : > { %v4706_v27 = vadd.f32 %v10190_v60, %v7175_v56 }
 0x2b0   : > { %v7267_v4 = vpop.f32.mrf.mxu1  ;;  %v7177_v54 = vpop.f32.mrf.mxu0 }
 0x2b1   : > { %v7178_v43 = vadd.f32 %v7177_v54, %v7176_v7  ;;  %v10258_v35 = vadd.f32 %v4706_v27, %v10087_v30 }
 0x2b2   : > { %v7268_v24 = vpop.f32.mrf.mxu1  ;;  %v7179_v61 = vpop.f32.mrf.mxu0 }
 0x2b3   : > { %v10260_v12 = vadd.f32 %v7268_v24, %v7267_v4  ;;  %v4709_v28 = vadd.f32 %v10195_v63, %v7178_v43 }
 0x2b4   : > { %v7270_v19 = vpop.f32.mrf.mxu1  ;;  %v7180_v40 = vpop.f32.mrf.mxu0 }
 0x2b5   : > { %v7181_v13 = vadd.f32 %v7180_v40, %v7179_v61  ;;  %v10264_v0 = vadd.f32 %v4709_v28, %v10097_v34 }
 0x2b6   : > { %v7271_v26 = vpop.f32.mrf.mxu1  ;;  %v7182_v60 = vpop.f32.mrf.mxu0 }
 0x2b7   : > { %v10266_v56 = vadd.f32 %v7271_v26, %v7270_v19  ;;  %v4714_v7 = vadd.f32 %v7181_v13, %v10202_v36 }
 0x2b8   : > { %v10269_v54 = vpop.f32.mrf.mxu1  ;;  %v7183_v30 = vpop.f32.mrf.mxu0 }
 0x2b9   : > { %v7184_v27 = vadd.f32 %v7183_v30, %v7182_v60  ;;  %v10274_v63 = vadd.f32 %v4714_v7, %v10118_v57 }
 0x2ba   : > { %v10271_v24 = vpop.f32.mrf.mxu1  ;;  %v7185_v4 = vpop.f32.mrf.mxu0 }
 0x2bb   : > { %10938 = vst [vmem:[#allocation9_spill] sm:$0xff] %v10274_v63  ;;  %v4717_v43 = vadd.f32 %v7184_v27, %v10209_v37 }
 0x2bc   : > { %v10277_v61 = vpop.f32.mrf.mxu1  ;;  %v7186_v34 = vpop.f32.mrf.mxu0 }
 0x2bd   : > { %v7187_v28 = vadd.f32 %v7186_v34, %v7185_v4  ;;  %v10282_v36 = vadd.f32 %v4717_v43, %v10128_v21 }
 0x2be   : > { %v10279_v19 = vpop.f32.mrf.mxu1  ;;  %v7188_v13 = vpop.f32.mrf.mxu0 }
 0x2bf   : > { %10939 = vst [vmem:[#allocation32_spill] sm:$0xff] %v10282_v36  ;;  %v4722_v40 = vadd.f32 %v10200_v48, %v7187_v28 }
 0x2c0   : > { %v10285_v26 = vpop.f32.mrf.mxu1  ;;  %v7189_v60 = vpop.f32.mrf.mxu0 }
 0x2c1   : > { %v7190_v57 = vadd.f32 %v7189_v60, %v7188_v13  ;;  %v10290_v37 = vadd.f32 %v4722_v40, %v10112_v16 }
 0x2c2   : > { %v10287_v7 = vpop.f32.mrf.mxu1  ;;  %v7191_v30 = vpop.f32.mrf.mxu0 }
 0x2c3   : > { %v4725_v27 = vadd.f32 %v10207_v2, %v7190_v57 }
 0x2c4   : > { %v10293_v4 = vpop.f32.mrf.mxu1  ;;  %v7192_v34 = vpop.f32.mrf.mxu0 }
 0x2c5   : > { %v7193_v21 = vadd.f32 %v7192_v34, %v7191_v30  ;;  %v10298_v48 = vadd.f32 %v4725_v27, %v10123_v50 }
 0x2c6   : > { %v10295_v43 = vpop.f32.mrf.mxu1  ;;  %v7194_v28 = vpop.f32.mrf.mxu0 }
 0x2c7   : > { %10940 = vst [vmem:[#allocation24_spill] sm:$0xff] %v10298_v48  ;;  %v4730_v13 = vadd.f32 %v7193_v21, %v10216_v38 }
 0x2c8   : > { %v10301_v60 = vpop.f32.mrf.mxu1  ;;  %v7195_v36 = vpop.f32.mrf.mxu0 }
 0x2c9   : > { %v7196_v16 = vadd.f32 %v7195_v36, %v7194_v28  ;;  %v10306_v2 = vadd.f32 %v4730_v13, %v10139_v18 }
 0x2ca   : > { %v10303_v40 = vpop.f32.mrf.mxu1  ;;  %v7197_v57 = vpop.f32.mrf.mxu0 }
 0x2cb   : > { %10941 = vst [vmem:[#allocation19_spill] sm:$0xff] %v10306_v2  ;;  %v4733_v30 = vadd.f32 %v7196_v16, %v10223_v31 }
 0x2cc   : > { %v10309_v34 = vpop.f32.mrf.mxu1  ;;  %v7198_v63 = vpop.f32.mrf.mxu0 }
 0x2cd   : > { %v7199_v50 = vadd.f32 %v7198_v63, %v7197_v57  ;;  %v10314_v38 = vadd.f32 %v4733_v30, %v10149_v32 }
 0x2ce   : > { %v10311_v27 = vpop.f32.mrf.mxu1  ;;  %v7200_v21 = vpop.f32.mrf.mxu0 }
 0x2cf   : > { %10942 = vst [vmem:[#allocation28_spill] sm:$0xff] %v10314_v38  ;;  %v4738_v36 = vadd.f32 %v10214_v39, %v7199_v50 }
 0x2d0   : > { %v10317_v28 = vpop.f32.mrf.mxu1  ;;  %v7201_v48 = vpop.f32.mrf.mxu0 }
 0x2d1   : > { %v7202_v18 = vadd.f32 %v7201_v48, %v7200_v21  ;;  %v10322_v31 = vadd.f32 %v4738_v36, %v10134_v29 }
 0x2d2   : > { %v10319_v13 = vpop.f32.mrf.mxu1  ;;  %v7203_v16 = vpop.f32.mrf.mxu0 }
 0x2d3   : > { %10943 = vst [vmem:[#allocation13_spill] sm:$0xff] %v10322_v31  ;;  %v4741_v63 = vadd.f32 %v10221_v46, %v7202_v18 }
 0x2d4   : > { %v10325_v57 = vpop.f32.mrf.mxu1  ;;  %v7204_v2 = vpop.f32.mrf.mxu0 }
 0x2d5   : > { %v7205_v32 = vadd.f32 %v7204_v2, %v7203_v16  ;;  %v10330_v39 = vadd.f32 %v4741_v63, %v10144_v33 }
 0x2d6   : > { %v10327_v30 = vpop.f32.mrf.mxu1  ;;  %v7206_v50 = vpop.f32.mrf.mxu0 }
 0x2d7   : > { %10944 = vst [vmem:[#allocation16_spill] sm:$0xff] %v10330_v39  ;;  %v4746_v48 = vadd.f32 %v7205_v32, %v10230_v25 }
 0x2d8   : > { %v10333_v21 = vpop.f32.mrf.mxu1  ;;  %v7207_v38 = vpop.f32.mrf.mxu0 }
 0x2d9   : > { %v7208_v29 = vadd.f32 %v7207_v38, %v7206_v50  ;;  %v10338_v46 = vadd.f32 %v4746_v48, %v10156_v22 }
 0x2da   : > { %v10335_v36 = vpop.f32.mrf.mxu1  ;;  %v7209_v18 = vpop.f32.mrf.mxu0 }
 0x2db   : > { %10945 = vst [vmem:[#allocation4_spill] sm:$0xff] %v10338_v46  ;;  %v4749_v2 = vadd.f32 %v7208_v29, %v10237_v58 }
 0x2dc   : > { %v10341_v16 = vpop.f32.mrf.mxu1  ;;  %v7210_v31 = vpop.f32.mrf.mxu0 }
 0x2dd   : > { %v7211_v33 = vadd.f32 %v7210_v31, %v7209_v18  ;;  %v10346_v25 = vadd.f32 %v4749_v2, %v10164_v52 }
 0x2de   : > { %v10343_v63 = vpop.f32.mrf.mxu1  ;;  %v7212_v32 = vpop.f32.mrf.mxu0 }
 0x2df   : > { %10946 = vst [vmem:[#allocation35_spill] sm:$0xff] %v10346_v25  ;;  %v4754_v38 = vadd.f32 %v10228_v6, %v7211_v33 }
 0x2e0   : > { %v10349_v50 = vpop.f32.mrf.mxu1  ;;  %v7213_v39 = vpop.f32.mrf.mxu0 }
 0x2e1   : > { %v7214_v22 = vadd.f32 %v7213_v39, %v7212_v32  ;;  %v10354_v58 = vadd.f32 %v4754_v38, %v10153_v59 }
 0x2e2   : > { %v10351_v48 = vpop.f32.mrf.mxu1  ;;  %v7215_v29 = vpop.f32.mrf.mxu0 }
 0x2e3   : > { %10947 = vst [vmem:[#allocation6_spill] sm:$0xff] %v10354_v58  ;;  %v4757_v31 = vadd.f32 %v10235_v53, %v7214_v22 }
 0x2e4   : > { %v10357_v18 = vpop.f32.mrf.mxu1  ;;  %v7216_v46 = vpop.f32.mrf.mxu0 }
 0x2e5   : > { %v7217_v52 = vadd.f32 %v7216_v46, %v7215_v29  ;;  %v10362_v6 = vadd.f32 %v4757_v31, %v10161_v14 }
 0x2e6   : > { %v10359_v2 = vpop.f32.mrf.mxu1  ;;  %v7218_v33 = vpop.f32.mrf.mxu0 }
 0x2e7   : > { %10948 = vst [vmem:[#allocation36_spill] sm:$0xff] %v10362_v6  ;;  %v4762_v39 = vadd.f32 %v7217_v52, %v10244_v17 }
 0x2e8   : > { %v10365_v32 = vpop.f32.mrf.mxu1  ;;  %v7219_v25 = vpop.f32.mrf.mxu0 }
 0x2e9   : > { %v7220_v59 = vadd.f32 %v7219_v25, %v7218_v33  ;;  %v10370_v53 = vadd.f32 %v4762_v39, %v10170_v10 }
 0x2ea   : > { %v10367_v38 = vpop.f32.mrf.mxu1  ;;  %v7221_v22 = vpop.f32.mrf.mxu0 }
 0x2eb   : > { %10949 = vst [vmem:[#allocation18_spill] sm:$0xff] %v10370_v53  ;;  %v4765_v46 = vadd.f32 %v7220_v59, %v10251_v5  ;;  %v7275_v5 = vadd.f32 %v10271_v24, %v10269_v54 }
 0x2ec   : > { %v10373_v29 = vpop.f32.mrf.mxu1  ;;  %v7222_v58 = vpop.f32.mrf.mxu0 }
 0x2ed   : > { %v7223_v14 = vadd.f32 %v7222_v58, %v7221_v22  ;;  %v10378_v17 = vadd.f32 %v4765_v46, %v10176_v9 }
 0x2ee   : > { %v10375_v31 = vpop.f32.mrf.mxu1  ;;  %v10380_v52 = vpop.f32.mrf.mxu0 }
 0x2ef   : > { %10950 = vst [vmem:[#allocation20_spill] sm:$0xff] %v10378_v17  ;;  %v4770_v25 = vadd.f32 %v10242_v11, %v7223_v14  ;;  %v10399_v11 = vld [vmem:[%s10669_s8] ss:$0 sm:$0xff]  ;;  %v7278_v14 = vadd.f32 %v10279_v19, %v10277_v61 }
 0x2f0   : > { %v10383_v33 = vpop.f32.mrf.mxu1  ;;  %v10385_v10 = vpop.f32.mrf.mxu0  ;;  %v10414_v61 = vld [vmem:[%s10670_s9] ss:$0 sm:$0xff] }
 0x2f1   : > { %v10390_v39 = vadd.f32 %v4770_v25, %v10167_v49 }
 0x2f2   : > { %v10392_v58 = vpop.f32.mrf.mxu1  ;;  %v7645_v59 = vpop.f32.mrf.mxu0 }
 0x2f3   : > { %10951 = vst [vmem:[#allocation15_spill] sm:$0xff] %v10390_v39  ;;  %v5205_v22 = vadd.f32 %v7645_v59, %v7275_v5 }
 0x2f4   : > { %v10394_v9 = vpop.f32.mrf.mxu1  ;;  %v5196_v46 = vpop.f32.mrf.mxu0 }
 0x2f5   : > { %v5325_v54 = vadd.f32 %v5205_v22, %v10185_v15  ;;  %v5197_v49 = vadd.f32 %v10260_v12, %v5196_v46 }
 0x2f6   : > { %v10405_v24 = vpop.f32.mrf.mxu1  ;;  %v7646_v25 = vpop.f32.mrf.mxu0 }
 0x2f7   : > { %v5364_v5 = vadd.f32 %v10399_v11, %v5325_v54  ;;  %v5323_v59 = vadd.f32 %v5197_v49, %v10179_v44  ;;  %v5208_v17 = vadd.f32 %v7646_v25, %v7278_v14  ;;  %v7287_v44 = vadd.f32 %v10303_v40, %v10301_v60  ;;  %v10435_v60 = vld [vmem:[%s10671_s10] ss:$0 sm:$0xff] }
 0x2f8   : > { %v10409_v53 = vpop.f32.mrf.mxu1  ;;  %v5199_v39 = vpop.f32.mrf.mxu0 }
 0x2f9   : > { %v5396_v6 = vmax.f32 %v5364_v5, 0.0  ;;  %v5362_v15 = vadd.f32 %v10399_v11, %v5323_v59  ;;  %v5326_v12 = vadd.f32 %v5208_v17, %v10188_v41  ;;  %v5200_v19 = vadd.f32 %v10266_v56, %v5199_v39 }
 0x2fa   : > { %v10419_v22 = vpop.f32.mrf.mxu1  ;;  %v7649_v46 = vpop.f32.mrf.mxu0  ;;  %v7281_v5 = vadd.f32 %v10287_v7, %v10285_v26  ;;  %v7290_v39 = vadd.f32 %v10311_v27, %v10309_v34 }
 0x2fb   : > { %v5394_v14 = vmax.f32 %v5362_v15, 0.0  ;;  %v5365_v54 = vadd.f32 %v10399_v11, %v5326_v12  ;;  %v5324_v49 = vadd.f32 %v5200_v19, %v10182_v62  ;;  %v5435_v41 = vmul.f32 %v10414_v61, %v5396_v6 }
 0x2fc   : > { %v10425_v25 = vpop.f32.mrf.mxu1  ;;  %v5221_v17 = vadd.f32 %v7649_v46, %v7287_v44  ;;  %v5212_v56 = vpop.f32.mrf.mxu0  ;;  %v7284_v12 = vadd.f32 %v10295_v43, %v10293_v4  ;;  %v7293_v46 = vadd.f32 %v10319_v13, %v10317_v28 }
 0x2fd   : > { %v5397_v40 = vmax.f32 %v5365_v54, 0.0  ;;  %v5363_v62 = vadd.f32 %v10399_v11, %v5324_v49  ;;  %v5433_v15 = vmul.f32 %v10414_v61, %v5394_v14  ;;  %v5213_v7 = vadd.f32 %v7281_v5, %v5212_v56 }
 0x2fe   : > { %v10438_v59 = vpop.f32.mrf.mxu1  ;;  %v5329_v26 = vadd.f32 %v5221_v17, %v10205_v47  ;;  %v7650_v6 = vpop.f32.mrf.mxu0  ;;  %v5474_v54 = vadd.f32 %v10435_v60, %v5435_v41 }
 0x2ff   : > { %v5436_v34 = vmul.f32 %v10414_v61, %v5397_v40  ;;  %v5395_v27 = vmax.f32 %v5363_v62, 0.0  ;;  %v5224_v19 = vadd.f32 %v7650_v6, %v7290_v39  ;;  %v5327_v47 = vadd.f32 %v5213_v7, %v10193_v3 }
 0x300   : > { %v10445_v44 = vpop.f32.mrf.mxu1  ;;  %v5368_v14 = vadd.f32 %v10399_v11, %v5329_v26  ;;  %v5215_v49 = vpop.f32.mrf.mxu0  ;;  %v7299_v39 = vadd.f32 %v10335_v36, %v10333_v21  ;;  %v5472_v28 = vadd.f32 %v10435_v60, %v5433_v15  ;;  %v7302_v36 = vadd.f32 %v10343_v63, %v10341_v16 }
 0x301   : > { %v5475_v5 = vadd.f32 %v10435_v60, %v5436_v34  ;;  %v5434_v4 = vmul.f32 %v10414_v61, %v5395_v27  ;;  %v5330_v43 = vadd.f32 %v5224_v19, %v10212_v42  ;;  %v5216_v17 = vadd.f32 %v7284_v12, %v5215_v49 }
 0x302   : > { %v10455_v56 = vpop.f32.mrf.mxu1  ;;  %v5400_v3 = vmax.f32 %v5368_v14, 0.0  ;;  %v5366_v13 = vadd.f32 %v10399_v11, %v5327_v47  ;;  %v7653_v41 = vpop.f32.mrf.mxu0 }
 0x303   : > { %v6484_v40 = vpack.c.bf16 %v5475_v5, %v5474_v54  ;;  %v5473_v42 = vadd.f32 %v10435_v60, %v5434_v4  ;;  %v5369_v62 = vadd.f32 %v10399_v11, %v5330_v43  ;;  %v5328_v26 = vadd.f32 %v5216_v17, %v10198_v23 }
 0x304   : > { %v10470_v21 = vpop.f32.mrf.mxu1  ;;  %v5439_v15 = vmul.f32 %v10414_v61, %v5400_v3  ;;  %v5398_v7 = vmax.f32 %v5366_v13, 0.0  ;;  %v5237_v6 = vadd.f32 %v7653_v41, %v7299_v39  ;;  %v5228_v12 = vpop.f32.mrf.mxu0  ;;  %v7296_v17 = vadd.f32 %v10327_v30, %v10325_v57 }
 0x305   : > { %6556 = vst [vmem:[%s10464_s30 + $0x8] sm:$0xff] %v6484_v40   ;;  %v6479_v34 = vpack.c.bf16 %v5473_v42, %v5472_v28  ;;  %v5401_v27 = vmax.f32 %v5369_v62, 0.0  ;;  %v5367_v19 = vadd.f32 %v10399_v11, %v5328_v26  ;;  %v5229_v54 = vadd.f32 %v7293_v46, %v5228_v12 }
 0x306   : > { %v10477_v14 = vpop.f32.mrf.mxu1  ;;  %v5437_v23 = vmul.f32 %v10414_v61, %v5398_v7  ;;  %v5333_v47 = vadd.f32 %v5237_v6, %v10233_v1  ;;  %v7654_v49 = vpop.f32.mrf.mxu0  ;;  %v5478_v46 = vadd.f32 %v10435_v60, %v5439_v15  ;;  %v7305_v40 = vadd.f32 %v10351_v48, %v10349_v50 }
 0x307   : > { %6480 = vst [vmem:[%s10464_s30] sm:$0xff] %v6479_v34   ;;  %v5440_v16 = vmul.f32 %v10414_v61, %v5401_v27  ;;  %v5399_v63 = vmax.f32 %v5367_v19, 0.0  ;;  %v5331_v5 = vadd.f32 %v5229_v54, %v10219_v51  ;;  %v5240_v4 = vadd.f32 %v7654_v49, %v7302_v36 }
 0x308   : > { %v10484_v43 = vpop.f32.mrf.mxu1  ;;  %v5372_v39 = vadd.f32 %v10399_v11, %v5333_v47  ;;  %v5231_v28 = vpop.f32.mrf.mxu0  ;;  %v7311_v57 = vadd.f32 %v10367_v38, %v10365_v32  ;;  %v5476_v26 = vadd.f32 %v10435_v60, %v5437_v23  ;;  %v7314_v38 = vadd.f32 %v10375_v31, %v10373_v29 }
 0x309   : > { %v5479_v1 = vadd.f32 %v10435_v60, %v5440_v16  ;;  %v5438_v3 = vmul.f32 %v10414_v61, %v5399_v63  ;;  %v5370_v13 = vadd.f32 %v10399_v11, %v5331_v5  ;;  %v5334_v41 = vadd.f32 %v5240_v4, %v10240_v20 }
 0x30a   : > { %v10494_v51 = vpop.f32.mrf.mxu1  ;;  %v5404_v30 = vmax.f32 %v5372_v39, 0.0  ;;  %v5232_v42 = vadd.f32 %v7296_v17, %v5231_v28  ;;  %v7657_v62 = vpop.f32.mrf.mxu0  ;;  %v7308_v16 = vadd.f32 %v10359_v2, %v10357_v18 }
 0x30b   : > { %v6494_v36 = vpack.c.bf16 %v5479_v1, %v5478_v46  ;;  %v5477_v15 = vadd.f32 %v10435_v60, %v5438_v3  ;;  %v5373_v7 = vadd.f32 %v10399_v11, %v5334_v41  ;;  %v5402_v50 = vmax.f32 %v5370_v13, 0.0 }
 0x30c   : > { %v10503_v20 = vpop.f32.mrf.mxu1  ;;  %v5443_v6 = vmul.f32 %v10414_v61, %v5404_v30  ;;  %v5332_v48 = vadd.f32 %v5232_v42, %v10226_v8  ;;  %v5253_v12 = vadd.f32 %v7657_v62, %v7311_v57  ;;  %v5244_v32 = vpop.f32.mrf.mxu0  ;;  %v7323_v3 = vadd.f32 %v10419_v22, %v10409_v53 }
 0x30d   : > { %6558 = vst [vmem:[%s10464_s30 + $0x18] sm:$0xff] %v6494_v36   ;;  %v6489_v34 = vpack.c.bf16 %v5477_v15, %v5476_v26  ;;  %v5405_v27 = vmax.f32 %v5373_v7, 0.0  ;;  %v5245_v19 = vadd.f32 %v7305_v40, %v5244_v32  ;;  %v5441_v4 = vmul.f32 %v10414_v61, %v5402_v50 }
 0x30e   : > { %v10510_v54 = vpop.f32.mrf.mxu1  ;;  %v5371_v23 = vadd.f32 %v10399_v11, %v5332_v48  ;;  %v5337_v47 = vadd.f32 %v5253_v12, %v10258_v35  ;;  %v7658_v49 = vpop.f32.mrf.mxu0  ;;  %v5482_v5 = vadd.f32 %v10435_v60, %v5443_v6 }
 0x30f   : > { %6557 = vst [vmem:[%s10464_s30 + $0x10] sm:$0xff] %v6489_v34   ;;  %v5444_v8 = vmul.f32 %v10414_v61, %v5405_v27  ;;  %v5335_v63 = vadd.f32 %v5245_v19, %v10247_v45  ;;  %v5256_v29 = vadd.f32 %v7658_v49, %v7314_v38  ;;  %v7317_v45 = vadd.f32 %v10392_v58, %v10383_v33  ;;  %v10952_v19 = vld [vmem:[#allocation9_spill] sm:$0xff] }
 0x310   : > { %v10519_v31 = vpop.f32.mrf.mxu1  ;;  %v5403_v17 = vmax.f32 %v5371_v23, 0.0  ;;  %v5376_v46 = vadd.f32 %v10399_v11, %v5337_v47  ;;  %v5247_v35 = vpop.f32.mrf.mxu0  ;;  %v5480_v26 = vadd.f32 %v10435_v60, %v5441_v4  ;;  %v7320_v38 = vadd.f32 %v10405_v24, %v10394_v9  ;;  %v10953_v4 = vld [vmem:[#allocation24_spill] sm:$0xff] }
 0x311   : > { %v5483_v39 = vadd.f32 %v10435_v60, %v5444_v8  ;;  %v5374_v18 = vadd.f32 %v10399_v11, %v5335_v63  ;;  %v5338_v2 = vadd.f32 %v5256_v29, %v10264_v0  ;;  %v5248_v28 = vadd.f32 %v7308_v16, %v5247_v35 }
 0x312   : > { %v10527_v1 = vpop.f32.mrf.mxu1  ;;  %v5442_v13 = vmul.f32 %v10414_v61, %v5403_v17  ;;  %v5408_v41 = vmax.f32 %v5376_v46, 0.0  ;;  %v7661_v40 = vpop.f32.mrf.mxu0  ;;  %v7329_v49 = vadd.f32 %v10455_v56, %v10445_v44 }
 0x313   : > { %v6504_v57 = vpack.c.bf16 %v5483_v39, %v5482_v5  ;;  %v5406_v30 = vmax.f32 %v5374_v18, 0.0  ;;  %v5377_v42 = vadd.f32 %v10399_v11, %v5338_v2  ;;  %v5336_v0 = vadd.f32 %v5248_v28, %v10254_v55  ;;  %v10954_v2 = vld [vmem:[#allocation32_spill] sm:$0xff] }
 0x314   : > { %v10536_v62 = vpop.f32.mrf.mxu1  ;;  %v5481_v36 = vadd.f32 %v10435_v60, %v5442_v13  ;;  %v5447_v33 = vmul.f32 %v10414_v61, %v5408_v41  ;;  %v5269_v58 = vadd.f32 %v7661_v40, %v7323_v3  ;;  %v5260_v53 = vpop.f32.mrf.mxu0  ;;  %v7326_v55 = vadd.f32 %v10438_v59, %v10425_v25 }
 0x315   : > { %6560 = vst [vmem:[%s10464_s30 + $0x28] sm:$0xff] %v6504_v57   ;;  %v5409_v22 = vmax.f32 %v5377_v42, 0.0  ;;  %v5375_v15 = vadd.f32 %v10399_v11, %v5336_v0  ;;  %v5261_v7 = vadd.f32 %v7317_v45, %v5260_v53  ;;  %v5445_v48 = vmul.f32 %v10414_v61, %v5406_v30 }
 0x316   : > { %v10543_v6 = vpop.f32.mrf.mxu1  ;;  %v6499_v50 = vpack.c.bf16 %v5481_v36, %v5480_v26  ;;  %v5341_v12 = vadd.f32 %v5269_v58, %v10290_v37  ;;  %v7662_v32 = vpop.f32.mrf.mxu0  ;;  %v5486_v25 = vadd.f32 %v10435_v60, %v5447_v33  ;;  %v7335_v5 = vadd.f32 %v10494_v51, %v10484_v43  ;;  %v10955_v36 = vld [vmem:[#allocation13_spill] sm:$0xff] }
 0x317   : > { %v5448_v34 = vmul.f32 %v10414_v61, %v5409_v22  ;;  %v5407_v27 = vmax.f32 %v5375_v15, 0.0  ;;  %v5339_v23 = vadd.f32 %v5261_v7, %v10952_v19  ;;  %v5272_v16 = vadd.f32 %v7662_v32, %v7326_v55  ;;  %v10956_v15 = vld [vmem:[#allocation19_spill] sm:$0xff] }
 0x318   : > { %v7345_v47 = vpop.f32.mrf.mxu1  ;;  %6559 = vst [vmem:[%s10464_s30 + $0x20] sm:$0xff] %v6499_v50   ;;  %v5380_v59 = vadd.f32 %v10399_v11, %v5341_v12  ;;  %v5263_v37 = vpop.f32.mrf.mxu0  ;;  %v5484_v44 = vadd.f32 %v10435_v60, %v5445_v48  ;;  %v7338_v43 = vadd.f32 %v10510_v54, %v10503_v20  ;;  %v7332_v53 = vadd.f32 %v10477_v14, %v10470_v21 }
 0x319   : > { %v5487_v8 = vadd.f32 %v10435_v60, %v5448_v34  ;;  %v5446_v9 = vmul.f32 %v10414_v61, %v5407_v27  ;;  %v5378_v24 = vadd.f32 %v10399_v11, %v5339_v23  ;;  %v5264_v63 = vadd.f32 %v7320_v38, %v5263_v37  ;;  %v10957_v34 = vld [vmem:[#allocation16_spill] sm:$0xff] }
 0x31a   : > { %v7346_v29 = vpop.f32.mrf.mxu1  ;;  %v5412_v56 = vmax.f32 %v5380_v59, 0.0  ;;  %v5342_v17 = vadd.f32 %v5272_v16, %v10953_v4  ;;  %v7665_v46 = vpop.f32.mrf.mxu0 }
 0x31b   : > { %v6514_v35 = vpack.c.bf16 %v5487_v8, %v5486_v25  ;;  %v5485_v39 = vadd.f32 %v10435_v60, %v5446_v9  ;;  %v5410_v18 = vmax.f32 %v5378_v24, 0.0  ;;  %v5340_v28 = vadd.f32 %v5264_v63, %v10954_v2  ;;  %v10958_v8 = vld [vmem:[#allocation28_spill] sm:$0xff] }
 0x31c   : > { %v7348_v45 = vpop.f32.mrf.mxu1  ;;  %v5381_v3 = vadd.f32 %v10399_v11, %v5342_v17  ;;  %v5285_v13 = vadd.f32 %v7665_v46, %v7335_v5  ;;  %v5276_v41 = vpop.f32.mrf.mxu0  ;;  %v5451_v42 = vmul.f32 %v10414_v61, %v5412_v56  ;;  %v7347_v48 = vadd.f32 %v7346_v29, %v7345_v47 }
 0x31d   : > { %6562 = vst [vmem:[%s10464_s30 + $0x38] sm:$0xff] %v6514_v35   ;;  %v6509_v51 = vpack.c.bf16 %v5485_v39, %v5484_v44  ;;  %v5379_v40 = vadd.f32 %v10399_v11, %v5340_v28  ;;  %v5277_v57 = vadd.f32 %v7329_v49, %v5276_v41  ;;  %v5449_v0 = vmul.f32 %v10414_v61, %v5410_v18  ;;  %v10959_v28 = vld [vmem:[#allocation6_spill] sm:$0xff] }
 0x31e   : > { %v7349_v30 = vpop.f32.mrf.mxu1  ;;  %v5413_v26 = vmax.f32 %v5381_v3, 0.0  ;;  %v5345_v33 = vadd.f32 %v5285_v13, %v10955_v36  ;;  %v7666_v58 = vpop.f32.mrf.mxu0  ;;  %v5490_v14 = vadd.f32 %v10435_v60, %v5451_v42  ;;  %v7341_v63 = vadd.f32 %v10527_v1, %v10519_v31  ;;  %v10961_v36 = vld [vmem:[#allocation36_spill] sm:$0xff] }
 0x31f   : > { %6561 = vst [vmem:[%s10464_s30 + $0x30] sm:$0xff] %v6509_v51   ;;  %v5411_v22 = vmax.f32 %v5379_v40, 0.0  ;;  %v5343_v20 = vadd.f32 %v5277_v57, %v10956_v15  ;;  %v5288_v54 = vadd.f32 %v7666_v58, %v7338_v43  ;;  %v5488_v23 = vadd.f32 %v10435_v60, %v5449_v0  ;;  %v10960_v57 = vld [vmem:[#allocation4_spill] sm:$0xff] }
 0x320   : > { %v7351_v7 = vpop.f32.mrf.mxu1  ;;  %v5452_v55 = vmul.f32 %v10414_v61, %v5413_v26  ;;  %v5384_v50 = vadd.f32 %v10399_v11, %v5345_v33  ;;  %v5279_v12 = vpop.f32.mrf.mxu0  ;;  %v7350_v46 = vadd.f32 %v7349_v30, %v7348_v45  ;;  %v7226_v18 = vadd.f32 %v10385_v10, %v10380_v52 }
 0x321   : > { %v5450_v32 = vmul.f32 %v10414_v61, %v5411_v22  ;;  %v5382_v38 = vadd.f32 %v10399_v11, %v5343_v20  ;;  %v5346_v27 = vadd.f32 %v5288_v54, %v10957_v34  ;;  %v5280_v19 = vadd.f32 %v7332_v53, %v5279_v12 }
 0x322   : > { %v7352_v21 = vpop.f32.mrf.mxu1  ;;  %v5491_v49 = vadd.f32 %v10435_v60, %v5452_v55  ;;  %v5416_v25 = vmax.f32 %v5384_v50, 0.0  ;;  %v7669_v59 = vpop.f32.mrf.mxu0  ;;  %v7344_v13 = vadd.f32 %v10543_v6, %v10536_v62  ;;  %v10962_v50 = vld [vmem:[#allocation35_spill] sm:$0xff] }
 0x323   : > { %v5489_v16 = vadd.f32 %v10435_v60, %v5450_v32  ;;  %v5414_v47 = vmax.f32 %v5382_v38, 0.0  ;;  %v5385_v37 = vadd.f32 %v10399_v11, %v5346_v27  ;;  %v5344_v9 = vadd.f32 %v5280_v19, %v10958_v8  ;;  %v10963_v32 = vld [vmem:[#allocation11_spill] sm:$0xff] }
 0x324   : > { %v7354_v24 = vpop.f32.mrf.mxu1  ;;  %v6524_v29 = vpack.c.bf16 %v5491_v49, %v5490_v14  ;;  %v5455_v5 = vmul.f32 %v10414_v61, %v5416_v25  ;;  %v5301_v44 = vadd.f32 %v7669_v59, %v7347_v48  ;;  %v5292_v56 = vpop.f32.mrf.mxu0  ;;  %v7353_v10 = vadd.f32 %v7352_v21, %v7351_v7 }
 0x325   : > { %v6519_v4 = vpack.c.bf16 %v5489_v16, %v5488_v23  ;;  %v5417_v17 = vmax.f32 %v5385_v37, 0.0  ;;  %v5383_v35 = vadd.f32 %v10399_v11, %v5344_v9  ;;  %v5453_v2 = vmul.f32 %v10414_v61, %v5414_v47  ;;  %v10964_v47 = vld [vmem:[#allocation15_spill] sm:$0xff] }
 0x326   : > { %v7355_v39 = vpop.f32.mrf.mxu1  ;;  %6564 = vst [vmem:[%s10464_s30 + $0x48] sm:$0xff] %v6524_v29   ;;  %v5349_v31 = vadd.f32 %v5301_v44, %v10959_v28  ;;  %v5293_v1 = vadd.f32 %v7341_v63, %v5292_v56  ;;  %v7670_v3 = vpop.f32.mrf.mxu0  ;;  %v5494_v40 = vadd.f32 %v10435_v60, %v5455_v5  ;;  %v4773_v38 = vadd.f32 %v10963_v32, %v7226_v18  ;;  %v10965_v44 = vld [vmem:[#allocation18_spill] sm:$0xff] }
 0x327   : > { %6563 = vst [vmem:[%s10464_s30 + $0x40] sm:$0xff] %v6519_v4   ;;  %v5456_v41 = vmul.f32 %v10414_v61, %v5417_v17  ;;  %v5415_v45 = vmax.f32 %v5383_v35, 0.0  ;;  %v5304_v43 = vadd.f32 %v7670_v3, %v7350_v46  ;;  %v5492_v58 = vadd.f32 %v10435_v60, %v5453_v2  ;;  %v10966_v4 = vld [vmem:[#allocation31_spill] sm:$0xff] }
 0x328   : > { %v7357_v51 = vpop.f32.mrf.mxu1  ;;  %v5388_v52 = vadd.f32 %v10399_v11, %v5349_v31  ;;  %v5347_v30 = vadd.f32 %v5293_v1, %v10960_v57  ;;  %v5295_v42 = vpop.f32.mrf.mxu0  ;;  %v7356_v29 = vadd.f32 %v7355_v39, %v7354_v24  ;;  %v4807_v17 = vadd.f32 %v4773_v38, %v10966_v4 }
 0x329   : > { %v5495_v0 = vadd.f32 %v10435_v60, %v5456_v41  ;;  %v5454_v26 = vmul.f32 %v10414_v61, %v5415_v45  ;;  %v5350_v62 = vadd.f32 %v5304_v43, %v10961_v36  ;;  %v5296_v6 = vadd.f32 %v7344_v13, %v5295_v42 }
 0x32a   : > { %v7358_v33 = vpop.f32.mrf.mxu1  ;;  %v5420_v53 = vmax.f32 %v5388_v52, 0.0  ;;  %v5386_v22 = vadd.f32 %v10399_v11, %v5347_v30  ;;  %v7673_v15 = vpop.f32.mrf.mxu0 }
 0x32b   : > { %v7359_v20 = vadd.f32 %v7358_v33, %v7357_v51  ;;  %v6534_v54 = vpack.c.bf16 %v5495_v0, %v5494_v40  ;;  %v5493_v7 = vadd.f32 %v10435_v60, %v5454_v26  ;;  %v5389_v55 = vadd.f32 %v10399_v11, %v5350_v62  ;;  %v10967_v51 = vld [vmem:[#allocation20_spill] sm:$0xff] }
 0x32c   : > { %v5348_v48 = vadd.f32 %v5296_v6, %v10962_v50  ;;  %v7360_v12 = vpop.f32.mrf.mxu1  ;;  %v5459_v34 = vmul.f32 %v10414_v61, %v5420_v53  ;;  %v5418_v27 = vmax.f32 %v5386_v22, 0.0  ;;  %v5308_v21 = vpop.f32.mrf.mxu0 }
 0x32d   : > { %v5317_v19 = vadd.f32 %v7673_v15, %v7359_v20  ;;  %6566 = vst [vmem:[%s10464_s30 + $0x58] sm:$0xff] %v6534_v54   ;;  %v6529_v14 = vpack.c.bf16 %v5493_v7, %v5492_v58  ;;  %v5421_v23 = vmax.f32 %v5389_v55, 0.0  ;;  %v5309_v25 = vadd.f32 %v7353_v10, %v5308_v21 }
 0x32e   : > { %v5387_v49 = vadd.f32 %v10399_v11, %v5348_v48  ;;  %v7361_v59 = vpop.f32.mrf.mxu1  ;;  %v5457_v16 = vmul.f32 %v10414_v61, %v5418_v27  ;;  %v7674_v8 = vpop.f32.mrf.mxu0  ;;  %v5498_v46 = vadd.f32 %v10435_v60, %v5459_v34 }
 0x32f   : > { %v5353_v37 = vadd.f32 %v5317_v19, %v10964_v47  ;;  %v7362_v9 = vadd.f32 %v7361_v59, %v7360_v12  ;;  %6565 = vst [vmem:[%s10464_s30 + $0x50] sm:$0xff] %v6529_v14   ;;  %v5460_v63 = vmul.f32 %v10414_v61, %v5421_v23  ;;  %v5351_v56 = vadd.f32 %v5309_v25, %v10965_v44 }
 0x330   : > { %v5419_v5 = vmax.f32 %v5387_v49, 0.0  ;;  %v5311_v2 = vpop.f32.mrf.mxu0  ;;  %v5496_v39 = vadd.f32 %v10435_v60, %v5457_v16 }
 0x331   : > { %v5392_v35 = vadd.f32 %v10399_v11, %v5353_v37  ;;  %v5320_v18 = vadd.f32 %v7674_v8, %v7362_v9  ;;  %v5499_v28 = vadd.f32 %v10435_v60, %v5460_v63  ;;  %v5390_v1 = vadd.f32 %v10399_v11, %v5351_v56 }
 0x332   : > { %v5458_v31 = vmul.f32 %v10414_v61, %v5419_v5  ;;  %v5312_v24 = vadd.f32 %v7356_v29, %v5311_v2 }
 0x333   : > { %v5424_v3 = vmax.f32 %v5392_v35, 0.0  ;;  %v5354_v13 = vadd.f32 %v5320_v18, %v4807_v17  ;;  %v6544_v41 = vpack.c.bf16 %v5499_v28, %v5498_v46  ;;  %v5422_v43 = vmax.f32 %v5390_v1, 0.0 }
 0x334   : > { %v5497_v45 = vadd.f32 %v10435_v60, %v5458_v31  ;;  %v5352_v40 = vadd.f32 %v5312_v24, %v10967_v51 }
 0x335   : > { %v5393_v52 = vadd.f32 %v10399_v11, %v5354_v13  ;;  %6568 = vst [vmem:[%s10464_s30 + $0x68] sm:$0xff] %v6544_v41   ;;  %v5463_v30 = vmul.f32 %v10414_v61, %v5424_v3  ;;  %v5461_v0 = vmul.f32 %v10414_v61, %v5422_v43 }
 0x336   : > { %v6539_v10 = vpack.c.bf16 %v5497_v45, %v5496_v39  ;;  %v5391_v57 = vadd.f32 %v10399_v11, %v5352_v40 }
 0x337   : > { %v5425_v42 = vmax.f32 %v5393_v52, 0.0  ;;  %v5502_v6 = vadd.f32 %v10435_v60, %v5463_v30  ;;  %v5500_v58 = vadd.f32 %v10435_v60, %v5461_v0 }
 0x338   : > { %6567 = vst [vmem:[%s10464_s30 + $0x60] sm:$0xff] %v6539_v10   ;;  %v5423_v26 = vmax.f32 %v5391_v57, 0.0 }
 0x339   : > { %v5464_v36 = vmul.f32 %v10414_v61, %v5425_v42 }
 0x33a   : > { %v5462_v62 = vmul.f32 %v10414_v61, %v5423_v26 }
 0x33b   : > { %v5503_v33 = vadd.f32 %v10435_v60, %v5464_v36 }
 0x33c   : > { %v5501_v53 = vadd.f32 %v10435_v60, %v5462_v62 }
 0x33d   : > { %v6554_v11 = vpack.c.bf16 %v5503_v33, %v5502_v6 }
 0x33e   : > { %v6549_v22 = vpack.c.bf16 %v5501_v53, %v5500_v58 }
 0x33f   : > { %6570 = vst [vmem:[%s10464_s30 + $0x78] sm:$0xff] %v6554_v11  }
 0x340   : > { %6569 = vst [vmem:[%s10464_s30 + $0x70] sm:$0xff] %v6549_v22  }
 0x341 PF: > { %s21_s21 = sadd.s32 1, %s7929_s21   ;;  %s10968_s13 = sld [smem:[#allocation2_spill]] }
 0x342   : > { %p18_p12 = scmp.ge.s32.totalorder %s21_s21, 10   ;;  %s10969_s17 = smov %s7921_s19 }
 0x343   : > { %s10970_s18 = smov %s7925_s20  ;;  %s10971_s19 = smov %s10974_s22 }
 0x344   :  { %20 = sbr.rel (!%p18_p12) target bundleno = 3 (0x3), region = 128 }
 0x347   : > { %s10972_s20 = smov %s10968_s13 }

</bundles_post_ra>
